<compile_context>
chip_gen: v6e
topology: v6e:2x2x1
jax: 0.10.0
libtpu: 0.0.40
codegen_flags: <defaults>
</compile_context>

<pallas_src>
import numpy as np
import jax
import jax.numpy as jnp
from jax.experimental import pallas as pl
from jax.experimental.pallas import tpu as pltpu

LANE = 128
# v7x has 64 MiB VMEM per TensorCore (v5e/v6e: 128 MiB); 40 MiB is safe on all.
_VMEM_LIMIT = 40 * 1024 * 1024


def _round_up(a, b):
    return (a + b - 1) // b * b


def _choose_tm(m, max_tm=1024):
    """M tile (multiple of 16, bf16-friendly) and the padded M it divides.

    Prefers >= 2 grid steps so both v7x TensorCores get work on real batches;
    caps the tile so per-step VMEM stays well under the v7x budget while each
    step still carries far more than the ~0.35 us per-step overhead of work.
    """
    m_pad = _round_up(max(m, 16), 16)
    if m_pad <= 16:
        return 16, 16
    if m_pad <= 2 * max_tm:
        tm = _round_up((m_pad + 1) // 2, 16)
        return tm, 2 * tm
    return max_tm, _round_up(m_pad, max_tm)


# ------------------------------ Pallas kernels ------------------------------

def _conv1_kernel(x_ref, w_ref, b_ref, o_ref):
    """conv1 (one expanded matmul) + 2x2 max-pool + bias + ReLU.

    x: (tm, 768) bf16, rows = (n, qh), cols = (h_phase s, w, c).
    w: (768, 672) bf16, lanes = (di, dj, r, pw, oc).
    Pooling == max over the 4 (di, dj) lane groups; relu(max(z)+b) identity.
    """
    y = jnp.dot(x_ref[...], w_ref[...], preferred_element_type=jnp.float32)
    y = jnp.maximum(jnp.maximum(y[:, 0:168], y[:, 168:336]),
                    jnp.maximum(y[:, 336:504], y[:, 504:672]))
    o_ref[...] = jnp.maximum(y + b_ref[...], 0.0).astype(o_ref.dtype)


def _tail_kernel(x_ref, wc_ref, bc_ref, w1_ref, b1_ref, w2_ref, b2_ref,
                 w3_ref, b3_ref, o_ref):
    """conv2 (one expanded matmul) + pool + bias + ReLU, then FC1/FC2/FC3."""
    y = jnp.dot(x_ref[...], wc_ref[...], preferred_element_type=jnp.float32)
    y = jnp.maximum(jnp.maximum(y[:, 0:400], y[:, 400:800]),
                    jnp.maximum(y[:, 800:1200], y[:, 1200:1600]))
    h = jnp.maximum(y + bc_ref[...], 0.0)                       # (tm, 400) f32
    # TODO(synk): nn.Dropout(0.5) is identity in eval/inference mode; omitted.
    h = jnp.dot(h.astype(w1_ref.dtype), w1_ref[...],
                preferred_element_type=jnp.float32)
    h = jnp.maximum(h + b1_ref[...], 0.0)
    h = jnp.dot(h.astype(w2_ref.dtype), w2_ref[...],
                preferred_element_type=jnp.float32)
    h = jnp.maximum(h + b2_ref[...], 0.0)
    h = jnp.dot(h.astype(w3_ref.dtype), w3_ref[...],
                preferred_element_type=jnp.float32)
    o_ref[...] = (h + b3_ref[...]).astype(o_ref.dtype)


# ----------------------------- kernel wrappers -------------------------------

def conv1_pool_relu(x_nhwc, w_exp, b_row):
    """Fused conv1 + ReLU + MaxPool2d(2,2).  Returns (N*8, 168) bf16 rows
    (n, qh) with lanes (r, pw, oc); pooled row ph1 = 2*qh + r."""
    n = x_nhwc.shape[0]
    xr = x_nhwc.reshape(n, 32, 96)                       # lanes = w*3 + c
    xr = jnp.pad(xr, ((0, 0), (0, 4), (0, 0)))           # h padded to 36
    hidx = 4 * jnp.arange(8)[:, None] + jnp.arange(8)[None, :]   # (qh, s) -> h
    lhs = jnp.take(xr, hidx, axis=1)                     # (n, 8, 8, 96)
    lhs = lhs.reshape(n * 8, 768).astype(jnp.bfloat16)   # rows = (n, qh)
    m = n * 8
    tm, m_pad = _choose_tm(m)
    lhs = jnp.pad(lhs, ((0, m_pad - m), (0, 0)))
    cost = pl.CostEstimate(
        flops=2 * m_pad * 768 * 672 + 5 * m_pad * 672,
        transcendentals=0,
        bytes_accessed=m_pad * 768 * 2 + 768 * 672 * 2 + 168 * 4
        + m_pad * 168 * 2)
    out = pl.pallas_call(
        _conv1_kernel,
        out_shape=jax.ShapeDtypeStruct((m_pad, 168), jnp.bfloat16),
        grid=(m_pad // tm,),
        in_specs=[
            pl.BlockSpec((tm, 768), lambda i: (i, 0)),
            pl.BlockSpec((768, 672), lambda i: (0, 0)),   # VMEM-resident weight
            pl.BlockSpec((1, 168), lambda i: (0, 0)),     # bias
        ],
        out_specs=pl.BlockSpec((tm, 168), lambda i: (i, 0)),
        compiler_params=pltpu.CompilerParams(
            dimension_semantics=("parallel",),
            vmem_limit_bytes=_VMEM_LIMIT),
        cost_estimate=cost,
    )(lhs, w_exp, b_row)
    return out[:m]


def conv2_fc_fused(p1_rows, prep, num_classes):
    """Fused conv2 + ReLU + pool + FC1 + ReLU + FC2 + ReLU + FC3."""
    m = p1_rows.shape[0] // 8
    feat = p1_rows.reshape(m, 1344)                      # per-image flatten
    tm, m_pad = _choose_tm(m)
    feat = jnp.pad(feat, ((0, m_pad - m), (0, 0)))
    cost = pl.CostEstimate(
        flops=2 * m_pad * (1344 * 1600 + 400 * LANE + 2 * LANE * LANE)
        + 8 * m_pad * 400,
        transcendentals=0,
        bytes_accessed=m_pad * 1344 * 2 + 1344 * 1600 * 2
        + (400 + 2 * LANE) * LANE * 2 + m_pad * LANE * 4)
    out = pl.pallas_call(
        _tail_kernel,
        out_shape=jax.ShapeDtypeStruct((m_pad, LANE), jnp.float32),
        grid=(m_pad // tm,),
        in_specs=[
            pl.BlockSpec((tm, 1344), lambda i: (i, 0)),
            pl.BlockSpec((1344, 1600), lambda i: (0, 0)),  # expanded conv2 w
            pl.BlockSpec((1, 400), lambda i: (0, 0)),      # conv2 bias
            pl.BlockSpec((400, LANE), lambda i: (0, 0)),   # fc1 w
            pl.BlockSpec((1, LANE), lambda i: (0, 0)),
            pl.BlockSpec((LANE, LANE), lambda i: (0, 0)),  # fc2 w
            pl.BlockSpec((1, LANE), lambda i: (0, 0)),
            pl.BlockSpec((LANE, LANE), lambda i: (0, 0)),  # fc3 w
            pl.BlockSpec((1, LANE), lambda i: (0, 0)),
        ],
        out_specs=pl.BlockSpec((tm, LANE), lambda i: (i, 0)),
        compiler_params=pltpu.CompilerParams(
            dimension_semantics=("parallel",),
            vmem_limit_bytes=_VMEM_LIMIT),
        cost_estimate=cost,
    )(feat, prep["conv2_wexp"], prep["conv2_bias"],
      prep["fc1_w"], prep["fc1_b"], prep["fc2_w"], prep["fc2_b"],
      prep["fc3_w"], prep["fc3_b"])
    return out[:m, :num_classes]


# ------------------------------ LeNet-5 model --------------------------------

def init_params(key, num_classes=10):
    """PyTorch-style uniform(-1/sqrt(fan_in), 1/sqrt(fan_in)) init."""
    ks = jax.random.split(key, 10)

    def u(k, shape, fan_in):
        bound = 1.0 / np.sqrt(float(fan_in))
        return jax.random.uniform(k, shape, jnp.float32, -bound, bound)

    return {
        "conv1_w": u(ks[0], (6, 3, 5, 5), 3 * 5 * 5),
        "conv1_b": u(ks[1], (6,), 3 * 5 * 5),
        "conv2_w": u(ks[2], (16, 6, 5, 5), 6 * 5 * 5),
        "conv2_b": u(ks[3], (16,), 6 * 5 * 5),
        "fc1_w":   u(ks[4], (120, 400), 400),
        "fc1_b":   u(ks[5], (120,), 400),
        "fc2_w":   u(ks[6], (84, 120), 120),
        "fc2_b":   u(ks[7], (84,), 120),
        "fc3_w":   u(ks[8], (num_classes, 84), 84),
        "fc3_b":   u(ks[9], (num_classes,), 84),
    }


def prepare_params(params):
    """One-time host-side weight prep: fold the conv im2col gathers, the 2x2
    pool-window enumeration and the PyTorch CHW flatten permutation into
    expanded / lane-padded bf16 matrices (f32 biases)."""
    w1 = np.asarray(params["conv1_w"], np.float32)   # (6, 3, 5, 5)
    b1 = np.asarray(params["conv1_b"], np.float32)
    w2 = np.asarray(params["conv2_w"], np.float32)   # (16, 6, 5, 5)
    b2 = np.asarray(params["conv2_b"], np.float32)
    f1w = np.asarray(params["fc1_w"], np.float32)    # (120, 400)
    f1b = np.asarray(params["fc1_b"], np.float32)
    f2w = np.asarray(params["fc2_w"], np.float32)    # (84, 120)
    f2b = np.asarray(params["fc2_b"], np.float32)
    f3w = np.asarray(params["fc3_w"], np.float32)    # (nc, 84)
    f3b = np.asarray(params["fc3_b"], np.float32)
    nc = f3w.shape[0]

    # conv1: lhs row (n, qh) holds x[n, 4*qh + s, w, c] at column s*96+w*3+c.
    # Output lane (di, dj, r, pw, oc) = conv1 at (oh, ow) = (2*(2qh+r)+di,
    # 2*pw+dj); the kernel max-pools over the (di, dj) lane groups.
    wb1 = np.zeros((8, 32, 3, 2, 2, 2, 14, 6), np.float32)
    for i in range(5):
        for j in range(5):
            for di in range(2):
                for dj in range(2):
                    for r in range(2):
                        s = 2 * r + di + i               # input h-phase
                        for pw in range(14):
                            w_in = 2 * pw + dj + j       # input w
                            wb1[s, w_in, :, di, dj, r, pw, :] = w1[:, :, i, j].T
    conv1_wexp = wb1.reshape(768, 672)
    conv1_bias = np.tile(b1, 2 * 14).reshape(1, 168)

    # conv2: lhs row n holds pooled conv1 P1[n, c1, 2*qh+r, pw1] at column
    # qh*168 + r*84 + pw1*6 + c1 (qh == 7 columns are conv1 padding -> zero
    # weights).  Output lane (di, dj, ph2, pw2, oc2); kernel pools (di, dj).
    wc2 = np.zeros((8, 2, 14, 6, 2, 2, 5, 5, 16), np.float32)
    for i in range(5):
        for j in range(5):
            for di in range(2):
                for dj in range(2):
                    for ph2 in range(5):
                        ph1 = 2 * ph2 + di + i
                        qh, r = ph1 // 2, ph1 % 2
                        for pw2 in range(5):
                            pw1 = 2 * pw2 + dj + j
                            wc2[qh, r, pw1, :, di, dj, ph2, pw2, :] = \
                                w2[:, :, i, j].T
    conv2_wexp = wc2.reshape(1344, 1600)
    conv2_bias = np.tile(b2, 5 * 5).reshape(1, 400)

    # fc1: fold the PyTorch CHW flatten order (k = c*25 + h*5 + w) into the
    # weight so it consumes our (ph2, pw2, oc2) lane order directly.
    ph2g, pw2g, ocg = np.meshgrid(np.arange(5), np.arange(5), np.arange(16),
                                  indexing="ij")
    k_pt = (ocg * 25 + ph2g * 5 + pw2g).reshape(400)
    fc1_w = np.zeros((400, LANE), np.float32)
    fc1_w[:, :120] = f1w.T[k_pt, :]
    fc1_b = np.zeros((1, LANE), np.float32)
    fc1_b[0, :120] = f1b
    fc2_w = np.zeros((LANE, LANE), np.float32)
    fc2_w[:120, :84] = f2w.T
    fc2_b = np.zeros((1, LANE), np.float32)
    fc2_b[0, :84] = f2b
    fc3_w = np.zeros((LANE, LANE), np.float32)
    fc3_w[:84, :nc] = f3w.T
    fc3_b = np.zeros((1, LANE), np.float32)
    fc3_b[0, :nc] = f3b

    bf = lambda a: jnp.asarray(a, jnp.bfloat16)
    f32 = lambda a: jnp.asarray(a, jnp.float32)
    return {
        "conv1_wexp": bf(conv1_wexp), "conv1_bias": f32(conv1_bias),
        "conv2_wexp": bf(conv2_wexp), "conv2_bias": f32(conv2_bias),
        "fc1_w": bf(fc1_w), "fc1_b": f32(fc1_b),
        "fc2_w": bf(fc2_w), "fc2_b": f32(fc2_b),
        "fc3_w": bf(fc3_w), "fc3_b": f32(fc3_b),
    }


def lenet5_forward(prep, x, num_classes=10):
    # x: (N, 3, 32, 32) NCHW float32 (PyTorch layout).  LeNet-5 as defined
    # requires 32x32 spatial input (so 16*5*5 = 400 flattened features).
    x = jnp.transpose(x, (0, 2, 3, 1))                   # NHWC
    p1 = conv1_pool_relu(x, prep["conv1_wexp"], prep["conv1_bias"])
    return conv2_fc_fused(p1, prep, num_classes)


if __name__ == "__main__":
    key = jax.random.PRNGKey(0)
    k_params, k_x = jax.random.split(key)
    params = init_params(k_params, num_classes=10)
    prep = prepare_params(params)
    x = jax.random.normal(k_x, (2, 3, 32, 32), dtype=jnp.float32)

    fwd = jax.jit(lenet5_forward)
    out = jax.block_until_ready(fwd(prep, x))
    assert out.shape == (2, 10) and out.dtype == jnp.float32
    print("KERNEL_OK")
</pallas_src>

<mosaic_0001>
module attributes {stable_mosaic.version = 11 : i64} {
  func.func @_conv1_kernel(%arg0: i32, %arg1: memref<16x768xbf16, #tpu.memory_space<vmem>>, %arg2: memref<768x672xbf16, #tpu.memory_space<vmem>>, %arg3: memref<1x168xf32, #tpu.memory_space<vmem>>, %arg4: memref<16x168xbf16, #tpu.memory_space<vmem>>) attributes {dimension_semantics = [#tpu.dimension_semantics<parallel>], iteration_bounds = array<i64: 1>, scalar_prefetch = 0 : i64, scratch_operands = 0 : i64, tpu.core_type = #tpu.core_type<tc>, window_params = [{transform_indices = @transform_0, window_bounds = array<i64: 16, 768>}, {pipeline_mode = #tpu.pipeline_mode<synchronous>, transform_indices = @transform_1, window_bounds = array<i64: 768, 672>}, {pipeline_mode = #tpu.pipeline_mode<synchronous>, transform_indices = @transform_2, window_bounds = array<i64: 1, 168>}, {transform_indices = @transform_3, window_bounds = array<i64: 16, 168>}]} {
    %c0 = arith.constant 0 : index
    %c0_0 = arith.constant 0 : index
    %0 = vector.load %arg1[%c0, %c0_0] : memref<16x768xbf16, #tpu.memory_space<vmem>>, vector<16x768xbf16>
    %c0_1 = arith.constant 0 : index
    %c0_2 = arith.constant 0 : index
    %1 = vector.load %arg2[%c0_1, %c0_2] : memref<768x672xbf16, #tpu.memory_space<vmem>>, vector<768x672xbf16>
    %cst = arith.constant dense<0.000000e+00> : vector<16x672xf32>
    %2 = tpu.matmul %0, %1, %cst {dimension_numbers = #tpu.dot_dimension_numbers<[1], [0], [0], [1], [0, 0, 1, 1], [], []>} : vector<16x768xbf16>, vector<768x672xbf16>, vector<16x672xf32> -> vector<16x672xf32>
    %3 = vector.extract_strided_slice %2 {offsets = [0, 0], sizes = [16, 168], strides = [1, 1]} : vector<16x672xf32> to vector<16x168xf32>
    %4 = vector.extract_strided_slice %2 {offsets = [0, 168], sizes = [16, 168], strides = [1, 1]} : vector<16x672xf32> to vector<16x168xf32>
    %5 = arith.maximumf %3, %4 : vector<16x168xf32>
    %6 = vector.extract_strided_slice %2 {offsets = [0, 336], sizes = [16, 168], strides = [1, 1]} : vector<16x672xf32> to vector<16x168xf32>
    %7 = vector.extract_strided_slice %2 {offsets = [0, 504], sizes = [16, 168], strides = [1, 1]} : vector<16x672xf32> to vector<16x168xf32>
    %8 = arith.maximumf %6, %7 : vector<16x168xf32>
    %9 = arith.maximumf %5, %8 : vector<16x168xf32>
    %c0_3 = arith.constant 0 : index
    %c0_4 = arith.constant 0 : index
    %10 = vector.load %arg3[%c0_3, %c0_4] : memref<1x168xf32, #tpu.memory_space<vmem>>, vector<1x168xf32>
    %11 = vector.broadcast %10 : vector<1x168xf32> to vector<16x168xf32>
    %12 = arith.addf %9, %11 : vector<16x168xf32>
    %cst_5 = arith.constant 0.000000e+00 : f32
    %13 = vector.broadcast %cst_5 : f32 to vector<16x168xf32>
    %14 = arith.maximumf %12, %13 : vector<16x168xf32>
    %15 = arith.truncf %14 : vector<16x168xf32> to vector<16x168xbf16>
    %c0_6 = arith.constant 0 : index
    %c0_7 = arith.constant 0 : index
    %16 = vector.load %arg4[%c0_6, %c0_7] : memref<16x168xbf16, #tpu.memory_space<vmem>>, vector<16x168xbf16>
    tpu.vector_store %arg4[%c0_6, %c0_7], %15 {strides = array<i32>} : memref<16x168xbf16, #tpu.memory_space<vmem>>, vector<16x168xbf16>,
    return
  }
  func.func @transform_0(%arg0: i32) -> (i32, i32) {
    %c0_i32 = arith.constant 0 : i32
    %c0_i32_0 = arith.constant 0 : i32
    return %arg0, %c0_i32 : i32, i32
  }
  func.func @transform_1(%arg0: i32) -> (i32, i32) {
    %c0_i32 = arith.constant 0 : i32
    %c0_i32_0 = arith.constant 0 : i32
    %c0_i32_1 = arith.constant 0 : i32
    return %c0_i32, %c0_i32_0 : i32, i32
  }
  func.func @transform_2(%arg0: i32) -> (i32, i32) {
    %c0_i32 = arith.constant 0 : i32
    %c0_i32_0 = arith.constant 0 : i32
    %c0_i32_1 = arith.constant 0 : i32
    return %c0_i32, %c0_i32_0 : i32, i32
  }
  func.func @transform_3(%arg0: i32) -> (i32, i32) {
    %c0_i32 = arith.constant 0 : i32
    %c0_i32_0 = arith.constant 0 : i32
    return %arg0, %c0_i32 : i32, i32
  }
}

module attributes {stable_mosaic.version = 11 : i64} {
  func.func @_tail_kernel(%arg0: i32, %arg1: memref<16x1344xbf16, #tpu.memory_space<vmem>>, %arg2: memref<1344x1600xbf16, #tpu.memory_space<vmem>>, %arg3: memref<1x400xf32, #tpu.memory_space<vmem>>, %arg4: memref<400x128xbf16, #tpu.memory_space<vmem>>, %arg5: memref<1x128xf32, #tpu.memory_space<vmem>>, %arg6: memref<128x128xbf16, #tpu.memory_space<vmem>>, %arg7: memref<1x128xf32, #tpu.memory_space<vmem>>, %arg8: memref<128x128xbf16, #tpu.memory_space<vmem>>, %arg9: memref<1x128xf32, #tpu.memory_space<vmem>>, %arg10: memref<16x128xf32, #tpu.memory_space<vmem>>) attributes {dimension_semantics = [#tpu.dimension_semantics<parallel>], iteration_bounds = array<i64: 1>, scalar_prefetch = 0 : i64, scratch_operands = 0 : i64, tpu.core_type = #tpu.core_type<tc>, window_params = [{transform_indices = @transform_0, window_bounds = array<i64: 16, 1344>}, {pipeline_mode = #tpu.pipeline_mode<synchronous>, transform_indices = @transform_1, window_bounds = array<i64: 1344, 1600>}, {pipeline_mode = #tpu.pipeline_mode<synchronous>, transform_indices = @transform_2, window_bounds = array<i64: 1, 400>}, {pipeline_mode = #tpu.pipeline_mode<synchronous>, transform_indices = @transform_3, window_bounds = array<i64: 400, 128>}, {pipeline_mode = #tpu.pipeline_mode<synchronous>, transform_indices = @transform_4, window_bounds = array<i64: 1, 128>}, {pipeline_mode = #tpu.pipeline_mode<synchronous>, transform_indices = @transform_5, window_bounds = array<i64: 128, 128>}, {pipeline_mode = #tpu.pipeline_mode<synchronous>, transform_indices = @transform_6, window_bounds = array<i64: 1, 128>}, {pipeline_mode = #tpu.pipeline_mode<synchronous>, transform_indices = @transform_7, window_bounds = array<i64: 128, 128>}, {pipeline_mode = #tpu.pipeline_mode<synchronous>, transform_indices = @transform_8, window_bounds = array<i64: 1, 128>}, {transform_indices = @transform_9, window_bounds = array<i64: 16, 128>}]} {
    %c0 = arith.constant 0 : index
    %c0_0 = arith.constant 0 : index
    %0 = vector.load %arg1[%c0, %c0_0] : memref<16x1344xbf16, #tpu.memory_space<vmem>>, vector<16x1344xbf16>
    %c0_1 = arith.constant 0 : index
    %c0_2 = arith.constant 0 : index
    %1 = vector.load %arg2[%c0_1, %c0_2] : memref<1344x1600xbf16, #tpu.memory_space<vmem>>, vector<1344x1600xbf16>
    %cst = arith.constant dense<0.000000e+00> : vector<16x1600xf32>
    %2 = tpu.matmul %0, %1, %cst {dimension_numbers = #tpu.dot_dimension_numbers<[1], [0], [0], [1], [0, 0, 1, 1], [], []>} : vector<16x1344xbf16>, vector<1344x1600xbf16>, vector<16x1600xf32> -> vector<16x1600xf32>
    %3 = vector.extract_strided_slice %2 {offsets = [0, 0], sizes = [16, 400], strides = [1, 1]} : vector<16x1600xf32> to vector<16x400xf32>
    %4 = vector.extract_strided_slice %2 {offsets = [0, 400], sizes = [16, 400], strides = [1, 1]} : vector<16x1600xf32> to vector<16x400xf32>
    %5 = arith.maximumf %3, %4 : vector<16x400xf32>
    %6 = vector.extract_strided_slice %2 {offsets = [0, 800], sizes = [16, 400], strides = [1, 1]} : vector<16x1600xf32> to vector<16x400xf32>
    %7 = vector.extract_strided_slice %2 {offsets = [0, 1200], sizes = [16, 400], strides = [1, 1]} : vector<16x1600xf32> to vector<16x400xf32>
    %8 = arith.maximumf %6, %7 : vector<16x400xf32>
    %9 = arith.maximumf %5, %8 : vector<16x400xf32>
    %c0_3 = arith.constant 0 : index
    %c0_4 = arith.constant 0 : index
    %10 = vector.load %arg3[%c0_3, %c0_4] : memref<1x400xf32, #tpu.memory_space<vmem>>, vector<1x400xf32>
    %11 = vector.broadcast %10 : vector<1x400xf32> to vector<16x400xf32>
    %12 = arith.addf %9, %11 : vector<16x400xf32>
    %cst_5 = arith.constant 0.000000e+00 : f32
    %13 = vector.broadcast %cst_5 : f32 to vector<16x400xf32>
    %14 = arith.maximumf %12, %13 : vector<16x400xf32>
    %15 = arith.truncf %14 : vector<16x400xf32> to vector<16x400xbf16>
    %c0_6 = arith.constant 0 : index
    %c0_7 = arith.constant 0 : index
    %16 = vector.load %arg4[%c0_6, %c0_7] : memref<400x128xbf16, #tpu.memory_space<vmem>>, vector<400x128xbf16>
    %cst_8 = arith.constant dense<0.000000e+00> : vector<16x128xf32>
    %17 = tpu.matmul %15, %16, %cst_8 {dimension_numbers = #tpu.dot_dimension_numbers<[1], [0], [0], [1], [0, 0, 1, 1], [], []>} : vector<16x400xbf16>, vector<400x128xbf16>, vector<16x128xf32> -> vector<16x128xf32>
    %c0_9 = arith.constant 0 : index
    %c0_10 = arith.constant 0 : index
    %18 = vector.load %arg5[%c0_9, %c0_10] : memref<1x128xf32, #tpu.memory_space<vmem>>, vector<1x128xf32>
    %19 = vector.broadcast %18 : vector<1x128xf32> to vector<16x128xf32>
    %20 = arith.addf %17, %19 : vector<16x128xf32>
    %cst_11 = arith.constant 0.000000e+00 : f32
    %21 = vector.broadcast %cst_11 : f32 to vector<16x128xf32>
    %22 = arith.maximumf %20, %21 : vector<16x128xf32>
    %23 = arith.truncf %22 : vector<16x128xf32> to vector<16x128xbf16>
    %c0_12 = arith.constant 0 : index
    %c0_13 = arith.constant 0 : index
    %24 = vector.load %arg6[%c0_12, %c0_13] : memref<128x128xbf16, #tpu.memory_space<vmem>>, vector<128x128xbf16>
    %cst_14 = arith.constant dense<0.000000e+00> : vector<16x128xf32>
    %25 = tpu.matmul %23, %24, %cst_14 {dimension_numbers = #tpu.dot_dimension_numbers<[1], [0], [0], [1], [0, 0, 1, 1], [], []>} : vector<16x128xbf16>, vector<128x128xbf16>, vector<16x128xf32> -> vector<16x128xf32>
    %c0_15 = arith.constant 0 : index
    %c0_16 = arith.constant 0 : index
    %26 = vector.load %arg7[%c0_15, %c0_16] : memref<1x128xf32, #tpu.memory_space<vmem>>, vector<1x128xf32>
    %27 = vector.broadcast %26 : vector<1x128xf32> to vector<16x128xf32>
    %28 = arith.addf %25, %27 : vector<16x128xf32>
    %cst_17 = arith.constant 0.000000e+00 : f32
    %29 = vector.broadcast %cst_17 : f32 to vector<16x128xf32>
    %30 = arith.maximumf %28, %29 : vector<16x128xf32>
    %31 = arith.truncf %30 : vector<16x128xf32> to vector<16x128xbf16>
    %c0_18 = arith.constant 0 : index
    %c0_19 = arith.constant 0 : index
    %32 = vector.load %arg8[%c0_18, %c0_19] : memref<128x128xbf16, #tpu.memory_space<vmem>>, vector<128x128xbf16>
    %cst_20 = arith.constant dense<0.000000e+00> : vector<16x128xf32>
    %33 = tpu.matmul %31, %32, %cst_20 {dimension_numbers = #tpu.dot_dimension_numbers<[1], [0], [0], [1], [0, 0, 1, 1], [], []>} : vector<16x128xbf16>, vector<128x128xbf16>, vector<16x128xf32> -> vector<16x128xf32>
    %c0_21 = arith.constant 0 : index
    %c0_22 = arith.constant 0 : index
    %34 = vector.load %arg9[%c0_21, %c0_22] : memref<1x128xf32, #tpu.memory_space<vmem>>, vector<1x128xf32>
    %35 = vector.broadcast %34 : vector<1x128xf32> to vector<16x128xf32>
    %36 = arith.addf %33, %35 : vector<16x128xf32>
    %c0_23 = arith.constant 0 : index
    %c0_24 = arith.constant 0 : index
    %37 = vector.load %arg10[%c0_23, %c0_24] : memref<16x128xf32, #tpu.memory_space<vmem>>, vector<16x128xf32>
    tpu.vector_store %arg10[%c0_23, %c0_24], %36 {strides = array<i32>} : memref<16x128xf32, #tpu.memory_space<vmem>>, vector<16x128xf32>,
    return
  }
  func.func @transform_0(%arg0: i32) -> (i32, i32) {
    %c0_i32 = arith.constant 0 : i32
    %c0_i32_0 = arith.constant 0 : i32
    return %arg0, %c0_i32 : i32, i32
  }
  func.func @transform_1(%arg0: i32) -> (i32, i32) {
    %c0_i32 = arith.constant 0 : i32
    %c0_i32_0 = arith.constant 0 : i32
    %c0_i32_1 = arith.constant 0 : i32
    return %c0_i32, %c0_i32_0 : i32, i32
  }
  func.func @transform_2(%arg0: i32) -> (i32, i32) {
    %c0_i32 = arith.constant 0 : i32
    %c0_i32_0 = arith.constant 0 : i32
    %c0_i32_1 = arith.constant 0 : i32
    return %c0_i32, %c0_i32_0 : i32, i32
  }
  func.func @transform_3(%arg0: i32) -> (i32, i32) {
    %c0_i32 = arith.constant 0 : i32
    %c0_i32_0 = arith.constant 0 : i32
    %c0_i32_1 = arith.constant 0 : i32
    return %c0_i32, %c0_i32_0 : i32, i32
  }
  func.func @transform_4(%arg0: i32) -> (i32, i32) {
    %c0_i32 = arith.constant 0 : i32
    %c0_i32_0 = arith.constant 0 : i32
    %c0_i32_1 = arith.constant 0 : i32
    return %c0_i32, %c0_i32_0 : i32, i32
  }
  func.func @transform_5(%arg0: i32) -> (i32, i32) {
    %c0_i32 = arith.constant 0 : i32
    %c0_i32_0 = arith.constant 0 : i32
    %c0_i32_1 = arith.constant 0 : i32
    return %c0_i32, %c0_i32_0 : i32, i32
  }
  func.func @transform_6(%arg0: i32) -> (i32, i32) {
    %c0_i32 = arith.constant 0 : i32
    %c0_i32_0 = arith.constant 0 : i32
    %c0_i32_1 = arith.constant 0 : i32
    return %c0_i32, %c0_i32_0 : i32, i32
  }
  func.func @transform_7(%arg0: i32) -> (i32, i32) {
    %c0_i32 = arith.constant 0 : i32
    %c0_i32_0 = arith.constant 0 : i32
    %c0_i32_1 = arith.constant 0 : i32
    return %c0_i32, %c0_i32_0 : i32, i32
  }
  func.func @transform_8(%arg0: i32) -> (i32, i32) {
    %c0_i32 = arith.constant 0 : i32
    %c0_i32_0 = arith.constant 0 : i32
    %c0_i32_1 = arith.constant 0 : i32
    return %c0_i32, %c0_i32_0 : i32, i32
  }
  func.func @transform_9(%arg0: i32) -> (i32, i32) {
    %c0_i32 = arith.constant 0 : i32
    %c0_i32_0 = arith.constant 0 : i32
    return %arg0, %c0_i32 : i32, i32
  }
}

</mosaic_0001>

<bundles_post_ra>
// kernel: lenet5_forward.2
= control target key start
LH: loop header
LB: loop body
LE: loop exit
PB: predicated region body
PF: predicated region fallthrough
CT: control target
= control target key end

     0   :  { %8 = vsyncpa [#allocation3], 0  ;;  %s3063_s12 = smov [#allocation2]   ;;  %s4052_s0 = inlined_call_operand.vmem [shape: bf16[16,768], index: 0, kind: input, shape index: {}]   ;;  %s4053_s1 = inlined_call_operand.vmem [shape: bf16[768,672], index: 1, kind: input, shape index: {}]   ;;  %s4054_s2 = inlined_call_operand.hbm [shape: f32[1,168], index: 2, kind: input, shape index: {}]   ;;  %s4055_s3 = inlined_call_operand.vmem [shape: bf16[16,168], index: 3, kind: output, shape index: {}]  }
   0x1   :  { %s19_s13 = sshll.u32 %s3063_s12, 4  ;;  %s20_s13 = int_to_ptr.vmem [resolvable:$true] %s19_s13 }
   0x2   :  { %s3049_s14 = scalar_lea.vmem %s20_s13, 32  ;;  %p3054_p1 = scmp.lt.s32.totalorder %s20_s13, %s20_s13 }
   0x3   :  { %p3050_p0 = scmp.ne.s32.totalorder %s20_s13, %s3049_s14  ;;  %p3055_p2 = scmp.lt.s32.totalorder %s3049_s14, %s3049_s14 }
   0x5   :  { %p3056_p3 = por %p3055_p2, %p3054_p1 }
   0x7   :  { %p3057_p4 = pnand %p3056_p3, %p3050_p0 }
   0x9   :  { %3060 = shalt.err (!%p3057_p4)
}
   0xa   :  { %22 = dma.hbm_to_vmem [thread:$0]  %s4054_s2, 32, %s20_s13, [#allocation3]  }
   0xb   :  { %3061 = dma.done.wait [#allocation3], 32  }
   0xc   :  { %3062 = vsyncadd [#allocation3], 4294967264  ;;  %v2596_v0 = vld [vmem:[%s4053_s1 + $0x154] ss:$24 sps:$4 sm:$0xff]   ;;  %v2600_v2 = vld [vmem:[%s4053_s1 + $0x150] ss:$24 sps:$4 sm:$0xff]  }
   0xd   :  { %v2598_v1 = vld [vmem:[%s4053_s1 + $0x454] ss:$24 sps:$4 sm:$0xff]   ;;  %1790 = vmatprep.subr.bf16.mxu0 %v2596_v0  ;;  %v2601_v3 = vld [vmem:[%s4053_s1 + $0x450] ss:$24 sps:$4 sm:$0xff]   ;;  %v2602_v4 = vld [vmem:[%s4053_s1 + $0x124] ss:$24 sps:$4 sm:$0xff]  }
   0xe   :  { %1833 = vmatprep.subr.bf16.mxu1 %v2598_v1  ;;  %1791 = vmatpush1.bf16.msra.mxu0 %v2600_v2  ;;  %v2604_v5 = vld [vmem:[%s4053_s1 + $0x424] ss:$24 sps:$4 sm:$0xff]   ;;  %v2606_v6 = vld [vmem:[%s4053_s1 + $0x120] ss:$24 sps:$4 sm:$0xff]   ;;  %v2608_v8 = vld [vmem:[%s4053_s1 + $0xf4] ss:$24 sps:$4 sm:$0xff]  }
   0xf   :  { %1834 = vmatpush1.bf16.msra.mxu1 %v2601_v3  ;;  %1792 = vmatprep.subr.bf16.mxu0 %v2602_v4  ;;  %v2607_v7 = vld [vmem:[%s4053_s1 + $0x420] ss:$24 sps:$4 sm:$0xff]   ;;  %v2610_v9 = vld [vmem:[%s4053_s1 + $0x3f4] ss:$24 sps:$4 sm:$0xff]   ;;  %v2612_v10 = vld [vmem:[%s4053_s1 + $0xf0] ss:$24 sps:$4 sm:$0xff]  }
  0x10   :  { %1835 = vmatprep.subr.bf16.mxu1 %v2604_v5  ;;  %v2613_v11 = vld [vmem:[%s4053_s1 + $0x3f0] ss:$24 sps:$4 sm:$0xff]   ;;  %v2614_v12 = vld [vmem:[%s4053_s1 + $0xc4] ss:$24 sps:$4 sm:$0xff]   ;;  %v2618_v14 = vld [vmem:[%s4053_s1 + $0xc0] ss:$24 sps:$4 sm:$0xff]  }
  0x11   :  { %v2616_v13 = vld [vmem:[%s4053_s1 + $0x3c4] ss:$24 sps:$4 sm:$0xff]   ;;  %v2619_v15 = vld [vmem:[%s4053_s1 + $0x3c0] ss:$24 sps:$4 sm:$0xff]   ;;  %v2620_v16 = vld [vmem:[%s4053_s1 + $0x94] ss:$24 sps:$4 sm:$0xff]  }
  0x12   :  { %1793 = vmatpush1.bf16.msra.mxu0 %v2606_v6  ;;  %v2622_v17 = vld [vmem:[%s4053_s1 + $0x394] ss:$24 sps:$4 sm:$0xff]   ;;  %v2624_v18 = vld [vmem:[%s4053_s1 + $0x90] ss:$24 sps:$4 sm:$0xff]   ;;  %v2626_v20 = vld [vmem:[%s4053_s1 + $0x64] ss:$24 sps:$4 sm:$0xff]  }
  0x13   :  { %1836 = vmatpush1.bf16.msra.mxu1 %v2607_v7  ;;  %1794 = vmatprep.subr.bf16.mxu0 %v2608_v8  ;;  %v2625_v19 = vld [vmem:[%s4053_s1 + $0x390] ss:$24 sps:$4 sm:$0xff]   ;;  %v2628_v21 = vld [vmem:[%s4053_s1 + $0x364] ss:$24 sps:$4 sm:$0xff]   ;;  %v2630_v22 = vld [vmem:[%s4053_s1 + $0x60] ss:$24 sps:$4 sm:$0xff]  }
  0x14   :  { %1837 = vmatprep.subr.bf16.mxu1 %v2610_v9  ;;  %v2631_v23 = vld [vmem:[%s4053_s1 + $0x360] ss:$24 sps:$4 sm:$0xff]   ;;  %v2632_v24 = vld [vmem:[%s4053_s1 + $0x34] ss:$24 sps:$4 sm:$0xff]   ;;  %v2636_v26 = vld [vmem:[%s4053_s1 + $0x30] ss:$24 sps:$4 sm:$0xff]  }
  0x15   :  { %v2634_v25 = vld [vmem:[%s4053_s1 + $0x334] ss:$24 sps:$4 sm:$0xff]   ;;  %v2637_v27 = vld [vmem:[%s4053_s1 + $0x330] ss:$24 sps:$4 sm:$0xff]   ;;  %v2638_v28 = vld [vmem:[%s4053_s1 + $0x4] ss:$24 sps:$4 sm:$0xff]  }
  0x16   :  { %1795 = vmatpush1.bf16.msra.mxu0 %v2612_v10  ;;  %v2640_v29 = vld [vmem:[%s4053_s1 + $0x304] ss:$24 sps:$4 sm:$0xff]   ;;  %v2642_v30 = vld [vmem:[%s4053_s1] ss:$24 sps:$4 sm:$0xff]   ;;  %v2644_v32 = vld [vmem:[%s4053_s1 + $0x2d4] ss:$24 sps:$4 sm:$0xff]  }
  0x17   :  { %1838 = vmatpush1.bf16.msra.mxu1 %v2613_v11  ;;  %1796 = vmatprep.subr.bf16.mxu0 %v2614_v12  ;;  %v2643_v31 = vld [vmem:[%s4053_s1 + $0x300] ss:$24 sps:$4 sm:$0xff]   ;;  %v2646_v33 = vld [vmem:[%s4053_s1 + $0x5d4] ss:$24 sps:$4 sm:$0xff]   ;;  %v2648_v34 = vld [vmem:[%s4053_s1 + $0x2d0] ss:$24 sps:$4 sm:$0xff]  }
  0x18   :  { %1839 = vmatprep.subr.bf16.mxu1 %v2616_v13  ;;  %v2649_v35 = vld [vmem:[%s4053_s1 + $0x5d0] ss:$24 sps:$4 sm:$0xff]   ;;  %v2650_v36 = vld [vmem:[%s4053_s1 + $0x2a4] ss:$24 sps:$4 sm:$0xff]   ;;  %v2654_v38 = vld [vmem:[%s4053_s1 + $0x2a0] ss:$24 sps:$4 sm:$0xff]  }
  0x19   :  { %v2652_v37 = vld [vmem:[%s4053_s1 + $0x5a4] ss:$24 sps:$4 sm:$0xff]   ;;  %v2655_v39 = vld [vmem:[%s4053_s1 + $0x5a0] ss:$24 sps:$4 sm:$0xff]   ;;  %v2656_v40 = vld [vmem:[%s4053_s1 + $0x274] ss:$24 sps:$4 sm:$0xff]  }
  0x1a   :  { %1797 = vmatpush1.bf16.msra.mxu0 %v2618_v14  ;;  %v2658_v41 = vld [vmem:[%s4053_s1 + $0x574] ss:$24 sps:$4 sm:$0xff]   ;;  %v2660_v42 = vld [vmem:[%s4053_s1 + $0x270] ss:$24 sps:$4 sm:$0xff]   ;;  %v2662_v44 = vld [vmem:[%s4053_s1 + $0x244] ss:$24 sps:$4 sm:$0xff]  }
  0x1b   :  { %1840 = vmatpush1.bf16.msra.mxu1 %v2619_v15  ;;  %1798 = vmatprep.subr.bf16.mxu0 %v2620_v16  ;;  %v2661_v43 = vld [vmem:[%s4053_s1 + $0x570] ss:$24 sps:$4 sm:$0xff]   ;;  %v2664_v45 = vld [vmem:[%s4053_s1 + $0x544] ss:$24 sps:$4 sm:$0xff]   ;;  %v2666_v46 = vld [vmem:[%s4053_s1 + $0x240] ss:$24 sps:$4 sm:$0xff]  }
  0x1c   :  { %1841 = vmatprep.subr.bf16.mxu1 %v2622_v17  ;;  %v2667_v47 = vld [vmem:[%s4053_s1 + $0x540] ss:$24 sps:$4 sm:$0xff]   ;;  %v2692_v48 = vld [vmem:[%s4052_s0 + $0x4] ss:$24 sps:$4 sm:$0xff]   ;;  %v2668_v49 = vld [vmem:[%s4053_s1 + $0x214] ss:$24 sps:$4 sm:$0xff]  }
  0x1d   :  { %v3242_v50 = vld [vmem:[%s4052_s0 + $0xc] ss:$24 sps:$4 sm:$0xff]   ;;  %1822 = vmatprep.mubr.bf16.mxu0 %v2692_v48  ;;  %v2672_v52 = vld [vmem:[%s4053_s1 + $0x210] ss:$24 sps:$4 sm:$0xff]   ;;  %v2678_v56 = vld [vmem:[%s4053_s1 + $0x1e0] ss:$24 sps:$4 sm:$0xff]  }
  0x1e   :  { %1799 = vmatpush1.bf16.msra.mxu0 %v2624_v18  ;;  %v2670_v51 = vld [vmem:[%s4053_s1 + $0x514] ss:$24 sps:$4 sm:$0xff]   ;;  %1865 = vmatprep.mubr.bf16.mxu1 %v3242_v50  ;;  %v2673_v53 = vld [vmem:[%s4053_s1 + $0x510] ss:$24 sps:$4 sm:$0xff]   ;;  %v2674_v54 = vld [vmem:[%s4053_s1 + $0x1e4] ss:$24 sps:$4 sm:$0xff]  }
  0x1f   :  { %1842 = vmatpush1.bf16.msra.mxu1 %v2625_v19  ;;  %1800 = vmatprep.subr.bf16.mxu0 %v2626_v20  ;;  %v2676_v55 = vld [vmem:[%s4053_s1 + $0x4e4] ss:$24 sps:$4 sm:$0xff]   ;;  %v2679_v57 = vld [vmem:[%s4053_s1 + $0x4e0] ss:$24 sps:$4 sm:$0xff]   ;;  %v2680_v58 = vld [vmem:[%s4053_s1 + $0x1b4] ss:$24 sps:$4 sm:$0xff]  }
  0x20   :  { %1843 = vmatprep.subr.bf16.mxu1 %v2628_v21  ;;  %v2682_v59 = vld [vmem:[%s4053_s1 + $0x4b4] ss:$24 sps:$4 sm:$0xff]   ;;  %v2684_v60 = vld [vmem:[%s4053_s1 + $0x1b0] ss:$24 sps:$4 sm:$0xff]   ;;  %v2686_v62 = vld [vmem:[%s4053_s1 + $0x184] ss:$24 sps:$4 sm:$0xff]  }
  0x21   :  { %v2685_v61 = vld [vmem:[%s4053_s1 + $0x4b0] ss:$24 sps:$4 sm:$0xff]   ;;  %v2688_v63 = vld [vmem:[%s4053_s1 + $0x484] ss:$24 sps:$4 sm:$0xff]   ;;  %v2690_v0 = vld [vmem:[%s4053_s1 + $0x180] ss:$24 sps:$4 sm:$0xff]  }
  0x22   :  { %1801 = vmatpush1.bf16.msra.mxu0 %v2630_v22  ;;  %v2691_v1 = vld [vmem:[%s4053_s1 + $0x480] ss:$24 sps:$4 sm:$0xff]   ;;  %v2700_v2 = vld [vmem:[%s4053_s1 + $0x754] ss:$24 sps:$4 sm:$0xff]   ;;  %v2698_v6 = vld [vmem:[%s4053_s1 + $0x750] ss:$24 sps:$4 sm:$0xff]  }
  0x23   :  { %1844 = vmatpush1.bf16.msra.mxu1 %v2631_v23  ;;  %1802 = vmatprep.subr.bf16.mxu0 %v2632_v24  ;;  %v2703_v3 = vld [vmem:[%s4053_s1 + $0x15c] ss:$24 sps:$4 sm:$0xff]   ;;  %v3299_v4 = vld [vmem:[%s4052_s0] ss:$24 sps:$4 sm:$0xff]   ;;  %v2709_v9 = vld [vmem:[%s4053_s1 + $0x12c] ss:$24 sps:$4 sm:$0xff]  }
  0x24   :  { %1845 = vmatprep.subr.bf16.mxu1 %v2634_v25  ;;  %v3304_v5 = vld [vmem:[%s4052_s0 + $0x8] ss:$24 sps:$4 sm:$0xff]   ;;  %v2701_v7 = vld [vmem:[%s4053_s1 + $0x158] ss:$24 sps:$4 sm:$0xff]   ;;  %v2706_v8 = vld [vmem:[%s4053_s1 + $0x724] ss:$24 sps:$4 sm:$0xff]  }
  0x25   :  { %v2704_v10 = vld [vmem:[%s4053_s1 + $0x720] ss:$24 sps:$4 sm:$0xff]   ;;  %v2712_v12 = vld [vmem:[%s4053_s1 + $0x6f4] ss:$24 sps:$4 sm:$0xff]   ;;  %v2710_v14 = vld [vmem:[%s4053_s1 + $0x6f0] ss:$24 sps:$4 sm:$0xff]  }
  0x26   :  { %1803 = vmatpush1.bf16.msra.mxu0 %v2636_v26  ;;  %v2707_v11 = vld [vmem:[%s4053_s1 + $0x128] ss:$24 sps:$4 sm:$0xff]   ;;  %v2715_v13 = vld [vmem:[%s4053_s1 + $0xfc] ss:$24 sps:$4 sm:$0xff]   ;;  %v2713_v15 = vld [vmem:[%s4053_s1 + $0xf8] ss:$24 sps:$4 sm:$0xff]  }
  0x27   :  { %1846 = vmatpush1.bf16.msra.mxu1 %v2637_v27  ;;  %1804 = vmatprep.subr.bf16.mxu0 %v2638_v28  ;;  %v2718_v16 = vld [vmem:[%s4053_s1 + $0x6c4] ss:$24 sps:$4 sm:$0xff]   ;;  %v2716_v18 = vld [vmem:[%s4053_s1 + $0x6c0] ss:$24 sps:$4 sm:$0xff]   ;;  %v2724_v20 = vld [vmem:[%s4053_s1 + $0x694] ss:$24 sps:$4 sm:$0xff]  }
  0x28   :  { %1847 = vmatprep.subr.bf16.mxu1 %v2640_v29  ;;  %v2721_v17 = vld [vmem:[%s4053_s1 + $0xcc] ss:$24 sps:$4 sm:$0xff]   ;;  %v2719_v19 = vld [vmem:[%s4053_s1 + $0xc8] ss:$24 sps:$4 sm:$0xff]   ;;  %v2727_v21 = vld [vmem:[%s4053_s1 + $0x9c] ss:$24 sps:$4 sm:$0xff]  }
  0x29   :  { %v2722_v22 = vld [vmem:[%s4053_s1 + $0x690] ss:$24 sps:$4 sm:$0xff]   ;;  %v2730_v24 = vld [vmem:[%s4053_s1 + $0x664] ss:$24 sps:$4 sm:$0xff]   ;;  %v2728_v26 = vld [vmem:[%s4053_s1 + $0x660] ss:$24 sps:$4 sm:$0xff]  }
  0x2a   :  { %1805 = vmatpush1.bf16.msra.mxu0 %v2642_v30  ;;  %v2725_v23 = vld [vmem:[%s4053_s1 + $0x98] ss:$24 sps:$4 sm:$0xff]   ;;  %v2733_v25 = vld [vmem:[%s4053_s1 + $0x6c] ss:$24 sps:$4 sm:$0xff]   ;;  %v2731_v27 = vld [vmem:[%s4053_s1 + $0x68] ss:$24 sps:$4 sm:$0xff]  }
  0x2b   :  { %1848 = vmatpush1.bf16.msra.mxu1 %v2643_v31  ;;  %1806 = vmatprep.subr.bf16.mxu0 %v2644_v32  ;;  %v2736_v28 = vld [vmem:[%s4053_s1 + $0x634] ss:$24 sps:$4 sm:$0xff]   ;;  %v2734_v30 = vld [vmem:[%s4053_s1 + $0x630] ss:$24 sps:$4 sm:$0xff]   ;;  %v2742_v32 = vld [vmem:[%s4053_s1 + $0x604] ss:$24 sps:$4 sm:$0xff]  }
  0x2c   :  { %1849 = vmatprep.subr.bf16.mxu1 %v2646_v33  ;;  %v2739_v29 = vld [vmem:[%s4053_s1 + $0x3c] ss:$24 sps:$4 sm:$0xff]   ;;  %v2737_v31 = vld [vmem:[%s4053_s1 + $0x38] ss:$24 sps:$4 sm:$0xff]   ;;  %v2745_v33 = vld [vmem:[%s4053_s1 + $0xc] ss:$24 sps:$4 sm:$0xff]  }
  0x2d   :  { %vm2189_vm0 = vcmask 719872   ;;  %s3065_s23 = smov 48   ;;  %vm2242_vm1 = vcmask 392192   ;;  %vm2285_vm2 = vcmask 1043456   ;;  %vm2286_vm3 = vcmask 326660  }
  0x2e   :  { %1807 = vmatpush2.bf16.msra.mxu0 %v2648_v34  ;;  %v3395_v34 = vld [vmem:[%s4052_s0 + $0x14] ss:$24 sps:$4 sm:$0xff]   ;;  %vm2287_vm4 = vmor %vm2286_vm3, %vm2285_vm2 }
  0x2f   :  { %1850 = vmatpush2.bf16.msra.mxu1 %v2649_v35  ;;  %1808 = vmatprep.subr.bf16.mxu0 %v2650_v36  ;;  %v2740_v35 = vld [vmem:[%s4053_s1 + $0x600] ss:$24 sps:$4 sm:$0xff]  }
  0x30   :  { %1851 = vmatprep.subr.bf16.mxu1 %v2652_v37  ;;  %v2743_v36 = vld [vmem:[%s4053_s1 + $0x8] ss:$24 sps:$4 sm:$0xff]   ;;  %v2748_v37 = vld [vmem:[%s4053_s1 + $0x8d4] ss:$24 sps:$4 sm:$0xff]  }
  0x32   :  { %1809 = vmatpush2.bf16.msra.mxu0 %v2654_v38  ;;  %v2751_v38 = vld [vmem:[%s4053_s1 + $0x2dc] ss:$24 sps:$4 sm:$0xff]  }
  0x33   :  { %1852 = vmatpush2.bf16.msra.mxu1 %v2655_v39  ;;  %1810 = vmatprep.subr.bf16.mxu0 %v2656_v40  ;;  %v2746_v39 = vld [vmem:[%s4053_s1 + $0x8d0] ss:$24 sps:$4 sm:$0xff]  }
  0x34   :  { %1853 = vmatprep.subr.bf16.mxu1 %v2658_v41  ;;  %v2749_v40 = vld [vmem:[%s4053_s1 + $0x2d8] ss:$24 sps:$4 sm:$0xff]   ;;  %v2754_v41 = vld [vmem:[%s4053_s1 + $0x8a4] ss:$24 sps:$4 sm:$0xff]  }
  0x36   :  { %1811 = vmatpush2.bf16.msra.mxu0 %v2660_v42  ;;  %v2757_v42 = vld [vmem:[%s4053_s1 + $0x2ac] ss:$24 sps:$4 sm:$0xff]  }
  0x37   :  { %1854 = vmatpush2.bf16.msra.mxu1 %v2661_v43  ;;  %1812 = vmatprep.subr.bf16.mxu0 %v2662_v44  ;;  %v2752_v43 = vld [vmem:[%s4053_s1 + $0x8a0] ss:$24 sps:$4 sm:$0xff]  }
  0x38   :  { %1855 = vmatprep.subr.bf16.mxu1 %v2664_v45  ;;  %v2755_v44 = vld [vmem:[%s4053_s1 + $0x2a8] ss:$24 sps:$4 sm:$0xff]   ;;  %v2760_v45 = vld [vmem:[%s4053_s1 + $0x874] ss:$24 sps:$4 sm:$0xff]  }
  0x3a   :  { %1813 = vmatpush2.bf16.msra.mxu0 %v2666_v46  ;;  %v2763_v46 = vld [vmem:[%s4053_s1 + $0x27c] ss:$24 sps:$4 sm:$0xff]  }
  0x3b   :  { %1856 = vmatpush2.bf16.msra.mxu1 %v2667_v47  ;;  %1814 = vmatprep.subr.bf16.mxu0 %v2668_v49  ;;  %v2758_v47 = vld [vmem:[%s4053_s1 + $0x870] ss:$24 sps:$4 sm:$0xff]   ;;  %v2766_v49 = vld [vmem:[%s4053_s1 + $0x844] ss:$24 sps:$4 sm:$0xff]  }
  0x3c   :  { %1857 = vmatprep.subr.bf16.mxu1 %v2670_v51  ;;  %v2769_v51 = vld [vmem:[%s4053_s1 + $0x24c] ss:$24 sps:$4 sm:$0xff]  }
  0x3e   :  { %1815 = vmatpush2.bf16.msra.mxu0 %v2672_v52  ;;  %v2764_v52 = vld [vmem:[%s4053_s1 + $0x840] ss:$24 sps:$4 sm:$0xff]  }
  0x3f   :  { %1858 = vmatpush2.bf16.msra.mxu1 %v2673_v53  ;;  %1816 = vmatprep.subr.bf16.mxu0 %v2674_v54  ;;  %v2767_v53 = vld [vmem:[%s4053_s1 + $0x248] ss:$24 sps:$4 sm:$0xff]   ;;  %v2772_v54 = vld [vmem:[%s4053_s1 + $0x814] ss:$24 sps:$4 sm:$0xff]  }
  0x40   :  { %1859 = vmatprep.subr.bf16.mxu1 %v2676_v55  ;;  %v2775_v55 = vld [vmem:[%s4053_s1 + $0x21c] ss:$24 sps:$4 sm:$0xff]  }
  0x42   :  { %1817 = vmatpush2.bf16.msra.mxu0 %v2678_v56  ;;  %v2770_v56 = vld [vmem:[%s4053_s1 + $0x810] ss:$24 sps:$4 sm:$0xff]  }
  0x43   :  { %1860 = vmatpush2.bf16.msra.mxu1 %v2679_v57  ;;  %1818 = vmatprep.subr.bf16.mxu0 %v2680_v58  ;;  %v2773_v57 = vld [vmem:[%s4053_s1 + $0x218] ss:$24 sps:$4 sm:$0xff]   ;;  %v2778_v58 = vld [vmem:[%s4053_s1 + $0x7e4] ss:$24 sps:$4 sm:$0xff]  }
  0x44   :  { %1861 = vmatprep.subr.bf16.mxu1 %v2682_v59  ;;  %v2781_v59 = vld [vmem:[%s4053_s1 + $0x1ec] ss:$24 sps:$4 sm:$0xff]  }
  0x46   :  { %1819 = vmatpush2.bf16.msra.mxu0 %v2684_v60  ;;  %v2776_v60 = vld [vmem:[%s4053_s1 + $0x7e0] ss:$24 sps:$4 sm:$0xff]  }
  0x47   :  { %1862 = vmatpush2.bf16.msra.mxu1 %v2685_v61  ;;  %1820 = vmatprep.subr.bf16.mxu0 %v2686_v62  ;;  %v2779_v61 = vld [vmem:[%s4053_s1 + $0x1e8] ss:$24 sps:$4 sm:$0xff]   ;;  %v2784_v62 = vld [vmem:[%s4053_s1 + $0x7b4] ss:$24 sps:$4 sm:$0xff]  }
  0x48   :  { %1863 = vmatprep.subr.bf16.mxu1 %v2688_v63  ;;  %v2787_v63 = vld [vmem:[%s4053_s1 + $0x1bc] ss:$24 sps:$4 sm:$0xff]  }
  0x4a   :  { %1821 = vmatpush2.bf16.msra.mxu0 %v2690_v0  ;;  %v2782_v0 = vld [vmem:[%s4053_s1 + $0x7b0] ss:$24 sps:$4 sm:$0xff]  }
  0x4b   :  { %1864 = vmatpush2.bf16.msra.mxu1 %v2691_v1  ;;  %1876 = vmatprep.subr.bf16.mxu0 %v2700_v2  ;;  %v2785_v1 = vld [vmem:[%s4053_s1 + $0x1b8] ss:$24 sps:$4 sm:$0xff]   ;;  %v2790_v2 = vld [vmem:[%s4053_s1 + $0x784] ss:$24 sps:$4 sm:$0xff]  }
  0x4c   :  { %1919 = vmatprep.subr.bf16.mxu1 %v2703_v3  ;;  %v2793_v3 = vld [vmem:[%s4053_s1 + $0x18c] ss:$24 sps:$4 sm:$0xff]  }
  0x4d   :  { %1823 = vmatmul.mubr.bf16.vlgmr.msra.gmra.mxu0 %v3299_v4 }
  0x4e   :  { %1866 = vmatmul.mubr.bf16.vlgmr.msra.gmra.mxu1 %v3304_v5  ;;  %1877 = vmatpush1.bf16.msra.mxu0 %v2698_v6  ;;  %v2788_v6 = vld [vmem:[%s4053_s1 + $0x780] ss:$24 sps:$4 sm:$0xff]  }
  0x4f   :  { %1920 = vmatpush1.bf16.msra.mxu1 %v2701_v7  ;;  %1878 = vmatprep.subr.bf16.mxu0 %v2706_v8  ;;  %v2791_v7 = vld [vmem:[%s4053_s1 + $0x188] ss:$24 sps:$4 sm:$0xff]   ;;  %v2799_v8 = vld [vmem:[%s4053_s1 + $0x45c] ss:$24 sps:$4 sm:$0xff]  }
  0x50   :  { %1921 = vmatprep.subr.bf16.mxu1 %v2709_v9  ;;  %1951 = vmatprep.mubr.bf16.mxu1 %v2692_v48  ;;  %v2761_v48 = vld [vmem:[%s4053_s1 + $0x278] ss:$24 sps:$4 sm:$0xff]   ;;  %v2802_v9 = vld [vmem:[%s4053_s1 + $0x75c] ss:$24 sps:$4 sm:$0xff]  }
  0x51   :  { %1908 = vmatprep.mubr.bf16.mxu0 %v3395_v34 }
  0x52   :  { %1879 = vmatpush1.bf16.msra.mxu0 %v2704_v10  ;;  %v3509_v10 = vld [vmem:[%s4052_s0 + $0x10] ss:$24 sps:$4 sm:$0xff]  }
  0x53   :  { %1922 = vmatpush1.bf16.msra.mxu1 %v2707_v11  ;;  %1880 = vmatprep.subr.bf16.mxu0 %v2712_v12  ;;  %v2797_v11 = vld [vmem:[%s4053_s1 + $0x458] ss:$24 sps:$4 sm:$0xff]  }
  0x54   :  { %1923 = vmatprep.subr.bf16.mxu1 %v2715_v13  ;;  %v2800_v12 = vld [vmem:[%s4053_s1 + $0x758] ss:$24 sps:$4 sm:$0xff]   ;;  %v2805_v13 = vld [vmem:[%s4053_s1 + $0x42c] ss:$24 sps:$4 sm:$0xff]  }
  0x56   :  { %1881 = vmatpush1.bf16.msra.mxu0 %v2710_v14  ;;  %v2808_v14 = vld [vmem:[%s4053_s1 + $0x72c] ss:$24 sps:$4 sm:$0xff]  }
  0x57   :  { %1924 = vmatpush1.bf16.msra.mxu1 %v2713_v15  ;;  %1882 = vmatprep.subr.bf16.mxu0 %v2718_v16  ;;  %v2803_v15 = vld [vmem:[%s4053_s1 + $0x428] ss:$24 sps:$4 sm:$0xff]  }
  0x58   :  { %1925 = vmatprep.subr.bf16.mxu1 %v2721_v17  ;;  %v2806_v16 = vld [vmem:[%s4053_s1 + $0x728] ss:$24 sps:$4 sm:$0xff]   ;;  %v2811_v17 = vld [vmem:[%s4053_s1 + $0x3fc] ss:$24 sps:$4 sm:$0xff]  }
  0x5a   :  { %1883 = vmatpush1.bf16.msra.mxu0 %v2716_v18  ;;  %v2809_v18 = vld [vmem:[%s4053_s1 + $0x3f8] ss:$24 sps:$4 sm:$0xff]  }
  0x5b   :  { %1926 = vmatpush1.bf16.msra.mxu1 %v2719_v19  ;;  %1884 = vmatprep.subr.bf16.mxu0 %v2724_v20  ;;  %v2812_v19 = vld [vmem:[%s4053_s1 + $0x6f8] ss:$24 sps:$4 sm:$0xff]   ;;  %v2817_v20 = vld [vmem:[%s4053_s1 + $0x3cc] ss:$24 sps:$4 sm:$0xff]  }
  0x5c   :  { %1927 = vmatprep.subr.bf16.mxu1 %v2727_v21  ;;  %v2815_v21 = vld [vmem:[%s4053_s1 + $0x3c8] ss:$24 sps:$4 sm:$0xff]  }
  0x5e   :  { %1885 = vmatpush1.bf16.msra.mxu0 %v2722_v22  ;;  %v2818_v22 = vld [vmem:[%s4053_s1 + $0x6c8] ss:$24 sps:$4 sm:$0xff]  }
  0x5f   :  { %1928 = vmatpush1.bf16.msra.mxu1 %v2725_v23  ;;  %1886 = vmatprep.subr.bf16.mxu0 %v2730_v24  ;;  %v2823_v23 = vld [vmem:[%s4053_s1 + $0x39c] ss:$24 sps:$4 sm:$0xff]  }
  0x60   :  { %1929 = vmatprep.subr.bf16.mxu1 %v2733_v25  ;;  %v2826_v24 = vld [vmem:[%s4053_s1 + $0x69c] ss:$24 sps:$4 sm:$0xff]   ;;  %v2821_v25 = vld [vmem:[%s4053_s1 + $0x398] ss:$24 sps:$4 sm:$0xff]  }
  0x62   :  { %1887 = vmatpush1.bf16.msra.mxu0 %v2728_v26  ;;  %v2824_v26 = vld [vmem:[%s4053_s1 + $0x698] ss:$24 sps:$4 sm:$0xff]  }
  0x63   :  { %1930 = vmatpush1.bf16.msra.mxu1 %v2731_v27  ;;  %1888 = vmatprep.subr.bf16.mxu0 %v2736_v28  ;;  %v2829_v27 = vld [vmem:[%s4053_s1 + $0x36c] ss:$24 sps:$4 sm:$0xff]  }
  0x64   :  { %1931 = vmatprep.subr.bf16.mxu1 %v2739_v29  ;;  %v2832_v28 = vld [vmem:[%s4053_s1 + $0x66c] ss:$24 sps:$4 sm:$0xff]   ;;  %v2827_v29 = vld [vmem:[%s4053_s1 + $0x368] ss:$24 sps:$4 sm:$0xff]  }
  0x66   :  { %1889 = vmatpush1.bf16.msra.mxu0 %v2734_v30  ;;  %v2830_v30 = vld [vmem:[%s4053_s1 + $0x668] ss:$24 sps:$4 sm:$0xff]  }
  0x67   :  { %1932 = vmatpush1.bf16.msra.mxu1 %v2737_v31  ;;  %1890 = vmatprep.subr.bf16.mxu0 %v2742_v32  ;;  %v2835_v31 = vld [vmem:[%s4053_s1 + $0x33c] ss:$24 sps:$4 sm:$0xff]  }
  0x68   :  { %1933 = vmatprep.subr.bf16.mxu1 %v2745_v33  ;;  %v2838_v32 = vld [vmem:[%s4053_s1 + $0x63c] ss:$24 sps:$4 sm:$0xff]   ;;  %v2833_v33 = vld [vmem:[%s4053_s1 + $0x338] ss:$24 sps:$4 sm:$0xff]  }
  0x6a   :  { %1891 = vmatpush1.bf16.msra.mxu0 %v2740_v35  ;;  %v2836_v35 = vld [vmem:[%s4053_s1 + $0x638] ss:$24 sps:$4 sm:$0xff]  }
  0x6b   :  { %1934 = vmatpush1.bf16.msra.mxu1 %v2743_v36  ;;  %1892 = vmatprep.subr.bf16.mxu0 %v2748_v37  ;;  %v2841_v36 = vld [vmem:[%s4053_s1 + $0x30c] ss:$24 sps:$4 sm:$0xff]  }
  0x6c   :  { %1935 = vmatprep.subr.bf16.mxu1 %v2751_v38  ;;  %v2844_v37 = vld [vmem:[%s4053_s1 + $0x60c] ss:$24 sps:$4 sm:$0xff]   ;;  %v2839_v38 = vld [vmem:[%s4053_s1 + $0x308] ss:$24 sps:$4 sm:$0xff]  }
  0x6e   :  { %1893 = vmatpush2.bf16.msra.mxu0 %v2746_v39  ;;  %v2842_v39 = vld [vmem:[%s4053_s1 + $0x608] ss:$24 sps:$4 sm:$0xff]  }
  0x6f   :  { %1936 = vmatpush2.bf16.msra.mxu1 %v2749_v40  ;;  %1894 = vmatprep.subr.bf16.mxu0 %v2754_v41  ;;  %v2847_v40 = vld [vmem:[%s4053_s1 + $0x5dc] ss:$24 sps:$4 sm:$0xff]  }
  0x70   :  { %1937 = vmatprep.subr.bf16.mxu1 %v2757_v42  ;;  %v2850_v41 = vld [vmem:[%s4053_s1 + $0x8dc] ss:$24 sps:$4 sm:$0xff]   ;;  %v2845_v42 = vld [vmem:[%s4053_s1 + $0x5d8] ss:$24 sps:$4 sm:$0xff]  }
  0x72   :  { %1895 = vmatpush2.bf16.msra.mxu0 %v2752_v43  ;;  %v2848_v43 = vld [vmem:[%s4053_s1 + $0x8d8] ss:$24 sps:$4 sm:$0xff]  }
  0x73   :  { %1938 = vmatpush2.bf16.msra.mxu1 %v2755_v44  ;;  %1896 = vmatprep.subr.bf16.mxu0 %v2760_v45  ;;  %v2853_v44 = vld [vmem:[%s4053_s1 + $0x5ac] ss:$24 sps:$4 sm:$0xff]  }
  0x74   :  { %1939 = vmatprep.subr.bf16.mxu1 %v2763_v46  ;;  %v2856_v45 = vld [vmem:[%s4053_s1 + $0x8ac] ss:$24 sps:$4 sm:$0xff]   ;;  %v2851_v46 = vld [vmem:[%s4053_s1 + $0x5a8] ss:$24 sps:$4 sm:$0xff]  }
  0x76   :  { %1897 = vmatpush2.bf16.msra.mxu0 %v2758_v47  ;;  %v2854_v47 = vld [vmem:[%s4053_s1 + $0x8a8] ss:$24 sps:$4 sm:$0xff]  }
  0x77   :  { %1940 = vmatpush2.bf16.msra.mxu1 %v2761_v48  ;;  %1898 = vmatprep.subr.bf16.mxu0 %v2766_v49  ;;  %v2859_v48 = vld [vmem:[%s4053_s1 + $0x57c] ss:$24 sps:$4 sm:$0xff]  }
  0x78   :  { %1941 = vmatprep.subr.bf16.mxu1 %v2769_v51  ;;  %v2862_v49 = vld [vmem:[%s4053_s1 + $0x87c] ss:$24 sps:$4 sm:$0xff]   ;;  %v2857_v51 = vld [vmem:[%s4053_s1 + $0x578] ss:$24 sps:$4 sm:$0xff]  }
  0x7a   :  { %1899 = vmatpush2.bf16.msra.mxu0 %v2764_v52  ;;  %v2860_v52 = vld [vmem:[%s4053_s1 + $0x878] ss:$24 sps:$4 sm:$0xff]  }
  0x7b   :  { %1942 = vmatpush2.bf16.msra.mxu1 %v2767_v53  ;;  %1900 = vmatprep.subr.bf16.mxu0 %v2772_v54  ;;  %v2865_v53 = vld [vmem:[%s4053_s1 + $0x54c] ss:$24 sps:$4 sm:$0xff]  }
  0x7c   :  { %1943 = vmatprep.subr.bf16.mxu1 %v2775_v55  ;;  %v2868_v54 = vld [vmem:[%s4053_s1 + $0x84c] ss:$24 sps:$4 sm:$0xff]   ;;  %v2863_v55 = vld [vmem:[%s4053_s1 + $0x548] ss:$24 sps:$4 sm:$0xff]  }
  0x7e   :  { %1901 = vmatpush2.bf16.msra.mxu0 %v2770_v56  ;;  %v2866_v56 = vld [vmem:[%s4053_s1 + $0x848] ss:$24 sps:$4 sm:$0xff]  }
  0x7f   :  { %1944 = vmatpush2.bf16.msra.mxu1 %v2773_v57  ;;  %1902 = vmatprep.subr.bf16.mxu0 %v2778_v58  ;;  %v2871_v57 = vld [vmem:[%s4053_s1 + $0x51c] ss:$24 sps:$4 sm:$0xff]  }
  0x80   :  { %1945 = vmatprep.subr.bf16.mxu1 %v2781_v59  ;;  %v2874_v58 = vld [vmem:[%s4053_s1 + $0x81c] ss:$24 sps:$4 sm:$0xff]   ;;  %v2869_v59 = vld [vmem:[%s4053_s1 + $0x518] ss:$24 sps:$4 sm:$0xff]  }
  0x82   :  { %1903 = vmatpush2.bf16.msra.mxu0 %v2776_v60  ;;  %v2872_v60 = vld [vmem:[%s4053_s1 + $0x818] ss:$24 sps:$4 sm:$0xff]  }
  0x83   :  { %1946 = vmatpush2.bf16.msra.mxu1 %v2779_v61  ;;  %1904 = vmatprep.subr.bf16.mxu0 %v2784_v62  ;;  %v2877_v61 = vld [vmem:[%s4053_s1 + $0x4ec] ss:$24 sps:$4 sm:$0xff]  }
  0x84   :  { %1947 = vmatprep.subr.bf16.mxu1 %v2787_v63  ;;  %v2880_v62 = vld [vmem:[%s4053_s1 + $0x7ec] ss:$24 sps:$4 sm:$0xff]   ;;  %v2875_v63 = vld [vmem:[%s4053_s1 + $0x4e8] ss:$24 sps:$4 sm:$0xff]  }
  0x86   :  { %1905 = vmatpush2.bf16.msra.mxu0 %v2782_v0  ;;  %v2878_v0 = vld [vmem:[%s4053_s1 + $0x7e8] ss:$24 sps:$4 sm:$0xff]  }
  0x87   :  { %1948 = vmatpush2.bf16.msra.mxu1 %v2785_v1  ;;  %1906 = vmatprep.subr.bf16.mxu0 %v2790_v2  ;;  %v2883_v1 = vld [vmem:[%s4053_s1 + $0x4bc] ss:$24 sps:$4 sm:$0xff]  }
  0x88   :  { %1949 = vmatprep.subr.bf16.mxu1 %v2793_v3  ;;  %v2886_v2 = vld [vmem:[%s4053_s1 + $0x7bc] ss:$24 sps:$4 sm:$0xff]   ;;  %v2881_v3 = vld [vmem:[%s4053_s1 + $0x4b8] ss:$24 sps:$4 sm:$0xff]  }
  0x8a   :  { %1907 = vmatpush2.bf16.msra.mxu0 %v2788_v6  ;;  %v2884_v6 = vld [vmem:[%s4053_s1 + $0x7b8] ss:$24 sps:$4 sm:$0xff]  }
  0x8b   :  { %1950 = vmatpush2.bf16.msra.mxu1 %v2791_v7  ;;  %1962 = vmatprep.subr.bf16.mxu0 %v2799_v8  ;;  %v2889_v7 = vld [vmem:[%s4053_s1 + $0x48c] ss:$24 sps:$4 sm:$0xff]  }
  0x8c   :  { %2005 = vmatprep.subr.bf16.mxu1 %v2802_v9  ;;  %v2892_v8 = vld [vmem:[%s4053_s1 + $0x78c] ss:$24 sps:$4 sm:$0xff]   ;;  %v2887_v9 = vld [vmem:[%s4053_s1 + $0x488] ss:$24 sps:$4 sm:$0xff]  }
  0x8d   :  { %1909 = vmatmul.mubr.bf16.vlgmr.msra.gmra.mxu0 %v3509_v10 }
  0x8e   :  { %1952 = vmatmul.mubr.bf16.vlgmr.msra.gmra.mxu1 %v3299_v4  ;;  %1963 = vmatpush1.bf16.msra.mxu0 %v2797_v11  ;;  %v2814_v4 = vld [vmem:[%s4053_s1 + $0x6fc] ss:$24 sps:$4 sm:$0xff]   ;;  %v2890_v11 = vld [vmem:[%s4053_s1 + $0x788] ss:$24 sps:$4 sm:$0xff]  }
  0x8f   :  { %2006 = vmatpush1.bf16.msra.mxu1 %v2800_v12  ;;  %1964 = vmatprep.subr.bf16.mxu0 %v2805_v13  ;;  %v2895_v12 = vld [vmem:[%s4053_s1 + $0x164] ss:$24 sps:$4 sm:$0xff]  }
  0x90   :  { %2007 = vmatprep.subr.bf16.mxu1 %v2808_v14  ;;  %1994 = vmatprep.mubr.bf16.mxu0 %v3242_v50  ;;  %v2820_v50 = vld [vmem:[%s4053_s1 + $0x6cc] ss:$24 sps:$4 sm:$0xff]   ;;  %v2893_v14 = vld [vmem:[%s4053_s1 + $0x160] ss:$24 sps:$4 sm:$0xff]  }
  0x91   :  { %2037 = vmatprep.mubr.bf16.mxu1 %v3395_v34  ;;  %v2898_v13 = vld [vmem:[%s4053_s1 + $0x464] ss:$24 sps:$4 sm:$0xff]  }
  0x92   :  { %1965 = vmatpush1.bf16.msra.mxu0 %v2803_v15  ;;  %v2896_v15 = vld [vmem:[%s4053_s1 + $0x460] ss:$24 sps:$4 sm:$0xff]  }
  0x93   :  { %2008 = vmatpush1.bf16.msra.mxu1 %v2806_v16  ;;  %1966 = vmatprep.subr.bf16.mxu0 %v2811_v17  ;;  %v2901_v16 = vld [vmem:[%s4053_s1 + $0x134] ss:$24 sps:$4 sm:$0xff]  }
  0x94   :  { %2009 = vmatprep.subr.bf16.mxu1 %v2814_v4  ;;  %v2904_v17 = vld [vmem:[%s4053_s1 + $0x434] ss:$24 sps:$4 sm:$0xff]   ;;  %v2899_v4 = vld [vmem:[%s4053_s1 + $0x130] ss:$24 sps:$4 sm:$0xff]  }
  0x96   :  { %1967 = vmatpush1.bf16.msra.mxu0 %v2809_v18  ;;  %v2902_v18 = vld [vmem:[%s4053_s1 + $0x430] ss:$24 sps:$4 sm:$0xff]  }
  0x97   :  { %2010 = vmatpush1.bf16.msra.mxu1 %v2812_v19  ;;  %1968 = vmatprep.subr.bf16.mxu0 %v2817_v20  ;;  %v2907_v19 = vld [vmem:[%s4053_s1 + $0x104] ss:$24 sps:$4 sm:$0xff]  }
  0x98   :  { %2011 = vmatprep.subr.bf16.mxu1 %v2820_v50  ;;  %v3037_v20 = vld [vmem:[%s4052_s0 + $0x4] ss:$24 sps:$4 sm:$0xff]  }
  0x99   :  { %v3038_v50 = vld [vmem:[%s4052_s0 + $0xc] ss:$24 sps:$4 sm:$0xff]  }
  0x9a   :  { %1969 = vmatpush1.bf16.msra.mxu0 %v2815_v21  ;;  %v2905_v21 = vld [vmem:[%s4053_s1 + $0x100] ss:$24 sps:$4 sm:$0xff]  }
  0x9b   :  { %2012 = vmatpush1.bf16.msra.mxu1 %v2818_v22  ;;  %1970 = vmatprep.subr.bf16.mxu0 %v2823_v23  ;;  %v2908_v22 = vld [vmem:[%s4053_s1 + $0x400] ss:$24 sps:$4 sm:$0xff]   ;;  %v2913_v23 = vld [vmem:[%s4053_s1 + $0xd4] ss:$24 sps:$4 sm:$0xff]  }
  0x9c   :  { %2013 = vmatprep.subr.bf16.mxu1 %v2826_v24  ;;  %v2916_v24 = vld [vmem:[%s4053_s1 + $0x3d4] ss:$24 sps:$4 sm:$0xff]  }
  0x9e   :  { %1971 = vmatpush1.bf16.msra.mxu0 %v2821_v25  ;;  %v2911_v25 = vld [vmem:[%s4053_s1 + $0xd0] ss:$24 sps:$4 sm:$0xff]  }
  0x9f   :  { %2014 = vmatpush1.bf16.msra.mxu1 %v2824_v26  ;;  %1972 = vmatprep.subr.bf16.mxu0 %v2829_v27  ;;  %v2914_v26 = vld [vmem:[%s4053_s1 + $0x3d0] ss:$24 sps:$4 sm:$0xff]   ;;  %v2919_v27 = vld [vmem:[%s4053_s1 + $0xa4] ss:$24 sps:$4 sm:$0xff]  }
  0xa0   :  { %2015 = vmatprep.subr.bf16.mxu1 %v2832_v28  ;;  %v2922_v28 = vld [vmem:[%s4053_s1 + $0x3a4] ss:$24 sps:$4 sm:$0xff]  }
  0xa2   :  { %1973 = vmatpush1.bf16.msra.mxu0 %v2827_v29  ;;  %v2917_v29 = vld [vmem:[%s4053_s1 + $0xa0] ss:$24 sps:$4 sm:$0xff]  }
  0xa3   :  { %2016 = vmatpush1.bf16.msra.mxu1 %v2830_v30  ;;  %1974 = vmatprep.subr.bf16.mxu0 %v2835_v31  ;;  %v2920_v30 = vld [vmem:[%s4053_s1 + $0x3a0] ss:$24 sps:$4 sm:$0xff]   ;;  %v2925_v31 = vld [vmem:[%s4053_s1 + $0x74] ss:$24 sps:$4 sm:$0xff]  }
  0xa4   :  { %2017 = vmatprep.subr.bf16.mxu1 %v2838_v32  ;;  %v2928_v32 = vld [vmem:[%s4053_s1 + $0x374] ss:$24 sps:$4 sm:$0xff]  }
  0xa6   :  { %1975 = vmatpush1.bf16.msra.mxu0 %v2833_v33  ;;  %v2923_v33 = vld [vmem:[%s4053_s1 + $0x70] ss:$24 sps:$4 sm:$0xff]  }
  0xa7   :  { %2018 = vmatpush1.bf16.msra.mxu1 %v2836_v35  ;;  %1976 = vmatprep.subr.bf16.mxu0 %v2841_v36  ;;  %v2926_v35 = vld [vmem:[%s4053_s1 + $0x370] ss:$24 sps:$4 sm:$0xff]   ;;  %v2931_v36 = vld [vmem:[%s4053_s1 + $0x44] ss:$24 sps:$4 sm:$0xff]  }
  0xa8   :  { %2019 = vmatprep.subr.bf16.mxu1 %v2844_v37  ;;  %v2934_v37 = vld [vmem:[%s4053_s1 + $0x344] ss:$24 sps:$4 sm:$0xff]  }
  0xaa   :  { %1977 = vmatpush1.bf16.msra.mxu0 %v2839_v38  ;;  %v2929_v38 = vld [vmem:[%s4053_s1 + $0x40] ss:$24 sps:$4 sm:$0xff]  }
  0xab   :  { %2020 = vmatpush1.bf16.msra.mxu1 %v2842_v39  ;;  %1978 = vmatprep.subr.bf16.mxu0 %v2847_v40  ;;  %v2932_v39 = vld [vmem:[%s4053_s1 + $0x340] ss:$24 sps:$4 sm:$0xff]   ;;  %v2937_v40 = vld [vmem:[%s4053_s1 + $0x14] ss:$24 sps:$4 sm:$0xff]  }
  0xac   :  { %2021 = vmatprep.subr.bf16.mxu1 %v2850_v41  ;;  %v2940_v41 = vld [vmem:[%s4053_s1 + $0x314] ss:$24 sps:$4 sm:$0xff]  }
  0xae   :  { %1979 = vmatpush2.bf16.msra.mxu0 %v2845_v42  ;;  %v2935_v42 = vld [vmem:[%s4053_s1 + $0x10] ss:$24 sps:$4 sm:$0xff]  }
  0xaf   :  { %2022 = vmatpush2.bf16.msra.mxu1 %v2848_v43  ;;  %1980 = vmatprep.subr.bf16.mxu0 %v2853_v44  ;;  %v2938_v43 = vld [vmem:[%s4053_s1 + $0x310] ss:$24 sps:$4 sm:$0xff]   ;;  %v2943_v44 = vld [vmem:[%s4053_s1 + $0x2e4] ss:$24 sps:$4 sm:$0xff]  }
  0xb0   :  { %2023 = vmatprep.subr.bf16.mxu1 %v2856_v45  ;;  %v2946_v45 = vld [vmem:[%s4053_s1 + $0x5e4] ss:$24 sps:$4 sm:$0xff]  }
  0xb2   :  { %1981 = vmatpush2.bf16.msra.mxu0 %v2851_v46  ;;  %v2941_v46 = vld [vmem:[%s4053_s1 + $0x2e0] ss:$24 sps:$4 sm:$0xff]  }
  0xb3   :  { %2024 = vmatpush2.bf16.msra.mxu1 %v2854_v47  ;;  %1982 = vmatprep.subr.bf16.mxu0 %v2859_v48  ;;  %v2944_v47 = vld [vmem:[%s4053_s1 + $0x5e0] ss:$24 sps:$4 sm:$0xff]   ;;  %v2949_v48 = vld [vmem:[%s4053_s1 + $0x2b4] ss:$24 sps:$4 sm:$0xff]  }
  0xb4   :  { %2025 = vmatprep.subr.bf16.mxu1 %v2862_v49  ;;  %v2952_v49 = vld [vmem:[%s4053_s1 + $0x5b4] ss:$24 sps:$4 sm:$0xff]  }
  0xb6   :  { %1983 = vmatpush2.bf16.msra.mxu0 %v2857_v51  ;;  %v2947_v51 = vld [vmem:[%s4053_s1 + $0x2b0] ss:$24 sps:$4 sm:$0xff]  }
  0xb7   :  { %2026 = vmatpush2.bf16.msra.mxu1 %v2860_v52  ;;  %1984 = vmatprep.subr.bf16.mxu0 %v2865_v53  ;;  %v2950_v52 = vld [vmem:[%s4053_s1 + $0x5b0] ss:$24 sps:$4 sm:$0xff]   ;;  %v2955_v53 = vld [vmem:[%s4053_s1 + $0x284] ss:$24 sps:$4 sm:$0xff]  }
  0xb8   :  { %2027 = vmatprep.subr.bf16.mxu1 %v2868_v54  ;;  %v2958_v54 = vld [vmem:[%s4053_s1 + $0x584] ss:$24 sps:$4 sm:$0xff]  }
  0xba   :  { %1985 = vmatpush2.bf16.msra.mxu0 %v2863_v55  ;;  %v2953_v55 = vld [vmem:[%s4053_s1 + $0x280] ss:$24 sps:$4 sm:$0xff]  }
  0xbb   :  { %2028 = vmatpush2.bf16.msra.mxu1 %v2866_v56  ;;  %1986 = vmatprep.subr.bf16.mxu0 %v2871_v57  ;;  %v2956_v56 = vld [vmem:[%s4053_s1 + $0x580] ss:$24 sps:$4 sm:$0xff]   ;;  %v2961_v57 = vld [vmem:[%s4053_s1 + $0x254] ss:$24 sps:$4 sm:$0xff]  }
  0xbc   :  { %2029 = vmatprep.subr.bf16.mxu1 %v2874_v58  ;;  %v2964_v58 = vld [vmem:[%s4053_s1 + $0x554] ss:$24 sps:$4 sm:$0xff]  }
  0xbe   :  { %1987 = vmatpush2.bf16.msra.mxu0 %v2869_v59  ;;  %v2959_v59 = vld [vmem:[%s4053_s1 + $0x250] ss:$24 sps:$4 sm:$0xff]  }
  0xbf   :  { %2030 = vmatpush2.bf16.msra.mxu1 %v2872_v60  ;;  %1988 = vmatprep.subr.bf16.mxu0 %v2877_v61  ;;  %v2962_v60 = vld [vmem:[%s4053_s1 + $0x550] ss:$24 sps:$4 sm:$0xff]   ;;  %v2967_v61 = vld [vmem:[%s4053_s1 + $0x224] ss:$24 sps:$4 sm:$0xff]  }
  0xc0   :  { %2031 = vmatprep.subr.bf16.mxu1 %v2880_v62  ;;  %v2970_v62 = vld [vmem:[%s4053_s1 + $0x524] ss:$24 sps:$4 sm:$0xff]  }
  0xc2   :  { %1989 = vmatpush2.bf16.msra.mxu0 %v2875_v63  ;;  %v2965_v63 = vld [vmem:[%s4053_s1 + $0x220] ss:$24 sps:$4 sm:$0xff]  }
  0xc3   :  { %2032 = vmatpush2.bf16.msra.mxu1 %v2878_v0  ;;  %1990 = vmatprep.subr.bf16.mxu0 %v2883_v1  ;;  %v2968_v0 = vld [vmem:[%s4053_s1 + $0x520] ss:$24 sps:$4 sm:$0xff]   ;;  %v2973_v1 = vld [vmem:[%s4053_s1 + $0x1f4] ss:$24 sps:$4 sm:$0xff]  }
  0xc4   :  { %2033 = vmatprep.subr.bf16.mxu1 %v2886_v2  ;;  %v2976_v2 = vld [vmem:[%s4053_s1 + $0x4f4] ss:$24 sps:$4 sm:$0xff]  }
  0xc6   :  { %1991 = vmatpush2.bf16.msra.mxu0 %v2881_v3  ;;  %v2971_v3 = vld [vmem:[%s4053_s1 + $0x1f0] ss:$24 sps:$4 sm:$0xff]  }
  0xc7   :  { %2034 = vmatpush2.bf16.msra.mxu1 %v2884_v6  ;;  %1992 = vmatprep.subr.bf16.mxu0 %v2889_v7  ;;  %v2974_v6 = vld [vmem:[%s4053_s1 + $0x4f0] ss:$24 sps:$4 sm:$0xff]   ;;  %v2979_v7 = vld [vmem:[%s4053_s1 + $0x1c4] ss:$24 sps:$4 sm:$0xff]  }
  0xc8   :  { %2035 = vmatprep.subr.bf16.mxu1 %v2892_v8  ;;  %v2982_v8 = vld [vmem:[%s4053_s1 + $0x4c4] ss:$24 sps:$4 sm:$0xff]  }
  0xca   :  { %1993 = vmatpush2.bf16.msra.mxu0 %v2887_v9  ;;  %v2977_v9 = vld [vmem:[%s4053_s1 + $0x1c0] ss:$24 sps:$4 sm:$0xff]  }
  0xcb   :  { %2036 = vmatpush2.bf16.msra.mxu1 %v2890_v11  ;;  %2048 = vmatprep.subr.bf16.mxu0 %v2895_v12  ;;  %v2980_v11 = vld [vmem:[%s4053_s1 + $0x4c0] ss:$24 sps:$4 sm:$0xff]   ;;  %v2985_v12 = vld [vmem:[%s4053_s1 + $0x194] ss:$24 sps:$4 sm:$0xff]  }
  0xcc   :  { %2091 = vmatprep.subr.bf16.mxu1 %v2898_v13  ;;  %v2988_v13 = vld [vmem:[%s4053_s1 + $0x494] ss:$24 sps:$4 sm:$0xff]  }
  0xcd   :  { %1995 = vmatmul.mubr.bf16.vlgmr.msra.gmra.mxu0 %v3304_v5  ;;  %v2910_v5 = vld [vmem:[%s4053_s1 + $0x404] ss:$24 sps:$4 sm:$0xff]  }
  0xce   :  { %2038 = vmatmul.mubr.bf16.vlgmr.msra.gmra.mxu1 %v3509_v10  ;;  %2049 = vmatpush1.bf16.msra.mxu0 %v2893_v14  ;;  %v2983_v14 = vld [vmem:[%s4053_s1 + $0x190] ss:$24 sps:$4 sm:$0xff]  }
  0xcf   :  { %2092 = vmatpush1.bf16.msra.mxu1 %v2896_v15  ;;  %2050 = vmatprep.subr.bf16.mxu0 %v2901_v16  ;;  %v2986_v15 = vld [vmem:[%s4053_s1 + $0x490] ss:$24 sps:$4 sm:$0xff]   ;;  %v2991_v16 = vld [vmem:[%s4053_s1 + $0x764] ss:$24 sps:$4 sm:$0xff]  }
  0xd0   :  { %2093 = vmatprep.subr.bf16.mxu1 %v2904_v17  ;;  %2080 = vmatprep.mubr.bf16.mxu0 %v3037_v20  ;;  %v2989_v17 = vld [vmem:[%s4053_s1 + $0x760] ss:$24 sps:$4 sm:$0xff]  }
  0xd1   :  { %2123 = vmatprep.mubr.bf16.mxu1 %v3038_v50  ;;  %v3040_v20 = vld [vmem:[%s4052_s0 + $0x8] ss:$24 sps:$4 sm:$0xff]  }
  0xd2   :  { %2051 = vmatpush1.bf16.msra.mxu0 %v2899_v4  ;;  %v2994_v4 = vld [vmem:[%s4053_s1 + $0x734] ss:$24 sps:$4 sm:$0xff]  }
  0xd3   :  { %2094 = vmatpush1.bf16.msra.mxu1 %v2902_v18  ;;  %2052 = vmatprep.subr.bf16.mxu0 %v2907_v19 }
  0xd4   :  { %2095 = vmatprep.subr.bf16.mxu1 %v2910_v5  ;;  %v3039_v5 = vld [vmem:[%s4052_s0] ss:$24 sps:$4 sm:$0xff]  }
  0xd6   :  { %2053 = vmatpush1.bf16.msra.mxu0 %v2905_v21  ;;  %v2992_v21 = vld [vmem:[%s4053_s1 + $0x730] ss:$24 sps:$4 sm:$0xff]  }
  0xd7   :  { %2096 = vmatpush1.bf16.msra.mxu1 %v2908_v22  ;;  %2054 = vmatprep.subr.bf16.mxu0 %v2913_v23 }
  0xd8   :  { %2097 = vmatprep.subr.bf16.mxu1 %v2916_v24  ;;  %v2997_v24 = vld [vmem:[%s4053_s1 + $0x704] ss:$24 sps:$4 sm:$0xff]  }
  0xda   :  { %2055 = vmatpush1.bf16.msra.mxu0 %v2911_v25 }
  0xdb   :  { %2098 = vmatpush1.bf16.msra.mxu1 %v2914_v26  ;;  %2056 = vmatprep.subr.bf16.mxu0 %v2919_v27 }
  0xdc   :  { %2099 = vmatprep.subr.bf16.mxu1 %v2922_v28 }
  0xde   :  { %2057 = vmatpush1.bf16.msra.mxu0 %v2917_v29  ;;  %v2995_v29 = vld [vmem:[%s4053_s1 + $0x700] ss:$24 sps:$4 sm:$0xff]  }
  0xdf   :  { %2100 = vmatpush1.bf16.msra.mxu1 %v2920_v30  ;;  %2058 = vmatprep.subr.bf16.mxu0 %v2925_v31  ;;  %v3000_v31 = vld [vmem:[%s4053_s1 + $0x6d4] ss:$24 sps:$4 sm:$0xff]  }
  0xe0   :  { %2101 = vmatprep.subr.bf16.mxu1 %v2928_v32 }
  0xe2   :  { %2059 = vmatpush1.bf16.msra.mxu0 %v2923_v33  ;;  %v2998_v33 = vld [vmem:[%s4053_s1 + $0x6d0] ss:$24 sps:$4 sm:$0xff]  }
  0xe3   :  { %2102 = vmatpush1.bf16.msra.mxu1 %v2926_v35  ;;  %2060 = vmatprep.subr.bf16.mxu0 %v2931_v36  ;;  %v3003_v35 = vld [vmem:[%s4053_s1 + $0x6a4] ss:$24 sps:$4 sm:$0xff]   ;;  %v3001_v36 = vld [vmem:[%s4053_s1 + $0x6a0] ss:$24 sps:$4 sm:$0xff]  }
  0xe4   :  { %2103 = vmatprep.subr.bf16.mxu1 %v2934_v37  ;;  %v3006_v37 = vld [vmem:[%s4053_s1 + $0x674] ss:$24 sps:$4 sm:$0xff]  }
  0xe6   :  { %2061 = vmatpush1.bf16.msra.mxu0 %v2929_v38  ;;  %v3004_v38 = vld [vmem:[%s4053_s1 + $0x670] ss:$24 sps:$4 sm:$0xff]  }
  0xe7   :  { %2104 = vmatpush1.bf16.msra.mxu1 %v2932_v39  ;;  %2062 = vmatprep.subr.bf16.mxu0 %v2937_v40  ;;  %v3009_v39 = vld [vmem:[%s4053_s1 + $0x644] ss:$24 sps:$4 sm:$0xff]   ;;  %v3007_v40 = vld [vmem:[%s4053_s1 + $0x640] ss:$24 sps:$4 sm:$0xff]  }
  0xe8   :  { %2105 = vmatprep.subr.bf16.mxu1 %v2940_v41  ;;  %v3012_v41 = vld [vmem:[%s4053_s1 + $0x614] ss:$24 sps:$4 sm:$0xff]  }
  0xea   :  { %2063 = vmatpush1.bf16.msra.mxu0 %v2935_v42  ;;  %v3010_v42 = vld [vmem:[%s4053_s1 + $0x610] ss:$24 sps:$4 sm:$0xff]  }
  0xeb   :  { %2106 = vmatpush1.bf16.msra.mxu1 %v2938_v43  ;;  %2064 = vmatprep.subr.bf16.mxu0 %v2943_v44  ;;  %v3015_v43 = vld [vmem:[%s4053_s1 + $0x8e4] ss:$24 sps:$4 sm:$0xff]   ;;  %v3013_v44 = vld [vmem:[%s4053_s1 + $0x8e0] ss:$24 sps:$4 sm:$0xff]  }
  0xec   :  { %2107 = vmatprep.subr.bf16.mxu1 %v2946_v45  ;;  %v3018_v45 = vld [vmem:[%s4053_s1 + $0x8b4] ss:$24 sps:$4 sm:$0xff]  }
  0xee   :  { %2065 = vmatpush2.bf16.msra.mxu0 %v2941_v46  ;;  %v3016_v46 = vld [vmem:[%s4053_s1 + $0x8b0] ss:$24 sps:$4 sm:$0xff]  }
  0xef   :  { %2108 = vmatpush2.bf16.msra.mxu1 %v2944_v47  ;;  %2066 = vmatprep.subr.bf16.mxu0 %v2949_v48  ;;  %v3021_v47 = vld [vmem:[%s4053_s1 + $0x884] ss:$24 sps:$4 sm:$0xff]   ;;  %v3019_v48 = vld [vmem:[%s4053_s1 + $0x880] ss:$24 sps:$4 sm:$0xff]  }
  0xf0   :  { %2109 = vmatprep.subr.bf16.mxu1 %v2952_v49  ;;  %v3024_v49 = vld [vmem:[%s4053_s1 + $0x854] ss:$24 sps:$4 sm:$0xff]  }
  0xf2   :  { %2067 = vmatpush2.bf16.msra.mxu0 %v2947_v51  ;;  %v3022_v51 = vld [vmem:[%s4053_s1 + $0x850] ss:$24 sps:$4 sm:$0xff]  }
  0xf3   :  { %2110 = vmatpush2.bf16.msra.mxu1 %v2950_v52  ;;  %2068 = vmatprep.subr.bf16.mxu0 %v2955_v53  ;;  %v3027_v52 = vld [vmem:[%s4053_s1 + $0x824] ss:$24 sps:$4 sm:$0xff]   ;;  %v3025_v53 = vld [vmem:[%s4053_s1 + $0x820] ss:$24 sps:$4 sm:$0xff]  }
  0xf4   :  { %2111 = vmatprep.subr.bf16.mxu1 %v2958_v54  ;;  %v3030_v54 = vld [vmem:[%s4053_s1 + $0x7f4] ss:$24 sps:$4 sm:$0xff]  }
  0xf6   :  { %2069 = vmatpush2.bf16.msra.mxu0 %v2953_v55  ;;  %v3028_v55 = vld [vmem:[%s4053_s1 + $0x7f0] ss:$24 sps:$4 sm:$0xff]  }
  0xf7   :  { %2112 = vmatpush2.bf16.msra.mxu1 %v2956_v56  ;;  %2070 = vmatprep.subr.bf16.mxu0 %v2961_v57  ;;  %v3033_v56 = vld [vmem:[%s4053_s1 + $0x7c4] ss:$24 sps:$4 sm:$0xff]   ;;  %v3031_v57 = vld [vmem:[%s4053_s1 + $0x7c0] ss:$24 sps:$4 sm:$0xff]  }
  0xf8   :  { %2113 = vmatprep.subr.bf16.mxu1 %v2964_v58  ;;  %v3036_v58 = vld [vmem:[%s4053_s1 + $0x794] ss:$24 sps:$4 sm:$0xff]  }
  0xfa   :  { %2071 = vmatpush2.bf16.msra.mxu0 %v2959_v59  ;;  %v3034_v59 = vld [vmem:[%s4053_s1 + $0x790] ss:$24 sps:$4 sm:$0xff]   ;;  %s3064_s1 = smov 88  }
  0xfb   :  { %2114 = vmatpush2.bf16.msra.mxu1 %v2962_v60  ;;  %2072 = vmatprep.subr.bf16.mxu0 %v2967_v61 }
  0xfc   :  { %2115 = vmatprep.subr.bf16.mxu1 %v2970_v62 }
  0xfe   :  { %2073 = vmatpush2.bf16.msra.mxu0 %v2965_v63 }
  0xff   :  { %2116 = vmatpush2.bf16.msra.mxu1 %v2968_v0  ;;  %2074 = vmatprep.subr.bf16.mxu0 %v2973_v1 }
 0x100   :  { %2117 = vmatprep.subr.bf16.mxu1 %v2976_v2 }
 0x102   :  { %2075 = vmatpush2.bf16.msra.mxu0 %v2971_v3 }
 0x103   :  { %2118 = vmatpush2.bf16.msra.mxu1 %v2974_v6  ;;  %2076 = vmatprep.subr.bf16.mxu0 %v2979_v7 }
 0x104   :  { %2119 = vmatprep.subr.bf16.mxu1 %v2982_v8 }
 0x106   :  { %2077 = vmatpush2.bf16.msra.mxu0 %v2977_v9 }
 0x107   :  { %2120 = vmatpush2.bf16.msra.mxu1 %v2980_v11  ;;  %2078 = vmatprep.subr.bf16.mxu0 %v2985_v12 }
 0x108   :  { %2121 = vmatprep.subr.bf16.mxu1 %v2988_v13 }
 0x10a   :  { %2079 = vmatpush2.bf16.msra.mxu0 %v2983_v14 }
 0x10b   :  { %2122 = vmatpush2.bf16.msra.mxu1 %v2986_v15  ;;  %2134 = vmatprep.subr.bf16.mxu0 %v2991_v16 }
 0x10d   :  { %v1824_v18 = vpop.f32.mrf.mxu0  ;;  %2081 = vmatmul.mubr.bf16.vlgmr.msra.gmra.mxu0 %v3039_v5 }
 0x10e   :  { %v1867_v19 = vpop.f32.mrf.mxu1  ;;  %2124 = vmatmul.mubr.bf16.vlgmr.msra.gmra.mxu1 %v3040_v20  ;;  %2135 = vmatpush1.bf16.msra.mxu0 %v2989_v17 }
 0x10f   :  { %v3916_v50 = vadd.f32 %v1867_v19, %v1824_v18  ;;  %2166 = vmatprep.mubr.bf16.mxu0 %v3395_v34  ;;  %v1826_v22 = vpop.f32.mrf.mxu0  ;;  %2136 = vmatprep.subr.bf16.mxu0 %v2994_v4 }
 0x110   :  { %v1869_v23 = vpop.f32.mrf.mxu1 }
 0x111   :  { %v3925_v25 = vadd.f32 %v1869_v23, %v1826_v22  ;;  %v1828_v26 = vpop.f32.mrf.mxu0 }
 0x112   :  { %v1871_v27 = vpop.f32.mrf.mxu1  ;;  %2137 = vmatpush1.bf16.msra.mxu0 %v2992_v21 }
 0x113   :  { %v3927_v28 = vadd.f32 %v1871_v27, %v1828_v26  ;;  %v1830_v30 = vpop.f32.mrf.mxu0  ;;  %2138 = vmatprep.subr.bf16.mxu0 %v2997_v24 }
 0x114   :  { %v1873_v34 = vpop.f32.mrf.mxu1 }
 0x115   :  { %v1874_v32 = vadd.f32 %v1873_v34, %v1830_v30 }
 0x116   :  { %2139 = vmatpush1.bf16.msra.mxu0 %v2995_v29 }
 0x117   :  { %2140 = vmatprep.subr.bf16.mxu0 %v3000_v31 }
 0x11a   :  { %2141 = vmatpush1.bf16.msra.mxu0 %v2998_v33 }
 0x11b   :  { %2142 = vmatprep.subr.bf16.mxu0 %v3003_v35 }
 0x11e   :  { %2143 = vmatpush1.bf16.msra.mxu0 %v3001_v36 }
 0x11f   :  { %2144 = vmatprep.subr.bf16.mxu0 %v3006_v37 }
 0x122   :  { %2145 = vmatpush1.bf16.msra.mxu0 %v3004_v38 }
 0x123   :  { %2146 = vmatprep.subr.bf16.mxu0 %v3009_v39 }
 0x126   :  { %2147 = vmatpush1.bf16.msra.mxu0 %v3007_v40 }
 0x127   :  { %2148 = vmatprep.subr.bf16.mxu0 %v3012_v41 }
 0x12a   :  { %2149 = vmatpush1.bf16.msra.mxu0 %v3010_v42 }
 0x12b   :  { %2150 = vmatprep.subr.bf16.mxu0 %v3015_v43 }
 0x12e   :  { %2151 = vmatpush2.bf16.msra.mxu0 %v3013_v44 }
 0x12f   :  { %2152 = vmatprep.subr.bf16.mxu0 %v3018_v45 }
 0x132   :  { %2153 = vmatpush2.bf16.msra.mxu0 %v3016_v46 }
 0x133   :  { %2154 = vmatprep.subr.bf16.mxu0 %v3021_v47 }
 0x136   :  { %2155 = vmatpush2.bf16.msra.mxu0 %v3019_v48 }
 0x137   :  { %2156 = vmatprep.subr.bf16.mxu0 %v3024_v49 }
 0x13a   :  { %2157 = vmatpush2.bf16.msra.mxu0 %v3022_v51 }
 0x13b   :  { %2158 = vmatprep.subr.bf16.mxu0 %v3027_v52 }
 0x13e   :  { %2159 = vmatpush2.bf16.msra.mxu0 %v3025_v53 }
 0x13f   :  { %2160 = vmatprep.subr.bf16.mxu0 %v3030_v54 }
 0x142   :  { %2161 = vmatpush2.bf16.msra.mxu0 %v3028_v55 }
 0x143   :  { %2162 = vmatprep.subr.bf16.mxu0 %v3033_v56 }
 0x146   :  { %2163 = vmatpush2.bf16.msra.mxu0 %v3031_v57 }
 0x147   :  { %2164 = vmatprep.subr.bf16.mxu0 %v3036_v58 }
 0x14a   :  { %2165 = vmatpush2.bf16.msra.mxu0 %v3034_v59 }
 0x14d   :  { %v1910_v60 = vpop.f32.mrf.mxu0  ;;  %2167 = vmatmul.mubr.bf16.vlgmr.msra.gmra.mxu0 %v3509_v10 }
 0x14e   :  { %v4012_v61 = vadd.f32 %v1910_v60, %v3916_v50  ;;  %v1953_v6 = vpop.f32.mrf.mxu1 }
 0x14f   :  { %v1912_v62 = vpop.f32.mrf.mxu0 }
 0x150   :  { %v4015_v63 = vadd.f32 %v1912_v62, %v3925_v25  ;;  %v1955_v7 = vpop.f32.mrf.mxu1 }
 0x151   :  { %v1914_v0 = vpop.f32.mrf.mxu0 }
 0x152   :  { %v4018_v1 = vadd.f32 %v1914_v0, %v3927_v28  ;;  %v1957_v8 = vpop.f32.mrf.mxu1 }
 0x153   :  { %v1916_v2 = vpop.f32.mrf.mxu0 }
 0x154   :  { %v4020_v3 = vadd.f32 %v1916_v2, %v1874_v32  ;;  %v1959_v9 = vpop.f32.mrf.mxu1 }
 0x18d   :  { %v1996_v11 = vpop.f32.mrf.mxu0 }
 0x18e   :  { %v2039_v10 = vpop.f32.mrf.mxu1  ;;  %v1997_v12 = vadd.f32 %v1996_v11, %v1953_v6 }
 0x18f   :  { %v1998_v13 = vpop.f32.mrf.mxu0 }
 0x190   :  { %v2041_v14 = vpop.f32.mrf.mxu1  ;;  %v1999_v15 = vadd.f32 %v1998_v13, %v1955_v7  ;;  %v2040_v16 = vadd.f32 %v2039_v10, %v1997_v12  ;;  %v2253_v10 = vld [vmem:[#allocation2] sm:$0x3] }
 0x191   :  { %v2000_v17 = vpop.f32.mrf.mxu0 }
 0x192   :  { %v2043_v4 = vpop.f32.mrf.mxu1  ;;  %v2001_v18 = vadd.f32 %v2000_v17, %v1957_v8  ;;  %v2042_v19 = vadd.f32 %v2041_v14, %v1999_v15  ;;  %v2255_v8 = vlaneseq }
 0x193   :  { %v2002_v5 = vpop.f32.mrf.mxu0 }
 0x194   :  { %v2045_v20 = vpop.f32.mrf.mxu1  ;;  %v2003_v50 = vadd.f32 %v2002_v5, %v1959_v9  ;;  %v2044_v21 = vadd.f32 %v2043_v4, %v2001_v18  ;;  %2206 = vrot.lane.b32.xlu0 %v2042_v19, %s3064_s1  ;;  %v2256_v9 = vshrl.u32 %v2255_v8, 7 }
 0x196   :  { %v2046_v22 = vadd.f32 %v2045_v20, %v2003_v50  ;;  %v2261_v11 = vsub.s32 1, %v2256_v9  ;;  %v2257_v12 = vsub.s32 0, %v2256_v9 }
 0x198   :  { %2212 = vrot.lane.b32.xlu1 %v2046_v22, %s3064_s1  ;;  %v2262_v15 = vrot.slane %v2253_v10, %v2261_v11 }
 0x1cd   :  { %v2082_v23 = vpop.f32.mrf.mxu0 }
 0x1ce   :  { %v2125_v24 = vpop.f32.mrf.mxu1 }
 0x1cf   :  { %v2084_v25 = vpop.f32.mrf.mxu0  ;;  %v2126_v30 = vadd.f32 %v2125_v24, %v2082_v23 }
 0x1d0   :  { %v2127_v26 = vpop.f32.mrf.mxu1 }
 0x1d1   :  { %v2086_v27 = vpop.f32.mrf.mxu0  ;;  %v2128_v31 = vadd.f32 %v2127_v26, %v2084_v25 }
 0x1d2   :  { %v2129_v28 = vpop.f32.mrf.mxu1 }
 0x1d3   :  { %v2088_v29 = vpop.f32.mrf.mxu0  ;;  %v2130_v36 = vadd.f32 %v2129_v28, %v2086_v27 }
 0x1d4   :  { %v2131_v33 = vpop.f32.mrf.mxu1 }
 0x1d5   :  { %v2132_v39 = vadd.f32 %v2131_v33, %v2088_v29 }
 0x206   :  { %v2207_v43 = vpop.permute.xlu0 %2206 }
 0x20a   :  { %v2213_v44 = vpop.permute.xlu1 %2212 }
 0x20d   :  { %v2168_v34 = vpop.f32.mrf.mxu0 }
 0x20e   :  { %v2169_v32 = vadd.f32 %v2168_v34, %v2126_v30 }
 0x20f   :  { %v2170_v35 = vpop.f32.mrf.mxu0 }
 0x210   :  { %v2171_v37 = vadd.f32 %v2170_v35, %v2128_v31  ;;  %2208 = vrot.lane.b32.xlu0 %v2169_v32, %s3064_s1 }
 0x211   :  { %v2172_v38 = vpop.f32.mrf.mxu0 }
 0x212   :  { %v2173_v40 = vadd.f32 %v2172_v38, %v2130_v36  ;;  %2210 = vrot.lane.b32.xlu1 %v2171_v37, %s3064_s1 }
 0x213   :  { %v2174_v41 = vpop.f32.mrf.mxu0 }
 0x214   :  { %v2175_v42 = vadd.f32 %v2174_v41, %v2132_v39  ;;  %2214 = vrot.lane.b32.xlu0 %v2173_v40, %s3064_s1 }
 0x216   :  { %2216 = vrot.lane.b32.xlu1 %v2175_v42, %s3064_s1 }
 0x218   :  { %2181 = vrot.lane.b32.xlu0 %v4015_v63, %s3064_s1 }
 0x21a   :  { %2183 = vrot.lane.b32.xlu1 %v2040_v16, %s3064_s1 }
 0x21c   :  { %2185 = vrot.lane.b32.xlu0 %v4020_v3, %s3064_s1 }
 0x21e   :  { %2187 = vrot.lane.b32.xlu1 %v2044_v21, %s3064_s1 }
 0x282   :  { %v2209_v45 = vpop.permute.xlu0 %2208 }
 0x283   :  { %v2218_v46 = vsel %vm2189_vm0, %v2207_v43, %v2209_v45 }
 0x284   :  { %v2226_v47 = vmax.f32 %v2040_v16, %v2218_v46  ;;  %v2211_v48 = vpop.permute.xlu1 %2210  ;;  %v2258_v16 = vrot.slane %v2253_v10, %v2257_v12 }
 0x285   :  { %v2219_v49 = vsel %vm2189_vm0, %v2209_v45, %v2211_v48 }
 0x286   :  { %v2227_v51 = vmax.f32 %v2042_v19, %v2219_v49  ;;  %v2215_v52 = vpop.permute.xlu0 %2214  ;;  %2234 = vrot.lane.b32.xlu0 %v2226_v47, %s3065_s23 }
 0x287   :  { %v2220_v53 = vsel %vm2189_vm0, %v2213_v44, %v2215_v52 }
 0x288   :  { %v2228_v54 = vmax.f32 %v2044_v21, %v2220_v53  ;;  %v2217_v55 = vpop.permute.xlu1 %2216  ;;  %2236 = vrot.lane.b32.xlu1 %v2227_v51, %s3065_s23 }
 0x289   :  { %v2221_v56 = vsel %vm2189_vm0, %v2215_v52, %v2217_v55 }
 0x28a   :  { %v2229_v57 = vmax.f32 %v2046_v22, %v2221_v56  ;;  %v2182_v58 = vpop.permute.xlu0 %2181  ;;  %2238 = vrot.lane.b32.xlu0 %v2228_v54, %s3065_s23 }
 0x28c   :  { %2240 = vrot.lane.b32.xlu1 %v2229_v57, %s3065_s23  ;;  %v2184_v59 = vpop.permute.xlu1 %2183 }
 0x28d   :  { %v2190_v60 = vsel %vm2189_vm0, %v2182_v58, %v2184_v59  ;;  %v2197_v14 = vmax.f32 %v4015_v63, %v2184_v59 }
 0x28e   :  { %v2196_v62 = vmax.f32 %v4012_v61, %v2190_v60  ;;  %v2186_v0 = vpop.permute.xlu0 %2185 }
 0x290   :  { %v2188_v2 = vpop.permute.xlu1 %2187 }
 0x291   :  { %v2191_v6 = vsel %vm2189_vm0, %v2186_v0, %v2188_v2  ;;  %v2199_v19 = vmax.f32 %v4020_v3, %v2188_v2 }
 0x292   :  { %v2198_v7 = vmax.f32 %v4018_v1, %v2191_v6 }
 0x2f8   :  { %v2235_v13 = vpop.permute.xlu0 %2234 }
 0x2fa   :  { %v2237_v17 = vpop.permute.xlu1 %2236 }
 0x2fb   :  { %v2243_v61 = vsel %vm2242_vm1, %v2235_v13, %v2237_v17  ;;  %v2250_v4 = vmax.f32 %v2197_v14, %v2237_v17 }
 0x2fc   :  { %v2249_v18 = vmax.f32 %v2196_v62, %v2243_v61  ;;  %v2239_v20 = vpop.permute.xlu0 %2238 }
 0x2fd   :  { %v2266_v5 = vadd.f32 %v2262_v15, %v2250_v4 }
 0x2fe   :  { %v2265_v1 = vadd.f32 %v2258_v16, %v2249_v18  ;;  %v2241_v50 = vpop.permute.xlu1 %2240 }
 0x2ff   :  { %v2270_v21 = vmax.f32 %v2266_v5, 0.0  ;;  %v2244_v22 = vsel %vm2242_vm1, %v2239_v20, %v2241_v50  ;;  %v2252_v23 = vmax.f32 %v2199_v19, %v2241_v50 }
 0x300   :  { %v2269_v63 = vmax.f32 %v2265_v1, 0.0  ;;  %v2251_v24 = vmax.f32 %v2198_v7, %v2244_v22 }
 0x301   :  { %v2268_v25 = vadd.f32 %v2262_v15, %v2252_v23 }
 0x302   :  { %v2591_v26 = vpack.c.bf16 %v2270_v21, %v2269_v63  ;;  %v2267_v27 = vadd.f32 %v2258_v16, %v2251_v24 }
 0x303   :  { %v2272_v28 = vmax.f32 %v2268_v25, 0.0 }
 0x304   :  { %2288 = vst.msk [vmem:[%s4055_s3] sm:$0xff] %vm2287_vm4, %v2591_v26  ;;  %v2271_v3 = vmax.f32 %v2267_v27, 0.0 }
 0x306   :  { %v2592_v29 = vpack.c.bf16 %v2272_v28, %v2271_v3 }
 0x308   :  { %2289 = vst.msk [vmem:[%s4055_s3 + $0x8] sm:$0xff] %vm2287_vm4, %v2592_v29 }
 0x309   :  { %2294 = vsyncpa [#allocation3], 1 }

// kernel: lenet5_forward.3
= control target key start
LH: loop header
LB: loop body
LE: loop exit
PB: predicated region body
PF: predicated region fallthrough
CT: control target
= control target key end

     0   :  { %14 = vsyncpa [#allocation3], 0  ;;  %s13336_s0 = inlined_call_operand.vmem [shape: bf16[16,1344], index: 0, kind: input, shape index: {}]   ;;  %s13337_s1 = inlined_call_operand.hbm [shape: bf16[1344,1600], index: 1, kind: input, shape index: {}]   ;;  %s13338_s2 = inlined_call_operand.hbm [shape: f32[1,400], index: 2, kind: input, shape index: {}]   ;;  %s13339_s3 = inlined_call_operand.hbm [shape: bf16[400,128], index: 3, kind: input, shape index: {}]   ;;  %s13340_s4 = inlined_call_operand.hbm [shape: f32[1,128], index: 4, kind: input, shape index: {}]   ;;  %s13341_s5 = inlined_call_operand.hbm [shape: bf16[128,128], index: 5, kind: input, shape index: {}]   ;;  %s13342_s6 = inlined_call_operand.hbm [shape: f32[1,128], index: 6, kind: input, shape index: {}]   ;;  %s13343_s7 = inlined_call_operand.hbm [shape: bf16[128,128], index: 7, kind: input, shape index: {}]   ;;  %s13344_s8 = inlined_call_operand.hbm [shape: f32[1,128], index: 8, kind: input, shape index: {}]   ;;  %s13345_s9 = inlined_call_operand.vmem [shape: f32[16,128], index: 9, kind: output, shape index: {}]  }
   0x1   :  { %15 = vsyncpa [#allocation5], 0 }
   0x2   :  { %16 = vsyncpa [#allocation8], 0 }
   0x3   :  { %17 = vsyncpa [#allocation11], 0 }
   0x4   :  { %18 = vsyncpa [#allocation14], 0  ;;  %s12688_s30 = smov [#allocation4]   ;;  %s12689_s11 = smov [#allocation7]  }
   0x5   :  { %s39_s10 = sshll.u32 %s12688_s30, 4  ;;  %s61_s12 = sshll.u32 %s12689_s11, 4  ;;  %s40_s10 = int_to_ptr.vmem [resolvable:$true] %s39_s10  ;;  %s62_s12 = int_to_ptr.vmem [resolvable:$true] %s61_s12 }
   0x6   :  { %s12526_s13 = scalar_lea.vmem %s40_s10, 64  ;;  %p12531_p1 = scmp.lt.s32.totalorder %s40_s10, %s40_s10 }
   0x7   :  { %p12527_p0 = scmp.ne.s32.totalorder %s40_s10, %s12526_s13  ;;  %p12532_p2 = scmp.lt.s32.totalorder %s12526_s13, %s12526_s13 }
   0x9   :  { %p12533_p3 = por %p12532_p2, %p12531_p1 }
   0xb   :  { %p12534_p4 = pnand %p12533_p3, %p12527_p0 }
   0xd   :  { %12537 = shalt.err (!%p12534_p4)
}
   0xe   :  { %42 = dma.hbm_to_vmem [thread:$0]  %s13338_s2, 64, %s40_s10, [#allocation5]  }
   0xf   :  { %s12546_s16 = scalar_lea.vmem %s62_s12, 16  ;;  %s12550_s17 = scalar_lea.vmem %s62_s12, 32 }
  0x10   :  { %p12547_p5 = scmp.ne.s32.totalorder %s62_s12, %s12546_s16  ;;  %p12551_p6 = scmp.lt.s32.totalorder %s62_s12, %s62_s12 }
  0x11   :  { %p12552_p7 = scmp.lt.s32.totalorder %s12550_s17, %s12546_s16 }
  0x13   :  { %p12553_p8 = por %p12552_p7, %p12551_p6 }
  0x15   :  { %p12554_p9 = pnand %p12553_p8, %p12547_p5 }
  0x17   :  { %12557 = shalt.err (!%p12554_p9)
}
  0x18   :  { %64 = dma.hbm_to_vmem [thread:$0]  %s13340_s4, 16, %s62_s12, [#allocation8]  }
  0x19   :  { %s12690_s20 = smov [#allocation10]   ;;  %s12691_s22 = smov [#allocation2]  }
  0x1a   :  { %s83_s21 = sshll.u32 %s12690_s20, 4  ;;  %s26_s23 = sshll.u32 %s12691_s22, 4  ;;  %s84_s21 = int_to_ptr.vmem [resolvable:$true] %s83_s21  ;;  %s27_s23 = int_to_ptr.vmem [resolvable:$true] %s26_s23 }
  0x1b   :  { %s12566_s24 = scalar_lea.vmem %s84_s21, 16  ;;  %s12570_s2 = scalar_lea.vmem %s84_s21, 32 }
  0x1c   :  { %p12567_p10 = scmp.ne.s32.totalorder %s84_s21, %s12566_s24  ;;  %p12571_p11 = scmp.lt.s32.totalorder %s84_s21, %s84_s21 }
  0x1d   :  { %p12572_p12 = scmp.lt.s32.totalorder %s12570_s2, %s12566_s24 }
  0x1f   :  { %p12573_p13 = por %p12572_p12, %p12571_p11 }
  0x21   :  { %p12574_p0 = pnand %p12573_p13, %p12567_p10 }
  0x23   :  { %12577 = shalt.err (!%p12574_p0)
}
  0x24   :  { %86 = dma.hbm_to_vmem [thread:$0]  %s13342_s6, 16, %s84_s21, [#allocation11]  }
  0x25   :  { %s12586_s27 = scalar_lea.vmem %s27_s23, 139776  ;;  %p12591_p2 = scmp.lt.s32.totalorder %s27_s23, %s27_s23 }
  0x26   :  { %p12587_p1 = scmp.ne.s32.totalorder %s27_s23, %s12586_s27  ;;  %p12592_p3 = scmp.lt.s32.totalorder %s12586_s27, %s12586_s27 }
  0x28   :  { %p12593_p4 = por %p12592_p3, %p12591_p2 }
  0x2a   :  { %p12594_p5 = pnand %p12593_p4, %p12587_p1 }
  0x2c   :  { %12597 = shalt.err (!%p12594_p5)
}
  0x2d   :  { %s12692_s4 = smov 832   ;;  %s12693_s28 = smov 52  }
  0x2e   :  { %32 = dma.hbm_to_vmem [thread:$0]  %s13337_s1, 139776, %s27_s23, [#allocation3], %s12692_s4, %s12692_s4, %s12693_s28  }
  0x2f   :  { %s12694_s10 = smov [#allocation6]  }
  0x30   :  { %s48_s11 = sshll.u32 %s12694_s10, 4  ;;  %s49_s11 = int_to_ptr.vmem [resolvable:$true] %s48_s11 }
  0x31   :  { %s12606_s12 = scalar_lea.vmem %s49_s11, 3200  ;;  %p12611_p7 = scmp.lt.s32.totalorder %s49_s11, %s49_s11 }
  0x32   :  { %p12607_p6 = scmp.ne.s32.totalorder %s49_s11, %s12606_s12  ;;  %p12612_p8 = scmp.lt.s32.totalorder %s12606_s12, %s12606_s12 }
  0x34   :  { %p12613_p9 = por %p12612_p8, %p12611_p7 }
  0x36   :  { %p12614_p10 = pnand %p12613_p9, %p12607_p6 }
  0x38   :  { %12617 = shalt.err (!%p12614_p10)
}
  0x39   :  { %s12695_s6 = smov 64   ;;  %s12696_s13 = smov 4  }
  0x3a   :  { %54 = dma.hbm_to_vmem [thread:$0]  %s13339_s3, 3200, %s49_s11, [#allocation5], %s12695_s6, %s12695_s6, %s12696_s13  }
  0x3b   :  { %s12697_s16 = smov [#allocation9]   ;;  %s12698_s1 = smov [#allocation12]  }
  0x3c   :  { %s70_s17 = sshll.u32 %s12697_s16, 4  ;;  %s92_s18 = sshll.u32 %s12698_s1, 4  ;;  %s71_s17 = int_to_ptr.vmem [resolvable:$true] %s70_s17  ;;  %s93_s18 = int_to_ptr.vmem [resolvable:$true] %s92_s18 }
  0x3d   :  { %s12626_s19 = scalar_lea.vmem %s71_s17, 1024  ;;  %p12631_p12 = scmp.lt.s32.totalorder %s71_s17, %s71_s17 }
  0x3e   :  { %p12627_p11 = scmp.ne.s32.totalorder %s71_s17, %s12626_s19  ;;  %p12632_p13 = scmp.lt.s32.totalorder %s12626_s19, %s12626_s19 }
  0x40   :  { %p12633_p0 = por %p12632_p13, %p12631_p12 }
  0x42   :  { %p12634_p1 = pnand %p12633_p0, %p12627_p11 }
  0x44   :  { %12637 = shalt.err (!%p12634_p1)
}
  0x45   :  { %76 = dma.hbm_to_vmem [thread:$0]  %s13341_s5, 1024, %s71_s17, [#allocation8], %s12695_s6, %s12695_s6, %s12696_s13  }
  0x46   :  { %s12646_s22 = scalar_lea.vmem %s93_s18, 1024  ;;  %p12651_p3 = scmp.lt.s32.totalorder %s93_s18, %s93_s18 }
  0x47   :  { %p12647_p2 = scmp.ne.s32.totalorder %s93_s18, %s12646_s22  ;;  %p12652_p4 = scmp.lt.s32.totalorder %s12646_s22, %s12646_s22 }
  0x49   :  { %p12653_p5 = por %p12652_p4, %p12651_p3 }
  0x4b   :  { %p12654_p6 = pnand %p12653_p5, %p12647_p2 }
  0x4d   :  { %12657 = shalt.err (!%p12654_p6)
}
  0x4e   :  { %98 = dma.hbm_to_vmem [thread:$0]  %s13343_s7, 1024, %s93_s18, [#allocation11], %s12695_s6, %s12695_s6, %s12696_s13  }
  0x4f   :  { %s12699_s24 = smov [#allocation13]  }
  0x50   :  { %s105_s2 = sshll.u32 %s12699_s24, 4  ;;  %s106_s2 = int_to_ptr.vmem [resolvable:$true] %s105_s2 }
  0x51   :  { %s12666_s25 = scalar_lea.vmem %s106_s2, 16  ;;  %s12670_s26 = scalar_lea.vmem %s106_s2, 32 }
  0x52   :  { %p12667_p7 = scmp.ne.s32.totalorder %s106_s2, %s12666_s25  ;;  %p12671_p8 = scmp.lt.s32.totalorder %s106_s2, %s106_s2 }
  0x53   :  { %p12672_p9 = scmp.lt.s32.totalorder %s12670_s26, %s12666_s25 }
  0x55   :  { %p12673_p10 = por %p12672_p9, %p12671_p8 }
  0x57   :  { %p12674_p11 = pnand %p12673_p10, %p12667_p7 }
  0x59   :  { %12677 = shalt.err (!%p12674_p11)
}
  0x5a   :  { %108 = dma.hbm_to_vmem [thread:$0]  %s13344_s8, 16, %s106_s2, [#allocation14]  }
  0x5b   :  { %12678 = dma.done.wait [#allocation3], 139776  }
  0x5c   :  { %12679 = vsyncadd [#allocation3], 4294827520 }
  0x5d   :  { %12680 = dma.done.wait [#allocation5], 3264  }
  0x5e   :  { %12681 = vsyncadd [#allocation5], 4294964032 }
  0x5f   :  { %12682 = dma.done.wait [#allocation8], 1040  }
  0x60   :  { %12683 = vsyncadd [#allocation8], 4294966256 }
  0x61   :  { %12684 = dma.done.wait [#allocation11], 1040  }
  0x62   :  { %12685 = vsyncadd [#allocation11], 4294966256 }
  0x63   :  { %12686 = dma.done.wait [#allocation14], 16  }
  0x64   :  { %12687 = vsyncadd [#allocation14], 4294967280  ;;  %v10814_v0 = vld [vmem:[#allocation2 + $0x2dc] ss:$52 sps:$4 sm:$0xff]   ;;  %v10818_v2 = vld [vmem:[#allocation2 + $0x2d8] ss:$52 sps:$4 sm:$0xff]  }
  0x65   :  { %v10816_v1 = vld [vmem:[#allocation2 + $0x95c] ss:$52 sps:$4 sm:$0xff]   ;;  %6925 = vmatprep.subr.bf16.mxu0 %v10814_v0  ;;  %v10819_v3 = vld [vmem:[#allocation2 + $0x958] ss:$52 sps:$4 sm:$0xff]   ;;  %v10820_v4 = vld [vmem:[#allocation2 + $0x274] ss:$52 sps:$4 sm:$0xff]  }
  0x66   :  { %6968 = vmatprep.subr.bf16.mxu1 %v10816_v1  ;;  %6926 = vmatpush1.bf16.msra.mxu0 %v10818_v2  ;;  %v10822_v5 = vld [vmem:[#allocation2 + $0x8f4] ss:$52 sps:$4 sm:$0xff]   ;;  %v10824_v6 = vld [vmem:[#allocation2 + $0x270] ss:$52 sps:$4 sm:$0xff]   ;;  %v10826_v8 = vld [vmem:[#allocation2 + $0x20c] ss:$52 sps:$4 sm:$0xff]  }
  0x67   :  { %6969 = vmatpush1.bf16.msra.mxu1 %v10819_v3  ;;  %6927 = vmatprep.subr.bf16.mxu0 %v10820_v4  ;;  %v10825_v7 = vld [vmem:[#allocation2 + $0x8f0] ss:$52 sps:$4 sm:$0xff]   ;;  %v10828_v9 = vld [vmem:[#allocation2 + $0x88c] ss:$52 sps:$4 sm:$0xff]   ;;  %v10830_v10 = vld [vmem:[#allocation2 + $0x208] ss:$52 sps:$4 sm:$0xff]  }
  0x68   :  { %6970 = vmatprep.subr.bf16.mxu1 %v10822_v5  ;;  %v10831_v11 = vld [vmem:[#allocation2 + $0x888] ss:$52 sps:$4 sm:$0xff]   ;;  %v10832_v12 = vld [vmem:[#allocation2 + $0x1a4] ss:$52 sps:$4 sm:$0xff]   ;;  %v10836_v14 = vld [vmem:[#allocation2 + $0x1a0] ss:$52 sps:$4 sm:$0xff]  }
  0x69   :  { %v10834_v13 = vld [vmem:[#allocation2 + $0x824] ss:$52 sps:$4 sm:$0xff]   ;;  %v10837_v15 = vld [vmem:[#allocation2 + $0x820] ss:$52 sps:$4 sm:$0xff]   ;;  %v10838_v16 = vld [vmem:[#allocation2 + $0x13c] ss:$52 sps:$4 sm:$0xff]  }
  0x6a   :  { %6928 = vmatpush1.bf16.msra.mxu0 %v10824_v6  ;;  %v10840_v17 = vld [vmem:[#allocation2 + $0x7bc] ss:$52 sps:$4 sm:$0xff]   ;;  %v10842_v18 = vld [vmem:[#allocation2 + $0x138] ss:$52 sps:$4 sm:$0xff]   ;;  %v10844_v20 = vld [vmem:[#allocation2 + $0xd4] ss:$52 sps:$4 sm:$0xff]  }
  0x6b   :  { %6971 = vmatpush1.bf16.msra.mxu1 %v10825_v7  ;;  %6929 = vmatprep.subr.bf16.mxu0 %v10826_v8  ;;  %v10843_v19 = vld [vmem:[#allocation2 + $0x7b8] ss:$52 sps:$4 sm:$0xff]   ;;  %v10846_v21 = vld [vmem:[#allocation2 + $0x754] ss:$52 sps:$4 sm:$0xff]   ;;  %v10848_v22 = vld [vmem:[#allocation2 + $0xd0] ss:$52 sps:$4 sm:$0xff]  }
  0x6c   :  { %6972 = vmatprep.subr.bf16.mxu1 %v10828_v9  ;;  %v10849_v23 = vld [vmem:[#allocation2 + $0x750] ss:$52 sps:$4 sm:$0xff]   ;;  %v10850_v24 = vld [vmem:[#allocation2 + $0x6c] ss:$52 sps:$4 sm:$0xff]   ;;  %v10854_v26 = vld [vmem:[#allocation2 + $0x68] ss:$52 sps:$4 sm:$0xff]  }
  0x6d   :  { %v10852_v25 = vld [vmem:[#allocation2 + $0x6ec] ss:$52 sps:$4 sm:$0xff]   ;;  %v10855_v27 = vld [vmem:[#allocation2 + $0x6e8] ss:$52 sps:$4 sm:$0xff]   ;;  %v10856_v28 = vld [vmem:[#allocation2 + $0x4] ss:$52 sps:$4 sm:$0xff]  }
  0x6e   :  { %6930 = vmatpush1.bf16.msra.mxu0 %v10830_v10  ;;  %v10858_v29 = vld [vmem:[#allocation2 + $0x684] ss:$52 sps:$4 sm:$0xff]   ;;  %v10860_v30 = vld [vmem:[#allocation2] ss:$52 sps:$4 sm:$0xff]   ;;  %v10862_v32 = vld [vmem:[#allocation2 + $0x61c] ss:$52 sps:$4 sm:$0xff]  }
  0x6f   :  { %6973 = vmatpush1.bf16.msra.mxu1 %v10831_v11  ;;  %6931 = vmatprep.subr.bf16.mxu0 %v10832_v12  ;;  %v10861_v31 = vld [vmem:[#allocation2 + $0x680] ss:$52 sps:$4 sm:$0xff]   ;;  %v10864_v33 = vld [vmem:[#allocation2 + $0xc9c] ss:$52 sps:$4 sm:$0xff]   ;;  %v10866_v34 = vld [vmem:[#allocation2 + $0x618] ss:$52 sps:$4 sm:$0xff]  }
  0x70   :  { %6974 = vmatprep.subr.bf16.mxu1 %v10834_v13  ;;  %v10867_v35 = vld [vmem:[#allocation2 + $0xc98] ss:$52 sps:$4 sm:$0xff]   ;;  %v10868_v36 = vld [vmem:[#allocation2 + $0x5b4] ss:$52 sps:$4 sm:$0xff]   ;;  %v10872_v38 = vld [vmem:[#allocation2 + $0x5b0] ss:$52 sps:$4 sm:$0xff]  }
  0x71   :  { %v10870_v37 = vld [vmem:[#allocation2 + $0xc34] ss:$52 sps:$4 sm:$0xff]   ;;  %v10873_v39 = vld [vmem:[#allocation2 + $0xc30] ss:$52 sps:$4 sm:$0xff]   ;;  %v10874_v40 = vld [vmem:[#allocation2 + $0x54c] ss:$52 sps:$4 sm:$0xff]  }
  0x72   :  { %6932 = vmatpush1.bf16.msra.mxu0 %v10836_v14  ;;  %v10876_v41 = vld [vmem:[#allocation2 + $0xbcc] ss:$52 sps:$4 sm:$0xff]   ;;  %v10878_v42 = vld [vmem:[#allocation2 + $0x548] ss:$52 sps:$4 sm:$0xff]   ;;  %v10880_v44 = vld [vmem:[#allocation2 + $0x4e4] ss:$52 sps:$4 sm:$0xff]  }
  0x73   :  { %6975 = vmatpush1.bf16.msra.mxu1 %v10837_v15  ;;  %6933 = vmatprep.subr.bf16.mxu0 %v10838_v16  ;;  %v10879_v43 = vld [vmem:[#allocation2 + $0xbc8] ss:$52 sps:$4 sm:$0xff]   ;;  %v10882_v45 = vld [vmem:[#allocation2 + $0xb64] ss:$52 sps:$4 sm:$0xff]   ;;  %v10884_v46 = vld [vmem:[#allocation2 + $0x4e0] ss:$52 sps:$4 sm:$0xff]  }
  0x74   :  { %6976 = vmatprep.subr.bf16.mxu1 %v10840_v17  ;;  %v10885_v47 = vld [vmem:[#allocation2 + $0xb60] ss:$52 sps:$4 sm:$0xff]   ;;  %v12782_v48 = vld [vmem:[%s13336_s0 + $0x4] ss:$44 sps:$4 sm:$0xff]   ;;  %v10912_v50 = vld [vmem:[%s13336_s0 + $0xc] ss:$44 sps:$4 sm:$0xff]  }
  0x75   :  { %v10886_v49 = vld [vmem:[#allocation2 + $0x47c] ss:$52 sps:$4 sm:$0xff]   ;;  %6957 = vmatprep.mubr.bf16.mxu0 %v12782_v48  ;;  %7000 = vmatprep.mubr.bf16.mxu1 %v10912_v50  ;;  %v10890_v52 = vld [vmem:[#allocation2 + $0x478] ss:$52 sps:$4 sm:$0xff]   ;;  %v10892_v54 = vld [vmem:[#allocation2 + $0x414] ss:$52 sps:$4 sm:$0xff]  }
  0x76   :  { %6934 = vmatpush1.bf16.msra.mxu0 %v10842_v18  ;;  %v10888_v51 = vld [vmem:[#allocation2 + $0xafc] ss:$52 sps:$4 sm:$0xff]   ;;  %v10891_v53 = vld [vmem:[#allocation2 + $0xaf8] ss:$52 sps:$4 sm:$0xff]   ;;  %v10894_v55 = vld [vmem:[#allocation2 + $0xa94] ss:$52 sps:$4 sm:$0xff]  }
  0x77   :  { %6977 = vmatpush1.bf16.msra.mxu1 %v10843_v19  ;;  %6935 = vmatprep.subr.bf16.mxu0 %v10844_v20  ;;  %v10896_v56 = vld [vmem:[#allocation2 + $0x410] ss:$52 sps:$4 sm:$0xff]   ;;  %v10898_v58 = vld [vmem:[#allocation2 + $0x3ac] ss:$52 sps:$4 sm:$0xff]   ;;  %v10902_v60 = vld [vmem:[#allocation2 + $0x3a8] ss:$52 sps:$4 sm:$0xff]  }
  0x78   :  { %6978 = vmatprep.subr.bf16.mxu1 %v10846_v21  ;;  %v10897_v57 = vld [vmem:[#allocation2 + $0xa90] ss:$52 sps:$4 sm:$0xff]   ;;  %v10900_v59 = vld [vmem:[#allocation2 + $0xa2c] ss:$52 sps:$4 sm:$0xff]   ;;  %v10903_v61 = vld [vmem:[#allocation2 + $0xa28] ss:$52 sps:$4 sm:$0xff]  }
  0x79   :  { %v10904_v62 = vld [vmem:[#allocation2 + $0x344] ss:$52 sps:$4 sm:$0xff]   ;;  %v10908_v0 = vld [vmem:[#allocation2 + $0x340] ss:$52 sps:$4 sm:$0xff]   ;;  %v10918_v2 = vld [vmem:[#allocation2 + $0xfdc] ss:$52 sps:$4 sm:$0xff]  }
  0x7a   :  { %6936 = vmatpush1.bf16.msra.mxu0 %v10848_v22  ;;  %v10906_v63 = vld [vmem:[#allocation2 + $0x9c4] ss:$52 sps:$4 sm:$0xff]   ;;  %v10909_v1 = vld [vmem:[#allocation2 + $0x9c0] ss:$52 sps:$4 sm:$0xff]   ;;  %v10921_v3 = vld [vmem:[#allocation2 + $0x165c] ss:$52 sps:$4 sm:$0xff]  }
  0x7b   :  { %6979 = vmatpush1.bf16.msra.mxu1 %v10849_v23  ;;  %6937 = vmatprep.subr.bf16.mxu0 %v10850_v24  ;;  %v10914_v4 = vld [vmem:[%s13336_s0] ss:$44 sps:$4 sm:$0xff]   ;;  %v10915_v5 = vld [vmem:[%s13336_s0 + $0x8] ss:$44 sps:$4 sm:$0xff]   ;;  %v10922_v10 = vld [vmem:[#allocation2 + $0xf70] ss:$52 sps:$4 sm:$0xff]  }
  0x7c   :  { %6980 = vmatprep.subr.bf16.mxu1 %v10852_v25  ;;  %v10916_v6 = vld [vmem:[#allocation2 + $0xfd8] ss:$52 sps:$4 sm:$0xff]   ;;  %v10924_v8 = vld [vmem:[#allocation2 + $0xf74] ss:$52 sps:$4 sm:$0xff]   ;;  %v10925_v11 = vld [vmem:[#allocation2 + $0x15f0] ss:$52 sps:$4 sm:$0xff]  }
  0x7d   :  { %v10919_v7 = vld [vmem:[#allocation2 + $0x1658] ss:$52 sps:$4 sm:$0xff]   ;;  %v10927_v9 = vld [vmem:[#allocation2 + $0x15f4] ss:$52 sps:$4 sm:$0xff]   ;;  %v10942_v20 = vld [vmem:[#allocation2 + $0xe3c] ss:$52 sps:$4 sm:$0xff]  }
  0x7e   :  { %6938 = vmatpush1.bf16.msra.mxu0 %v10854_v26  ;;  %v10930_v12 = vld [vmem:[#allocation2 + $0xf0c] ss:$52 sps:$4 sm:$0xff]   ;;  %v10928_v14 = vld [vmem:[#allocation2 + $0xf08] ss:$52 sps:$4 sm:$0xff]   ;;  %v10936_v16 = vld [vmem:[#allocation2 + $0xea4] ss:$52 sps:$4 sm:$0xff]  }
  0x7f   :  { %6981 = vmatpush1.bf16.msra.mxu1 %v10855_v27  ;;  %6939 = vmatprep.subr.bf16.mxu0 %v10856_v28  ;;  %v10933_v13 = vld [vmem:[#allocation2 + $0x158c] ss:$52 sps:$4 sm:$0xff]   ;;  %v10931_v15 = vld [vmem:[#allocation2 + $0x1588] ss:$52 sps:$4 sm:$0xff]   ;;  %v10939_v17 = vld [vmem:[#allocation2 + $0x1524] ss:$52 sps:$4 sm:$0xff]  }
  0x80   :  { %6982 = vmatprep.subr.bf16.mxu1 %v10858_v29  ;;  %v10934_v18 = vld [vmem:[#allocation2 + $0xea0] ss:$52 sps:$4 sm:$0xff]   ;;  %v10945_v21 = vld [vmem:[#allocation2 + $0x14bc] ss:$52 sps:$4 sm:$0xff]   ;;  %v10940_v22 = vld [vmem:[#allocation2 + $0xe38] ss:$52 sps:$4 sm:$0xff]  }
  0x81   :  { %v10937_v19 = vld [vmem:[#allocation2 + $0x1520] ss:$52 sps:$4 sm:$0xff]   ;;  %v10943_v23 = vld [vmem:[#allocation2 + $0x14b8] ss:$52 sps:$4 sm:$0xff]   ;;  %v10946_v26 = vld [vmem:[#allocation2 + $0xdd0] ss:$52 sps:$4 sm:$0xff]  }
  0x82   :  { %6940 = vmatpush1.bf16.msra.mxu0 %v10860_v30  ;;  %v10948_v24 = vld [vmem:[#allocation2 + $0xdd4] ss:$52 sps:$4 sm:$0xff]   ;;  %v10949_v27 = vld [vmem:[#allocation2 + $0x1450] ss:$52 sps:$4 sm:$0xff]   ;;  %v10954_v28 = vld [vmem:[#allocation2 + $0xd6c] ss:$52 sps:$4 sm:$0xff]  }
  0x83   :  { %6983 = vmatpush1.bf16.msra.mxu1 %v10861_v31  ;;  %6941 = vmatprep.subr.bf16.mxu0 %v10862_v32  ;;  %v10951_v25 = vld [vmem:[#allocation2 + $0x1454] ss:$52 sps:$4 sm:$0xff]   ;;  %v10957_v29 = vld [vmem:[#allocation2 + $0x13ec] ss:$52 sps:$4 sm:$0xff]   ;;  %v10960_v32 = vld [vmem:[#allocation2 + $0xd04] ss:$52 sps:$4 sm:$0xff]  }
  0x84   :  { %6984 = vmatprep.subr.bf16.mxu1 %v10864_v33  ;;  %v10952_v30 = vld [vmem:[#allocation2 + $0xd68] ss:$52 sps:$4 sm:$0xff]   ;;  %v10963_v33 = vld [vmem:[#allocation2 + $0x1384] ss:$52 sps:$4 sm:$0xff]   ;;  %vm6921_vm0 = vcmask 523264   ;;  %vm12702_vm1 = vmmov 0  }
  0x85   :  { %v10955_v31 = vld [vmem:[#allocation2 + $0x13e8] ss:$52 sps:$4 sm:$0xff]   ;;  %vm8743_vm2 = vcmask 916480   ;;  %s12704_s12 = smov 96   ;;  %vm8836_vm3 = vcmask 785408   ;;  %vm9108_vm4 = vcmask 130048  }
  0x86   :  { %6942 = vmatpush2.bf16.msra.mxu0 %v10866_v34  ;;  %v12797_v34 = vld [vmem:[%s13336_s0 + $0x14] ss:$44 sps:$4 sm:$0xff]   ;;  %v10979_v50 = vld [vmem:[#allocation2 + $0x18c8] ss:$52 sps:$4 sm:$0xff]  }
  0x87   :  { %6985 = vmatpush2.bf16.msra.mxu1 %v10867_v35  ;;  %6943 = vmatprep.subr.bf16.mxu0 %v10868_v36  ;;  %v11014_v35 = vld [vmem:[%s13336_s0 + $0x1c] ss:$44 sps:$4 sm:$0xff]   ;;  %v10958_v36 = vld [vmem:[#allocation2 + $0xd00] ss:$52 sps:$4 sm:$0xff]  }
  0x88   :  { %6986 = vmatprep.subr.bf16.mxu1 %v10870_v37  ;;  %v10961_v37 = vld [vmem:[#allocation2 + $0x1380] ss:$52 sps:$4 sm:$0xff]  }
  0x8a   :  { %6944 = vmatpush2.bf16.msra.mxu0 %v10872_v38  ;;  %v10966_v38 = vld [vmem:[#allocation2 + $0x131c] ss:$52 sps:$4 sm:$0xff]  }
  0x8b   :  { %6987 = vmatpush2.bf16.msra.mxu1 %v10873_v39  ;;  %6945 = vmatprep.subr.bf16.mxu0 %v10874_v40  ;;  %v10969_v39 = vld [vmem:[#allocation2 + $0x199c] ss:$52 sps:$4 sm:$0xff]   ;;  %v10964_v40 = vld [vmem:[#allocation2 + $0x1318] ss:$52 sps:$4 sm:$0xff]  }
  0x8c   :  { %6988 = vmatprep.subr.bf16.mxu1 %v10876_v41  ;;  %v10967_v41 = vld [vmem:[#allocation2 + $0x1998] ss:$52 sps:$4 sm:$0xff]  }
  0x8e   :  { %6946 = vmatpush2.bf16.msra.mxu0 %v10878_v42  ;;  %v10972_v42 = vld [vmem:[#allocation2 + $0x12b4] ss:$52 sps:$4 sm:$0xff]  }
  0x8f   :  { %6989 = vmatpush2.bf16.msra.mxu1 %v10879_v43  ;;  %6947 = vmatprep.subr.bf16.mxu0 %v10880_v44  ;;  %v10975_v43 = vld [vmem:[#allocation2 + $0x1934] ss:$52 sps:$4 sm:$0xff]   ;;  %v10970_v44 = vld [vmem:[#allocation2 + $0x12b0] ss:$52 sps:$4 sm:$0xff]  }
  0x90   :  { %6990 = vmatprep.subr.bf16.mxu1 %v10882_v45  ;;  %v10973_v45 = vld [vmem:[#allocation2 + $0x1930] ss:$52 sps:$4 sm:$0xff]  }
  0x92   :  { %6948 = vmatpush2.bf16.msra.mxu0 %v10884_v46  ;;  %v10978_v46 = vld [vmem:[#allocation2 + $0x124c] ss:$52 sps:$4 sm:$0xff]  }
  0x93   :  { %6991 = vmatpush2.bf16.msra.mxu1 %v10885_v47  ;;  %6949 = vmatprep.subr.bf16.mxu0 %v10886_v49  ;;  %v10981_v47 = vld [vmem:[#allocation2 + $0x18cc] ss:$52 sps:$4 sm:$0xff]   ;;  %v10976_v49 = vld [vmem:[#allocation2 + $0x1248] ss:$52 sps:$4 sm:$0xff]  }
  0x94   :  { %6992 = vmatprep.subr.bf16.mxu1 %v10888_v51  ;;  %v10984_v51 = vld [vmem:[#allocation2 + $0x11e4] ss:$52 sps:$4 sm:$0xff]  }
  0x96   :  { %6950 = vmatpush2.bf16.msra.mxu0 %v10890_v52  ;;  %v10987_v52 = vld [vmem:[#allocation2 + $0x1864] ss:$52 sps:$4 sm:$0xff]  }
  0x97   :  { %6993 = vmatpush2.bf16.msra.mxu1 %v10891_v53  ;;  %6951 = vmatprep.subr.bf16.mxu0 %v10892_v54  ;;  %v10982_v53 = vld [vmem:[#allocation2 + $0x11e0] ss:$52 sps:$4 sm:$0xff]  }
  0x98   :  { %6994 = vmatprep.subr.bf16.mxu1 %v10894_v55  ;;  %v10985_v54 = vld [vmem:[#allocation2 + $0x1860] ss:$52 sps:$4 sm:$0xff]   ;;  %v10990_v55 = vld [vmem:[#allocation2 + $0x117c] ss:$52 sps:$4 sm:$0xff]  }
  0x9a   :  { %6952 = vmatpush2.bf16.msra.mxu0 %v10896_v56  ;;  %v10993_v56 = vld [vmem:[#allocation2 + $0x17fc] ss:$52 sps:$4 sm:$0xff]  }
  0x9b   :  { %6995 = vmatpush2.bf16.msra.mxu1 %v10897_v57  ;;  %6953 = vmatprep.subr.bf16.mxu0 %v10898_v58  ;;  %v10988_v57 = vld [vmem:[#allocation2 + $0x1178] ss:$52 sps:$4 sm:$0xff]  }
  0x9c   :  { %6996 = vmatprep.subr.bf16.mxu1 %v10900_v59  ;;  %v10991_v58 = vld [vmem:[#allocation2 + $0x17f8] ss:$52 sps:$4 sm:$0xff]   ;;  %v10996_v59 = vld [vmem:[#allocation2 + $0x1114] ss:$52 sps:$4 sm:$0xff]  }
  0x9e   :  { %6954 = vmatpush2.bf16.msra.mxu0 %v10902_v60  ;;  %v10999_v60 = vld [vmem:[#allocation2 + $0x1794] ss:$52 sps:$4 sm:$0xff]  }
  0x9f   :  { %6997 = vmatpush2.bf16.msra.mxu1 %v10903_v61  ;;  %6955 = vmatprep.subr.bf16.mxu0 %v10904_v62  ;;  %v10994_v61 = vld [vmem:[#allocation2 + $0x1110] ss:$52 sps:$4 sm:$0xff]  }
  0xa0   :  { %6998 = vmatprep.subr.bf16.mxu1 %v10906_v63  ;;  %v10997_v62 = vld [vmem:[#allocation2 + $0x1790] ss:$52 sps:$4 sm:$0xff]   ;;  %v11002_v63 = vld [vmem:[#allocation2 + $0x10ac] ss:$52 sps:$4 sm:$0xff]  }
  0xa2   :  { %6956 = vmatpush2.bf16.msra.mxu0 %v10908_v0  ;;  %v11005_v0 = vld [vmem:[#allocation2 + $0x172c] ss:$52 sps:$4 sm:$0xff]  }
  0xa3   :  { %6999 = vmatpush2.bf16.msra.mxu1 %v10909_v1  ;;  %7011 = vmatprep.subr.bf16.mxu0 %v10918_v2  ;;  %v11000_v1 = vld [vmem:[#allocation2 + $0x10a8] ss:$52 sps:$4 sm:$0xff]  }
  0xa4   :  { %7054 = vmatprep.subr.bf16.mxu1 %v10921_v3  ;;  %v11003_v2 = vld [vmem:[#allocation2 + $0x1728] ss:$52 sps:$4 sm:$0xff]   ;;  %v11008_v3 = vld [vmem:[#allocation2 + $0x1044] ss:$52 sps:$4 sm:$0xff]  }
  0xa5   :  { %6958 = vmatmul.mubr.bf16.vlgmr.msra.gmra.mxu0 %v10914_v4  ;;  %v11011_v4 = vld [vmem:[#allocation2 + $0x16c4] ss:$52 sps:$4 sm:$0xff]  }
  0xa6   :  { %7001 = vmatmul.mubr.bf16.vlgmr.msra.gmra.mxu1 %v10915_v5  ;;  %7012 = vmatpush1.bf16.msra.mxu0 %v10916_v6  ;;  %v11006_v5 = vld [vmem:[#allocation2 + $0x1040] ss:$52 sps:$4 sm:$0xff]  }
  0xa7   :  { %7055 = vmatpush1.bf16.msra.mxu1 %v10919_v7  ;;  %7013 = vmatprep.subr.bf16.mxu0 %v10924_v8  ;;  %v11009_v6 = vld [vmem:[#allocation2 + $0x16c0] ss:$52 sps:$4 sm:$0xff]   ;;  %v11020_v7 = vld [vmem:[#allocation2 + $0x1cdc] ss:$52 sps:$4 sm:$0xff]  }
  0xa8   :  { %7056 = vmatprep.subr.bf16.mxu1 %v10927_v9  ;;  %7043 = vmatprep.mubr.bf16.mxu0 %v12797_v34  ;;  %v11023_v8 = vld [vmem:[#allocation2 + $0x21bc] ss:$52 sps:$4 sm:$0xff]  }
  0xa9   :  { %7086 = vmatprep.mubr.bf16.mxu1 %v11014_v35  ;;  %v11016_v9 = vld [vmem:[%s13336_s0 + $0x10] ss:$44 sps:$4 sm:$0xff]  }
  0xaa   :  { %7014 = vmatpush1.bf16.msra.mxu0 %v10922_v10  ;;  %v11017_v10 = vld [vmem:[%s13336_s0 + $0x18] ss:$44 sps:$4 sm:$0xff]  }
  0xab   :  { %7057 = vmatpush1.bf16.msra.mxu1 %v10925_v11  ;;  %7015 = vmatprep.subr.bf16.mxu0 %v10930_v12  ;;  %v11018_v11 = vld [vmem:[#allocation2 + $0x1cd8] ss:$52 sps:$4 sm:$0xff]   ;;  %v11049_v35 = vld [vmem:[#allocation2 + $0x1ad0] ss:$52 sps:$4 sm:$0xff]  }
  0xac   :  { %7058 = vmatprep.subr.bf16.mxu1 %v10933_v13  ;;  %v11021_v12 = vld [vmem:[#allocation2 + $0x21b8] ss:$52 sps:$4 sm:$0xff]   ;;  %v11026_v13 = vld [vmem:[#allocation2 + $0x1c74] ss:$52 sps:$4 sm:$0xff]  }
  0xae   :  { %7016 = vmatpush1.bf16.msra.mxu0 %v10928_v14  ;;  %v11029_v14 = vld [vmem:[#allocation2 + $0x2154] ss:$52 sps:$4 sm:$0xff]  }
  0xaf   :  { %7059 = vmatpush1.bf16.msra.mxu1 %v10931_v15  ;;  %7017 = vmatprep.subr.bf16.mxu0 %v10936_v16  ;;  %v11024_v15 = vld [vmem:[#allocation2 + $0x1c70] ss:$52 sps:$4 sm:$0xff]  }
  0xb0   :  { %7060 = vmatprep.subr.bf16.mxu1 %v10939_v17  ;;  %v11027_v16 = vld [vmem:[#allocation2 + $0x2150] ss:$52 sps:$4 sm:$0xff]   ;;  %v11032_v17 = vld [vmem:[#allocation2 + $0x1c0c] ss:$52 sps:$4 sm:$0xff]  }
  0xb2   :  { %7018 = vmatpush1.bf16.msra.mxu0 %v10934_v18  ;;  %v11035_v18 = vld [vmem:[#allocation2 + $0x20ec] ss:$52 sps:$4 sm:$0xff]  }
  0xb3   :  { %7061 = vmatpush1.bf16.msra.mxu1 %v10937_v19  ;;  %7019 = vmatprep.subr.bf16.mxu0 %v10942_v20  ;;  %v12700_v19 = vmov 0   ;;  %v11030_v20 = vld [vmem:[#allocation2 + $0x1c08] ss:$52 sps:$4 sm:$0xff]  }
  0xb4   :  { %7062 = vmatprep.subr.bf16.mxu1 %v10945_v21  ;;  %v11115_v21 = vld [vmem:[%s13336_s0 + $0x24] ss:$44 sps:$4 sm:$0xff]  }
  0xb6   :  { %7020 = vmatpush1.bf16.msra.mxu0 %v10940_v22  ;;  %v11033_v22 = vld [vmem:[#allocation2 + $0x20e8] ss:$52 sps:$4 sm:$0xff]  }
  0xb7   :  { %7063 = vmatpush1.bf16.msra.mxu1 %v10943_v23  ;;  %7021 = vmatprep.subr.bf16.mxu0 %v10948_v24  ;;  %v11038_v23 = vld [vmem:[#allocation2 + $0x1ba4] ss:$52 sps:$4 sm:$0xff]  }
  0xb8   :  { %7064 = vmatprep.subr.bf16.mxu1 %v10951_v25  ;;  %v11041_v24 = vld [vmem:[#allocation2 + $0x2084] ss:$52 sps:$4 sm:$0xff]   ;;  %v11036_v25 = vld [vmem:[#allocation2 + $0x1ba0] ss:$52 sps:$4 sm:$0xff]  }
  0xba   :  { %7022 = vmatpush1.bf16.msra.mxu0 %v10946_v26  ;;  %v11039_v26 = vld [vmem:[#allocation2 + $0x2080] ss:$52 sps:$4 sm:$0xff]  }
  0xbb   :  { %7065 = vmatpush1.bf16.msra.mxu1 %v10949_v27  ;;  %7023 = vmatprep.subr.bf16.mxu0 %v10954_v28  ;;  %v11044_v27 = vld [vmem:[#allocation2 + $0x1b3c] ss:$52 sps:$4 sm:$0xff]   ;;  %v11048_v28 = vld [vmem:[#allocation2 + $0x2e4] ss:$52 sps:$4 sm:$0xff]  }
  0xbc   :  { %7066 = vmatprep.subr.bf16.mxu1 %v10957_v29  ;;  %v11042_v29 = vld [vmem:[#allocation2 + $0x1b38] ss:$52 sps:$4 sm:$0xff]  }
  0xbe   :  { %7024 = vmatpush1.bf16.msra.mxu0 %v10952_v30  ;;  %v11045_v30 = vld [vmem:[%s13336_s0 + $0x28] ss:$44 sps:$4 sm:$0xff]  }
  0xbf   :  { %7067 = vmatpush1.bf16.msra.mxu1 %v10955_v31  ;;  %7025 = vmatprep.subr.bf16.mxu0 %v10960_v32  ;;  %v11046_v31 = vld [vmem:[#allocation2 + $0x2e0] ss:$52 sps:$4 sm:$0xff]  }
  0xc0   :  { %7068 = vmatprep.subr.bf16.mxu1 %v10963_v33  ;;  %v11051_v32 = vld [vmem:[#allocation2 + $0x1ad4] ss:$52 sps:$4 sm:$0xff]   ;;  %v11054_v33 = vld [vmem:[#allocation2 + $0x27c] ss:$52 sps:$4 sm:$0xff]  }
  0xc2   :  { %7026 = vmatpush1.bf16.msra.mxu0 %v10958_v36  ;;  %v11052_v36 = vld [vmem:[#allocation2 + $0x278] ss:$52 sps:$4 sm:$0xff]  }
  0xc3   :  { %7069 = vmatpush1.bf16.msra.mxu1 %v10961_v37  ;;  %7027 = vmatprep.subr.bf16.mxu0 %v10966_v38  ;;  %v11057_v37 = vld [vmem:[#allocation2 + $0x1a6c] ss:$52 sps:$4 sm:$0xff]   ;;  %v11060_v38 = vld [vmem:[#allocation2 + $0x214] ss:$52 sps:$4 sm:$0xff]  }
  0xc4   :  { %7070 = vmatprep.subr.bf16.mxu1 %v10969_v39  ;;  %v11055_v39 = vld [vmem:[#allocation2 + $0x1a68] ss:$52 sps:$4 sm:$0xff]  }
  0xc6   :  { %7028 = vmatpush2.bf16.msra.mxu0 %v10964_v40  ;;  %v11058_v40 = vld [vmem:[#allocation2 + $0x210] ss:$52 sps:$4 sm:$0xff]  }
  0xc7   :  { %7071 = vmatpush2.bf16.msra.mxu1 %v10967_v41  ;;  %7029 = vmatprep.subr.bf16.mxu0 %v10972_v42  ;;  %v11063_v41 = vld [vmem:[#allocation2 + $0x1a04] ss:$52 sps:$4 sm:$0xff]   ;;  %v11066_v42 = vld [vmem:[#allocation2 + $0x1ac] ss:$52 sps:$4 sm:$0xff]  }
  0xc8   :  { %7072 = vmatprep.subr.bf16.mxu1 %v10975_v43  ;;  %v11061_v43 = vld [vmem:[#allocation2 + $0x1a00] ss:$52 sps:$4 sm:$0xff]  }
  0xca   :  { %7030 = vmatpush2.bf16.msra.mxu0 %v10970_v44  ;;  %v11064_v44 = vld [vmem:[#allocation2 + $0x1a8] ss:$52 sps:$4 sm:$0xff]  }
  0xcb   :  { %7073 = vmatpush2.bf16.msra.mxu1 %v10973_v45  ;;  %7031 = vmatprep.subr.bf16.mxu0 %v10978_v46  ;;  %v11069_v45 = vld [vmem:[#allocation2 + $0x201c] ss:$52 sps:$4 sm:$0xff]   ;;  %v11072_v46 = vld [vmem:[#allocation2 + $0x144] ss:$52 sps:$4 sm:$0xff]  }
  0xcc   :  { %7074 = vmatprep.subr.bf16.mxu1 %v10981_v47  ;;  %v11067_v47 = vld [vmem:[#allocation2 + $0x2018] ss:$52 sps:$4 sm:$0xff]  }
  0xce   :  { %7032 = vmatpush2.bf16.msra.mxu0 %v10976_v49  ;;  %v11075_v49 = vld [vmem:[#allocation2 + $0x1fb4] ss:$52 sps:$4 sm:$0xff]  }
  0xcf   :  { %7075 = vmatpush2.bf16.msra.mxu1 %v10979_v50  ;;  %7033 = vmatprep.subr.bf16.mxu0 %v10984_v51  ;;  %v11078_v50 = vld [vmem:[#allocation2 + $0xdc] ss:$52 sps:$4 sm:$0xff]  }
  0xd0   :  { %7076 = vmatprep.subr.bf16.mxu1 %v10987_v52  ;;  %v11073_v51 = vld [vmem:[#allocation2 + $0x1fb0] ss:$52 sps:$4 sm:$0xff]   ;;  %v11076_v52 = vld [vmem:[#allocation2 + $0xd8] ss:$52 sps:$4 sm:$0xff]  }
  0xd2   :  { %7034 = vmatpush2.bf16.msra.mxu0 %v10982_v53  ;;  %v11081_v53 = vld [vmem:[#allocation2 + $0x1f4c] ss:$52 sps:$4 sm:$0xff]  }
  0xd3   :  { %7077 = vmatpush2.bf16.msra.mxu1 %v10985_v54  ;;  %7035 = vmatprep.subr.bf16.mxu0 %v10990_v55  ;;  %v11084_v54 = vld [vmem:[#allocation2 + $0x74] ss:$52 sps:$4 sm:$0xff]  }
  0xd4   :  { %7078 = vmatprep.subr.bf16.mxu1 %v10993_v56  ;;  %v11079_v55 = vld [vmem:[#allocation2 + $0x1f48] ss:$52 sps:$4 sm:$0xff]   ;;  %v11082_v56 = vld [vmem:[#allocation2 + $0x70] ss:$52 sps:$4 sm:$0xff]  }
  0xd6   :  { %7036 = vmatpush2.bf16.msra.mxu0 %v10988_v57  ;;  %v11087_v57 = vld [vmem:[#allocation2 + $0x1ee4] ss:$52 sps:$4 sm:$0xff]  }
  0xd7   :  { %7079 = vmatpush2.bf16.msra.mxu1 %v10991_v58  ;;  %7037 = vmatprep.subr.bf16.mxu0 %v10996_v59  ;;  %v11090_v58 = vld [vmem:[#allocation2 + $0xc] ss:$52 sps:$4 sm:$0xff]  }
  0xd8   :  { %7080 = vmatprep.subr.bf16.mxu1 %v10999_v60  ;;  %v11085_v59 = vld [vmem:[#allocation2 + $0x1ee0] ss:$52 sps:$4 sm:$0xff]   ;;  %v11088_v60 = vld [vmem:[#allocation2 + $0x8] ss:$52 sps:$4 sm:$0xff]  }
  0xda   :  { %7038 = vmatpush2.bf16.msra.mxu0 %v10994_v61  ;;  %v11093_v61 = vld [vmem:[#allocation2 + $0x1e7c] ss:$52 sps:$4 sm:$0xff]  }
  0xdb   :  { %7081 = vmatpush2.bf16.msra.mxu1 %v10997_v62  ;;  %7039 = vmatprep.subr.bf16.mxu0 %v11002_v63  ;;  %v11096_v62 = vld [vmem:[#allocation2 + $0x624] ss:$52 sps:$4 sm:$0xff]  }
  0xdc   :  { %7082 = vmatprep.subr.bf16.mxu1 %v11005_v0  ;;  %v11091_v63 = vld [vmem:[#allocation2 + $0x1e78] ss:$52 sps:$4 sm:$0xff]   ;;  %v11094_v0 = vld [vmem:[#allocation2 + $0x620] ss:$52 sps:$4 sm:$0xff]  }
  0xde   :  { %7040 = vmatpush2.bf16.msra.mxu0 %v11000_v1  ;;  %v11099_v1 = vld [vmem:[#allocation2 + $0x1e14] ss:$52 sps:$4 sm:$0xff]  }
  0xdf   :  { %7083 = vmatpush2.bf16.msra.mxu1 %v11003_v2  ;;  %7041 = vmatprep.subr.bf16.mxu0 %v11008_v3  ;;  %v11102_v2 = vld [vmem:[#allocation2 + $0x5bc] ss:$52 sps:$4 sm:$0xff]  }
  0xe0   :  { %7084 = vmatprep.subr.bf16.mxu1 %v11011_v4  ;;  %v11097_v3 = vld [vmem:[#allocation2 + $0x1e10] ss:$52 sps:$4 sm:$0xff]   ;;  %v11100_v4 = vld [vmem:[#allocation2 + $0x5b8] ss:$52 sps:$4 sm:$0xff]  }
  0xe2   :  { %7042 = vmatpush2.bf16.msra.mxu0 %v11006_v5  ;;  %v11105_v5 = vld [vmem:[#allocation2 + $0x1dac] ss:$52 sps:$4 sm:$0xff]  }
  0xe3   :  { %7085 = vmatpush2.bf16.msra.mxu1 %v11009_v6  ;;  %7097 = vmatprep.subr.bf16.mxu0 %v11020_v7  ;;  %v11108_v6 = vld [vmem:[#allocation2 + $0x554] ss:$52 sps:$4 sm:$0xff]  }
  0xe4   :  { %7148 = vmatprep.subr.bf16.mxu1 %v11023_v8  ;;  %v11103_v7 = vld [vmem:[#allocation2 + $0x1da8] ss:$52 sps:$4 sm:$0xff]   ;;  %v11106_v8 = vld [vmem:[#allocation2 + $0x550] ss:$52 sps:$4 sm:$0xff]  }
  0xe5   :  { %7044 = vmatmul.mubr.bf16.vlgmr.msra.gmra.mxu0 %v11016_v9  ;;  %v11111_v9 = vld [vmem:[#allocation2 + $0x1d44] ss:$52 sps:$4 sm:$0xff]  }
  0xe6   :  { %7087 = vmatmul.mubr.bf16.vlgmr.msra.gmra.mxu1 %v11017_v10  ;;  %7098 = vmatpush1.bf16.msra.mxu0 %v11018_v11  ;;  %v11114_v10 = vld [vmem:[#allocation2 + $0x4ec] ss:$52 sps:$4 sm:$0xff]  }
  0xe7   :  { %7149 = vmatpush1.bf16.msra.mxu1 %v11021_v12  ;;  %7099 = vmatprep.subr.bf16.mxu0 %v11026_v13  ;;  %v11109_v11 = vld [vmem:[#allocation2 + $0x1d40] ss:$52 sps:$4 sm:$0xff]   ;;  %v11112_v12 = vld [vmem:[#allocation2 + $0x4e8] ss:$52 sps:$4 sm:$0xff]   ;;  %v11120_v13 = vld [vmem:[#allocation2 + $0x484] ss:$52 sps:$4 sm:$0xff]  }
  0xe8   :  { %7150 = vmatprep.subr.bf16.mxu1 %v11029_v14  ;;  %7172 = vmatprep.mubr.bf16.mxu1 %v12700_v19  ;;  %v11123_v14 = vld [vmem:[#allocation2 + $0x964] ss:$52 sps:$4 sm:$0xff]  }
  0xe9   :  { %7129 = vmatprep.mubr.bf16.mxu0 %v11115_v21  ;;  %v11124_v21 = vld [vmem:[#allocation2 + $0x418] ss:$52 sps:$4 sm:$0xff]  }
  0xea   :  { %7100 = vmatpush1.bf16.msra.mxu0 %v11024_v15  ;;  %v11117_v15 = vld [vmem:[%s13336_s0 + $0x20] ss:$44 sps:$4 sm:$0xff]  }
  0xeb   :  { %7151 = vmatpush1.bf16.msra.mxu1 %v11027_v16  ;;  %7101 = vmatprep.subr.bf16.mxu0 %v11032_v17  ;;  %v11118_v16 = vld [vmem:[#allocation2 + $0x480] ss:$52 sps:$4 sm:$0xff]  }
  0xec   :  { %7152 = vmatprep.subr.bf16.mxu1 %v11035_v18  ;;  %v11121_v17 = vld [vmem:[#allocation2 + $0x960] ss:$52 sps:$4 sm:$0xff]   ;;  %v11126_v18 = vld [vmem:[#allocation2 + $0x41c] ss:$52 sps:$4 sm:$0xff]  }
  0xee   :  { %7102 = vmatpush1.bf16.msra.mxu0 %v11030_v20  ;;  %v11129_v20 = vld [vmem:[#allocation2 + $0x8fc] ss:$52 sps:$4 sm:$0xff]  }
  0xef   :  { %7153 = vmatpush1.bf16.msra.mxu1 %v11033_v22  ;;  %7103 = vmatprep.subr.bf16.mxu0 %v11038_v23  ;;  %v11127_v22 = vld [vmem:[#allocation2 + $0x8f8] ss:$52 sps:$4 sm:$0xff]   ;;  %v11132_v23 = vld [vmem:[#allocation2 + $0x3b4] ss:$52 sps:$4 sm:$0xff]  }
  0xf0   :  { %7154 = vmatprep.subr.bf16.mxu1 %v11041_v24  ;;  %v11135_v24 = vld [vmem:[#allocation2 + $0x894] ss:$52 sps:$4 sm:$0xff]  }
  0xf2   :  { %7104 = vmatpush1.bf16.msra.mxu0 %v11036_v25  ;;  %v12467_v25 = vld [vmem:[%s13336_s0 + $0xc] ss:$44 sps:$4 sm:$0xff]  }
  0xf3   :  { %7155 = vmatpush1.bf16.msra.mxu1 %v11039_v26  ;;  %7105 = vmatprep.subr.bf16.mxu0 %v11044_v27  ;;  %v11130_v26 = vld [vmem:[#allocation2 + $0x3b0] ss:$52 sps:$4 sm:$0xff]  }
  0xf4   :  { %7183 = vmatprep.subr.bf16.mxu1 %v11048_v28  ;;  %v11133_v27 = vld [vmem:[#allocation2 + $0x890] ss:$52 sps:$4 sm:$0xff]   ;;  %v11138_v28 = vld [vmem:[#allocation2 + $0x34c] ss:$52 sps:$4 sm:$0xff]  }
  0xf6   :  { %10538 = vmatmul.mubr.msk.bf16.vlgmr.msra.gmra.mxu1 %vm6921_vm0, %v11045_v30  ;;  %7106 = vmatpush1.bf16.msra.mxu0 %v11042_v29  ;;  %v11141_v29 = vld [vmem:[#allocation2 + $0x82c] ss:$52 sps:$4 sm:$0xff]   ;;  %v11136_v30 = vld [vmem:[#allocation2 + $0x348] ss:$52 sps:$4 sm:$0xff]  }
  0xf7   :  { %7184 = vmatpush1.bf16.msra.mxu1 %v11046_v31  ;;  %7107 = vmatprep.subr.bf16.mxu0 %v11051_v32  ;;  %v11139_v31 = vld [vmem:[#allocation2 + $0x828] ss:$52 sps:$4 sm:$0xff]   ;;  %v11144_v32 = vld [vmem:[#allocation2 + $0x7c4] ss:$52 sps:$4 sm:$0xff]  }
  0xf8   :  { %7185 = vmatprep.subr.bf16.mxu1 %v11054_v33  ;;  %7215 = vmatprep.mubr.bf16.mxu1 %v12782_v48  ;;  %v11070_v48 = vld [vmem:[#allocation2 + $0x140] ss:$52 sps:$4 sm:$0xff]   ;;  %v11147_v33 = vld [vmem:[#allocation2 + $0xfe4] ss:$52 sps:$4 sm:$0xff]  }
  0xfa   :  { %7108 = vmatpush1.bf16.msra.mxu0 %v11049_v35  ;;  %v11142_v35 = vld [vmem:[#allocation2 + $0x7c0] ss:$52 sps:$4 sm:$0xff]  }
  0xfb   :  { %7186 = vmatpush1.bf16.msra.mxu1 %v11052_v36  ;;  %7109 = vmatprep.subr.bf16.mxu0 %v11057_v37  ;;  %v11145_v36 = vld [vmem:[#allocation2 + $0xfe0] ss:$52 sps:$4 sm:$0xff]   ;;  %v11150_v37 = vld [vmem:[#allocation2 + $0x75c] ss:$52 sps:$4 sm:$0xff]  }
  0xfc   :  { %7187 = vmatprep.subr.bf16.mxu1 %v11060_v38  ;;  %v11153_v38 = vld [vmem:[#allocation2 + $0xf7c] ss:$52 sps:$4 sm:$0xff]  }
  0xfe   :  { %7110 = vmatpush1.bf16.msra.mxu0 %v11055_v39  ;;  %v12468_v39 = vld [vmem:[%s13336_s0] ss:$44 sps:$4 sm:$0xff]  }
  0xff   :  { %7188 = vmatpush1.bf16.msra.mxu1 %v11058_v40  ;;  %7111 = vmatprep.subr.bf16.mxu0 %v11063_v41  ;;  %v11148_v40 = vld [vmem:[#allocation2 + $0x758] ss:$52 sps:$4 sm:$0xff]  }
 0x100   :  { %7189 = vmatprep.subr.bf16.mxu1 %v11066_v42  ;;  %v11151_v41 = vld [vmem:[#allocation2 + $0xf78] ss:$52 sps:$4 sm:$0xff]   ;;  %v11156_v42 = vld [vmem:[#allocation2 + $0x6f4] ss:$52 sps:$4 sm:$0xff]  }
 0x102   :  { %7112 = vmatpush1.bf16.msra.mxu0 %v11061_v43  ;;  %v11159_v43 = vld [vmem:[#allocation2 + $0xf14] ss:$52 sps:$4 sm:$0xff]  }
 0x103   :  { %7190 = vmatpush1.bf16.msra.mxu1 %v11064_v44  ;;  %7113 = vmatprep.subr.bf16.mxu0 %v11069_v45  ;;  %v11154_v44 = vld [vmem:[#allocation2 + $0x6f0] ss:$52 sps:$4 sm:$0xff]  }
 0x104   :  { %7191 = vmatprep.subr.bf16.mxu1 %v11072_v46  ;;  %v11157_v45 = vld [vmem:[#allocation2 + $0xf10] ss:$52 sps:$4 sm:$0xff]   ;;  %v11162_v46 = vld [vmem:[#allocation2 + $0x68c] ss:$52 sps:$4 sm:$0xff]  }
 0x106   :  { %7114 = vmatpush2.bf16.msra.mxu0 %v11067_v47  ;;  %v11165_v47 = vld [vmem:[#allocation2 + $0xeac] ss:$52 sps:$4 sm:$0xff]  }
 0x107   :  { %7192 = vmatpush1.bf16.msra.mxu1 %v11070_v48  ;;  %7115 = vmatprep.subr.bf16.mxu0 %v11075_v49  ;;  %v11160_v48 = vld [vmem:[#allocation2 + $0x688] ss:$52 sps:$4 sm:$0xff]  }
 0x108   :  { %7193 = vmatprep.subr.bf16.mxu1 %v11078_v50  ;;  %v11163_v49 = vld [vmem:[#allocation2 + $0xea8] ss:$52 sps:$4 sm:$0xff]   ;;  %v11168_v50 = vld [vmem:[#allocation2 + $0xca4] ss:$52 sps:$4 sm:$0xff]  }
 0x10a   :  { %7116 = vmatpush2.bf16.msra.mxu0 %v11073_v51  ;;  %v11171_v51 = vld [vmem:[#allocation2 + $0xe44] ss:$52 sps:$4 sm:$0xff]  }
 0x10b   :  { %7194 = vmatpush1.bf16.msra.mxu1 %v11076_v52  ;;  %7117 = vmatprep.subr.bf16.mxu0 %v11081_v53  ;;  %v11166_v52 = vld [vmem:[#allocation2 + $0xca0] ss:$52 sps:$4 sm:$0xff]   ;;  %v11174_v53 = vld [vmem:[#allocation2 + $0xc3c] ss:$52 sps:$4 sm:$0xff]  }
 0x10c   :  { %7195 = vmatprep.subr.bf16.mxu1 %v11084_v54  ;;  %v11177_v54 = vld [vmem:[#allocation2 + $0xddc] ss:$52 sps:$4 sm:$0xff]  }
 0x10e   :  { %7118 = vmatpush2.bf16.msra.mxu0 %v11079_v55  ;;  %v11172_v55 = vld [vmem:[#allocation2 + $0xc38] ss:$52 sps:$4 sm:$0xff]  }
 0x10f   :  { %7196 = vmatpush1.bf16.msra.mxu1 %v11082_v56  ;;  %7119 = vmatprep.subr.bf16.mxu0 %v11087_v57  ;;  %v11175_v56 = vld [vmem:[#allocation2 + $0xdd8] ss:$52 sps:$4 sm:$0xff]   ;;  %v11180_v57 = vld [vmem:[#allocation2 + $0xbd4] ss:$52 sps:$4 sm:$0xff]  }
 0x110   :  { %7197 = vmatprep.subr.bf16.mxu1 %v11090_v58  ;;  %v11183_v58 = vld [vmem:[#allocation2 + $0xd74] ss:$52 sps:$4 sm:$0xff]  }
 0x112   :  { %7120 = vmatpush2.bf16.msra.mxu0 %v11085_v59  ;;  %v11178_v59 = vld [vmem:[#allocation2 + $0xbd0] ss:$52 sps:$4 sm:$0xff]  }
 0x113   :  { %7198 = vmatpush1.bf16.msra.mxu1 %v11088_v60  ;;  %7121 = vmatprep.subr.bf16.mxu0 %v11093_v61  ;;  %v11181_v60 = vld [vmem:[#allocation2 + $0xd70] ss:$52 sps:$4 sm:$0xff]   ;;  %v11186_v61 = vld [vmem:[#allocation2 + $0xb6c] ss:$52 sps:$4 sm:$0xff]  }
 0x114   :  { %7199 = vmatprep.subr.bf16.mxu1 %v11096_v62  ;;  %v11189_v62 = vld [vmem:[#allocation2 + $0xd0c] ss:$52 sps:$4 sm:$0xff]  }
 0x116   :  { %7122 = vmatpush2.bf16.msra.mxu0 %v11091_v63  ;;  %v11184_v63 = vld [vmem:[#allocation2 + $0xb68] ss:$52 sps:$4 sm:$0xff]  }
 0x117   :  { %7200 = vmatpush2.bf16.msra.mxu1 %v11094_v0  ;;  %7123 = vmatprep.subr.bf16.mxu0 %v11099_v1  ;;  %v11187_v0 = vld [vmem:[#allocation2 + $0xd08] ss:$52 sps:$4 sm:$0xff]   ;;  %v11192_v1 = vld [vmem:[#allocation2 + $0xb04] ss:$52 sps:$4 sm:$0xff]  }
 0x118   :  { %7201 = vmatprep.subr.bf16.mxu1 %v11102_v2  ;;  %v11195_v2 = vld [vmem:[#allocation2 + $0x1324] ss:$52 sps:$4 sm:$0xff]  }
 0x11a   :  { %7124 = vmatpush2.bf16.msra.mxu0 %v11097_v3  ;;  %v11190_v3 = vld [vmem:[#allocation2 + $0xb00] ss:$52 sps:$4 sm:$0xff]  }
 0x11b   :  { %7202 = vmatpush2.bf16.msra.mxu1 %v11100_v4  ;;  %7125 = vmatprep.subr.bf16.mxu0 %v11105_v5  ;;  %v11193_v4 = vld [vmem:[#allocation2 + $0x1320] ss:$52 sps:$4 sm:$0xff]   ;;  %v11198_v5 = vld [vmem:[#allocation2 + $0xa9c] ss:$52 sps:$4 sm:$0xff]  }
 0x11c   :  { %7203 = vmatprep.subr.bf16.mxu1 %v11108_v6  ;;  %v11201_v6 = vld [vmem:[#allocation2 + $0x12bc] ss:$52 sps:$4 sm:$0xff]  }
 0x11e   :  { %7126 = vmatpush2.bf16.msra.mxu0 %v11103_v7  ;;  %v11196_v7 = vld [vmem:[#allocation2 + $0xa98] ss:$52 sps:$4 sm:$0xff]  }
 0x11f   :  { %7204 = vmatpush2.bf16.msra.mxu1 %v11106_v8  ;;  %7127 = vmatprep.subr.bf16.mxu0 %v11111_v9  ;;  %v11199_v8 = vld [vmem:[#allocation2 + $0x12b8] ss:$52 sps:$4 sm:$0xff]   ;;  %v11204_v9 = vld [vmem:[#allocation2 + $0xa34] ss:$52 sps:$4 sm:$0xff]  }
 0x120   :  { %7205 = vmatprep.subr.bf16.mxu1 %v11114_v10  ;;  %v11207_v10 = vld [vmem:[#allocation2 + $0x1254] ss:$52 sps:$4 sm:$0xff]  }
 0x122   :  { %7128 = vmatpush2.bf16.msra.mxu0 %v11109_v11  ;;  %v11202_v11 = vld [vmem:[#allocation2 + $0xa30] ss:$52 sps:$4 sm:$0xff]  }
 0x123   :  { %7206 = vmatpush2.bf16.msra.mxu1 %v11112_v12  ;;  %7226 = vmatprep.subr.bf16.mxu0 %v11123_v14  ;;  %v11205_v12 = vld [vmem:[#allocation2 + $0x1250] ss:$52 sps:$4 sm:$0xff]   ;;  %v11213_v14 = vld [vmem:[#allocation2 + $0x11ec] ss:$52 sps:$4 sm:$0xff]  }
 0x124   :  { %7207 = vmatprep.subr.bf16.mxu1 %v11120_v13  ;;  %v11210_v13 = vld [vmem:[#allocation2 + $0x9cc] ss:$52 sps:$4 sm:$0xff]  }
 0x125   :  { %7130 = vmatmul.mubr.bf16.vlgmr.msra.gmra.mxu0 %v11117_v15  ;;  %v11208_v15 = vld [vmem:[#allocation2 + $0x9c8] ss:$52 sps:$4 sm:$0xff]  }
 0x126   :  { %7227 = vmatpush1.bf16.msra.mxu0 %v11121_v17  ;;  %7258 = vmatprep.mubr.bf16.mxu0 %v12467_v25  ;;  %v11216_v17 = vld [vmem:[#allocation2 + $0x1184] ss:$52 sps:$4 sm:$0xff]  }
 0x127   :  { %7208 = vmatpush2.bf16.msra.mxu1 %v11118_v16  ;;  %7228 = vmatprep.subr.bf16.mxu0 %v11129_v20  ;;  %v11211_v16 = vld [vmem:[#allocation2 + $0x11e8] ss:$52 sps:$4 sm:$0xff]   ;;  %v11214_v20 = vld [vmem:[#allocation2 + $0x1180] ss:$52 sps:$4 sm:$0xff]  }
 0x128   :  { %7209 = vmatprep.subr.bf16.mxu1 %v11126_v18  ;;  %v11219_v18 = vld [vmem:[#allocation2 + $0x1664] ss:$52 sps:$4 sm:$0xff]  }
 0x12a   :  { %7229 = vmatpush1.bf16.msra.mxu0 %v11127_v22  ;;  %v11222_v22 = vld [vmem:[#allocation2 + $0x111c] ss:$52 sps:$4 sm:$0xff]  }
 0x12b   :  { %7210 = vmatpush2.bf16.msra.mxu1 %v11124_v21  ;;  %7230 = vmatprep.subr.bf16.mxu0 %v11135_v24  ;;  %v11217_v21 = vld [vmem:[#allocation2 + $0x1660] ss:$52 sps:$4 sm:$0xff]  }
 0x12c   :  { %7211 = vmatprep.subr.bf16.mxu1 %v11132_v23  ;;  %v11225_v23 = vld [vmem:[#allocation2 + $0x15fc] ss:$52 sps:$4 sm:$0xff]  }
 0x12e   :  { %7231 = vmatpush1.bf16.msra.mxu0 %v11133_v27  ;;  %v11220_v27 = vld [vmem:[#allocation2 + $0x1118] ss:$52 sps:$4 sm:$0xff]  }
 0x12f   :  { %7212 = vmatpush2.bf16.msra.mxu1 %v11130_v26  ;;  %7232 = vmatprep.subr.bf16.mxu0 %v11141_v29  ;;  %v12469_v26 = vld [vmem:[%s13336_s0 + $0x8] ss:$44 sps:$4 sm:$0xff]   ;;  %v11223_v29 = vld [vmem:[#allocation2 + $0x15f8] ss:$52 sps:$4 sm:$0xff]  }
 0x130   :  { %7213 = vmatprep.subr.bf16.mxu1 %v11138_v28 }
 0x132   :  { %7233 = vmatpush1.bf16.msra.mxu0 %v11139_v31 }
 0x133   :  { %7214 = vmatpush2.bf16.msra.mxu1 %v11136_v30  ;;  %7234 = vmatprep.subr.bf16.mxu0 %v11144_v32  ;;  %v11228_v30 = vld [vmem:[#allocation2 + $0x10b4] ss:$52 sps:$4 sm:$0xff]  }
 0x134   :  { %7269 = vmatprep.subr.bf16.mxu1 %v11147_v33  ;;  %v11231_v33 = vld [vmem:[#allocation2 + $0x1594] ss:$52 sps:$4 sm:$0xff]  }
 0x136   :  { %7216 = vmatmul.mubr.bf16.vlgmr.msra.gmra.mxu1 %v12468_v39  ;;  %7235 = vmatpush1.bf16.msra.mxu0 %v11142_v35  ;;  %v11226_v39 = vld [vmem:[#allocation2 + $0x10b0] ss:$52 sps:$4 sm:$0xff]  }
 0x137   :  { %7270 = vmatpush1.bf16.msra.mxu1 %v11145_v36  ;;  %7236 = vmatprep.subr.bf16.mxu0 %v11150_v37  ;;  %v12470_v36 = vld [vmem:[%s13336_s0 + $0x1c] ss:$44 sps:$4 sm:$0xff]  }
 0x138   :  { %7271 = vmatprep.subr.bf16.mxu1 %v11153_v38  ;;  %7301 = vmatprep.mubr.bf16.mxu1 %v12797_v34  ;;  %v11169_v34 = vld [vmem:[#allocation2 + $0xe40] ss:$52 sps:$4 sm:$0xff]  }
 0x13a   :  { %7237 = vmatpush1.bf16.msra.mxu0 %v11148_v40 }
 0x13b   :  { %7272 = vmatpush1.bf16.msra.mxu1 %v11151_v41  ;;  %7238 = vmatprep.subr.bf16.mxu0 %v11156_v42  ;;  %v11229_v41 = vld [vmem:[#allocation2 + $0x1590] ss:$52 sps:$4 sm:$0xff]   ;;  %v11234_v42 = vld [vmem:[#allocation2 + $0x104c] ss:$52 sps:$4 sm:$0xff]  }
 0x13c   :  { %7273 = vmatprep.subr.bf16.mxu1 %v11159_v43 }
 0x13e   :  { %7239 = vmatpush1.bf16.msra.mxu0 %v11154_v44 }
 0x13f   :  { %7274 = vmatpush1.bf16.msra.mxu1 %v11157_v45  ;;  %7240 = vmatprep.subr.bf16.mxu0 %v11162_v46  ;;  %v11237_v45 = vld [vmem:[#allocation2 + $0x152c] ss:$52 sps:$4 sm:$0xff]  }
 0x140   :  { %7275 = vmatprep.subr.bf16.mxu1 %v11165_v47  ;;  %v11232_v47 = vld [vmem:[#allocation2 + $0x1048] ss:$52 sps:$4 sm:$0xff]  }
 0x142   :  { %7241 = vmatpush1.bf16.msra.mxu0 %v11160_v48  ;;  %v11235_v48 = vld [vmem:[#allocation2 + $0x1528] ss:$52 sps:$4 sm:$0xff]  }
 0x143   :  { %7276 = vmatpush1.bf16.msra.mxu1 %v11163_v49  ;;  %7242 = vmatprep.subr.bf16.mxu0 %v11168_v50  ;;  %v11240_v49 = vld [vmem:[#allocation2 + $0x14c4] ss:$52 sps:$4 sm:$0xff]  }
 0x144   :  { %7277 = vmatprep.subr.bf16.mxu1 %v11171_v51  ;;  %v11243_v50 = vld [vmem:[#allocation2 + $0x1ce4] ss:$52 sps:$4 sm:$0xff]   ;;  %v11238_v51 = vld [vmem:[#allocation2 + $0x14c0] ss:$52 sps:$4 sm:$0xff]  }
 0x146   :  { %7243 = vmatpush2.bf16.msra.mxu0 %v11166_v52  ;;  %v11241_v52 = vld [vmem:[#allocation2 + $0x1ce0] ss:$52 sps:$4 sm:$0xff]  }
 0x147   :  { %7278 = vmatpush1.bf16.msra.mxu1 %v11169_v34  ;;  %7244 = vmatprep.subr.bf16.mxu0 %v11174_v53  ;;  %v11246_v34 = vld [vmem:[#allocation2 + $0x145c] ss:$52 sps:$4 sm:$0xff]  }
 0x148   :  { %7279 = vmatprep.subr.bf16.mxu1 %v11177_v54  ;;  %v11249_v53 = vld [vmem:[#allocation2 + $0x1c7c] ss:$52 sps:$4 sm:$0xff]  }
 0x149   :  { %v12471_v54 = vld [vmem:[%s13336_s0 + $0x10] ss:$44 sps:$4 sm:$0xff]  }
 0x14a   :  { %7245 = vmatpush2.bf16.msra.mxu0 %v11172_v55  ;;  %v11244_v55 = vld [vmem:[#allocation2 + $0x1458] ss:$52 sps:$4 sm:$0xff]  }
 0x14b   :  { %7280 = vmatpush1.bf16.msra.mxu1 %v11175_v56  ;;  %7246 = vmatprep.subr.bf16.mxu0 %v11180_v57  ;;  %v11247_v56 = vld [vmem:[#allocation2 + $0x1c78] ss:$52 sps:$4 sm:$0xff]   ;;  %v11252_v57 = vld [vmem:[#allocation2 + $0x13f4] ss:$52 sps:$4 sm:$0xff]  }
 0x14c   :  { %7281 = vmatprep.subr.bf16.mxu1 %v11183_v58  ;;  %v11255_v58 = vld [vmem:[#allocation2 + $0x1c14] ss:$52 sps:$4 sm:$0xff]  }
 0x14e   :  { %7247 = vmatpush2.bf16.msra.mxu0 %v11178_v59  ;;  %v12472_v59 = vld [vmem:[%s13336_s0 + $0x24] ss:$44 sps:$4 sm:$0xff]  }
 0x14f   :  { %7282 = vmatpush1.bf16.msra.mxu1 %v11181_v60  ;;  %7248 = vmatprep.subr.bf16.mxu0 %v11186_v61  ;;  %v11250_v60 = vld [vmem:[#allocation2 + $0x13f0] ss:$52 sps:$4 sm:$0xff]  }
 0x150   :  { %7283 = vmatprep.subr.bf16.mxu1 %v11189_v62  ;;  %v11253_v61 = vld [vmem:[#allocation2 + $0x1c10] ss:$52 sps:$4 sm:$0xff]   ;;  %v11258_v62 = vld [vmem:[#allocation2 + $0x138c] ss:$52 sps:$4 sm:$0xff]  }
 0x152   :  { %7249 = vmatpush2.bf16.msra.mxu0 %v11184_v63  ;;  %v11261_v63 = vld [vmem:[#allocation2 + $0x1bac] ss:$52 sps:$4 sm:$0xff]  }
 0x153   :  { %7284 = vmatpush1.bf16.msra.mxu1 %v11187_v0  ;;  %7250 = vmatprep.subr.bf16.mxu0 %v11192_v1  ;;  %v11256_v0 = vld [vmem:[#allocation2 + $0x1388] ss:$52 sps:$4 sm:$0xff]  }
 0x154   :  { %7285 = vmatprep.subr.bf16.mxu1 %v11195_v2  ;;  %v11259_v1 = vld [vmem:[#allocation2 + $0x1ba8] ss:$52 sps:$4 sm:$0xff]   ;;  %v11264_v2 = vld [vmem:[#allocation2 + $0x19a4] ss:$52 sps:$4 sm:$0xff]  }
 0x156   :  { %7251 = vmatpush2.bf16.msra.mxu0 %v11190_v3  ;;  %v11267_v3 = vld [vmem:[#allocation2 + $0x1b44] ss:$52 sps:$4 sm:$0xff]  }
 0x157   :  { %7286 = vmatpush2.bf16.msra.mxu1 %v11193_v4  ;;  %7252 = vmatprep.subr.bf16.mxu0 %v11198_v5  ;;  %v11262_v4 = vld [vmem:[#allocation2 + $0x19a0] ss:$52 sps:$4 sm:$0xff]  }
 0x158   :  { %7287 = vmatprep.subr.bf16.mxu1 %v11201_v6  ;;  %v11265_v5 = vld [vmem:[#allocation2 + $0x1b40] ss:$52 sps:$4 sm:$0xff]   ;;  %v11270_v6 = vld [vmem:[#allocation2 + $0x193c] ss:$52 sps:$4 sm:$0xff]  }
 0x15a   :  { %7253 = vmatpush2.bf16.msra.mxu0 %v11196_v7  ;;  %v11273_v7 = vld [vmem:[#allocation2 + $0x1adc] ss:$52 sps:$4 sm:$0xff]  }
 0x15b   :  { %7288 = vmatpush2.bf16.msra.mxu1 %v11199_v8  ;;  %7254 = vmatprep.subr.bf16.mxu0 %v11204_v9  ;;  %v11268_v8 = vld [vmem:[#allocation2 + $0x1938] ss:$52 sps:$4 sm:$0xff]  }
 0x15c   :  { %7289 = vmatprep.subr.bf16.mxu1 %v11207_v10  ;;  %v11271_v9 = vld [vmem:[#allocation2 + $0x1ad8] ss:$52 sps:$4 sm:$0xff]   ;;  %v11276_v10 = vld [vmem:[#allocation2 + $0x18d4] ss:$52 sps:$4 sm:$0xff]  }
 0x15e   :  { %7255 = vmatpush2.bf16.msra.mxu0 %v11202_v11  ;;  %v11279_v11 = vld [vmem:[#allocation2 + $0x1a74] ss:$52 sps:$4 sm:$0xff]  }
 0x15f   :  { %7290 = vmatpush2.bf16.msra.mxu1 %v11205_v12  ;;  %7256 = vmatprep.subr.bf16.mxu0 %v11210_v13  ;;  %v11274_v12 = vld [vmem:[#allocation2 + $0x18d0] ss:$52 sps:$4 sm:$0xff]  }
 0x160   :  { %7291 = vmatprep.subr.bf16.mxu1 %v11213_v14  ;;  %v11277_v13 = vld [vmem:[#allocation2 + $0x1a70] ss:$52 sps:$4 sm:$0xff]   ;;  %v11282_v14 = vld [vmem:[#allocation2 + $0x186c] ss:$52 sps:$4 sm:$0xff]  }
 0x162   :  { %7257 = vmatpush2.bf16.msra.mxu0 %v11208_v15  ;;  %v11285_v15 = vld [vmem:[#allocation2 + $0x1a0c] ss:$52 sps:$4 sm:$0xff]  }
 0x163   :  { %7292 = vmatpush2.bf16.msra.mxu1 %v11211_v16  ;;  %7312 = vmatprep.subr.bf16.mxu0 %v11219_v18  ;;  %v11280_v16 = vld [vmem:[#allocation2 + $0x1868] ss:$52 sps:$4 sm:$0xff]   ;;  %v11288_v18 = vld [vmem:[#allocation2 + $0x1804] ss:$52 sps:$4 sm:$0xff]  }
 0x164   :  { %7293 = vmatprep.subr.bf16.mxu1 %v11216_v17  ;;  %v11283_v17 = vld [vmem:[#allocation2 + $0x1a08] ss:$52 sps:$4 sm:$0xff]  }
 0x165   :  { %v6959_v24 = vpop.f32.mrf.mxu0  ;;  %7259 = vmatmul.mubr.bf16.vlgmr.msra.gmra.mxu0 %v12469_v26  ;;  %v11295_v26 = vld [vmem:[#allocation2 + $0x1fb8] ss:$52 sps:$4 sm:$0xff]  }
 0x166   :  { %v7002_v25 = vpop.f32.mrf.mxu1  ;;  %7313 = vmatpush1.bf16.msra.mxu0 %v11217_v21  ;;  %7344 = vmatprep.mubr.bf16.mxu0 %v12470_v36  ;;  %v11286_v21 = vld [vmem:[#allocation2 + $0x1800] ss:$52 sps:$4 sm:$0xff]   ;;  %v11304_v36 = vld [vmem:[#allocation2 + $0x16c8] ss:$52 sps:$4 sm:$0xff]  }
 0x167   :  { %v12831_v28 = vadd.f32 %v7002_v25, %v6959_v24  ;;  %7294 = vmatpush2.bf16.msra.mxu1 %v11214_v20  ;;  %v6961_v31 = vpop.f32.mrf.mxu0  ;;  %7314 = vmatprep.subr.bf16.mxu0 %v11225_v23  ;;  %v11291_v20 = vld [vmem:[#allocation2 + $0x2024] ss:$52 sps:$4 sm:$0xff]   ;;  %v11294_v23 = vld [vmem:[#allocation2 + $0x179c] ss:$52 sps:$4 sm:$0xff]  }
 0x168   :  { %v7004_v32 = vpop.f32.mrf.mxu1  ;;  %7295 = vmatprep.subr.bf16.mxu1 %v11222_v22  ;;  %v11289_v22 = vld [vmem:[#allocation2 + $0x2020] ss:$52 sps:$4 sm:$0xff]   ;;  %v11297_v24 = vld [vmem:[#allocation2 + $0x1fbc] ss:$52 sps:$4 sm:$0xff]   ;;  %v11292_v25 = vld [vmem:[#allocation2 + $0x1798] ss:$52 sps:$4 sm:$0xff]  }
 0x169   :  { %v12833_v35 = vadd.f32 %v7004_v32, %v6961_v31  ;;  %v6963_v37 = vpop.f32.mrf.mxu0  ;;  %v11301_v31 = vld [vmem:[#allocation2 + $0x1f50] ss:$52 sps:$4 sm:$0xff]   ;;  %v11306_v32 = vld [vmem:[#allocation2 + $0x16cc] ss:$52 sps:$4 sm:$0xff]  }
 0x16a   :  { %v7006_v38 = vpop.f32.mrf.mxu1  ;;  %7315 = vmatpush1.bf16.msra.mxu0 %v11223_v29  ;;  %v11303_v29 = vld [vmem:[#allocation2 + $0x1f54] ss:$52 sps:$4 sm:$0xff]  }
 0x16b   :  { %v12838_v40 = vadd.f32 %v7006_v38, %v6963_v37  ;;  %7296 = vmatpush2.bf16.msra.mxu1 %v11220_v27  ;;  %v6965_v43 = vpop.f32.mrf.mxu0  ;;  %7316 = vmatprep.subr.bf16.mxu0 %v11231_v33  ;;  %v11300_v27 = vld [vmem:[#allocation2 + $0x1734] ss:$52 sps:$4 sm:$0xff]   ;;  %v11309_v33 = vld [vmem:[#allocation2 + $0x1eec] ss:$52 sps:$4 sm:$0xff]   ;;  %v11312_v38 = vld [vmem:[#allocation2 + $0x1e84] ss:$52 sps:$4 sm:$0xff]  }
 0x16c   :  { %v7008_v44 = vpop.f32.mrf.mxu1  ;;  %7297 = vmatprep.subr.bf16.mxu1 %v11228_v30  ;;  %v11298_v30 = vld [vmem:[#allocation2 + $0x1730] ss:$52 sps:$4 sm:$0xff]   ;;  %v11307_v37 = vld [vmem:[#allocation2 + $0x1ee8] ss:$52 sps:$4 sm:$0xff]  }
 0x16d   :  { %v12840_v46 = vadd.f32 %v7008_v44, %v6965_v43  ;;  %v11318_v43 = vld [vmem:[#allocation2 + $0x1e1c] ss:$52 sps:$4 sm:$0xff]   ;;  %v11321_v44 = vld [vmem:[#allocation2 + $0x284] ss:$52 sps:$4 sm:$0xff]  }
 0x16e   :  { %7317 = vmatpush1.bf16.msra.mxu0 %v11229_v41  ;;  %v11310_v41 = vld [vmem:[#allocation2 + $0x1e80] ss:$52 sps:$4 sm:$0xff]  }
 0x16f   :  { %7298 = vmatpush2.bf16.msra.mxu1 %v11226_v39  ;;  %7318 = vmatprep.subr.bf16.mxu0 %v11237_v45  ;;  %v11315_v39 = vld [vmem:[#allocation2 + $0x2ec] ss:$52 sps:$4 sm:$0xff]  }
 0x170   :  { %7299 = vmatprep.subr.bf16.mxu1 %v11234_v42  ;;  %v11313_v42 = vld [vmem:[#allocation2 + $0x2e8] ss:$52 sps:$4 sm:$0xff]   ;;  %v11316_v45 = vld [vmem:[#allocation2 + $0x1e18] ss:$52 sps:$4 sm:$0xff]  }
 0x172   :  { %7319 = vmatpush1.bf16.msra.mxu0 %v11235_v48 }
 0x173   :  { %7300 = vmatpush2.bf16.msra.mxu1 %v11232_v47  ;;  %7320 = vmatprep.subr.bf16.mxu0 %v11240_v49  ;;  %v11319_v47 = vld [vmem:[#allocation2 + $0x280] ss:$52 sps:$4 sm:$0xff]  }
 0x174   :  { %7355 = vmatprep.subr.bf16.mxu1 %v11243_v50  ;;  %v12473_v50 = vld [vmem:[%s13336_s0 + $0x18] ss:$44 sps:$4 sm:$0xff]  }
 0x176   :  { %7302 = vmatmul.mubr.bf16.vlgmr.msra.gmra.mxu1 %v12471_v54  ;;  %7321 = vmatpush1.bf16.msra.mxu0 %v11238_v51  ;;  %v11327_v54 = vld [vmem:[#allocation2 + $0x21c] ss:$52 sps:$4 sm:$0xff]  }
 0x177   :  { %7356 = vmatpush1.bf16.msra.mxu1 %v11241_v52  ;;  %7322 = vmatprep.subr.bf16.mxu0 %v11246_v34 }
 0x178   :  { %7357 = vmatprep.subr.bf16.mxu1 %v11249_v53  ;;  %7387 = vmatprep.mubr.bf16.mxu1 %v12472_v59  ;;  %v11324_v53 = vld [vmem:[#allocation2 + $0x1db4] ss:$52 sps:$4 sm:$0xff]   ;;  %v12474_v59 = vld [vmem:[%s13336_s0 + $0x4] ss:$44 sps:$4 sm:$0xff]  }
 0x17a   :  { %7323 = vmatpush1.bf16.msra.mxu0 %v11244_v55 }
 0x17b   :  { %7358 = vmatpush1.bf16.msra.mxu1 %v11247_v56  ;;  %7324 = vmatprep.subr.bf16.mxu0 %v11252_v57  ;;  %v11322_v57 = vld [vmem:[#allocation2 + $0x1db0] ss:$52 sps:$4 sm:$0xff]  }
 0x17c   :  { %7359 = vmatprep.subr.bf16.mxu1 %v11255_v58  ;;  %v11325_v58 = vld [vmem:[#allocation2 + $0x218] ss:$52 sps:$4 sm:$0xff]  }
 0x17e   :  { %7325 = vmatpush1.bf16.msra.mxu0 %v11250_v60 }
 0x17f   :  { %7360 = vmatpush1.bf16.msra.mxu1 %v11253_v61  ;;  %7326 = vmatprep.subr.bf16.mxu0 %v11258_v62 }
 0x180   :  { %7361 = vmatprep.subr.bf16.mxu1 %v11261_v63 }
 0x182   :  { %7327 = vmatpush1.bf16.msra.mxu0 %v11256_v0  ;;  %v11330_v0 = vld [vmem:[#allocation2 + $0x1d4c] ss:$52 sps:$4 sm:$0xff]  }
 0x183   :  { %7362 = vmatpush1.bf16.msra.mxu1 %v11259_v1  ;;  %7328 = vmatprep.subr.bf16.mxu0 %v11264_v2 }
 0x184   :  { %7363 = vmatprep.subr.bf16.mxu1 %v11267_v3 }
 0x186   :  { %7329 = vmatpush2.bf16.msra.mxu0 %v11262_v4 }
 0x187   :  { %7364 = vmatpush1.bf16.msra.mxu1 %v11265_v5  ;;  %7330 = vmatprep.subr.bf16.mxu0 %v11270_v6  ;;  %v11328_v5 = vld [vmem:[#allocation2 + $0x1d48] ss:$52 sps:$4 sm:$0xff]   ;;  %v11331_v6 = vld [vmem:[#allocation2 + $0x1b0] ss:$52 sps:$4 sm:$0xff]  }
 0x188   :  { %7365 = vmatprep.subr.bf16.mxu1 %v11273_v7  ;;  %v11339_v7 = vld [vmem:[#allocation2 + $0x14c] ss:$52 sps:$4 sm:$0xff]  }
 0x18a   :  { %7331 = vmatpush2.bf16.msra.mxu0 %v11268_v8  ;;  %v11334_v8 = vld [vmem:[#allocation2 + $0x21c0] ss:$52 sps:$4 sm:$0xff]  }
 0x18b   :  { %7366 = vmatpush1.bf16.msra.mxu1 %v11271_v9  ;;  %7332 = vmatprep.subr.bf16.mxu0 %v11276_v10  ;;  %v11337_v9 = vld [vmem:[#allocation2 + $0x148] ss:$52 sps:$4 sm:$0xff]  }
 0x18c   :  { %7367 = vmatprep.subr.bf16.mxu1 %v11279_v11  ;;  %v11342_v10 = vld [vmem:[#allocation2 + $0x215c] ss:$52 sps:$4 sm:$0xff]   ;;  %v11345_v11 = vld [vmem:[#allocation2 + $0xe4] ss:$52 sps:$4 sm:$0xff]  }
 0x18e   :  { %7333 = vmatpush2.bf16.msra.mxu0 %v11274_v12  ;;  %v11343_v12 = vld [vmem:[#allocation2 + $0xe0] ss:$52 sps:$4 sm:$0xff]  }
 0x18f   :  { %7368 = vmatpush1.bf16.msra.mxu1 %v11277_v13  ;;  %7334 = vmatprep.subr.bf16.mxu0 %v11282_v14  ;;  %v12475_v13 = vld [vmem:[%s13336_s0 + $0x20] ss:$44 sps:$4 sm:$0xff]   ;;  %v11348_v14 = vld [vmem:[#allocation2 + $0x20f4] ss:$52 sps:$4 sm:$0xff]  }
 0x190   :  { %7369 = vmatprep.subr.bf16.mxu1 %v11285_v15  ;;  %v11351_v15 = vld [vmem:[#allocation2 + $0x7c] ss:$52 sps:$4 sm:$0xff]  }
 0x192   :  { %7335 = vmatpush2.bf16.msra.mxu0 %v11280_v16  ;;  %v11346_v16 = vld [vmem:[#allocation2 + $0x20f0] ss:$52 sps:$4 sm:$0xff]  }
 0x193   :  { %7370 = vmatpush1.bf16.msra.mxu1 %v11283_v17  ;;  %7336 = vmatprep.subr.bf16.mxu0 %v11288_v18  ;;  %v11349_v17 = vld [vmem:[#allocation2 + $0x78] ss:$52 sps:$4 sm:$0xff]  }
 0x194   :  { %7371 = vmatprep.subr.bf16.mxu1 %v11291_v20  ;;  %v11354_v18 = vld [vmem:[#allocation2 + $0x208c] ss:$52 sps:$4 sm:$0xff]   ;;  %v11357_v20 = vld [vmem:[#allocation2 + $0x14] ss:$52 sps:$4 sm:$0xff]  }
 0x196   :  { %7337 = vmatpush2.bf16.msra.mxu0 %v11286_v21  ;;  %v11352_v21 = vld [vmem:[#allocation2 + $0x2088] ss:$52 sps:$4 sm:$0xff]  }
 0x197   :  { %7372 = vmatpush2.bf16.msra.mxu1 %v11289_v22  ;;  %7338 = vmatprep.subr.bf16.mxu0 %v11294_v23  ;;  %v11355_v22 = vld [vmem:[#allocation2 + $0x10] ss:$52 sps:$4 sm:$0xff]   ;;  %v11360_v23 = vld [vmem:[#allocation2 + $0x62c] ss:$52 sps:$4 sm:$0xff]  }
 0x198   :  { %7373 = vmatprep.subr.bf16.mxu1 %v11297_v24  ;;  %v11363_v24 = vld [vmem:[#allocation2 + $0x96c] ss:$52 sps:$4 sm:$0xff]  }
 0x19a   :  { %7339 = vmatpush2.bf16.msra.mxu0 %v11292_v25  ;;  %v11358_v25 = vld [vmem:[#allocation2 + $0x628] ss:$52 sps:$4 sm:$0xff]  }
 0x19b   :  { %7374 = vmatpush2.bf16.msra.mxu1 %v11295_v26  ;;  %7340 = vmatprep.subr.bf16.mxu0 %v11300_v27  ;;  %v11361_v26 = vld [vmem:[#allocation2 + $0x968] ss:$52 sps:$4 sm:$0xff]   ;;  %v11366_v27 = vld [vmem:[#allocation2 + $0x5c4] ss:$52 sps:$4 sm:$0xff]  }
 0x19c   :  { %7375 = vmatprep.subr.bf16.mxu1 %v11303_v29  ;;  %v11369_v29 = vld [vmem:[#allocation2 + $0x904] ss:$52 sps:$4 sm:$0xff]  }
 0x19e   :  { %7341 = vmatpush2.bf16.msra.mxu0 %v11298_v30  ;;  %v12476_v30 = vld [vmem:[%s13336_s0 + $0x28] ss:$44 sps:$4 sm:$0xff]  }
 0x19f   :  { %7376 = vmatpush2.bf16.msra.mxu1 %v11301_v31  ;;  %7342 = vmatprep.subr.bf16.mxu0 %v11306_v32  ;;  %v11364_v31 = vld [vmem:[#allocation2 + $0x5c0] ss:$52 sps:$4 sm:$0xff]  }
 0x1a0   :  { %7377 = vmatprep.subr.bf16.mxu1 %v11309_v33  ;;  %v11367_v32 = vld [vmem:[#allocation2 + $0x900] ss:$52 sps:$4 sm:$0xff]   ;;  %v11372_v33 = vld [vmem:[#allocation2 + $0x55c] ss:$52 sps:$4 sm:$0xff]  }
 0x1a2   :  { %7343 = vmatpush2.bf16.msra.mxu0 %v11304_v36  ;;  %v11375_v36 = vld [vmem:[#allocation2 + $0x89c] ss:$52 sps:$4 sm:$0xff]  }
 0x1a3   :  { %7378 = vmatpush2.bf16.msra.mxu1 %v11307_v37  ;;  %7441 = vmatprep.subr.bf16.mxu0 %v11315_v39  ;;  %v12477_v37 = vld [vmem:[%s13336_s0 + $0xc] ss:$44 sps:$4 sm:$0xff]  }
 0x1a4   :  { %7379 = vmatprep.subr.bf16.mxu1 %v11312_v38  ;;  %v11370_v38 = vld [vmem:[#allocation2 + $0x558] ss:$52 sps:$4 sm:$0xff]  }
 0x1a5   :  { %v7045_v48 = vpop.f32.mrf.mxu0  ;;  %7345 = vmatmul.mubr.bf16.vlgmr.msra.gmra.mxu0 %v12473_v50  ;;  %v11373_v39 = vld [vmem:[#allocation2 + $0x898] ss:$52 sps:$4 sm:$0xff]  }
 0x1a6   :  { %v7088_v49 = vpop.f32.mrf.mxu1  ;;  %v7046_v51 = vadd.f32 %v7045_v48, %v12831_v28  ;;  %7442 = vmatpush1.bf16.msra.mxu0 %v11313_v42  ;;  %7473 = vmatprep.mubr.bf16.mxu0 %v12474_v59  ;;  %v11381_v42 = vld [vmem:[#allocation2 + $0x834] ss:$52 sps:$4 sm:$0xff]   ;;  %v11390_v50 = vld [vmem:[#allocation2 + $0x424] ss:$52 sps:$4 sm:$0xff]  }
 0x1a7   :  { %7380 = vmatpush2.bf16.msra.mxu1 %v11310_v41  ;;  %v7047_v52 = vpop.f32.mrf.mxu0  ;;  %7443 = vmatprep.subr.bf16.mxu0 %v11321_v44  ;;  %v11378_v41 = vld [vmem:[#allocation2 + $0x4f4] ss:$52 sps:$4 sm:$0xff]   ;;  %v11379_v44 = vld [vmem:[#allocation2 + $0x830] ss:$52 sps:$4 sm:$0xff]  }
 0x1a8   :  { %v7090_v34 = vpop.f32.mrf.mxu1  ;;  %7381 = vmatprep.subr.bf16.mxu1 %v11318_v43  ;;  %v12852_v55 = vadd.f32 %v7088_v49, %v7046_v51  ;;  %v7048_v56 = vadd.f32 %v7047_v52, %v12833_v35  ;;  %v11333_v35 = vld [vmem:[#allocation2 + $0x1b4] ss:$52 sps:$4 sm:$0xff]   ;;  %v11376_v43 = vld [vmem:[#allocation2 + $0x4f0] ss:$52 sps:$4 sm:$0xff]  }
 0x1a9   :  { %v7049_v28 = vpop.f32.mrf.mxu0  ;;  %v11382_v48 = vld [vmem:[#allocation2 + $0x488] ss:$52 sps:$4 sm:$0xff]   ;;  %v11393_v51 = vld [vmem:[#allocation2 + $0x764] ss:$52 sps:$4 sm:$0xff]   ;;  %v11388_v52 = vld [vmem:[#allocation2 + $0x420] ss:$52 sps:$4 sm:$0xff]  }
 0x1aa   :  { %v7092_v60 = vpop.f32.mrf.mxu1  ;;  %v12858_v61 = vadd.f32 %v7090_v34, %v7048_v56  ;;  %v7050_v62 = vadd.f32 %v7049_v28, %v12838_v40  ;;  %7444 = vmatpush1.bf16.msra.mxu0 %v11319_v47  ;;  %v11336_v40 = vld [vmem:[#allocation2 + $0x21c4] ss:$52 sps:$4 sm:$0xff]   ;;  %v11387_v47 = vld [vmem:[#allocation2 + $0x7cc] ss:$52 sps:$4 sm:$0xff]   ;;  %v11385_v49 = vld [vmem:[#allocation2 + $0x7c8] ss:$52 sps:$4 sm:$0xff]  }
 0x1ab   :  { %7382 = vmatpush2.bf16.msra.mxu1 %v11316_v45  ;;  %v7051_v63 = vpop.f32.mrf.mxu0  ;;  %7445 = vmatprep.subr.bf16.mxu0 %v11327_v54  ;;  %v11384_v45 = vld [vmem:[#allocation2 + $0x48c] ss:$52 sps:$4 sm:$0xff]   ;;  %v11399_v54 = vld [vmem:[#allocation2 + $0x6fc] ss:$52 sps:$4 sm:$0xff]   ;;  %v11405_v59 = vld [vmem:[#allocation2 + $0x694] ss:$52 sps:$4 sm:$0xff]  }
 0x1ac   :  { %7383 = vmatprep.subr.bf16.mxu1 %v11324_v53  ;;  %v12861_v1 = vadd.f32 %v7092_v60, %v7050_v62  ;;  %v7052_v2 = vadd.f32 %v7051_v63, %v12840_v46  ;;  %v7094_v3 = vpop.f32.mrf.mxu1  ;;  %v11340_v46 = vld [vmem:[#allocation2 + $0x2158] ss:$52 sps:$4 sm:$0xff]   ;;  %v11391_v34 = vld [vmem:[#allocation2 + $0x760] ss:$52 sps:$4 sm:$0xff]   ;;  %v11396_v53 = vld [vmem:[#allocation2 + $0x3bc] ss:$52 sps:$4 sm:$0xff]  }
 0x1ad   :  { %v11394_v56 = vld [vmem:[#allocation2 + $0x3b8] ss:$52 sps:$4 sm:$0xff]   ;;  %v11400_v28 = vld [vmem:[#allocation2 + $0x350] ss:$52 sps:$4 sm:$0xff]  }
 0x1ae   :  { %v12864_v4 = vadd.f32 %v7094_v3, %v7052_v2  ;;  %7446 = vmatpush1.bf16.msra.mxu0 %v11325_v58  ;;  %v11402_v58 = vld [vmem:[#allocation2 + $0x354] ss:$52 sps:$4 sm:$0xff]   ;;  %v11403_v60 = vld [vmem:[#allocation2 + $0x690] ss:$52 sps:$4 sm:$0xff]   ;;  %v11408_v62 = vld [vmem:[#allocation2 + $0xcac] ss:$52 sps:$4 sm:$0xff]  }
 0x1af   :  { %7384 = vmatpush2.bf16.msra.mxu1 %v11322_v57  ;;  %7447 = vmatprep.subr.bf16.mxu0 %v11333_v35  ;;  %v11397_v57 = vld [vmem:[#allocation2 + $0x6f8] ss:$52 sps:$4 sm:$0xff]   ;;  %v11409_v35 = vld [vmem:[#allocation2 + $0xfe8] ss:$52 sps:$4 sm:$0xff]  }
 0x1b0   :  { %7385 = vmatprep.subr.bf16.mxu1 %v11330_v0  ;;  %v11411_v63 = vld [vmem:[#allocation2 + $0xfec] ss:$52 sps:$4 sm:$0xff]   ;;  %v11406_v0 = vld [vmem:[#allocation2 + $0xca8] ss:$52 sps:$4 sm:$0xff]   ;;  %v11414_v3 = vld [vmem:[#allocation2 + $0xc44] ss:$52 sps:$4 sm:$0xff]  }
 0x1b2   :  { %7448 = vmatpush1.bf16.msra.mxu0 %v11331_v6  ;;  %v11412_v6 = vld [vmem:[#allocation2 + $0xc40] ss:$52 sps:$4 sm:$0xff]  }
 0x1b3   :  { %7386 = vmatpush2.bf16.msra.mxu1 %v11328_v5  ;;  %7449 = vmatprep.subr.bf16.mxu0 %v11339_v7  ;;  %v11417_v5 = vld [vmem:[#allocation2 + $0xf84] ss:$52 sps:$4 sm:$0xff]  }
 0x1b4   :  { %7406 = vmatprep.subr.bf16.mxu1 %v11336_v40  ;;  %v11415_v40 = vld [vmem:[#allocation2 + $0xf80] ss:$52 sps:$4 sm:$0xff]  }
 0x1b6   :  { %7388 = vmatmul.mubr.bf16.vlgmr.msra.gmra.mxu1 %v12475_v13  ;;  %7450 = vmatpush1.bf16.msra.mxu0 %v11337_v9  ;;  %v7174_v2 = vpop.f32.mrf.mxu1  ;;  %v12478_v9 = vld [vmem:[%s13336_s0] ss:$44 sps:$4 sm:$0xff]  }
 0x1b7   :  { %7407 = vmatpush1.bf16.msra.mxu1 %v11334_v8  ;;  %7451 = vmatprep.subr.bf16.mxu0 %v11345_v11 }
 0x1b8   :  { %7408 = vmatprep.subr.bf16.mxu1 %v11342_v10  ;;  %7430 = vmatprep.mubr.bf16.mxu1 %v12700_v19  ;;  %v7176_v7 = vpop.f32.mrf.mxu1 }
 0x1ba   :  { %7452 = vmatpush1.bf16.msra.mxu0 %v11343_v12  ;;  %v11423_v12 = vld [vmem:[#allocation2 + $0xf1c] ss:$52 sps:$4 sm:$0xff]  }
 0x1bb   :  { %7409 = vmatpush1.bf16.msra.mxu1 %v11340_v46  ;;  %7453 = vmatprep.subr.bf16.mxu0 %v11351_v15  ;;  %v11420_v46 = vld [vmem:[#allocation2 + $0xbdc] ss:$52 sps:$4 sm:$0xff]   ;;  %v11418_v15 = vld [vmem:[#allocation2 + $0xbd8] ss:$52 sps:$4 sm:$0xff]  }
 0x1bc   :  { %7410 = vmatprep.subr.bf16.mxu1 %v11348_v14 }
 0x1be   :  { %7454 = vmatpush1.bf16.msra.mxu0 %v11349_v17  ;;  %v12479_v17 = vld [vmem:[%s13336_s0 + $0x14] ss:$44 sps:$4 sm:$0xff]  }
 0x1bf   :  { %7411 = vmatpush1.bf16.msra.mxu1 %v11346_v16  ;;  %7455 = vmatprep.subr.bf16.mxu0 %v11357_v20  ;;  %v11421_v16 = vld [vmem:[#allocation2 + $0xf18] ss:$52 sps:$4 sm:$0xff]  }
 0x1c0   :  { %7412 = vmatprep.subr.bf16.mxu1 %v11354_v18  ;;  %v7178_v18 = vpop.f32.mrf.mxu1 }
 0x1c2   :  { %7456 = vmatpush1.bf16.msra.mxu0 %v11355_v22 }
 0x1c3   :  { %7413 = vmatpush1.bf16.msra.mxu1 %v11352_v21  ;;  %7457 = vmatprep.subr.bf16.mxu0 %v11360_v23  ;;  %v11426_v23 = vld [vmem:[#allocation2 + $0xb74] ss:$52 sps:$4 sm:$0xff]  }
 0x1c4   :  { %7484 = vmatprep.subr.bf16.mxu1 %v11363_v24 }
 0x1c6   :  { %10539 = vmatmul.mubr.msk.bf16.vlgmr.msra.gmra.mxu1 %vm6921_vm0, %v12476_v30  ;;  %7458 = vmatpush2.bf16.msra.mxu0 %v11358_v25  ;;  %v11427_v30 = vld [vmem:[#allocation2 + $0xeb0] ss:$52 sps:$4 sm:$0xff]  }
 0x1c7   :  { %7485 = vmatpush1.bf16.msra.mxu1 %v11361_v26  ;;  %7459 = vmatprep.subr.bf16.mxu0 %v11366_v27  ;;  %v7180_v26 = vpop.f32.mrf.mxu1 }
 0x1c8   :  { %7486 = vmatprep.subr.bf16.mxu1 %v11369_v29  ;;  %7516 = vmatprep.mubr.bf16.mxu1 %v12477_v37  ;;  %v11424_v29 = vld [vmem:[#allocation2 + $0xb70] ss:$52 sps:$4 sm:$0xff]  }
 0x1c9   :  { %v11441_v37 = vld [vmem:[#allocation2 + $0xde4] ss:$52 sps:$4 sm:$0xff]  }
 0x1ca   :  { %7460 = vmatpush2.bf16.msra.mxu0 %v11364_v31  ;;  %v11435_v31 = vld [vmem:[#allocation2 + $0xe4c] ss:$52 sps:$4 sm:$0xff]  }
 0x1cb   :  { %7487 = vmatpush1.bf16.msra.mxu1 %v11367_v32  ;;  %7461 = vmatprep.subr.bf16.mxu0 %v11372_v33  ;;  %v11430_v32 = vld [vmem:[#allocation2 + $0xb08] ss:$52 sps:$4 sm:$0xff]  }
 0x1cc   :  { %7488 = vmatprep.subr.bf16.mxu1 %v11375_v36  ;;  %v11433_v33 = vld [vmem:[#allocation2 + $0xe48] ss:$52 sps:$4 sm:$0xff]   ;;  %v11438_v36 = vld [vmem:[#allocation2 + $0xaa4] ss:$52 sps:$4 sm:$0xff]  }
 0x1ce   :  { %7462 = vmatpush2.bf16.msra.mxu0 %v11370_v38  ;;  %v11439_v38 = vld [vmem:[#allocation2 + $0xde0] ss:$52 sps:$4 sm:$0xff]  }
 0x1cf   :  { %7489 = vmatpush1.bf16.msra.mxu1 %v11373_v39  ;;  %7463 = vmatprep.subr.bf16.mxu0 %v11378_v41  ;;  %v11444_v39 = vld [vmem:[#allocation2 + $0xa3c] ss:$52 sps:$4 sm:$0xff]  }
 0x1d0   :  { %7490 = vmatprep.subr.bf16.mxu1 %v11381_v42  ;;  %v11447_v41 = vld [vmem:[#allocation2 + $0xd7c] ss:$52 sps:$4 sm:$0xff]   ;;  %v11442_v42 = vld [vmem:[#allocation2 + $0xa38] ss:$52 sps:$4 sm:$0xff]  }
 0x1d2   :  { %7464 = vmatpush2.bf16.msra.mxu0 %v11376_v43  ;;  %v11445_v43 = vld [vmem:[#allocation2 + $0xd78] ss:$52 sps:$4 sm:$0xff]  }
 0x1d3   :  { %7491 = vmatpush1.bf16.msra.mxu1 %v11379_v44  ;;  %7465 = vmatprep.subr.bf16.mxu0 %v11384_v45  ;;  %v11450_v44 = vld [vmem:[#allocation2 + $0x9d4] ss:$52 sps:$4 sm:$0xff]  }
 0x1d4   :  { %7492 = vmatprep.subr.bf16.mxu1 %v11387_v47  ;;  %v11453_v45 = vld [vmem:[#allocation2 + $0xd14] ss:$52 sps:$4 sm:$0xff]   ;;  %v11448_v47 = vld [vmem:[#allocation2 + $0x9d0] ss:$52 sps:$4 sm:$0xff]  }
 0x1d6   :  { %7466 = vmatpush2.bf16.msra.mxu0 %v11382_v48  ;;  %v11451_v48 = vld [vmem:[#allocation2 + $0xd10] ss:$52 sps:$4 sm:$0xff]  }
 0x1d7   :  { %7493 = vmatpush1.bf16.msra.mxu1 %v11385_v49  ;;  %7467 = vmatprep.subr.bf16.mxu0 %v11390_v50  ;;  %v11456_v49 = vld [vmem:[#allocation2 + $0x132c] ss:$52 sps:$4 sm:$0xff]  }
 0x1d8   :  { %7494 = vmatprep.subr.bf16.mxu1 %v11393_v51  ;;  %v11459_v50 = vld [vmem:[#allocation2 + $0x166c] ss:$52 sps:$4 sm:$0xff]   ;;  %v11454_v51 = vld [vmem:[#allocation2 + $0x1328] ss:$52 sps:$4 sm:$0xff]  }
 0x1da   :  { %7468 = vmatpush2.bf16.msra.mxu0 %v11388_v52  ;;  %v11457_v52 = vld [vmem:[#allocation2 + $0x1668] ss:$52 sps:$4 sm:$0xff]  }
 0x1db   :  { %7495 = vmatpush1.bf16.msra.mxu1 %v11391_v34  ;;  %7469 = vmatprep.subr.bf16.mxu0 %v11396_v53  ;;  %v11462_v34 = vld [vmem:[#allocation2 + $0x12c4] ss:$52 sps:$4 sm:$0xff]  }
 0x1dc   :  { %7496 = vmatprep.subr.bf16.mxu1 %v11399_v54  ;;  %v11465_v53 = vld [vmem:[#allocation2 + $0x1604] ss:$52 sps:$4 sm:$0xff]   ;;  %v11460_v54 = vld [vmem:[#allocation2 + $0x12c0] ss:$52 sps:$4 sm:$0xff]  }
 0x1de   :  { %7470 = vmatpush2.bf16.msra.mxu0 %v11394_v56  ;;  %v11463_v56 = vld [vmem:[#allocation2 + $0x1600] ss:$52 sps:$4 sm:$0xff]  }
 0x1df   :  { %7497 = vmatpush1.bf16.msra.mxu1 %v11397_v57  ;;  %7471 = vmatprep.subr.bf16.mxu0 %v11402_v58  ;;  %v12480_v57 = vld [vmem:[%s13336_s0 + $0x8] ss:$44 sps:$4 sm:$0xff]   ;;  %v11468_v58 = vld [vmem:[#allocation2 + $0x125c] ss:$52 sps:$4 sm:$0xff]  }
 0x1e0   :  { %7498 = vmatprep.subr.bf16.mxu1 %v11405_v59  ;;  %v11471_v59 = vld [vmem:[#allocation2 + $0x159c] ss:$52 sps:$4 sm:$0xff]  }
 0x1e2   :  { %7472 = vmatpush2.bf16.msra.mxu0 %v11400_v28  ;;  %v11466_v28 = vld [vmem:[#allocation2 + $0x1258] ss:$52 sps:$4 sm:$0xff]  }
 0x1e3   :  { %7499 = vmatpush1.bf16.msra.mxu1 %v11403_v60  ;;  %7527 = vmatprep.subr.bf16.mxu0 %v11411_v63  ;;  %v11469_v60 = vld [vmem:[#allocation2 + $0x1598] ss:$52 sps:$4 sm:$0xff]   ;;  %v11474_v63 = vld [vmem:[#allocation2 + $0x11f4] ss:$52 sps:$4 sm:$0xff]  }
 0x1e4   :  { %7500 = vmatprep.subr.bf16.mxu1 %v11408_v62  ;;  %v12481_v62 = vld [vmem:[%s13336_s0 + $0x1c] ss:$44 sps:$4 sm:$0xff]  }
 0x1e5   :  { %v7131_v8 = vpop.f32.mrf.mxu0  ;;  %7474 = vmatmul.mubr.bf16.vlgmr.msra.gmra.mxu0 %v12478_v9  ;;  %v11484_v9 = vld [vmem:[#allocation2 + $0x1120] ss:$52 sps:$4 sm:$0xff]  }
 0x1e6   :  { %v7132_v10 = vadd.f32 %v7131_v8, %v12852_v55  ;;  %7528 = vmatpush1.bf16.msra.mxu0 %v11409_v35  ;;  %7559 = vmatprep.mubr.bf16.mxu0 %v12479_v17  ;;  %v11472_v35 = vld [vmem:[#allocation2 + $0x11f0] ss:$52 sps:$4 sm:$0xff]  }
 0x1e7   :  { %7501 = vmatpush2.bf16.msra.mxu1 %v11406_v0  ;;  %v7133_v11 = vpop.f32.mrf.mxu0  ;;  %7529 = vmatprep.subr.bf16.mxu0 %v11417_v5  ;;  %v11477_v0 = vld [vmem:[#allocation2 + $0x1534] ss:$52 sps:$4 sm:$0xff]   ;;  %v11483_v5 = vld [vmem:[#allocation2 + $0x14cc] ss:$52 sps:$4 sm:$0xff]   ;;  %v11489_v8 = vld [vmem:[#allocation2 + $0x1464] ss:$52 sps:$4 sm:$0xff]  }
 0x1e8   :  { %7502 = vmatprep.subr.bf16.mxu1 %v11414_v3  ;;  %v12881_v13 = vadd.f32 %v7174_v2, %v7132_v10  ;;  %v7134_v14 = vadd.f32 %v7133_v11, %v12858_v61  ;;  %v11429_v61 = vld [vmem:[#allocation2 + $0xeb4] ss:$52 sps:$4 sm:$0xff]   ;;  %v11475_v2 = vld [vmem:[#allocation2 + $0x1530] ss:$52 sps:$4 sm:$0xff]   ;;  %v11480_v3 = vld [vmem:[#allocation2 + $0x118c] ss:$52 sps:$4 sm:$0xff]  }
 0x1e9   :  { %v7135_v55 = vpop.f32.mrf.mxu0  ;;  %v11487_v10 = vld [vmem:[#allocation2 + $0x1460] ss:$52 sps:$4 sm:$0xff]   ;;  %v11492_v11 = vld [vmem:[#allocation2 + $0x10bc] ss:$52 sps:$4 sm:$0xff]  }
 0x1ea   :  { %v12887_v20 = vadd.f32 %v7176_v7, %v7134_v14  ;;  %v7136_v21 = vadd.f32 %v7135_v55, %v12861_v1  ;;  %7530 = vmatpush1.bf16.msra.mxu0 %v11415_v40  ;;  %v11432_v1 = vld [vmem:[#allocation2 + $0xb0c] ss:$52 sps:$4 sm:$0xff]   ;;  %v11481_v40 = vld [vmem:[#allocation2 + $0x14c8] ss:$52 sps:$4 sm:$0xff]   ;;  %v11486_v7 = vld [vmem:[#allocation2 + $0x1124] ss:$52 sps:$4 sm:$0xff]  }
 0x1eb   :  { %7503 = vmatpush2.bf16.msra.mxu1 %v11412_v6  ;;  %v7137_v22 = vpop.f32.mrf.mxu0  ;;  %7531 = vmatprep.subr.bf16.mxu0 %v11423_v12  ;;  %v11478_v6 = vld [vmem:[#allocation2 + $0x1188] ss:$52 sps:$4 sm:$0xff]   ;;  %v11490_v12 = vld [vmem:[#allocation2 + $0x10b8] ss:$52 sps:$4 sm:$0xff]   ;;  %v11496_v17 = vld [vmem:[#allocation2 + $0x1050] ss:$52 sps:$4 sm:$0xff]  }
 0x1ec   :  { %7504 = vmatprep.subr.bf16.mxu1 %v11420_v46  ;;  %v12890_v24 = vadd.f32 %v7178_v18, %v7136_v21  ;;  %v7138_v25 = vadd.f32 %v7137_v22, %v12864_v4  ;;  %v11436_v4 = vld [vmem:[#allocation2 + $0xaa0] ss:$52 sps:$4 sm:$0xff]   ;;  %v11495_v46 = vld [vmem:[#allocation2 + $0x13fc] ss:$52 sps:$4 sm:$0xff]   ;;  %v11493_v14 = vld [vmem:[#allocation2 + $0x13f8] ss:$52 sps:$4 sm:$0xff]  }
 0x1ed   :  { %v11499_v18 = vld [vmem:[#allocation2 + $0x1390] ss:$52 sps:$4 sm:$0xff]   ;;  %v11504_v21 = vld [vmem:[#allocation2 + $0x19ac] ss:$52 sps:$4 sm:$0xff]  }
 0x1ee   :  { %v12893_v27 = vadd.f32 %v7180_v26, %v7138_v25  ;;  %7532 = vmatpush1.bf16.msra.mxu0 %v11421_v16  ;;  %v11501_v16 = vld [vmem:[#allocation2 + $0x1394] ss:$52 sps:$4 sm:$0xff]   ;;  %v11507_v22 = vld [vmem:[#allocation2 + $0x1cec] ss:$52 sps:$4 sm:$0xff]   ;;  %v11510_v26 = vld [vmem:[#allocation2 + $0x1944] ss:$52 sps:$4 sm:$0xff]  }
 0x1ef   :  { %7505 = vmatpush2.bf16.msra.mxu1 %v11418_v15  ;;  %7533 = vmatprep.subr.bf16.mxu0 %v11429_v61  ;;  %v11498_v15 = vld [vmem:[#allocation2 + $0x1054] ss:$52 sps:$4 sm:$0xff]  }
 0x1f0   :  { %7506 = vmatprep.subr.bf16.mxu1 %v11426_v23  ;;  %v11502_v23 = vld [vmem:[#allocation2 + $0x19a8] ss:$52 sps:$4 sm:$0xff]  }
 0x1f1   :  { %v11505_v61 = vld [vmem:[#allocation2 + $0x1ce8] ss:$52 sps:$4 sm:$0xff]  }
 0x1f2   :  { %7534 = vmatpush1.bf16.msra.mxu0 %v11427_v30 }
 0x1f3   :  { %7507 = vmatpush2.bf16.msra.mxu1 %v11424_v29  ;;  %7535 = vmatprep.subr.bf16.mxu0 %v11435_v31  ;;  %v11513_v29 = vld [vmem:[#allocation2 + $0x1c84] ss:$52 sps:$4 sm:$0xff]  }
 0x1f4   :  { %7508 = vmatprep.subr.bf16.mxu1 %v11432_v1  ;;  %v12482_v1 = vld [vmem:[%s13336_s0 + $0x10] ss:$44 sps:$4 sm:$0xff]  }
 0x1f6   :  { %7536 = vmatpush1.bf16.msra.mxu0 %v11433_v33  ;;  %v7217_v55 = vpop.f32.mrf.mxu1  ;;  %v11511_v33 = vld [vmem:[#allocation2 + $0x1c80] ss:$52 sps:$4 sm:$0xff]  }
 0x1f7   :  { %7509 = vmatpush2.bf16.msra.mxu1 %v11430_v32  ;;  %7537 = vmatprep.subr.bf16.mxu0 %v11441_v37  ;;  %v11508_v32 = vld [vmem:[#allocation2 + $0x1940] ss:$52 sps:$4 sm:$0xff]  }
 0x1f8   :  { %7510 = vmatprep.subr.bf16.mxu1 %v11438_v36  ;;  %v7219_v25 = vpop.f32.mrf.mxu1 }
 0x1fa   :  { %7538 = vmatpush1.bf16.msra.mxu0 %v11439_v38  ;;  %v7221_v36 = vpop.f32.mrf.mxu1  ;;  %v11519_v38 = vld [vmem:[#allocation2 + $0x1c1c] ss:$52 sps:$4 sm:$0xff]  }
 0x1fb   :  { %7511 = vmatpush2.bf16.msra.mxu1 %v11436_v4  ;;  %7539 = vmatprep.subr.bf16.mxu0 %v11447_v41  ;;  %v11516_v4 = vld [vmem:[#allocation2 + $0x18dc] ss:$52 sps:$4 sm:$0xff]  }
 0x1fc   :  { %7512 = vmatprep.subr.bf16.mxu1 %v11444_v39  ;;  %v12483_v41 = vld [vmem:[%s13336_s0 + $0x24] ss:$44 sps:$4 sm:$0xff]  }
 0x1fe   :  { %7540 = vmatpush1.bf16.msra.mxu0 %v11445_v43 }
 0x1ff   :  { %7513 = vmatpush2.bf16.msra.mxu1 %v11442_v42  ;;  %7541 = vmatprep.subr.bf16.mxu0 %v11453_v45  ;;  %v11517_v45 = vld [vmem:[#allocation2 + $0x1c18] ss:$52 sps:$4 sm:$0xff]  }
 0x200   :  { %7514 = vmatprep.subr.bf16.mxu1 %v11450_v44  ;;  %v11514_v44 = vld [vmem:[#allocation2 + $0x18d8] ss:$52 sps:$4 sm:$0xff]  }
 0x202   :  { %7542 = vmatpush1.bf16.msra.mxu0 %v11451_v48 }
 0x203   :  { %7515 = vmatpush2.bf16.msra.mxu1 %v11448_v47  ;;  %7543 = vmatprep.subr.bf16.mxu0 %v11456_v49  ;;  %v7223_v47 = vpop.f32.mrf.mxu1  ;;  %v11522_v49 = vld [vmem:[#allocation2 + $0x1874] ss:$52 sps:$4 sm:$0xff]  }
 0x204   :  { %7570 = vmatprep.subr.bf16.mxu1 %v11459_v50  ;;  %v11525_v50 = vld [vmem:[#allocation2 + $0x1bb4] ss:$52 sps:$4 sm:$0xff]  }
 0x206   :  { %7517 = vmatmul.mubr.bf16.vlgmr.msra.gmra.mxu1 %v12480_v57  ;;  %7544 = vmatpush2.bf16.msra.mxu0 %v11454_v51  ;;  %v11529_v57 = vld [vmem:[#allocation2 + $0x1b48] ss:$52 sps:$4 sm:$0xff]  }
 0x207   :  { %7571 = vmatpush1.bf16.msra.mxu1 %v11457_v52  ;;  %7545 = vmatprep.subr.bf16.mxu0 %v11462_v34  ;;  %v11520_v52 = vld [vmem:[#allocation2 + $0x1870] ss:$52 sps:$4 sm:$0xff]  }
 0x208   :  { %7572 = vmatprep.subr.bf16.mxu1 %v11465_v53  ;;  %7602 = vmatprep.mubr.bf16.mxu1 %v12481_v62  ;;  %v11523_v34 = vld [vmem:[#allocation2 + $0x1bb0] ss:$52 sps:$4 sm:$0xff]   ;;  %v11528_v53 = vld [vmem:[#allocation2 + $0x180c] ss:$52 sps:$4 sm:$0xff]  }
 0x209   :  { %v11532_v62 = vld [vmem:[#allocation2 + $0x17a0] ss:$52 sps:$4 sm:$0xff]  }
 0x20a   :  { %7546 = vmatpush2.bf16.msra.mxu0 %v11460_v54  ;;  %v11531_v54 = vld [vmem:[#allocation2 + $0x1b4c] ss:$52 sps:$4 sm:$0xff]  }
 0x20b   :  { %7573 = vmatpush1.bf16.msra.mxu1 %v11463_v56  ;;  %7547 = vmatprep.subr.bf16.mxu0 %v11468_v58  ;;  %v11526_v56 = vld [vmem:[#allocation2 + $0x1808] ss:$52 sps:$4 sm:$0xff]   ;;  %v11534_v58 = vld [vmem:[#allocation2 + $0x17a4] ss:$52 sps:$4 sm:$0xff]  }
 0x20c   :  { %7574 = vmatprep.subr.bf16.mxu1 %v11471_v59  ;;  %v11537_v59 = vld [vmem:[#allocation2 + $0x1ae4] ss:$52 sps:$4 sm:$0xff]  }
 0x20e   :  { %7548 = vmatpush2.bf16.msra.mxu0 %v11466_v28 }
 0x20f   :  { %7575 = vmatpush1.bf16.msra.mxu1 %v11469_v60  ;;  %7549 = vmatprep.subr.bf16.mxu0 %v11474_v63  ;;  %v11535_v63 = vld [vmem:[#allocation2 + $0x1ae0] ss:$52 sps:$4 sm:$0xff]  }
 0x210   :  { %7576 = vmatprep.subr.bf16.mxu1 %v11477_v0 }
 0x212   :  { %7550 = vmatpush2.bf16.msra.mxu0 %v11472_v35  ;;  %v11540_v35 = vld [vmem:[#allocation2 + $0x173c] ss:$52 sps:$4 sm:$0xff]  }
 0x213   :  { %7577 = vmatpush1.bf16.msra.mxu1 %v11475_v2  ;;  %7551 = vmatprep.subr.bf16.mxu0 %v11480_v3  ;;  %v11543_v2 = vld [vmem:[#allocation2 + $0x1a7c] ss:$52 sps:$4 sm:$0xff]  }
 0x214   :  { %7578 = vmatprep.subr.bf16.mxu1 %v11483_v5 }
 0x216   :  { %7552 = vmatpush2.bf16.msra.mxu0 %v11478_v6 }
 0x217   :  { %7579 = vmatpush1.bf16.msra.mxu1 %v11481_v40  ;;  %7553 = vmatprep.subr.bf16.mxu0 %v11486_v7  ;;  %v11538_v40 = vld [vmem:[#allocation2 + $0x1738] ss:$52 sps:$4 sm:$0xff]  }
 0x218   :  { %7580 = vmatprep.subr.bf16.mxu1 %v11489_v8  ;;  %v11541_v7 = vld [vmem:[#allocation2 + $0x1a78] ss:$52 sps:$4 sm:$0xff]  }
 0x21a   :  { %7554 = vmatpush2.bf16.msra.mxu0 %v11484_v9  ;;  %v11546_v9 = vld [vmem:[#allocation2 + $0x16d4] ss:$52 sps:$4 sm:$0xff]  }
 0x21b   :  { %7581 = vmatpush1.bf16.msra.mxu1 %v11487_v10  ;;  %7555 = vmatprep.subr.bf16.mxu0 %v11492_v11  ;;  %v11549_v10 = vld [vmem:[#allocation2 + $0x1a14] ss:$52 sps:$4 sm:$0xff]  }
 0x21c   :  { %7582 = vmatprep.subr.bf16.mxu1 %v11495_v46  ;;  %v11544_v46 = vld [vmem:[#allocation2 + $0x16d0] ss:$52 sps:$4 sm:$0xff]  }
 0x21e   :  { %7556 = vmatpush2.bf16.msra.mxu0 %v11490_v12  ;;  %v11547_v12 = vld [vmem:[#allocation2 + $0x1a10] ss:$52 sps:$4 sm:$0xff]  }
 0x21f   :  { %7583 = vmatpush1.bf16.msra.mxu1 %v11493_v14  ;;  %7557 = vmatprep.subr.bf16.mxu0 %v11498_v15  ;;  %v11552_v14 = vld [vmem:[#allocation2 + $0x202c] ss:$52 sps:$4 sm:$0xff]  }
 0x220   :  { %7584 = vmatprep.subr.bf16.mxu1 %v11501_v16  ;;  %v11555_v15 = vld [vmem:[#allocation2 + $0x21cc] ss:$52 sps:$4 sm:$0xff]   ;;  %v11550_v16 = vld [vmem:[#allocation2 + $0x2028] ss:$52 sps:$4 sm:$0xff]  }
 0x222   :  { %7558 = vmatpush2.bf16.msra.mxu0 %v11496_v17  ;;  %v11553_v17 = vld [vmem:[#allocation2 + $0x21c8] ss:$52 sps:$4 sm:$0xff]  }
 0x223   :  { %7585 = vmatpush1.bf16.msra.mxu1 %v11499_v18  ;;  %7613 = vmatprep.subr.bf16.mxu0 %v11507_v22  ;;  %v11558_v18 = vld [vmem:[#allocation2 + $0x1fc4] ss:$52 sps:$4 sm:$0xff]   ;;  %v11559_v22 = vld [vmem:[#allocation2 + $0x2160] ss:$52 sps:$4 sm:$0xff]  }
 0x224   :  { %7586 = vmatprep.subr.bf16.mxu1 %v11504_v21  ;;  %v11556_v21 = vld [vmem:[#allocation2 + $0x1fc0] ss:$52 sps:$4 sm:$0xff]  }
 0x225   :  { %v7260_v30 = vpop.f32.mrf.mxu0  ;;  %7560 = vmatmul.mubr.bf16.vlgmr.msra.gmra.mxu0 %v12482_v1  ;;  %v11573_v1 = vld [vmem:[#allocation2 + $0x2094] ss:$52 sps:$4 sm:$0xff]  }
 0x226   :  { %v7261_v31 = vadd.f32 %v7260_v30, %v7217_v55  ;;  %7614 = vmatpush1.bf16.msra.mxu0 %v11505_v61  ;;  %7645 = vmatprep.mubr.bf16.mxu0 %v12483_v41  ;;  %v11561_v55 = vld [vmem:[#allocation2 + $0x2164] ss:$52 sps:$4 sm:$0xff]   ;;  %v11564_v61 = vld [vmem:[#allocation2 + $0x1f5c] ss:$52 sps:$4 sm:$0xff]   ;;  %v11570_v30 = vld [vmem:[#allocation2 + $0x1ef4] ss:$52 sps:$4 sm:$0xff]  }
 0x227   :  { %7587 = vmatpush2.bf16.msra.mxu1 %v11502_v23  ;;  %v7262_v37 = vpop.f32.mrf.mxu0  ;;  %7615 = vmatprep.subr.bf16.mxu0 %v11513_v29  ;;  %v12484_v23 = vld [vmem:[%s13336_s0 + $0x18] ss:$44 sps:$4 sm:$0xff]   ;;  %v12485_v41 = vld [vmem:[%s13336_s0 + $0x28] ss:$44 sps:$4 sm:$0xff]  }
 0x228   :  { %7588 = vmatprep.subr.bf16.mxu1 %v11510_v26  ;;  %v7263_v39 = vadd.f32 %v7262_v37, %v7219_v25  ;;  %v11567_v25 = vld [vmem:[#allocation2 + $0x20fc] ss:$52 sps:$4 sm:$0xff]   ;;  %v11562_v26 = vld [vmem:[#allocation2 + $0x1f58] ss:$52 sps:$4 sm:$0xff]  }
 0x229   :  { %v7264_v42 = vpop.f32.mrf.mxu0  ;;  %v11565_v29 = vld [vmem:[#allocation2 + $0x20f8] ss:$52 sps:$4 sm:$0xff]   ;;  %v11574_v37 = vld [vmem:[#allocation2 + $0x1e88] ss:$52 sps:$4 sm:$0xff]  }
 0x22a   :  { %v7265_v43 = vadd.f32 %v7264_v42, %v7221_v36  ;;  %7616 = vmatpush1.bf16.msra.mxu0 %v11511_v33  ;;  %v11576_v33 = vld [vmem:[#allocation2 + $0x1e8c] ss:$52 sps:$4 sm:$0xff]   ;;  %v11579_v36 = vld [vmem:[#allocation2 + $0x2f4] ss:$52 sps:$4 sm:$0xff]  }
 0x22b   :  { %7589 = vmatpush2.bf16.msra.mxu1 %v11508_v32  ;;  %v7266_v48 = vpop.f32.mrf.mxu0  ;;  %7617 = vmatprep.subr.bf16.mxu0 %v11519_v38  ;;  %v11571_v32 = vld [vmem:[#allocation2 + $0x2090] ss:$52 sps:$4 sm:$0xff]   ;;  %v11580_v42 = vld [vmem:[#allocation2 + $0x1e20] ss:$52 sps:$4 sm:$0xff]  }
 0x22c   :  { %7590 = vmatprep.subr.bf16.mxu1 %v11516_v4  ;;  %v7267_v51 = vadd.f32 %v7266_v48, %v7223_v47  ;;  %v11577_v4 = vld [vmem:[#allocation2 + $0x2f0] ss:$52 sps:$4 sm:$0xff]   ;;  %v11586_v48 = vld [vmem:[#allocation2 + $0x1db8] ss:$52 sps:$4 sm:$0xff]  }
 0x22d   :  { %v11582_v38 = vld [vmem:[#allocation2 + $0x1e24] ss:$52 sps:$4 sm:$0xff]  }
 0x22e   :  { %7618 = vmatpush1.bf16.msra.mxu0 %v11517_v45  ;;  %v11591_v45 = vld [vmem:[#allocation2 + $0x224] ss:$52 sps:$4 sm:$0xff]  }
 0x22f   :  { %7591 = vmatpush2.bf16.msra.mxu1 %v11514_v44  ;;  %7619 = vmatprep.subr.bf16.mxu0 %v11525_v50  ;;  %v11588_v44 = vld [vmem:[#allocation2 + $0x1dbc] ss:$52 sps:$4 sm:$0xff]   ;;  %v11594_v50 = vld [vmem:[#allocation2 + $0x1d54] ss:$52 sps:$4 sm:$0xff]  }
 0x230   :  { %7592 = vmatprep.subr.bf16.mxu1 %v11522_v49  ;;  %v12486_v47 = vld [vmem:[%s13336_s0 + $0x4] ss:$44 sps:$4 sm:$0xff]   ;;  %v11589_v49 = vld [vmem:[#allocation2 + $0x220] ss:$52 sps:$4 sm:$0xff]  }
 0x232   :  { %7620 = vmatpush1.bf16.msra.mxu0 %v11523_v34  ;;  %v11595_v34 = vld [vmem:[#allocation2 + $0x1b8] ss:$52 sps:$4 sm:$0xff]  }
 0x233   :  { %7593 = vmatpush2.bf16.msra.mxu1 %v11520_v52  ;;  %7621 = vmatprep.subr.bf16.mxu0 %v11531_v54  ;;  %v11592_v52 = vld [vmem:[#allocation2 + $0x1d50] ss:$52 sps:$4 sm:$0xff]   ;;  %v11603_v54 = vld [vmem:[#allocation2 + $0x974] ss:$52 sps:$4 sm:$0xff]  }
 0x234   :  { %7594 = vmatprep.subr.bf16.mxu1 %v11528_v53  ;;  %v11600_v53 = vld [vmem:[#allocation2 + $0x154] ss:$52 sps:$4 sm:$0xff]  }
 0x236   :  { %v7303_v28 = vpop.f32.mrf.mxu1  ;;  %7622 = vmatpush1.bf16.msra.mxu0 %v11529_v57  ;;  %v11601_v57 = vld [vmem:[#allocation2 + $0x970] ss:$52 sps:$4 sm:$0xff]  }
 0x237   :  { %v12907_v60 = vadd.f32 %v7303_v28, %v7261_v31  ;;  %7595 = vmatpush2.bf16.msra.mxu1 %v11526_v56  ;;  %7623 = vmatprep.subr.bf16.mxu0 %v11537_v59  ;;  %v11568_v31 = vld [vmem:[#allocation2 + $0x1ef0] ss:$52 sps:$4 sm:$0xff]   ;;  %v11609_v59 = vld [vmem:[#allocation2 + $0x90c] ss:$52 sps:$4 sm:$0xff]   ;;  %v11604_v28 = vld [vmem:[#allocation2 + $0xe8] ss:$52 sps:$4 sm:$0xff]  }
 0x238   :  { %v7305_v0 = vpop.f32.mrf.mxu1  ;;  %7596 = vmatprep.subr.bf16.mxu1 %v11534_v58  ;;  %v11598_v56 = vld [vmem:[#allocation2 + $0x150] ss:$52 sps:$4 sm:$0xff]   ;;  %v11606_v58 = vld [vmem:[#allocation2 + $0xec] ss:$52 sps:$4 sm:$0xff]  }
 0x239   :  { %v12909_v3 = vadd.f32 %v7305_v0, %v7263_v39  ;;  %v11585_v39 = vld [vmem:[#allocation2 + $0x28c] ss:$52 sps:$4 sm:$0xff]  }
 0x23a   :  { %v7307_v5 = vpop.f32.mrf.mxu1  ;;  %7624 = vmatpush1.bf16.msra.mxu0 %v11535_v63  ;;  %v12487_v0 = vld [vmem:[%s13336_s0 + $0x20] ss:$44 sps:$4 sm:$0xff]  }
 0x23b   :  { %v12911_v6 = vadd.f32 %v7307_v5, %v7265_v43  ;;  %7597 = vmatpush2.bf16.msra.mxu1 %v11532_v62  ;;  %7625 = vmatprep.subr.bf16.mxu0 %v11543_v2  ;;  %v11583_v43 = vld [vmem:[#allocation2 + $0x288] ss:$52 sps:$4 sm:$0xff]   ;;  %v11612_v5 = vld [vmem:[#allocation2 + $0x84] ss:$52 sps:$4 sm:$0xff]  }
 0x23c   :  { %v7309_v8 = vpop.f32.mrf.mxu1  ;;  %7598 = vmatprep.subr.bf16.mxu1 %v11540_v35  ;;  %v11607_v62 = vld [vmem:[#allocation2 + $0x908] ss:$52 sps:$4 sm:$0xff]  }
 0x23d   :  { %v12913_v11 = vadd.f32 %v7309_v8, %v7267_v51  ;;  %v11597_v51 = vld [vmem:[#allocation2 + $0x1bc] ss:$52 sps:$4 sm:$0xff]   ;;  %v11610_v8 = vld [vmem:[#allocation2 + $0x80] ss:$52 sps:$4 sm:$0xff]  }
 0x23e   :  { %7626 = vmatpush1.bf16.msra.mxu0 %v11541_v7 }
 0x23f   :  { %7599 = vmatpush2.bf16.msra.mxu1 %v11538_v40  ;;  %7627 = vmatprep.subr.bf16.mxu0 %v11549_v10  ;;  %v11615_v40 = vld [vmem:[#allocation2 + $0x8a4] ss:$52 sps:$4 sm:$0xff]  }
 0x240   :  { %7600 = vmatprep.subr.bf16.mxu1 %v11546_v9  ;;  %v11613_v9 = vld [vmem:[#allocation2 + $0x8a0] ss:$52 sps:$4 sm:$0xff]   ;;  %v12488_v10 = vld [vmem:[%s13336_s0 + $0xc] ss:$44 sps:$4 sm:$0xff]  }
 0x242   :  { %7628 = vmatpush1.bf16.msra.mxu0 %v11547_v12 }
 0x243   :  { %7601 = vmatpush2.bf16.msra.mxu1 %v11544_v46  ;;  %7629 = vmatprep.subr.bf16.mxu0 %v11552_v14  ;;  %v11618_v14 = vld [vmem:[#allocation2 + $0x1c] ss:$52 sps:$4 sm:$0xff]  }
 0x244   :  { %7664 = vmatprep.subr.bf16.mxu1 %v11555_v15  ;;  %v11621_v15 = vld [vmem:[#allocation2 + $0x83c] ss:$52 sps:$4 sm:$0xff]  }
 0x246   :  { %7603 = vmatmul.mubr.bf16.vlgmr.msra.gmra.mxu1 %v12484_v23  ;;  %7630 = vmatpush2.bf16.msra.mxu0 %v11550_v16  ;;  %v11633_v23 = vld [vmem:[#allocation2 + $0x76c] ss:$52 sps:$4 sm:$0xff]  }
 0x247   :  { %7665 = vmatpush1.bf16.msra.mxu1 %v11553_v17  ;;  %7631 = vmatprep.subr.bf16.mxu0 %v11558_v18  ;;  %v11619_v17 = vld [vmem:[#allocation2 + $0x838] ss:$52 sps:$4 sm:$0xff]   ;;  %v11624_v18 = vld [vmem:[#allocation2 + $0x634] ss:$52 sps:$4 sm:$0xff]  }
 0x248   :  { %7666 = vmatprep.subr.bf16.mxu1 %v11561_v55  ;;  %7688 = vmatprep.mubr.bf16.mxu1 %v12700_v19  ;;  %v11627_v55 = vld [vmem:[#allocation2 + $0x7d4] ss:$52 sps:$4 sm:$0xff]  }
 0x24a   :  { %7632 = vmatpush2.bf16.msra.mxu0 %v11556_v21  ;;  %v11625_v21 = vld [vmem:[#allocation2 + $0x7d0] ss:$52 sps:$4 sm:$0xff]  }
 0x24b   :  { %7667 = vmatpush1.bf16.msra.mxu1 %v11559_v22  ;;  %7633 = vmatprep.subr.bf16.mxu0 %v11564_v61  ;;  %v11630_v22 = vld [vmem:[#allocation2 + $0x5cc] ss:$52 sps:$4 sm:$0xff]  }
 0x24c   :  { %7668 = vmatprep.subr.bf16.mxu1 %v11567_v25 }
 0x24e   :  { %7634 = vmatpush2.bf16.msra.mxu0 %v11562_v26  ;;  %v11631_v26 = vld [vmem:[#allocation2 + $0x768] ss:$52 sps:$4 sm:$0xff]  }
 0x24f   :  { %7669 = vmatpush1.bf16.msra.mxu1 %v11565_v29  ;;  %7635 = vmatprep.subr.bf16.mxu0 %v11570_v30  ;;  %v11636_v30 = vld [vmem:[#allocation2 + $0x564] ss:$52 sps:$4 sm:$0xff]  }
 0x250   :  { %7670 = vmatprep.subr.bf16.mxu1 %v11573_v1  ;;  %v11639_v1 = vld [vmem:[#allocation2 + $0x704] ss:$52 sps:$4 sm:$0xff]  }
 0x252   :  { %7636 = vmatpush2.bf16.msra.mxu0 %v11568_v31 }
 0x253   :  { %7671 = vmatpush1.bf16.msra.mxu1 %v11571_v32  ;;  %7637 = vmatprep.subr.bf16.mxu0 %v11576_v33 }
 0x254   :  { %7699 = vmatprep.subr.bf16.mxu1 %v11579_v36  ;;  %v11634_v36 = vld [vmem:[#allocation2 + $0x560] ss:$52 sps:$4 sm:$0xff]  }
 0x256   :  { %10540 = vmatmul.mubr.msk.bf16.vlgmr.msra.gmra.mxu1 %vm6921_vm0, %v12485_v41  ;;  %7638 = vmatpush2.bf16.msra.mxu0 %v11574_v37  ;;  %v11637_v37 = vld [vmem:[#allocation2 + $0x700] ss:$52 sps:$4 sm:$0xff]  }
 0x257   :  { %7700 = vmatpush1.bf16.msra.mxu1 %v11577_v4  ;;  %7639 = vmatprep.subr.bf16.mxu0 %v11582_v38  ;;  %v11642_v38 = vld [vmem:[#allocation2 + $0x4fc] ss:$52 sps:$4 sm:$0xff]  }
 0x258   :  { %7701 = vmatprep.subr.bf16.mxu1 %v11585_v39  ;;  %7731 = vmatprep.mubr.bf16.mxu1 %v12486_v47  ;;  %v11645_v39 = vld [vmem:[#allocation2 + $0x69c] ss:$52 sps:$4 sm:$0xff]  }
 0x259   :  { %v11646_v47 = vld [vmem:[#allocation2 + $0x490] ss:$52 sps:$4 sm:$0xff]  }
 0x25a   :  { %7640 = vmatpush2.bf16.msra.mxu0 %v11580_v42  ;;  %v11640_v42 = vld [vmem:[#allocation2 + $0x4f8] ss:$52 sps:$4 sm:$0xff]  }
 0x25b   :  { %7702 = vmatpush1.bf16.msra.mxu1 %v11583_v43  ;;  %7641 = vmatprep.subr.bf16.mxu0 %v11588_v44  ;;  %v11643_v43 = vld [vmem:[#allocation2 + $0x698] ss:$52 sps:$4 sm:$0xff]   ;;  %v11648_v44 = vld [vmem:[#allocation2 + $0x494] ss:$52 sps:$4 sm:$0xff]  }
 0x25c   :  { %7703 = vmatprep.subr.bf16.mxu1 %v11591_v45  ;;  %v11651_v45 = vld [vmem:[#allocation2 + $0xcb4] ss:$52 sps:$4 sm:$0xff]  }
 0x25e   :  { %7642 = vmatpush2.bf16.msra.mxu0 %v11586_v48  ;;  %v11649_v48 = vld [vmem:[#allocation2 + $0xcb0] ss:$52 sps:$4 sm:$0xff]  }
 0x25f   :  { %7704 = vmatpush1.bf16.msra.mxu1 %v11589_v49  ;;  %7643 = vmatprep.subr.bf16.mxu0 %v11594_v50  ;;  %v11654_v49 = vld [vmem:[#allocation2 + $0x42c] ss:$52 sps:$4 sm:$0xff]  }
 0x260   :  { %7705 = vmatprep.subr.bf16.mxu1 %v11597_v51  ;;  %v11657_v50 = vld [vmem:[#allocation2 + $0xc4c] ss:$52 sps:$4 sm:$0xff]   ;;  %v11652_v51 = vld [vmem:[#allocation2 + $0x428] ss:$52 sps:$4 sm:$0xff]  }
 0x262   :  { %7644 = vmatpush2.bf16.msra.mxu0 %v11592_v52  ;;  %v11655_v52 = vld [vmem:[#allocation2 + $0xc48] ss:$52 sps:$4 sm:$0xff]  }
 0x263   :  { %7706 = vmatpush1.bf16.msra.mxu1 %v11595_v34  ;;  %7742 = vmatprep.subr.bf16.mxu0 %v11603_v54 }
 0x264   :  { %7707 = vmatprep.subr.bf16.mxu1 %v11600_v53 }
 0x265   :  { %v7346_v63 = vpop.f32.mrf.mxu0  ;;  %7646 = vmatmul.mubr.bf16.vlgmr.msra.gmra.mxu0 %v12487_v0 }
 0x266   :  { %v7347_v35 = vadd.f32 %v7346_v63, %v12907_v60  ;;  %7743 = vmatpush1.bf16.msra.mxu0 %v11601_v57  ;;  %7774 = vmatprep.mubr.bf16.mxu0 %v12488_v10  ;;  %v11663_v57 = vld [vmem:[#allocation2 + $0xbe4] ss:$52 sps:$4 sm:$0xff]  }
 0x267   :  { %7708 = vmatpush1.bf16.msra.mxu1 %v11598_v56  ;;  %v7348_v2 = vpop.f32.mrf.mxu0  ;;  %7744 = vmatprep.subr.bf16.mxu0 %v11609_v59  ;;  %v11660_v56 = vld [vmem:[#allocation2 + $0x3c4] ss:$52 sps:$4 sm:$0xff]   ;;  %v11658_v59 = vld [vmem:[#allocation2 + $0x3c0] ss:$52 sps:$4 sm:$0xff]  }
 0x268   :  { %7709 = vmatprep.subr.bf16.mxu1 %v11606_v58  ;;  %v7349_v7 = vadd.f32 %v7348_v2, %v12909_v3  ;;  %v11616_v3 = vld [vmem:[#allocation2 + $0x18] ss:$52 sps:$4 sm:$0xff]   ;;  %v11669_v2 = vld [vmem:[#allocation2 + $0xb7c] ss:$52 sps:$4 sm:$0xff]  }
 0x269   :  { %v7350_v46 = vpop.f32.mrf.mxu0  ;;  %v11670_v10 = vld [vmem:[#allocation2 + $0xb10] ss:$52 sps:$4 sm:$0xff]  }
 0x26a   :  { %v7351_v12 = vadd.f32 %v7350_v46, %v12911_v6  ;;  %7745 = vmatpush1.bf16.msra.mxu0 %v11607_v62  ;;  %v11622_v6 = vld [vmem:[#allocation2 + $0x630] ss:$52 sps:$4 sm:$0xff]  }
 0x26b   :  { %7710 = vmatpush1.bf16.msra.mxu1 %v11604_v28  ;;  %v7352_v60 = vpop.f32.mrf.mxu0  ;;  %7746 = vmatprep.subr.bf16.mxu0 %v11615_v40  ;;  %v11661_v28 = vld [vmem:[#allocation2 + $0xbe0] ss:$52 sps:$4 sm:$0xff]   ;;  %v11664_v40 = vld [vmem:[#allocation2 + $0x358] ss:$52 sps:$4 sm:$0xff]   ;;  %v11673_v46 = vld [vmem:[#allocation2 + $0xff0] ss:$52 sps:$4 sm:$0xff]  }
 0x26c   :  { %7711 = vmatprep.subr.bf16.mxu1 %v11612_v5  ;;  %v7353_v16 = vadd.f32 %v7352_v60, %v12913_v11  ;;  %v11628_v11 = vld [vmem:[#allocation2 + $0x5c8] ss:$52 sps:$4 sm:$0xff]   ;;  %v11681_v60 = vld [vmem:[#allocation2 + $0xf8c] ss:$52 sps:$4 sm:$0xff]  }
 0x26e   :  { %7747 = vmatpush1.bf16.msra.mxu0 %v11613_v9  ;;  %v11675_v9 = vld [vmem:[#allocation2 + $0xff4] ss:$52 sps:$4 sm:$0xff]  }
 0x26f   :  { %7712 = vmatpush1.bf16.msra.mxu1 %v11610_v8  ;;  %7748 = vmatprep.subr.bf16.mxu0 %v11621_v15  ;;  %v11672_v8 = vld [vmem:[#allocation2 + $0xb14] ss:$52 sps:$4 sm:$0xff]  }
 0x270   :  { %7713 = vmatprep.subr.bf16.mxu1 %v11618_v14  ;;  %v11676_v14 = vld [vmem:[#allocation2 + $0xaa8] ss:$52 sps:$4 sm:$0xff]  }
 0x271   :  { %v11679_v15 = vld [vmem:[#allocation2 + $0xf88] ss:$52 sps:$4 sm:$0xff]  }
 0x272   :  { %7749 = vmatpush1.bf16.msra.mxu0 %v11619_v17  ;;  %v11687_v17 = vld [vmem:[#allocation2 + $0xf24] ss:$52 sps:$4 sm:$0xff]  }
 0x273   :  { %7714 = vmatpush1.bf16.msra.mxu1 %v11616_v3  ;;  %7750 = vmatprep.subr.bf16.mxu0 %v11627_v55  ;;  %v11684_v3 = vld [vmem:[#allocation2 + $0xa44] ss:$52 sps:$4 sm:$0xff]   ;;  %v11685_v55 = vld [vmem:[#allocation2 + $0xf20] ss:$52 sps:$4 sm:$0xff]  }
 0x274   :  { %7715 = vmatprep.subr.bf16.mxu1 %v11624_v18  ;;  %v11682_v18 = vld [vmem:[#allocation2 + $0xa40] ss:$52 sps:$4 sm:$0xff]  }
 0x276   :  { %v7389_v61 = vpop.f32.mrf.mxu1  ;;  %7751 = vmatpush1.bf16.msra.mxu0 %v11625_v21  ;;  %v11690_v21 = vld [vmem:[#allocation2 + $0x9dc] ss:$52 sps:$4 sm:$0xff]  }
 0x277   :  { %v7390_v25 = vadd.f32 %v7389_v61, %v7347_v35  ;;  %7716 = vmatpush2.bf16.msra.mxu1 %v11622_v6  ;;  %7752 = vmatprep.subr.bf16.mxu0 %v11633_v23  ;;  %v11666_v35 = vld [vmem:[#allocation2 + $0x35c] ss:$52 sps:$4 sm:$0xff]   ;;  %v12490_v6 = vld [vmem:[%s13336_s0 + $0x14] ss:$44 sps:$4 sm:$0xff]   ;;  %v11688_v23 = vld [vmem:[#allocation2 + $0x9d8] ss:$52 sps:$4 sm:$0xff]  }
 0x278   :  { %v7391_v29 = vpop.f32.mrf.mxu1  ;;  %7717 = vmatprep.subr.bf16.mxu1 %v11630_v22  ;;  %v11693_v22 = vld [vmem:[#allocation2 + $0xebc] ss:$52 sps:$4 sm:$0xff]   ;;  %v11691_v61 = vld [vmem:[#allocation2 + $0xeb8] ss:$52 sps:$4 sm:$0xff]  }
 0x279   :  { %v7392_v31 = vadd.f32 %v7391_v29, %v7349_v7  ;;  %v11667_v7 = vld [vmem:[#allocation2 + $0xb78] ss:$52 sps:$4 sm:$0xff]   ;;  %v11697_v29 = vld [vmem:[#allocation2 + $0x1670] ss:$52 sps:$4 sm:$0xff]  }
 0x27a   :  { %v7393_v32 = vpop.f32.mrf.mxu1  ;;  %7753 = vmatpush1.bf16.msra.mxu0 %v11631_v26  ;;  %v11694_v26 = vld [vmem:[#allocation2 + $0xe50] ss:$52 sps:$4 sm:$0xff]  }
 0x27b   :  { %v7394_v33 = vadd.f32 %v7393_v32, %v7351_v12  ;;  %7718 = vmatpush2.bf16.msra.mxu1 %v11628_v11  ;;  %7754 = vmatprep.subr.bf16.mxu0 %v11639_v1  ;;  %v11678_v12 = vld [vmem:[#allocation2 + $0xaac] ss:$52 sps:$4 sm:$0xff]   ;;  %v11699_v11 = vld [vmem:[#allocation2 + $0x1674] ss:$52 sps:$4 sm:$0xff]  }
 0x27c   :  { %v7395_v4 = vpop.f32.mrf.mxu1  ;;  %7719 = vmatprep.subr.bf16.mxu1 %v11636_v30  ;;  %v11702_v30 = vld [vmem:[#allocation2 + $0xdec] ss:$52 sps:$4 sm:$0xff]   ;;  %v11703_v32 = vld [vmem:[#allocation2 + $0x1608] ss:$52 sps:$4 sm:$0xff]  }
 0x27d   :  { %v7396_v41 = vadd.f32 %v7395_v4, %v7353_v16  ;;  %v12489_v16 = vld [vmem:[%s13336_s0] ss:$44 sps:$4 sm:$0xff]  }
 0x27e   :  { %7755 = vmatpush1.bf16.msra.mxu0 %v11637_v37  ;;  %v11705_v1 = vld [vmem:[#allocation2 + $0x160c] ss:$52 sps:$4 sm:$0xff]   ;;  %v11711_v37 = vld [vmem:[#allocation2 + $0x15a4] ss:$52 sps:$4 sm:$0xff]  }
 0x27f   :  { %7720 = vmatpush2.bf16.msra.mxu1 %v11634_v36  ;;  %7756 = vmatprep.subr.bf16.mxu0 %v11645_v39  ;;  %v11708_v36 = vld [vmem:[#allocation2 + $0xd84] ss:$52 sps:$4 sm:$0xff]   ;;  %v11706_v4 = vld [vmem:[#allocation2 + $0xd80] ss:$52 sps:$4 sm:$0xff]   ;;  %v12492_v39 = vld [vmem:[%s13336_s0 + $0x1c] ss:$44 sps:$4 sm:$0xff]  }
 0x280   :  { %7721 = vmatprep.subr.bf16.mxu1 %v11642_v38  ;;  %v11709_v38 = vld [vmem:[#allocation2 + $0x15a0] ss:$52 sps:$4 sm:$0xff]  }
 0x282   :  { %7757 = vmatpush1.bf16.msra.mxu0 %v11643_v43  ;;  %v11712_v43 = vld [vmem:[#allocation2 + $0xd18] ss:$52 sps:$4 sm:$0xff]  }
 0x283   :  { %7722 = vmatpush2.bf16.msra.mxu1 %v11640_v42  ;;  %7758 = vmatprep.subr.bf16.mxu0 %v11651_v45  ;;  %v11717_v42 = vld [vmem:[#allocation2 + $0x153c] ss:$52 sps:$4 sm:$0xff]   ;;  %v11720_v45 = vld [vmem:[#allocation2 + $0x1334] ss:$52 sps:$4 sm:$0xff]  }
 0x284   :  { %7723 = vmatprep.subr.bf16.mxu1 %v11648_v44  ;;  %v11715_v44 = vld [vmem:[#allocation2 + $0x1538] ss:$52 sps:$4 sm:$0xff]  }
 0x286   :  { %v7432_v34 = vpop.f32.mrf.mxu1  ;;  %7759 = vmatpush2.bf16.msra.mxu0 %v11649_v48  ;;  %v11718_v48 = vld [vmem:[#allocation2 + $0x1330] ss:$52 sps:$4 sm:$0xff]  }
 0x287   :  { %v12936_v53 = vadd.f32 %v7432_v34, %v7390_v25  ;;  %7724 = vmatpush2.bf16.msra.mxu1 %v11646_v47  ;;  %7760 = vmatprep.subr.bf16.mxu0 %v11657_v50  ;;  %v11696_v25 = vld [vmem:[#allocation2 + $0xe54] ss:$52 sps:$4 sm:$0xff]   ;;  %v11726_v50 = vld [vmem:[#allocation2 + $0x12cc] ss:$52 sps:$4 sm:$0xff]  }
 0x288   :  { %v7434_v54 = vpop.f32.mrf.mxu1  ;;  %7725 = vmatprep.subr.bf16.mxu1 %v11654_v49  ;;  %v11723_v47 = vld [vmem:[#allocation2 + $0x14d4] ss:$52 sps:$4 sm:$0xff]   ;;  %v11721_v49 = vld [vmem:[#allocation2 + $0x14d0] ss:$52 sps:$4 sm:$0xff]  }
 0x289   :  { %v12938_v58 = vadd.f32 %v7434_v54, %v7392_v31  ;;  %v11700_v31 = vld [vmem:[#allocation2 + $0xde8] ss:$52 sps:$4 sm:$0xff]   ;;  %v11732_v54 = vld [vmem:[#allocation2 + $0x1264] ss:$52 sps:$4 sm:$0xff]  }
 0x28a   :  { %v7436_v62 = vpop.f32.mrf.mxu1  ;;  %7761 = vmatpush2.bf16.msra.mxu0 %v11655_v52  ;;  %v11724_v52 = vld [vmem:[#allocation2 + $0x12c8] ss:$52 sps:$4 sm:$0xff]  }
 0x28b   :  { %v12940_v63 = vadd.f32 %v7436_v62, %v7394_v33  ;;  %7726 = vmatpush2.bf16.msra.mxu1 %v11652_v51  ;;  %7762 = vmatprep.subr.bf16.mxu0 %v11663_v57  ;;  %v12491_v33 = vld [vmem:[%s13336_s0 + $0x8] ss:$44 sps:$4 sm:$0xff]   ;;  %v11729_v51 = vld [vmem:[#allocation2 + $0x146c] ss:$52 sps:$4 sm:$0xff]   ;;  %v11741_v62 = vld [vmem:[#allocation2 + $0x139c] ss:$52 sps:$4 sm:$0xff]  }
 0x28c   :  { %v7438_v0 = vpop.f32.mrf.mxu1  ;;  %7727 = vmatprep.subr.bf16.mxu1 %v11660_v56  ;;  %v11727_v34 = vld [vmem:[#allocation2 + $0x1468] ss:$52 sps:$4 sm:$0xff]   ;;  %v11735_v56 = vld [vmem:[#allocation2 + $0x1404] ss:$52 sps:$4 sm:$0xff]   ;;  %v11730_v57 = vld [vmem:[#allocation2 + $0x1260] ss:$52 sps:$4 sm:$0xff]  }
 0x28d   :  { %v12942_v5 = vadd.f32 %v7438_v0, %v7396_v41  ;;  %v11714_v41 = vld [vmem:[#allocation2 + $0xd1c] ss:$52 sps:$4 sm:$0xff]   ;;  %v11736_v0 = vld [vmem:[#allocation2 + $0x11f8] ss:$52 sps:$4 sm:$0xff]  }
 0x28e   :  { %7763 = vmatpush2.bf16.msra.mxu0 %v11661_v28  ;;  %v11738_v28 = vld [vmem:[#allocation2 + $0x11fc] ss:$52 sps:$4 sm:$0xff]  }
 0x28f   :  { %7728 = vmatpush2.bf16.msra.mxu1 %v11658_v59  ;;  %7764 = vmatprep.subr.bf16.mxu0 %v11669_v2  ;;  %v11733_v59 = vld [vmem:[#allocation2 + $0x1400] ss:$52 sps:$4 sm:$0xff]  }
 0x290   :  { %7729 = vmatprep.subr.bf16.mxu1 %v11666_v35  ;;  %v11739_v35 = vld [vmem:[#allocation2 + $0x1398] ss:$52 sps:$4 sm:$0xff]  }
 0x292   :  { %7765 = vmatpush2.bf16.msra.mxu0 %v11667_v7  ;;  %v11747_v7 = vld [vmem:[#allocation2 + $0x19b4] ss:$52 sps:$4 sm:$0xff]  }
 0x293   :  { %7730 = vmatpush2.bf16.msra.mxu1 %v11664_v40  ;;  %7766 = vmatprep.subr.bf16.mxu0 %v11672_v8  ;;  %v11744_v40 = vld [vmem:[#allocation2 + $0x1194] ss:$52 sps:$4 sm:$0xff]   ;;  %v11742_v8 = vld [vmem:[#allocation2 + $0x1190] ss:$52 sps:$4 sm:$0xff]  }
 0x294   :  { %7785 = vmatprep.subr.bf16.mxu1 %v11675_v9  ;;  %v11745_v9 = vld [vmem:[#allocation2 + $0x19b0] ss:$52 sps:$4 sm:$0xff]  }
 0x296   :  { %7732 = vmatmul.mubr.bf16.vlgmr.msra.gmra.mxu1 %v12489_v16  ;;  %7767 = vmatpush2.bf16.msra.mxu0 %v11670_v10  ;;  %v11751_v16 = vld [vmem:[#allocation2 + $0x1948] ss:$52 sps:$4 sm:$0xff]  }
 0x297   :  { %7786 = vmatpush1.bf16.msra.mxu1 %v11673_v46  ;;  %7768 = vmatprep.subr.bf16.mxu0 %v11678_v12  ;;  %v11750_v46 = vld [vmem:[#allocation2 + $0x112c] ss:$52 sps:$4 sm:$0xff]  }
 0x298   :  { %7787 = vmatprep.subr.bf16.mxu1 %v11681_v60  ;;  %7817 = vmatprep.mubr.bf16.mxu1 %v12490_v6  ;;  %v11753_v12 = vld [vmem:[#allocation2 + $0x194c] ss:$52 sps:$4 sm:$0xff]  }
 0x29a   :  { %7769 = vmatpush2.bf16.msra.mxu0 %v11676_v14 }
 0x29b   :  { %7788 = vmatpush1.bf16.msra.mxu1 %v11679_v15  ;;  %7770 = vmatprep.subr.bf16.mxu0 %v11684_v3  ;;  %v11748_v15 = vld [vmem:[#allocation2 + $0x1128] ss:$52 sps:$4 sm:$0xff]  }
 0x29c   :  { %7789 = vmatprep.subr.bf16.mxu1 %v11687_v17 }
 0x29e   :  { %7771 = vmatpush2.bf16.msra.mxu0 %v11682_v18  ;;  %v11756_v18 = vld [vmem:[#allocation2 + $0x10c4] ss:$52 sps:$4 sm:$0xff]  }
 0x29f   :  { %7790 = vmatpush1.bf16.msra.mxu1 %v11685_v55  ;;  %7772 = vmatprep.subr.bf16.mxu0 %v11690_v21  ;;  %v11759_v55 = vld [vmem:[#allocation2 + $0x18e4] ss:$52 sps:$4 sm:$0xff]  }
 0x2a0   :  { %7791 = vmatprep.subr.bf16.mxu1 %v11693_v22 }
 0x2a2   :  { %7773 = vmatpush2.bf16.msra.mxu0 %v11688_v23  ;;  %v11754_v23 = vld [vmem:[#allocation2 + $0x10c0] ss:$52 sps:$4 sm:$0xff]  }
 0x2a3   :  { %7792 = vmatpush1.bf16.msra.mxu1 %v11691_v61  ;;  %7828 = vmatprep.subr.bf16.mxu0 %v11699_v11  ;;  %v11757_v61 = vld [vmem:[#allocation2 + $0x18e0] ss:$52 sps:$4 sm:$0xff]  }
 0x2a4   :  { %7793 = vmatprep.subr.bf16.mxu1 %v11696_v25 }
 0x2a5   :  { %7775 = vmatmul.mubr.bf16.vlgmr.msra.gmra.mxu0 %v12491_v33  ;;  %v7475_v2 = vpop.f32.mrf.mxu0  ;;  %v11771_v33 = vld [vmem:[#allocation2 + $0x1cf4] ss:$52 sps:$4 sm:$0xff]  }
 0x2a6   :  { %7829 = vmatpush1.bf16.msra.mxu0 %v11697_v29  ;;  %7860 = vmatprep.mubr.bf16.mxu0 %v12492_v39  ;;  %v11765_v29 = vld [vmem:[#allocation2 + $0x187c] ss:$52 sps:$4 sm:$0xff]  }
 0x2a7   :  { %7794 = vmatpush1.bf16.msra.mxu1 %v11694_v26  ;;  %7830 = vmatprep.subr.bf16.mxu0 %v11705_v1  ;;  %v7477_v10 = vpop.f32.mrf.mxu0  ;;  %v11762_v26 = vld [vmem:[#allocation2 + $0x105c] ss:$52 sps:$4 sm:$0xff]   ;;  %v11760_v1 = vld [vmem:[#allocation2 + $0x1058] ss:$52 sps:$4 sm:$0xff]  }
 0x2a8   :  { %7795 = vmatprep.subr.bf16.mxu1 %v11702_v30  ;;  %v11772_v39 = vld [vmem:[#allocation2 + $0x17a8] ss:$52 sps:$4 sm:$0xff]  }
 0x2a9   :  { %v7479_v3 = vpop.f32.mrf.mxu0 }
 0x2aa   :  { %7831 = vmatpush1.bf16.msra.mxu0 %v11703_v32  ;;  %v11768_v32 = vld [vmem:[#allocation2 + $0x1814] ss:$52 sps:$4 sm:$0xff]  }
 0x2ab   :  { %7796 = vmatpush1.bf16.msra.mxu1 %v11700_v31  ;;  %7832 = vmatprep.subr.bf16.mxu0 %v11711_v37  ;;  %v7481_v25 = vpop.f32.mrf.mxu0  ;;  %v11763_v31 = vld [vmem:[#allocation2 + $0x1878] ss:$52 sps:$4 sm:$0xff]   ;;  %v11769_v37 = vld [vmem:[#allocation2 + $0x1cf0] ss:$52 sps:$4 sm:$0xff]  }
 0x2ac   :  { %7797 = vmatprep.subr.bf16.mxu1 %v11708_v36  ;;  %v11766_v36 = vld [vmem:[#allocation2 + $0x1810] ss:$52 sps:$4 sm:$0xff]  }
 0x2ae   :  { %7833 = vmatpush1.bf16.msra.mxu0 %v11709_v38  ;;  %v11777_v38 = vld [vmem:[#allocation2 + $0x1c8c] ss:$52 sps:$4 sm:$0xff]  }
 0x2af   :  { %7798 = vmatpush1.bf16.msra.mxu1 %v11706_v4  ;;  %7834 = vmatprep.subr.bf16.mxu0 %v11717_v42  ;;  %v11774_v4 = vld [vmem:[#allocation2 + $0x17ac] ss:$52 sps:$4 sm:$0xff]   ;;  %v12493_v42 = vld [vmem:[%s13336_s0 + $0x10] ss:$44 sps:$4 sm:$0xff]  }
 0x2b0   :  { %7799 = vmatprep.subr.bf16.mxu1 %v11714_v41  ;;  %v11775_v41 = vld [vmem:[#allocation2 + $0x1c88] ss:$52 sps:$4 sm:$0xff]  }
 0x2b2   :  { %7835 = vmatpush1.bf16.msra.mxu0 %v11715_v44  ;;  %v11783_v44 = vld [vmem:[#allocation2 + $0x1c24] ss:$52 sps:$4 sm:$0xff]  }
 0x2b3   :  { %7800 = vmatpush1.bf16.msra.mxu1 %v11712_v43  ;;  %7836 = vmatprep.subr.bf16.mxu0 %v11723_v47  ;;  %v11780_v43 = vld [vmem:[#allocation2 + $0x1744] ss:$52 sps:$4 sm:$0xff]   ;;  %v11781_v47 = vld [vmem:[#allocation2 + $0x1c20] ss:$52 sps:$4 sm:$0xff]  }
 0x2b4   :  { %7801 = vmatprep.subr.bf16.mxu1 %v11720_v45  ;;  %v11778_v45 = vld [vmem:[#allocation2 + $0x1740] ss:$52 sps:$4 sm:$0xff]  }
 0x2b6   :  { %7837 = vmatpush1.bf16.msra.mxu0 %v11721_v49  ;;  %v11786_v49 = vld [vmem:[#allocation2 + $0x16dc] ss:$52 sps:$4 sm:$0xff]  }
 0x2b7   :  { %7802 = vmatpush2.bf16.msra.mxu1 %v11718_v48  ;;  %7838 = vmatprep.subr.bf16.mxu0 %v11729_v51  ;;  %v12494_v48 = vld [vmem:[%s13336_s0 + $0x24] ss:$44 sps:$4 sm:$0xff]   ;;  %v11784_v51 = vld [vmem:[#allocation2 + $0x16d8] ss:$52 sps:$4 sm:$0xff]  }
 0x2b8   :  { %7803 = vmatprep.subr.bf16.mxu1 %v11726_v50  ;;  %v11789_v50 = vld [vmem:[#allocation2 + $0x1bbc] ss:$52 sps:$4 sm:$0xff]  }
 0x2ba   :  { %7839 = vmatpush1.bf16.msra.mxu0 %v11727_v34  ;;  %v11792_v34 = vld [vmem:[#allocation2 + $0x1b54] ss:$52 sps:$4 sm:$0xff]  }
 0x2bb   :  { %7804 = vmatpush2.bf16.msra.mxu1 %v11724_v52  ;;  %7840 = vmatprep.subr.bf16.mxu0 %v11735_v56  ;;  %v11787_v52 = vld [vmem:[#allocation2 + $0x1bb8] ss:$52 sps:$4 sm:$0xff]   ;;  %v11790_v56 = vld [vmem:[#allocation2 + $0x1b50] ss:$52 sps:$4 sm:$0xff]  }
 0x2bc   :  { %7805 = vmatprep.subr.bf16.mxu1 %v11732_v54  ;;  %v11795_v54 = vld [vmem:[#allocation2 + $0x21d4] ss:$52 sps:$4 sm:$0xff]  }
 0x2be   :  { %7841 = vmatpush1.bf16.msra.mxu0 %v11733_v59  ;;  %v11798_v59 = vld [vmem:[#allocation2 + $0x1aec] ss:$52 sps:$4 sm:$0xff]  }
 0x2bf   :  { %7806 = vmatpush2.bf16.msra.mxu1 %v11730_v57  ;;  %7842 = vmatprep.subr.bf16.mxu0 %v11741_v62  ;;  %v11793_v57 = vld [vmem:[#allocation2 + $0x21d0] ss:$52 sps:$4 sm:$0xff]   ;;  %v11796_v62 = vld [vmem:[#allocation2 + $0x1ae8] ss:$52 sps:$4 sm:$0xff]  }
 0x2c0   :  { %7807 = vmatprep.subr.bf16.mxu1 %v11738_v28  ;;  %v11801_v28 = vld [vmem:[#allocation2 + $0x216c] ss:$52 sps:$4 sm:$0xff]  }
 0x2c2   :  { %7843 = vmatpush1.bf16.msra.mxu0 %v11739_v35 }
 0x2c3   :  { %7808 = vmatpush2.bf16.msra.mxu1 %v11736_v0  ;;  %7844 = vmatprep.subr.bf16.mxu0 %v11747_v7  ;;  %v11799_v0 = vld [vmem:[#allocation2 + $0x2168] ss:$52 sps:$4 sm:$0xff]  }
 0x2c4   :  { %7809 = vmatprep.subr.bf16.mxu1 %v11744_v40 }
 0x2c6   :  { %v7518_v60 = vpop.f32.mrf.mxu1  ;;  %7845 = vmatpush2.bf16.msra.mxu0 %v11745_v9  ;;  %v11807_v9 = vld [vmem:[#allocation2 + $0x2104] ss:$52 sps:$4 sm:$0xff]  }
 0x2c7   :  { %v12956_v14 = vadd.f32 %v7518_v60, %v7475_v2  ;;  %7810 = vmatpush2.bf16.msra.mxu1 %v11742_v8  ;;  %7846 = vmatprep.subr.bf16.mxu0 %v11753_v12  ;;  %v12495_v2 = vld [vmem:[%s13336_s0 + $0x18] ss:$44 sps:$4 sm:$0xff]   ;;  %v11805_v12 = vld [vmem:[#allocation2 + $0x2100] ss:$52 sps:$4 sm:$0xff]  }
 0x2c8   :  { %v7520_v17 = vpop.f32.mrf.mxu1  ;;  %7811 = vmatprep.subr.bf16.mxu1 %v11750_v46  ;;  %v11804_v8 = vld [vmem:[#allocation2 + $0x1a84] ss:$52 sps:$4 sm:$0xff]   ;;  %v11802_v46 = vld [vmem:[#allocation2 + $0x1a80] ss:$52 sps:$4 sm:$0xff]  }
 0x2c9   :  { %v12958_v6 = vadd.f32 %v7520_v17, %v7477_v10 }
 0x2ca   :  { %v7522_v21 = vpop.f32.mrf.mxu1  ;;  %7847 = vmatpush2.bf16.msra.mxu0 %v11751_v16  ;;  %v11810_v16 = vld [vmem:[#allocation2 + $0x1a1c] ss:$52 sps:$4 sm:$0xff]  }
 0x2cb   :  { %v12960_v22 = vadd.f32 %v7522_v21, %v7479_v3  ;;  %7812 = vmatpush2.bf16.msra.mxu1 %v11748_v15  ;;  %7848 = vmatprep.subr.bf16.mxu0 %v11759_v55  ;;  %v11813_v3 = vld [vmem:[#allocation2 + $0x209c] ss:$52 sps:$4 sm:$0xff]   ;;  %v11811_v55 = vld [vmem:[#allocation2 + $0x2098] ss:$52 sps:$4 sm:$0xff]  }
 0x2cc   :  { %v7524_v11 = vpop.f32.mrf.mxu1  ;;  %7813 = vmatprep.subr.bf16.mxu1 %v11756_v18  ;;  %v11808_v18 = vld [vmem:[#allocation2 + $0x1a18] ss:$52 sps:$4 sm:$0xff]   ;;  %v11819_v21 = vld [vmem:[#allocation2 + $0x2fc] ss:$52 sps:$4 sm:$0xff]  }
 0x2cd   :  { %v12962_v30 = vadd.f32 %v7524_v11, %v7481_v25  ;;  %v11825_v25 = vld [vmem:[#allocation2 + $0x294] ss:$52 sps:$4 sm:$0xff]  }
 0x2ce   :  { %7849 = vmatpush2.bf16.msra.mxu0 %v11757_v61  ;;  %v11822_v61 = vld [vmem:[#allocation2 + $0x1fcc] ss:$52 sps:$4 sm:$0xff]   ;;  %v12989_v11 = vld [vmem:[%s13336_s0 + $0x28] ss:$44 sps:$4 sm:$0xff]  }
 0x2cf   :  { %7814 = vmatpush2.bf16.msra.mxu1 %v11754_v23  ;;  %7850 = vmatprep.subr.bf16.mxu0 %v11765_v29  ;;  %v11817_v23 = vld [vmem:[#allocation2 + $0x2f8] ss:$52 sps:$4 sm:$0xff]   ;;  %v11823_v29 = vld [vmem:[#allocation2 + $0x290] ss:$52 sps:$4 sm:$0xff]  }
 0x2d0   :  { %7815 = vmatprep.subr.bf16.mxu1 %v11762_v26  ;;  %v11820_v26 = vld [vmem:[#allocation2 + $0x1fc8] ss:$52 sps:$4 sm:$0xff]  }
 0x2d2   :  { %7851 = vmatpush2.bf16.msra.mxu0 %v11763_v31  ;;  %v12996_v31 = vld [vmem:[%s13336_s0 + $0x4] ss:$44 sps:$4 sm:$0xff]  }
 0x2d3   :  { %7816 = vmatpush2.bf16.msra.mxu1 %v11760_v1  ;;  %7852 = vmatprep.subr.bf16.mxu0 %v11768_v32  ;;  %v11831_v1 = vld [vmem:[#allocation2 + $0x22c] ss:$52 sps:$4 sm:$0xff]  }
 0x2d4   :  { %7871 = vmatprep.subr.bf16.mxu1 %v11771_v33  ;;  %v11826_v32 = vld [vmem:[#allocation2 + $0x1f60] ss:$52 sps:$4 sm:$0xff]   ;;  %v11829_v33 = vld [vmem:[#allocation2 + $0x228] ss:$52 sps:$4 sm:$0xff]  }
 0x2d6   :  { %7818 = vmatmul.mubr.bf16.vlgmr.msra.gmra.mxu1 %v12493_v42  ;;  %7853 = vmatpush2.bf16.msra.mxu0 %v11766_v36  ;;  %v11834_v36 = vld [vmem:[#allocation2 + $0x1efc] ss:$52 sps:$4 sm:$0xff]  }
 0x2d7   :  { %7872 = vmatpush1.bf16.msra.mxu1 %v11769_v37  ;;  %7854 = vmatprep.subr.bf16.mxu0 %v11774_v4  ;;  %v11837_v37 = vld [vmem:[#allocation2 + $0x1c4] ss:$52 sps:$4 sm:$0xff]  }
 0x2d8   :  { %7873 = vmatprep.subr.bf16.mxu1 %v11777_v38  ;;  %7903 = vmatprep.mubr.bf16.mxu1 %v12494_v48  ;;  %v11832_v4 = vld [vmem:[#allocation2 + $0x1ef8] ss:$52 sps:$4 sm:$0xff]   ;;  %v11835_v38 = vld [vmem:[#allocation2 + $0x1c0] ss:$52 sps:$4 sm:$0xff]   ;;  %v11838_v42 = vld [vmem:[#allocation2 + $0x1e90] ss:$52 sps:$4 sm:$0xff]  }
 0x2da   :  { %7855 = vmatpush2.bf16.msra.mxu0 %v11772_v39  ;;  %v11840_v39 = vld [vmem:[#allocation2 + $0x1e94] ss:$52 sps:$4 sm:$0xff]  }
 0x2db   :  { %7874 = vmatpush1.bf16.msra.mxu1 %v11775_v41  ;;  %7856 = vmatprep.subr.bf16.mxu0 %v11780_v43  ;;  %v11843_v41 = vld [vmem:[#allocation2 + $0x15c] ss:$52 sps:$4 sm:$0xff]   ;;  %v11841_v43 = vld [vmem:[#allocation2 + $0x158] ss:$52 sps:$4 sm:$0xff]  }
 0x2dc   :  { %7875 = vmatprep.subr.bf16.mxu1 %v11783_v44  ;;  %v11846_v44 = vld [vmem:[#allocation2 + $0x1e2c] ss:$52 sps:$4 sm:$0xff]  }
 0x2de   :  { %7857 = vmatpush2.bf16.msra.mxu0 %v11778_v45  ;;  %v11849_v45 = vld [vmem:[#allocation2 + $0xf4] ss:$52 sps:$4 sm:$0xff]  }
 0x2df   :  { %7876 = vmatpush1.bf16.msra.mxu1 %v11781_v47  ;;  %7858 = vmatprep.subr.bf16.mxu0 %v11786_v49  ;;  %v11844_v49 = vld [vmem:[#allocation2 + $0x1e28] ss:$52 sps:$4 sm:$0xff]  }
 0x2e0   :  { %7877 = vmatprep.subr.bf16.mxu1 %v11789_v50  ;;  %v11847_v50 = vld [vmem:[#allocation2 + $0xf0] ss:$52 sps:$4 sm:$0xff]  }
 0x2e2   :  { %7859 = vmatpush2.bf16.msra.mxu0 %v11784_v51 }
 0x2e3   :  { %7878 = vmatpush1.bf16.msra.mxu1 %v11787_v52  ;;  %7922 = vmatprep.subr.bf16.mxu0 %v11795_v54  ;;  %v11852_v52 = vld [vmem:[#allocation2 + $0x1dc4] ss:$52 sps:$4 sm:$0xff]  }
 0x2e4   :  { %7879 = vmatprep.subr.bf16.mxu1 %v11792_v34  ;;  %v11855_v34 = vld [vmem:[#allocation2 + $0x8c] ss:$52 sps:$4 sm:$0xff]  }
 0x2e5   :  { %v7561_v35 = vpop.f32.mrf.mxu0  ;;  %7861 = vmatmul.mubr.bf16.vlgmr.msra.gmra.mxu0 %v12495_v2 }
 0x2e6   :  { %v12974_v40 = vadd.f32 %v7561_v35, %v12956_v14  ;;  %7923 = vmatpush1.bf16.msra.mxu0 %v11793_v57  ;;  %7946 = vmatprep.mubr.bf16.mxu0 %v12700_v19  ;;  %v11861_v35 = vld [vmem:[#allocation2 + $0x24] ss:$52 sps:$4 sm:$0xff]  }
 0x2e7   :  { %7880 = vmatpush1.bf16.msra.mxu1 %v11790_v56  ;;  %v7563_v7 = vpop.f32.mrf.mxu0  ;;  %7924 = vmatprep.subr.bf16.mxu0 %v11801_v28  ;;  %v11853_v28 = vld [vmem:[#allocation2 + $0x88] ss:$52 sps:$4 sm:$0xff]  }
 0x2e8   :  { %7881 = vmatprep.subr.bf16.mxu1 %v11798_v59  ;;  %v12977_v10 = vadd.f32 %v7563_v7, %v12958_v6  ;;  %v11816_v6 = vld [vmem:[#allocation2 + $0x2034] ss:$52 sps:$4 sm:$0xff]  }
 0x2e9   :  { %v7565_v60 = vpop.f32.mrf.mxu0  ;;  %v11850_v59 = vld [vmem:[#allocation2 + $0x1dc0] ss:$52 sps:$4 sm:$0xff]  }
 0x2ea   :  { %v12981_v15 = vadd.f32 %v7565_v60, %v12960_v22  ;;  %7925 = vmatpush1.bf16.msra.mxu0 %v11799_v0  ;;  %v11814_v22 = vld [vmem:[#allocation2 + $0x2030] ss:$52 sps:$4 sm:$0xff]   ;;  %v11859_v7 = vld [vmem:[#allocation2 + $0x20] ss:$52 sps:$4 sm:$0xff]  }
 0x2eb   :  { %7882 = vmatpush1.bf16.msra.mxu1 %v11796_v62  ;;  %v7567_v14 = vpop.f32.mrf.mxu0  ;;  %7926 = vmatprep.subr.bf16.mxu0 %v11807_v9  ;;  %v11858_v0 = vld [vmem:[#allocation2 + $0x1d5c] ss:$52 sps:$4 sm:$0xff]   ;;  %v11873_v60 = vld [vmem:[#allocation2 + $0x914] ss:$52 sps:$4 sm:$0xff]  }
 0x2ec   :  { %7883 = vmatprep.subr.bf16.mxu1 %v11804_v8  ;;  %v12984_v17 = vadd.f32 %v7567_v14, %v12962_v30  ;;  %v11828_v30 = vld [vmem:[#allocation2 + $0x1f64] ss:$52 sps:$4 sm:$0xff]   ;;  %v11864_v8 = vld [vmem:[#allocation2 + $0x63c] ss:$52 sps:$4 sm:$0xff]  }
 0x2ed   :  { %v11867_v9 = vld [vmem:[#allocation2 + $0x97c] ss:$52 sps:$4 sm:$0xff]  }
 0x2ee   :  { %7927 = vmatpush1.bf16.msra.mxu0 %v11805_v12  ;;  %v11870_v12 = vld [vmem:[#allocation2 + $0x5d4] ss:$52 sps:$4 sm:$0xff]   ;;  %v11871_v14 = vld [vmem:[#allocation2 + $0x910] ss:$52 sps:$4 sm:$0xff]  }
 0x2ef   :  { %7884 = vmatpush1.bf16.msra.mxu1 %v11802_v46  ;;  %7928 = vmatprep.subr.bf16.mxu0 %v11813_v3  ;;  %v11865_v46 = vld [vmem:[#allocation2 + $0x978] ss:$52 sps:$4 sm:$0xff]  }
 0x2f0   :  { %7885 = vmatprep.subr.bf16.mxu1 %v11810_v16  ;;  %v13014_v16 = vld [vmem:[%s13336_s0 + $0x20] ss:$44 sps:$4 sm:$0xff]  }
 0x2f1   :  { %v11876_v3 = vld [vmem:[#allocation2 + $0x56c] ss:$52 sps:$4 sm:$0xff]  }
 0x2f2   :  { %7929 = vmatpush1.bf16.msra.mxu0 %v11811_v55  ;;  %v11877_v55 = vld [vmem:[#allocation2 + $0x8a8] ss:$52 sps:$4 sm:$0xff]  }
 0x2f3   :  { %7886 = vmatpush1.bf16.msra.mxu1 %v11808_v18  ;;  %7957 = vmatprep.subr.bf16.mxu0 %v11819_v21  ;;  %v11874_v18 = vld [vmem:[#allocation2 + $0x568] ss:$52 sps:$4 sm:$0xff]   ;;  %v11882_v21 = vld [vmem:[#allocation2 + $0x504] ss:$52 sps:$4 sm:$0xff]  }
 0x2f4   :  { %7887 = vmatprep.subr.bf16.mxu1 %v11816_v6  ;;  %v13020_v6 = vld [vmem:[%s13336_s0 + $0xc] ss:$44 sps:$4 sm:$0xff]  }
 0x2f5   :  { %10541 = vmatmul.mubr.msk.bf16.vlgmr.msra.gmra.mxu0 %vm6921_vm0, %v12989_v11 }
 0x2f6   :  { %7958 = vmatpush1.bf16.msra.mxu0 %v11817_v23  ;;  %7989 = vmatprep.mubr.bf16.mxu0 %v12996_v31  ;;  %v11880_v23 = vld [vmem:[#allocation2 + $0x500] ss:$52 sps:$4 sm:$0xff]  }
 0x2f7   :  { %7888 = vmatpush2.bf16.msra.mxu1 %v11814_v22  ;;  %7959 = vmatprep.subr.bf16.mxu0 %v11825_v25  ;;  %v11885_v22 = vld [vmem:[#allocation2 + $0x844] ss:$52 sps:$4 sm:$0xff]   ;;  %v11888_v25 = vld [vmem:[#allocation2 + $0x49c] ss:$52 sps:$4 sm:$0xff]  }
 0x2f8   :  { %7889 = vmatprep.subr.bf16.mxu1 %v11822_v61  ;;  %v11883_v61 = vld [vmem:[#allocation2 + $0x840] ss:$52 sps:$4 sm:$0xff]  }
 0x2fa   :  { %7960 = vmatpush1.bf16.msra.mxu0 %v11823_v29 }
 0x2fb   :  { %7890 = vmatpush2.bf16.msra.mxu1 %v11820_v26  ;;  %7961 = vmatprep.subr.bf16.mxu0 %v11831_v1  ;;  %v11891_v26 = vld [vmem:[#allocation2 + $0x7dc] ss:$52 sps:$4 sm:$0xff]   ;;  %v11889_v1 = vld [vmem:[#allocation2 + $0x7d8] ss:$52 sps:$4 sm:$0xff]  }
 0x2fc   :  { %7891 = vmatprep.subr.bf16.mxu1 %v11828_v30  ;;  %v11886_v30 = vld [vmem:[#allocation2 + $0x498] ss:$52 sps:$4 sm:$0xff]  }
 0x2fe   :  { %7962 = vmatpush1.bf16.msra.mxu0 %v11829_v33  ;;  %v11897_v33 = vld [vmem:[#allocation2 + $0x774] ss:$52 sps:$4 sm:$0xff]  }
 0x2ff   :  { %7892 = vmatpush2.bf16.msra.mxu1 %v11826_v32  ;;  %7963 = vmatprep.subr.bf16.mxu0 %v11837_v37  ;;  %v11894_v32 = vld [vmem:[#allocation2 + $0x434] ss:$52 sps:$4 sm:$0xff]  }
 0x300   :  { %7893 = vmatprep.subr.bf16.mxu1 %v11834_v36 }
 0x302   :  { %7964 = vmatpush1.bf16.msra.mxu0 %v11835_v38  ;;  %v11892_v38 = vld [vmem:[#allocation2 + $0x430] ss:$52 sps:$4 sm:$0xff]  }
 0x303   :  { %7894 = vmatpush2.bf16.msra.mxu1 %v11832_v4  ;;  %7965 = vmatprep.subr.bf16.mxu0 %v11843_v41 }
 0x304   :  { %7895 = vmatprep.subr.bf16.mxu1 %v11840_v39  ;;  %v11895_v39 = vld [vmem:[#allocation2 + $0x770] ss:$52 sps:$4 sm:$0xff]  }
 0x306   :  { %v7604_v47 = vpop.f32.mrf.mxu1  ;;  %7966 = vmatpush1.bf16.msra.mxu0 %v11841_v43  ;;  %v11903_v43 = vld [vmem:[#allocation2 + $0x70c] ss:$52 sps:$4 sm:$0xff]  }
 0x307   :  { %v13000_v48 = vadd.f32 %v7604_v47, %v12974_v40  ;;  %7896 = vmatpush2.bf16.msra.mxu1 %v11838_v42  ;;  %7967 = vmatprep.subr.bf16.mxu0 %v11849_v45  ;;  %v11856_v40 = vld [vmem:[#allocation2 + $0x1d58] ss:$52 sps:$4 sm:$0xff]  }
 0x308   :  { %v7606_v51 = vpop.f32.mrf.mxu1  ;;  %7897 = vmatprep.subr.bf16.mxu1 %v11846_v44  ;;  %v11900_v42 = vld [vmem:[#allocation2 + $0x3cc] ss:$52 sps:$4 sm:$0xff]  }
 0x309   :  { %v13003_v54 = vadd.f32 %v7606_v51, %v12977_v10  ;;  %v11862_v10 = vld [vmem:[#allocation2 + $0x638] ss:$52 sps:$4 sm:$0xff]  }
 0x30a   :  { %v7608_v56 = vpop.f32.mrf.mxu1  ;;  %7968 = vmatpush1.bf16.msra.mxu0 %v11847_v50 }
 0x30b   :  { %v13006_v57 = vadd.f32 %v7608_v56, %v12981_v15  ;;  %7898 = vmatpush2.bf16.msra.mxu1 %v11844_v49  ;;  %7969 = vmatprep.subr.bf16.mxu0 %v11855_v34  ;;  %v11868_v15 = vld [vmem:[#allocation2 + $0x5d0] ss:$52 sps:$4 sm:$0xff]  }
 0x30c   :  { %v7610_v62 = vpop.f32.mrf.mxu1  ;;  %7899 = vmatprep.subr.bf16.mxu1 %v11852_v52  ;;  %v11901_v52 = vld [vmem:[#allocation2 + $0x708] ss:$52 sps:$4 sm:$0xff]   ;;  %v11906_v56 = vld [vmem:[#allocation2 + $0x364] ss:$52 sps:$4 sm:$0xff]  }
 0x30d   :  { %v13009_v2 = vadd.f32 %v7610_v62, %v12984_v17  ;;  %v11879_v17 = vld [vmem:[#allocation2 + $0x8ac] ss:$52 sps:$4 sm:$0xff]  }
 0x30e   :  { %7970 = vmatpush1.bf16.msra.mxu0 %v11853_v28 }
 0x30f   :  { %7900 = vmatpush2.bf16.msra.mxu1 %v11850_v59  ;;  %7971 = vmatprep.subr.bf16.mxu0 %v11861_v35  ;;  %v11909_v59 = vld [vmem:[#allocation2 + $0x6a4] ss:$52 sps:$4 sm:$0xff]   ;;  %v11904_v35 = vld [vmem:[#allocation2 + $0x360] ss:$52 sps:$4 sm:$0xff]  }
 0x310   :  { %7901 = vmatprep.subr.bf16.mxu1 %v11858_v0 }
 0x312   :  { %7972 = vmatpush1.bf16.msra.mxu0 %v11859_v7  ;;  %v11915_v7 = vld [vmem:[#allocation2 + $0xffc] ss:$52 sps:$4 sm:$0xff]  }
 0x313   :  { %7902 = vmatpush2.bf16.msra.mxu1 %v11856_v40  ;;  %7973 = vmatprep.subr.bf16.mxu0 %v11864_v8  ;;  %v11912_v40 = vld [vmem:[#allocation2 + $0xcbc] ss:$52 sps:$4 sm:$0xff]   ;;  %v11910_v8 = vld [vmem:[#allocation2 + $0xcb8] ss:$52 sps:$4 sm:$0xff]  }
 0x314   :  { %8000 = vmatprep.subr.bf16.mxu1 %v11867_v9  ;;  %v11913_v9 = vld [vmem:[#allocation2 + $0xff8] ss:$52 sps:$4 sm:$0xff]  }
 0x316   :  { %7904 = vmatmul.mubr.bf16.vlgmr.msra.gmra.mxu1 %v13014_v16  ;;  %7974 = vmatpush2.bf16.msra.mxu0 %v11862_v10  ;;  %v7690_v29 = vpop.f32.mrf.mxu1  ;;  %v11918_v10 = vld [vmem:[#allocation2 + $0xc54] ss:$52 sps:$4 sm:$0xff]  }
 0x317   :  { %8001 = vmatpush1.bf16.msra.mxu1 %v11865_v46  ;;  %7975 = vmatprep.subr.bf16.mxu0 %v11870_v12  ;;  %v11921_v46 = vld [vmem:[#allocation2 + $0xf94] ss:$52 sps:$4 sm:$0xff]   ;;  %v11916_v12 = vld [vmem:[#allocation2 + $0xc50] ss:$52 sps:$4 sm:$0xff]  }
 0x318   :  { %8002 = vmatprep.subr.bf16.mxu1 %v11873_v60  ;;  %8032 = vmatprep.mubr.bf16.mxu1 %v13020_v6  ;;  %v7692_v36 = vpop.f32.mrf.mxu1  ;;  %v11919_v60 = vld [vmem:[#allocation2 + $0xf90] ss:$52 sps:$4 sm:$0xff]  }
 0x31a   :  { %7976 = vmatpush2.bf16.msra.mxu0 %v11868_v15  ;;  %v7694_v47 = vpop.f32.mrf.mxu1  ;;  %v11924_v15 = vld [vmem:[#allocation2 + $0xbec] ss:$52 sps:$4 sm:$0xff]  }
 0x31b   :  { %8003 = vmatpush1.bf16.msra.mxu1 %v11871_v14  ;;  %7977 = vmatprep.subr.bf16.mxu0 %v11876_v3  ;;  %v11927_v14 = vld [vmem:[#allocation2 + $0xf2c] ss:$52 sps:$4 sm:$0xff]  }
 0x31c   :  { %8004 = vmatprep.subr.bf16.mxu1 %v11879_v17  ;;  %v13044_v3 = vld [vmem:[%s13336_s0 + $0x14] ss:$44 sps:$4 sm:$0xff]   ;;  %v11922_v17 = vld [vmem:[#allocation2 + $0xbe8] ss:$52 sps:$4 sm:$0xff]  }
 0x31e   :  { %7978 = vmatpush2.bf16.msra.mxu0 %v11874_v18  ;;  %v11925_v18 = vld [vmem:[#allocation2 + $0xf28] ss:$52 sps:$4 sm:$0xff]  }
 0x31f   :  { %8005 = vmatpush1.bf16.msra.mxu1 %v11877_v55  ;;  %7979 = vmatprep.subr.bf16.mxu0 %v11882_v21  ;;  %v11930_v55 = vld [vmem:[#allocation2 + $0xb84] ss:$52 sps:$4 sm:$0xff]  }
 0x320   :  { %8006 = vmatprep.subr.bf16.mxu1 %v11885_v22  ;;  %v11933_v21 = vld [vmem:[#allocation2 + $0xec4] ss:$52 sps:$4 sm:$0xff]   ;;  %v11928_v22 = vld [vmem:[#allocation2 + $0xb80] ss:$52 sps:$4 sm:$0xff]  }
 0x322   :  { %7980 = vmatpush2.bf16.msra.mxu0 %v11880_v23  ;;  %v11931_v23 = vld [vmem:[#allocation2 + $0xec0] ss:$52 sps:$4 sm:$0xff]  }
 0x323   :  { %8007 = vmatpush1.bf16.msra.mxu1 %v11883_v61  ;;  %7981 = vmatprep.subr.bf16.mxu0 %v11888_v25  ;;  %v11936_v61 = vld [vmem:[#allocation2 + $0xb1c] ss:$52 sps:$4 sm:$0xff]  }
 0x324   :  { %8008 = vmatprep.subr.bf16.mxu1 %v11891_v26  ;;  %v11939_v25 = vld [vmem:[#allocation2 + $0xe5c] ss:$52 sps:$4 sm:$0xff]   ;;  %v11934_v26 = vld [vmem:[#allocation2 + $0xb18] ss:$52 sps:$4 sm:$0xff]  }
 0x325   :  { %v7647_v37 = vpop.f32.mrf.mxu0 }
 0x326   :  { %v7648_v4 = vadd.f32 %v7647_v37, %v13000_v48  ;;  %7982 = vmatpush2.bf16.msra.mxu0 %v11886_v30  ;;  %v11898_v48 = vld [vmem:[#allocation2 + $0x3c8] ss:$52 sps:$4 sm:$0xff]   ;;  %v11951_v37 = vld [vmem:[#allocation2 + $0xd8c] ss:$52 sps:$4 sm:$0xff]  }
 0x327   :  { %8009 = vmatpush1.bf16.msra.mxu1 %v11889_v1  ;;  %v7649_v41 = vpop.f32.mrf.mxu0  ;;  %7983 = vmatprep.subr.bf16.mxu0 %v11894_v32  ;;  %v11942_v30 = vld [vmem:[#allocation2 + $0xab4] ss:$52 sps:$4 sm:$0xff]   ;;  %v11940_v32 = vld [vmem:[#allocation2 + $0xab0] ss:$52 sps:$4 sm:$0xff]  }
 0x328   :  { %8010 = vmatprep.subr.bf16.mxu1 %v11897_v33  ;;  %v13024_v44 = vadd.f32 %v7690_v29, %v7648_v4  ;;  %v7650_v45 = vadd.f32 %v7649_v41, %v13003_v54  ;;  %v7696_v54 = vpop.f32.mrf.mxu1  ;;  %v11937_v29 = vld [vmem:[#allocation2 + $0xe58] ss:$52 sps:$4 sm:$0xff]   ;;  %v11945_v1 = vld [vmem:[#allocation2 + $0xdf4] ss:$52 sps:$4 sm:$0xff]   ;;  %v11943_v33 = vld [vmem:[#allocation2 + $0xdf0] ss:$52 sps:$4 sm:$0xff]  }
 0x329   :  { %v7651_v49 = vpop.f32.mrf.mxu0  ;;  %v11946_v4 = vld [vmem:[#allocation2 + $0xa48] ss:$52 sps:$4 sm:$0xff]   ;;  %v11957_v41 = vld [vmem:[#allocation2 + $0xd24] ss:$52 sps:$4 sm:$0xff]  }
 0x32a   :  { %v13027_v50 = vadd.f32 %v7692_v36, %v7650_v45  ;;  %v7652_v51 = vadd.f32 %v7651_v49, %v13006_v57  ;;  %7984 = vmatpush2.bf16.msra.mxu0 %v11892_v38  ;;  %v11907_v57 = vld [vmem:[#allocation2 + $0x6a0] ss:$52 sps:$4 sm:$0xff]   ;;  %v11949_v38 = vld [vmem:[#allocation2 + $0xd88] ss:$52 sps:$4 sm:$0xff]   ;;  %v11958_v49 = vld [vmem:[#allocation2 + $0x1338] ss:$52 sps:$4 sm:$0xff]  }
 0x32b   :  { %8011 = vmatpush1.bf16.msra.mxu1 %v11895_v39  ;;  %v7653_v34 = vpop.f32.mrf.mxu0  ;;  %7985 = vmatprep.subr.bf16.mxu0 %v11900_v42  ;;  %v11948_v36 = vld [vmem:[#allocation2 + $0xa4c] ss:$52 sps:$4 sm:$0xff]   ;;  %v11954_v39 = vld [vmem:[#allocation2 + $0x9e4] ss:$52 sps:$4 sm:$0xff]   ;;  %v11960_v45 = vld [vmem:[#allocation2 + $0x133c] ss:$52 sps:$4 sm:$0xff]  }
 0x32c   :  { %8012 = vmatprep.subr.bf16.mxu1 %v11903_v43  ;;  %v13030_v28 = vadd.f32 %v7694_v47, %v7652_v51  ;;  %v7654_v62 = vadd.f32 %v7653_v34, %v13009_v2  ;;  %v13038_v2 = vld [vmem:[%s13336_s0] ss:$44 sps:$4 sm:$0xff]   ;;  %v11963_v47 = vld [vmem:[#allocation2 + $0x167c] ss:$52 sps:$4 sm:$0xff]   ;;  %v13050_v34 = vld [vmem:[%s13336_s0 + $0x8] ss:$44 sps:$4 sm:$0xff]  }
 0x32d   :  { %v11952_v42 = vld [vmem:[#allocation2 + $0x9e0] ss:$52 sps:$4 sm:$0xff]   ;;  %v11961_v51 = vld [vmem:[#allocation2 + $0x1678] ss:$52 sps:$4 sm:$0xff]  }
 0x32e   :  { %v13033_v0 = vadd.f32 %v7696_v54, %v7654_v62  ;;  %7986 = vmatpush2.bf16.msra.mxu0 %v11898_v48  ;;  %v11955_v43 = vld [vmem:[#allocation2 + $0xd20] ss:$52 sps:$4 sm:$0xff]  }
 0x32f   :  { %8013 = vmatpush1.bf16.msra.mxu1 %v11901_v52  ;;  %7987 = vmatprep.subr.bf16.mxu0 %v11906_v56  ;;  %v11966_v48 = vld [vmem:[#allocation2 + $0x12d4] ss:$52 sps:$4 sm:$0xff]   ;;  %v11964_v56 = vld [vmem:[#allocation2 + $0x12d0] ss:$52 sps:$4 sm:$0xff]   ;;  %v11972_v62 = vld [vmem:[#allocation2 + $0x126c] ss:$52 sps:$4 sm:$0xff]  }
 0x330   :  { %8014 = vmatprep.subr.bf16.mxu1 %v11909_v59  ;;  %v11969_v52 = vld [vmem:[#allocation2 + $0x1614] ss:$52 sps:$4 sm:$0xff]   ;;  %v11967_v59 = vld [vmem:[#allocation2 + $0x1610] ss:$52 sps:$4 sm:$0xff]   ;;  %v11975_v54 = vld [vmem:[#allocation2 + $0x15ac] ss:$52 sps:$4 sm:$0xff]  }
 0x332   :  { %7988 = vmatpush2.bf16.msra.mxu0 %v11904_v35  ;;  %v13056_v35 = vld [vmem:[%s13336_s0 + $0x1c] ss:$44 sps:$4 sm:$0xff]  }
 0x333   :  { %8015 = vmatpush1.bf16.msra.mxu1 %v11907_v57  ;;  %8043 = vmatprep.subr.bf16.mxu0 %v11915_v7  ;;  %v11970_v57 = vld [vmem:[#allocation2 + $0x1268] ss:$52 sps:$4 sm:$0xff]   ;;  %v11978_v7 = vld [vmem:[#allocation2 + $0x1204] ss:$52 sps:$4 sm:$0xff]  }
 0x334   :  { %8016 = vmatprep.subr.bf16.mxu1 %v11912_v40  ;;  %v11973_v40 = vld [vmem:[#allocation2 + $0x15a8] ss:$52 sps:$4 sm:$0xff]  }
 0x335   :  { %7990 = vmatmul.mubr.bf16.vlgmr.msra.gmra.mxu0 %v13038_v2 }
 0x336   :  { %8044 = vmatpush1.bf16.msra.mxu0 %v11913_v9  ;;  %8075 = vmatprep.mubr.bf16.mxu0 %v13044_v3  ;;  %v11976_v9 = vld [vmem:[#allocation2 + $0x1200] ss:$52 sps:$4 sm:$0xff]  }
 0x337   :  { %8017 = vmatpush2.bf16.msra.mxu1 %v11910_v8  ;;  %8045 = vmatprep.subr.bf16.mxu0 %v11921_v46  ;;  %v11981_v8 = vld [vmem:[#allocation2 + $0x1544] ss:$52 sps:$4 sm:$0xff]  }
 0x338   :  { %8018 = vmatprep.subr.bf16.mxu1 %v11918_v10  ;;  %v11979_v10 = vld [vmem:[#allocation2 + $0x1540] ss:$52 sps:$4 sm:$0xff]  }
 0x33a   :  { %8046 = vmatpush1.bf16.msra.mxu0 %v11919_v60  ;;  %v11987_v60 = vld [vmem:[#allocation2 + $0x14dc] ss:$52 sps:$4 sm:$0xff]  }
 0x33b   :  { %8019 = vmatpush2.bf16.msra.mxu1 %v11916_v12  ;;  %8047 = vmatprep.subr.bf16.mxu0 %v11927_v14  ;;  %v11984_v12 = vld [vmem:[#allocation2 + $0x119c] ss:$52 sps:$4 sm:$0xff]   ;;  %v11985_v14 = vld [vmem:[#allocation2 + $0x14d8] ss:$52 sps:$4 sm:$0xff]  }
 0x33c   :  { %8020 = vmatprep.subr.bf16.mxu1 %v11924_v15  ;;  %v11982_v15 = vld [vmem:[#allocation2 + $0x1198] ss:$52 sps:$4 sm:$0xff]  }
 0x33e   :  { %8048 = vmatpush1.bf16.msra.mxu0 %v11925_v18  ;;  %v11990_v18 = vld [vmem:[#allocation2 + $0x1134] ss:$52 sps:$4 sm:$0xff]  }
 0x33f   :  { %8021 = vmatpush2.bf16.msra.mxu1 %v11922_v17  ;;  %8049 = vmatprep.subr.bf16.mxu0 %v11933_v21 }
 0x340   :  { %8022 = vmatprep.subr.bf16.mxu1 %v11930_v55  ;;  %v11993_v55 = vld [vmem:[#allocation2 + $0x1474] ss:$52 sps:$4 sm:$0xff]  }
 0x342   :  { %8050 = vmatpush1.bf16.msra.mxu0 %v11931_v23  ;;  %v11988_v23 = vld [vmem:[#allocation2 + $0x1130] ss:$52 sps:$4 sm:$0xff]  }
 0x343   :  { %8023 = vmatpush2.bf16.msra.mxu1 %v11928_v22  ;;  %8051 = vmatprep.subr.bf16.mxu0 %v11939_v25 }
 0x344   :  { %8024 = vmatprep.subr.bf16.mxu1 %v11936_v61  ;;  %v11991_v61 = vld [vmem:[#allocation2 + $0x1470] ss:$52 sps:$4 sm:$0xff]  }
 0x346   :  { %8052 = vmatpush1.bf16.msra.mxu0 %v11937_v29  ;;  %v11996_v29 = vld [vmem:[#allocation2 + $0x10cc] ss:$52 sps:$4 sm:$0xff]  }
 0x347   :  { %8025 = vmatpush2.bf16.msra.mxu1 %v11934_v26  ;;  %8053 = vmatprep.subr.bf16.mxu0 %v11945_v1 }
 0x348   :  { %8026 = vmatprep.subr.bf16.mxu1 %v11942_v30  ;;  %v11999_v30 = vld [vmem:[#allocation2 + $0x140c] ss:$52 sps:$4 sm:$0xff]  }
 0x34a   :  { %8054 = vmatpush1.bf16.msra.mxu0 %v11943_v33 }
 0x34b   :  { %8027 = vmatpush2.bf16.msra.mxu1 %v11940_v32  ;;  %8055 = vmatprep.subr.bf16.mxu0 %v11951_v37  ;;  %v11997_v37 = vld [vmem:[#allocation2 + $0x1408] ss:$52 sps:$4 sm:$0xff]  }
 0x34c   :  { %8028 = vmatprep.subr.bf16.mxu1 %v11948_v36  ;;  %v11994_v36 = vld [vmem:[#allocation2 + $0x10c8] ss:$52 sps:$4 sm:$0xff]  }
 0x34e   :  { %8056 = vmatpush1.bf16.msra.mxu0 %v11949_v38 }
 0x34f   :  { %8029 = vmatpush2.bf16.msra.mxu1 %v11946_v4  ;;  %8057 = vmatprep.subr.bf16.mxu0 %v11957_v41  ;;  %v12005_v41 = vld [vmem:[#allocation2 + $0x13a4] ss:$52 sps:$4 sm:$0xff]  }
 0x350   :  { %8030 = vmatprep.subr.bf16.mxu1 %v11954_v39  ;;  %v12002_v39 = vld [vmem:[#allocation2 + $0x1064] ss:$52 sps:$4 sm:$0xff]  }
 0x352   :  { %8058 = vmatpush1.bf16.msra.mxu0 %v11955_v43  ;;  %v12000_v43 = vld [vmem:[#allocation2 + $0x1060] ss:$52 sps:$4 sm:$0xff]  }
 0x353   :  { %8031 = vmatpush2.bf16.msra.mxu1 %v11952_v42  ;;  %8059 = vmatprep.subr.bf16.mxu0 %v11960_v45  ;;  %v12003_v45 = vld [vmem:[#allocation2 + $0x13a0] ss:$52 sps:$4 sm:$0xff]  }
 0x354   :  { %8086 = vmatprep.subr.bf16.mxu1 %v11963_v47  ;;  %v12008_v47 = vld [vmem:[#allocation2 + $0x19bc] ss:$52 sps:$4 sm:$0xff]  }
 0x356   :  { %8033 = vmatmul.mubr.bf16.vlgmr.msra.gmra.mxu1 %v13050_v34  ;;  %8060 = vmatpush2.bf16.msra.mxu0 %v11958_v49  ;;  %v7733_v46 = vpop.f32.mrf.mxu1  ;;  %v12011_v49 = vld [vmem:[#allocation2 + $0x1cfc] ss:$52 sps:$4 sm:$0xff]  }
 0x357   :  { %8087 = vmatpush1.bf16.msra.mxu1 %v11961_v51  ;;  %8061 = vmatprep.subr.bf16.mxu0 %v11966_v48  ;;  %v12006_v51 = vld [vmem:[#allocation2 + $0x19b8] ss:$52 sps:$4 sm:$0xff]  }
 0x358   :  { %8088 = vmatprep.subr.bf16.mxu1 %v11969_v52  ;;  %8118 = vmatprep.mubr.bf16.mxu1 %v13056_v35  ;;  %v7735_v17 = vpop.f32.mrf.mxu1  ;;  %v12009_v48 = vld [vmem:[#allocation2 + $0x1cf8] ss:$52 sps:$4 sm:$0xff]   ;;  %v12014_v52 = vld [vmem:[#allocation2 + $0x1954] ss:$52 sps:$4 sm:$0xff]  }
 0x35a   :  { %8062 = vmatpush2.bf16.msra.mxu0 %v11964_v56  ;;  %v7737_v25 = vpop.f32.mrf.mxu1  ;;  %v12017_v56 = vld [vmem:[#allocation2 + $0x1c94] ss:$52 sps:$4 sm:$0xff]  }
 0x35b   :  { %8089 = vmatpush1.bf16.msra.mxu1 %v11967_v59  ;;  %8063 = vmatprep.subr.bf16.mxu0 %v11972_v62  ;;  %v13070_v59 = vld [vmem:[%s13336_s0 + $0x10] ss:$44 sps:$4 sm:$0xff]  }
 0x35c   :  { %8090 = vmatprep.subr.bf16.mxu1 %v11975_v54  ;;  %v7739_v4 = vpop.f32.mrf.mxu1  ;;  %v12012_v62 = vld [vmem:[#allocation2 + $0x1950] ss:$52 sps:$4 sm:$0xff]  }
 0x35d   :  { %v12015_v54 = vld [vmem:[#allocation2 + $0x1c90] ss:$52 sps:$4 sm:$0xff]  }
 0x35e   :  { %8064 = vmatpush2.bf16.msra.mxu0 %v11970_v57  ;;  %v12020_v57 = vld [vmem:[#allocation2 + $0x18ec] ss:$52 sps:$4 sm:$0xff]  }
 0x35f   :  { %8091 = vmatpush1.bf16.msra.mxu1 %v11973_v40  ;;  %8065 = vmatprep.subr.bf16.mxu0 %v11978_v7  ;;  %v12023_v40 = vld [vmem:[#allocation2 + $0x1c2c] ss:$52 sps:$4 sm:$0xff]   ;;  %v13076_v7 = vld [vmem:[%s13336_s0 + $0x24] ss:$44 sps:$4 sm:$0xff]  }
 0x360   :  { %8092 = vmatprep.subr.bf16.mxu1 %v11981_v8  ;;  %v12018_v8 = vld [vmem:[#allocation2 + $0x18e8] ss:$52 sps:$4 sm:$0xff]  }
 0x362   :  { %8066 = vmatpush2.bf16.msra.mxu0 %v11976_v9  ;;  %v12021_v9 = vld [vmem:[#allocation2 + $0x1c28] ss:$52 sps:$4 sm:$0xff]  }
 0x363   :  { %8093 = vmatpush1.bf16.msra.mxu1 %v11979_v10  ;;  %8067 = vmatprep.subr.bf16.mxu0 %v11984_v12  ;;  %v12026_v10 = vld [vmem:[#allocation2 + $0x1884] ss:$52 sps:$4 sm:$0xff]   ;;  %v12024_v12 = vld [vmem:[#allocation2 + $0x1880] ss:$52 sps:$4 sm:$0xff]  }
 0x364   :  { %8094 = vmatprep.subr.bf16.mxu1 %v11987_v60  ;;  %v12027_v60 = vld [vmem:[#allocation2 + $0x1bc0] ss:$52 sps:$4 sm:$0xff]  }
 0x365   :  { %v7776_v21 = vpop.f32.mrf.mxu0 }
 0x366   :  { %v13059_v22 = vadd.f32 %v7776_v21, %v7733_v46  ;;  %8068 = vmatpush2.bf16.msra.mxu0 %v11982_v15  ;;  %v12029_v46 = vld [vmem:[#allocation2 + $0x1bc4] ss:$52 sps:$4 sm:$0xff]   ;;  %v12032_v15 = vld [vmem:[#allocation2 + $0x181c] ss:$52 sps:$4 sm:$0xff]   ;;  %v12041_v21 = vld [vmem:[#allocation2 + $0x1af4] ss:$52 sps:$4 sm:$0xff]  }
 0x367   :  { %8095 = vmatpush1.bf16.msra.mxu1 %v11985_v14  ;;  %v7778_v26 = vpop.f32.mrf.mxu0  ;;  %8069 = vmatprep.subr.bf16.mxu0 %v11990_v18  ;;  %v12035_v14 = vld [vmem:[#allocation2 + $0x1b5c] ss:$52 sps:$4 sm:$0xff]   ;;  %v12033_v18 = vld [vmem:[#allocation2 + $0x1b58] ss:$52 sps:$4 sm:$0xff]  }
 0x368   :  { %8096 = vmatprep.subr.bf16.mxu1 %v11993_v55  ;;  %v13061_v1 = vadd.f32 %v7778_v26, %v7735_v17  ;;  %v12030_v17 = vld [vmem:[#allocation2 + $0x1818] ss:$52 sps:$4 sm:$0xff]   ;;  %v12038_v55 = vld [vmem:[#allocation2 + $0x17b4] ss:$52 sps:$4 sm:$0xff]  }
 0x369   :  { %v7780_v32 = vpop.f32.mrf.mxu0  ;;  %v12047_v26 = vld [vmem:[#allocation2 + $0x1a8c] ss:$52 sps:$4 sm:$0xff]  }
 0x36a   :  { %v13063_v33 = vadd.f32 %v7780_v32, %v7737_v25  ;;  %8070 = vmatpush2.bf16.msra.mxu0 %v11988_v23  ;;  %v12036_v23 = vld [vmem:[#allocation2 + $0x17b0] ss:$52 sps:$4 sm:$0xff]   ;;  %v12044_v25 = vld [vmem:[#allocation2 + $0x174c] ss:$52 sps:$4 sm:$0xff]  }
 0x36b   :  { %8097 = vmatpush1.bf16.msra.mxu1 %v11991_v61  ;;  %v7782_v38 = vpop.f32.mrf.mxu0  ;;  %8071 = vmatprep.subr.bf16.mxu0 %v11996_v29  ;;  %v12039_v61 = vld [vmem:[#allocation2 + $0x1af0] ss:$52 sps:$4 sm:$0xff]   ;;  %v12042_v29 = vld [vmem:[#allocation2 + $0x1748] ss:$52 sps:$4 sm:$0xff]  }
 0x36c   :  { %8098 = vmatprep.subr.bf16.mxu1 %v11999_v30  ;;  %v13065_v42 = vadd.f32 %v7782_v38, %v7739_v4  ;;  %v12045_v30 = vld [vmem:[#allocation2 + $0x1a88] ss:$52 sps:$4 sm:$0xff]   ;;  %v12050_v32 = vld [vmem:[#allocation2 + $0x16e4] ss:$52 sps:$4 sm:$0xff]   ;;  %v12051_v4 = vld [vmem:[#allocation2 + $0x1a20] ss:$52 sps:$4 sm:$0xff]  }
 0x36d   :  { %v12056_v38 = vld [vmem:[#allocation2 + $0x203c] ss:$52 sps:$4 sm:$0xff]  }
 0x36e   :  { %8072 = vmatpush2.bf16.msra.mxu0 %v11994_v36  ;;  %v12053_v36 = vld [vmem:[#allocation2 + $0x1a24] ss:$52 sps:$4 sm:$0xff]  }
 0x36f   :  { %8099 = vmatpush1.bf16.msra.mxu1 %v11997_v37  ;;  %8073 = vmatprep.subr.bf16.mxu0 %v12002_v39  ;;  %v12048_v37 = vld [vmem:[#allocation2 + $0x16e0] ss:$52 sps:$4 sm:$0xff]   ;;  %v12059_v39 = vld [vmem:[#allocation2 + $0x21dc] ss:$52 sps:$4 sm:$0xff]  }
 0x370   :  { %8100 = vmatprep.subr.bf16.mxu1 %v12005_v41  ;;  %v12054_v41 = vld [vmem:[#allocation2 + $0x2038] ss:$52 sps:$4 sm:$0xff]  }
 0x372   :  { %8074 = vmatpush2.bf16.msra.mxu0 %v12000_v43  ;;  %v12057_v43 = vld [vmem:[#allocation2 + $0x21d8] ss:$52 sps:$4 sm:$0xff]  }
 0x373   :  { %8101 = vmatpush1.bf16.msra.mxu1 %v12003_v45  ;;  %8129 = vmatprep.subr.bf16.mxu0 %v12011_v49  ;;  %v12062_v45 = vld [vmem:[#allocation2 + $0x1fd4] ss:$52 sps:$4 sm:$0xff]  }
 0x374   :  { %8102 = vmatprep.subr.bf16.mxu1 %v12008_v47  ;;  %v12065_v47 = vld [vmem:[#allocation2 + $0x2174] ss:$52 sps:$4 sm:$0xff]  }
 0x375   :  { %8076 = vmatmul.mubr.bf16.vlgmr.msra.gmra.mxu0 %v13070_v59 }
 0x376   :  { %8130 = vmatpush1.bf16.msra.mxu0 %v12009_v48  ;;  %8161 = vmatprep.mubr.bf16.mxu0 %v13076_v7 }
 0x377   :  { %8103 = vmatpush2.bf16.msra.mxu1 %v12006_v51  ;;  %8131 = vmatprep.subr.bf16.mxu0 %v12017_v56  ;;  %v13082_v51 = vld [vmem:[%s13336_s0 + $0x18] ss:$44 sps:$4 sm:$0xff]  }
 0x378   :  { %8104 = vmatprep.subr.bf16.mxu1 %v12014_v52  ;;  %v12060_v52 = vld [vmem:[#allocation2 + $0x1fd0] ss:$52 sps:$4 sm:$0xff]  }
 0x379   :  { %v12063_v56 = vld [vmem:[#allocation2 + $0x2170] ss:$52 sps:$4 sm:$0xff]  }
 0x37a   :  { %8132 = vmatpush1.bf16.msra.mxu0 %v12015_v54  ;;  %v12068_v54 = vld [vmem:[#allocation2 + $0x1f6c] ss:$52 sps:$4 sm:$0xff]  }
 0x37b   :  { %8105 = vmatpush2.bf16.msra.mxu1 %v12012_v62  ;;  %8133 = vmatprep.subr.bf16.mxu0 %v12023_v40 }
 0x37c   :  { %8106 = vmatprep.subr.bf16.mxu1 %v12020_v57  ;;  %v12071_v57 = vld [vmem:[#allocation2 + $0x210c] ss:$52 sps:$4 sm:$0xff]  }
 0x37e   :  { %8134 = vmatpush1.bf16.msra.mxu0 %v12021_v9 }
 0x37f   :  { %8107 = vmatpush2.bf16.msra.mxu1 %v12018_v8  ;;  %8135 = vmatprep.subr.bf16.mxu0 %v12029_v46 }
 0x380   :  { %8108 = vmatprep.subr.bf16.mxu1 %v12026_v10  ;;  %v12066_v10 = vld [vmem:[#allocation2 + $0x1f68] ss:$52 sps:$4 sm:$0xff]  }
 0x382   :  { %8136 = vmatpush1.bf16.msra.mxu0 %v12027_v60  ;;  %v12077_v60 = vld [vmem:[#allocation2 + $0x20a4] ss:$52 sps:$4 sm:$0xff]  }
 0x383   :  { %8109 = vmatpush2.bf16.msra.mxu1 %v12024_v12  ;;  %8137 = vmatprep.subr.bf16.mxu0 %v12035_v14  ;;  %v12074_v12 = vld [vmem:[#allocation2 + $0x1f04] ss:$52 sps:$4 sm:$0xff]   ;;  %v12072_v14 = vld [vmem:[#allocation2 + $0x1f00] ss:$52 sps:$4 sm:$0xff]  }
 0x384   :  { %8110 = vmatprep.subr.bf16.mxu1 %v12032_v15 }
 0x386   :  { %8138 = vmatpush1.bf16.msra.mxu0 %v12033_v18  ;;  %v12083_v18 = vld [vmem:[#allocation2 + $0x304] ss:$52 sps:$4 sm:$0xff]  }
 0x387   :  { %8111 = vmatpush2.bf16.msra.mxu1 %v12030_v17  ;;  %8139 = vmatprep.subr.bf16.mxu0 %v12041_v21  ;;  %v12080_v17 = vld [vmem:[#allocation2 + $0x1e9c] ss:$52 sps:$4 sm:$0xff]   ;;  %v12086_v21 = vld [vmem:[#allocation2 + $0x1e34] ss:$52 sps:$4 sm:$0xff]  }
 0x388   :  { %8112 = vmatprep.subr.bf16.mxu1 %v12038_v55  ;;  %v12081_v55 = vld [vmem:[#allocation2 + $0x300] ss:$52 sps:$4 sm:$0xff]  }
 0x38a   :  { %8140 = vmatpush1.bf16.msra.mxu0 %v12039_v61 }
 0x38b   :  { %8113 = vmatpush2.bf16.msra.mxu1 %v12036_v23  ;;  %8141 = vmatprep.subr.bf16.mxu0 %v12047_v26  ;;  %v12089_v23 = vld [vmem:[#allocation2 + $0x29c] ss:$52 sps:$4 sm:$0xff]   ;;  %v12087_v26 = vld [vmem:[#allocation2 + $0x298] ss:$52 sps:$4 sm:$0xff]  }
 0x38c   :  { %8114 = vmatprep.subr.bf16.mxu1 %v12044_v25  ;;  %v12084_v25 = vld [vmem:[#allocation2 + $0x1e30] ss:$52 sps:$4 sm:$0xff]  }
 0x38e   :  { %8142 = vmatpush1.bf16.msra.mxu0 %v12045_v30  ;;  %v12092_v30 = vld [vmem:[#allocation2 + $0x1dcc] ss:$52 sps:$4 sm:$0xff]  }
 0x38f   :  { %8115 = vmatpush2.bf16.msra.mxu1 %v12042_v29  ;;  %8143 = vmatprep.subr.bf16.mxu0 %v12053_v36 }
 0x390   :  { %8116 = vmatprep.subr.bf16.mxu1 %v12050_v32  ;;  %v12095_v32 = vld [vmem:[#allocation2 + $0x234] ss:$52 sps:$4 sm:$0xff]  }
 0x392   :  { %8144 = vmatpush1.bf16.msra.mxu0 %v12051_v4 }
 0x393   :  { %8117 = vmatpush2.bf16.msra.mxu1 %v12048_v37  ;;  %8145 = vmatprep.subr.bf16.mxu0 %v12056_v38  ;;  %v12093_v38 = vld [vmem:[#allocation2 + $0x230] ss:$52 sps:$4 sm:$0xff]  }
 0x394   :  { %8180 = vmatprep.subr.bf16.mxu1 %v12059_v39 }
 0x396   :  { %v7819_v49 = vpop.f32.mrf.mxu1  ;;  %8119 = vmatmul.mubr.bf16.vlgmr.msra.gmra.mxu1 %v13082_v51  ;;  %8146 = vmatpush2.bf16.msra.mxu0 %v12054_v41  ;;  %v12098_v41 = vld [vmem:[#allocation2 + $0x1d64] ss:$52 sps:$4 sm:$0xff]  }
 0x397   :  { %v7820_v48 = vadd.f32 %v7819_v49, %v13059_v22  ;;  %8181 = vmatpush1.bf16.msra.mxu1 %v12057_v43  ;;  %8147 = vmatprep.subr.bf16.mxu0 %v12062_v45  ;;  %v12069_v22 = vld [vmem:[#allocation2 + $0x2108] ss:$52 sps:$4 sm:$0xff]   ;;  %v12101_v43 = vld [vmem:[#allocation2 + $0x1cc] ss:$52 sps:$4 sm:$0xff]  }
 0x398   :  { %v7821_v62 = vpop.f32.mrf.mxu1  ;;  %8182 = vmatprep.subr.bf16.mxu1 %v12065_v47  ;;  %8204 = vmatprep.mubr.bf16.mxu1 %v12700_v19  ;;  %v12096_v47 = vld [vmem:[#allocation2 + $0x1d60] ss:$52 sps:$4 sm:$0xff]   ;;  %v12099_v49 = vld [vmem:[#allocation2 + $0x1c8] ss:$52 sps:$4 sm:$0xff]  }
 0x399   :  { %v7822_v40 = vadd.f32 %v7821_v62, %v13061_v1  ;;  %v12075_v1 = vld [vmem:[#allocation2 + $0x20a0] ss:$52 sps:$4 sm:$0xff]   ;;  %v12110_v62 = vld [vmem:[#allocation2 + $0xfc] ss:$52 sps:$4 sm:$0xff]  }
 0x39a   :  { %v7823_v8 = vpop.f32.mrf.mxu1  ;;  %8148 = vmatpush2.bf16.msra.mxu0 %v12060_v52  ;;  %v12102_v52 = vld [vmem:[#allocation2 + $0x160] ss:$52 sps:$4 sm:$0xff]  }
 0x39b   :  { %v7824_v9 = vadd.f32 %v7823_v8, %v13063_v33  ;;  %8183 = vmatpush1.bf16.msra.mxu1 %v12063_v56  ;;  %8149 = vmatprep.subr.bf16.mxu0 %v12068_v54  ;;  %v12078_v33 = vld [vmem:[#allocation2 + $0x1e98] ss:$52 sps:$4 sm:$0xff]   ;;  %v12105_v56 = vld [vmem:[#allocation2 + $0x980] ss:$52 sps:$4 sm:$0xff]   ;;  %v12113_v54 = vld [vmem:[#allocation2 + $0x91c] ss:$52 sps:$4 sm:$0xff]  }
 0x39c   :  { %v7825_v46 = vpop.f32.mrf.mxu1  ;;  %8184 = vmatprep.subr.bf16.mxu1 %v12071_v57  ;;  %v12108_v57 = vld [vmem:[#allocation2 + $0xf8] ss:$52 sps:$4 sm:$0xff]   ;;  %v12116_v8 = vld [vmem:[#allocation2 + $0x94] ss:$52 sps:$4 sm:$0xff]  }
 0x39d   :  { %v7826_v15 = vadd.f32 %v7825_v46, %v13065_v42  ;;  %v12122_v46 = vld [vmem:[#allocation2 + $0x2c] ss:$52 sps:$4 sm:$0xff]  }
 0x39e   :  { %8150 = vmatpush2.bf16.msra.mxu0 %v12066_v10  ;;  %v12114_v10 = vld [vmem:[#allocation2 + $0x90] ss:$52 sps:$4 sm:$0xff]  }
 0x39f   :  { %8185 = vmatpush1.bf16.msra.mxu1 %v12069_v22  ;;  %8151 = vmatprep.subr.bf16.mxu0 %v12074_v12  ;;  %v12117_v22 = vld [vmem:[#allocation2 + $0x8b0] ss:$52 sps:$4 sm:$0xff]   ;;  %v12125_v12 = vld [vmem:[#allocation2 + $0x84c] ss:$52 sps:$4 sm:$0xff]  }
 0x3a0   :  { %8186 = vmatprep.subr.bf16.mxu1 %v12077_v60  ;;  %v12123_v60 = vld [vmem:[#allocation2 + $0x848] ss:$52 sps:$4 sm:$0xff]  }
 0x3a2   :  { %8152 = vmatpush2.bf16.msra.mxu0 %v12072_v14  ;;  %v12131_v14 = vld [vmem:[#allocation2 + $0x7e4] ss:$52 sps:$4 sm:$0xff]  }
 0x3a3   :  { %8187 = vmatpush1.bf16.msra.mxu1 %v12075_v1  ;;  %8153 = vmatprep.subr.bf16.mxu0 %v12080_v17  ;;  %v12126_v1 = vld [vmem:[#allocation2 + $0x640] ss:$52 sps:$4 sm:$0xff]   ;;  %v12134_v17 = vld [vmem:[#allocation2 + $0x5dc] ss:$52 sps:$4 sm:$0xff]  }
 0x3a4   :  { %8215 = vmatprep.subr.bf16.mxu1 %v12083_v18  ;;  %v12137_v18 = vld [vmem:[#allocation2 + $0x77c] ss:$52 sps:$4 sm:$0xff]  }
 0x3a5   :  { %v7862_v61 = vpop.f32.mrf.mxu0 }
 0x3a6   :  { %10542 = vmatmul.mubr.msk.bf16.vlgmr.msra.gmra.mxu1 %vm6921_vm0, %v12989_v11  ;;  %v13092_v42 = vadd.f32 %v7862_v61, %v7820_v48  ;;  %8154 = vmatpush2.bf16.msra.mxu0 %v12078_v33  ;;  %v12090_v11 = vld [vmem:[#allocation2 + $0x1dc8] ss:$52 sps:$4 sm:$0xff]   ;;  %v12107_v48 = vld [vmem:[#allocation2 + $0x984] ss:$52 sps:$4 sm:$0xff]  }
 0x3a7   :  { %8216 = vmatpush1.bf16.msra.mxu1 %v12081_v55  ;;  %v7864_v29 = vpop.f32.mrf.mxu0  ;;  %8155 = vmatprep.subr.bf16.mxu0 %v12086_v21  ;;  %v12132_v33 = vld [vmem:[#allocation2 + $0x5d8] ss:$52 sps:$4 sm:$0xff]   ;;  %v12140_v21 = vld [vmem:[#allocation2 + $0x574] ss:$52 sps:$4 sm:$0xff]   ;;  %v12138_v61 = vld [vmem:[#allocation2 + $0x570] ss:$52 sps:$4 sm:$0xff]  }
 0x3a8   :  { %8217 = vmatprep.subr.bf16.mxu1 %v12089_v23  ;;  %v13094_v36 = vadd.f32 %v7864_v29, %v7822_v40  ;;  %8247 = vmatprep.mubr.bf16.mxu1 %v12996_v31  ;;  %v12104_v31 = vld [vmem:[#allocation2 + $0x164] ss:$52 sps:$4 sm:$0xff]   ;;  %v12143_v23 = vld [vmem:[#allocation2 + $0x714] ss:$52 sps:$4 sm:$0xff]   ;;  %v12149_v29 = vld [vmem:[#allocation2 + $0x6ac] ss:$52 sps:$4 sm:$0xff]  }
 0x3a9   :  { %v7866_v37 = vpop.f32.mrf.mxu0  ;;  %v12111_v40 = vld [vmem:[#allocation2 + $0x918] ss:$52 sps:$4 sm:$0xff]  }
 0x3aa   :  { %v13097_v4 = vadd.f32 %v7866_v37, %v7824_v9  ;;  %8156 = vmatpush2.bf16.msra.mxu0 %v12084_v25  ;;  %v12119_v9 = vld [vmem:[#allocation2 + $0x8b4] ss:$52 sps:$4 sm:$0xff]   ;;  %v12135_v55 = vld [vmem:[#allocation2 + $0x778] ss:$52 sps:$4 sm:$0xff]   ;;  %v12141_v25 = vld [vmem:[#allocation2 + $0x710] ss:$52 sps:$4 sm:$0xff]  }
 0x3ab   :  { %8218 = vmatpush1.bf16.msra.mxu1 %v12087_v26  ;;  %v7868_v39 = vpop.f32.mrf.mxu0  ;;  %8157 = vmatprep.subr.bf16.mxu0 %v12092_v30  ;;  %v12146_v26 = vld [vmem:[#allocation2 + $0x50c] ss:$52 sps:$4 sm:$0xff]   ;;  %v12144_v30 = vld [vmem:[#allocation2 + $0x508] ss:$52 sps:$4 sm:$0xff]   ;;  %v12152_v37 = vld [vmem:[#allocation2 + $0x4a4] ss:$52 sps:$4 sm:$0xff]  }
 0x3ac   :  { %8219 = vmatprep.subr.bf16.mxu1 %v12095_v32  ;;  %v13099_v45 = vadd.f32 %v7868_v39, %v7826_v15  ;;  %v12128_v15 = vld [vmem:[#allocation2 + $0x644] ss:$52 sps:$4 sm:$0xff]   ;;  %v12147_v32 = vld [vmem:[#allocation2 + $0x6a8] ss:$52 sps:$4 sm:$0xff]   ;;  %v12150_v39 = vld [vmem:[#allocation2 + $0x4a0] ss:$52 sps:$4 sm:$0xff]  }
 0x3ae   :  { %8158 = vmatpush2.bf16.msra.mxu0 %v12090_v11  ;;  %v12155_v11 = vld [vmem:[#allocation2 + $0xcc4] ss:$52 sps:$4 sm:$0xff]  }
 0x3af   :  { %8220 = vmatpush1.bf16.msra.mxu1 %v12093_v38  ;;  %8159 = vmatprep.subr.bf16.mxu0 %v12098_v41  ;;  %v12153_v41 = vld [vmem:[#allocation2 + $0xcc0] ss:$52 sps:$4 sm:$0xff]  }
 0x3b0   :  { %8221 = vmatprep.subr.bf16.mxu1 %v12101_v43  ;;  %v12158_v43 = vld [vmem:[#allocation2 + $0x43c] ss:$52 sps:$4 sm:$0xff]  }
 0x3b2   :  { %8160 = vmatpush2.bf16.msra.mxu0 %v12096_v47  ;;  %v12161_v47 = vld [vmem:[#allocation2 + $0xc5c] ss:$52 sps:$4 sm:$0xff]  }
 0x3b3   :  { %8222 = vmatpush1.bf16.msra.mxu1 %v12099_v49  ;;  %8258 = vmatprep.subr.bf16.mxu0 %v12107_v48 }
 0x3b4   :  { %8223 = vmatprep.subr.bf16.mxu1 %v12104_v31 }
 0x3b5   :  { %8162 = vmatmul.mubr.bf16.vlgmr.msra.gmra.mxu0 %v13014_v16  ;;  %v12120_v16 = vld [vmem:[#allocation2 + $0x28] ss:$52 sps:$4 sm:$0xff]   ;;  %v7948_v38 = vpop.f32.mrf.mxu0 }
 0x3b6   :  { %8259 = vmatpush1.bf16.msra.mxu0 %v12105_v56  ;;  %8290 = vmatprep.mubr.bf16.mxu0 %v13020_v6  ;;  %v12129_v6 = vld [vmem:[#allocation2 + $0x7e0] ss:$52 sps:$4 sm:$0xff]   ;;  %v12159_v56 = vld [vmem:[#allocation2 + $0xc58] ss:$52 sps:$4 sm:$0xff]  }
 0x3b7   :  { %8224 = vmatpush1.bf16.msra.mxu1 %v12102_v52  ;;  %8260 = vmatprep.subr.bf16.mxu0 %v12113_v54  ;;  %v7950_v49 = vpop.f32.mrf.mxu0  ;;  %v12156_v52 = vld [vmem:[#allocation2 + $0x438] ss:$52 sps:$4 sm:$0xff]   ;;  %v12164_v54 = vld [vmem:[#allocation2 + $0x3d4] ss:$52 sps:$4 sm:$0xff]  }
 0x3b8   :  { %8225 = vmatprep.subr.bf16.mxu1 %v12110_v62 }
 0x3ba   :  { %8261 = vmatpush1.bf16.msra.mxu0 %v12111_v40 }
 0x3bb   :  { %8226 = vmatpush1.bf16.msra.mxu1 %v12108_v57  ;;  %8262 = vmatprep.subr.bf16.mxu0 %v12119_v9  ;;  %v12167_v57 = vld [vmem:[#allocation2 + $0xbf4] ss:$52 sps:$4 sm:$0xff]   ;;  %v7952_v9 = vpop.f32.mrf.mxu0 }
 0x3bc   :  { %8227 = vmatprep.subr.bf16.mxu1 %v12116_v8 }
 0x3be   :  { %8263 = vmatpush1.bf16.msra.mxu0 %v12117_v22 }
 0x3bf   :  { %8228 = vmatpush1.bf16.msra.mxu1 %v12114_v10  ;;  %8264 = vmatprep.subr.bf16.mxu0 %v12125_v12  ;;  %v12165_v12 = vld [vmem:[#allocation2 + $0xbf0] ss:$52 sps:$4 sm:$0xff]  }
 0x3c0   :  { %8229 = vmatprep.subr.bf16.mxu1 %v12122_v46 }
 0x3c2   :  { %8265 = vmatpush1.bf16.msra.mxu0 %v12123_v60  ;;  %v12170_v60 = vld [vmem:[#allocation2 + $0x36c] ss:$52 sps:$4 sm:$0xff]  }
 0x3c3   :  { %8230 = vmatpush1.bf16.msra.mxu1 %v12120_v16  ;;  %8266 = vmatprep.subr.bf16.mxu0 %v12131_v14 }
 0x3c4   :  { %8231 = vmatprep.subr.bf16.mxu1 %v12128_v15  ;;  %v12173_v15 = vld [vmem:[#allocation2 + $0xb8c] ss:$52 sps:$4 sm:$0xff]  }
 0x3c6   :  { %8267 = vmatpush1.bf16.msra.mxu0 %v12129_v6 }
 0x3c7   :  { %8232 = vmatpush2.bf16.msra.mxu1 %v12126_v1  ;;  %8268 = vmatprep.subr.bf16.mxu0 %v12137_v18  ;;  %v12176_v18 = vld [vmem:[#allocation2 + $0xb24] ss:$52 sps:$4 sm:$0xff]  }
 0x3c8   :  { %8233 = vmatprep.subr.bf16.mxu1 %v12134_v17  ;;  %v12168_v17 = vld [vmem:[#allocation2 + $0x368] ss:$52 sps:$4 sm:$0xff]  }
 0x3ca   :  { %8269 = vmatpush1.bf16.msra.mxu0 %v12135_v55  ;;  %v12174_v55 = vld [vmem:[#allocation2 + $0xb20] ss:$52 sps:$4 sm:$0xff]  }
 0x3cb   :  { %8234 = vmatpush2.bf16.msra.mxu1 %v12132_v33  ;;  %8270 = vmatprep.subr.bf16.mxu0 %v12143_v23  ;;  %v12179_v33 = vld [vmem:[#allocation2 + $0x1004] ss:$52 sps:$4 sm:$0xff]   ;;  %v12182_v23 = vld [vmem:[#allocation2 + $0xabc] ss:$52 sps:$4 sm:$0xff]  }
 0x3cc   :  { %8235 = vmatprep.subr.bf16.mxu1 %v12140_v21  ;;  %v12177_v21 = vld [vmem:[#allocation2 + $0x1000] ss:$52 sps:$4 sm:$0xff]  }
 0x3ce   :  { %8271 = vmatpush1.bf16.msra.mxu0 %v12141_v25  ;;  %v12183_v25 = vld [vmem:[#allocation2 + $0xf98] ss:$52 sps:$4 sm:$0xff]  }
 0x3cf   :  { %8236 = vmatpush2.bf16.msra.mxu1 %v12138_v61  ;;  %8272 = vmatprep.subr.bf16.mxu0 %v12149_v29  ;;  %v12185_v61 = vld [vmem:[#allocation2 + $0xf9c] ss:$52 sps:$4 sm:$0xff]   ;;  %v12191_v29 = vld [vmem:[#allocation2 + $0xf34] ss:$52 sps:$4 sm:$0xff]  }
 0x3d0   :  { %8237 = vmatprep.subr.bf16.mxu1 %v12146_v26  ;;  %v12188_v26 = vld [vmem:[#allocation2 + $0xa54] ss:$52 sps:$4 sm:$0xff]  }
 0x3d2   :  { %8273 = vmatpush1.bf16.msra.mxu0 %v12147_v32  ;;  %v12189_v32 = vld [vmem:[#allocation2 + $0xf30] ss:$52 sps:$4 sm:$0xff]  }
 0x3d3   :  { %8238 = vmatpush2.bf16.msra.mxu1 %v12144_v30  ;;  %8274 = vmatprep.subr.bf16.mxu0 %v12155_v11  ;;  %v12186_v30 = vld [vmem:[#allocation2 + $0xa50] ss:$52 sps:$4 sm:$0xff]   ;;  %v12197_v11 = vld [vmem:[#allocation2 + $0xecc] ss:$52 sps:$4 sm:$0xff]  }
 0x3d4   :  { %8239 = vmatprep.subr.bf16.mxu1 %v12152_v37  ;;  %v12194_v37 = vld [vmem:[#allocation2 + $0x9ec] ss:$52 sps:$4 sm:$0xff]  }
 0x3d6   :  { %v7905_v31 = vpop.f32.mrf.mxu1  ;;  %8275 = vmatpush2.bf16.msra.mxu0 %v12153_v41  ;;  %v12203_v41 = vld [vmem:[#allocation2 + $0x1684] ss:$52 sps:$4 sm:$0xff]  }
 0x3d7   :  { %v7906_v48 = vadd.f32 %v7905_v31, %v13092_v42  ;;  %8240 = vmatpush2.bf16.msra.mxu1 %v12150_v39  ;;  %8276 = vmatprep.subr.bf16.mxu0 %v12161_v47  ;;  %v12162_v42 = vld [vmem:[#allocation2 + $0x3d0] ss:$52 sps:$4 sm:$0xff]   ;;  %v12204_v31 = vld [vmem:[#allocation2 + $0xdf8] ss:$52 sps:$4 sm:$0xff]  }
 0x3d8   :  { %v7907_v62 = vpop.f32.mrf.mxu1  ;;  %8241 = vmatprep.subr.bf16.mxu1 %v12158_v43  ;;  %v12200_v39 = vld [vmem:[#allocation2 + $0xe64] ss:$52 sps:$4 sm:$0xff]   ;;  %v12198_v43 = vld [vmem:[#allocation2 + $0xe60] ss:$52 sps:$4 sm:$0xff]   ;;  %v12206_v47 = vld [vmem:[#allocation2 + $0xdfc] ss:$52 sps:$4 sm:$0xff]  }
 0x3d9   :  { %v13104_v40 = vadd.f32 %v7948_v38, %v7906_v48  ;;  %v7908_v8 = vadd.f32 %v7907_v62, %v13094_v36  ;;  %v7954_v36 = vpop.f32.mrf.mxu0  ;;  %v12195_v38 = vld [vmem:[#allocation2 + $0xec8] ss:$52 sps:$4 sm:$0xff]   ;;  %v12207_v48 = vld [vmem:[#allocation2 + $0x1618] ss:$52 sps:$4 sm:$0xff]   ;;  %v12210_v62 = vld [vmem:[#allocation2 + $0xd90] ss:$52 sps:$4 sm:$0xff]  }
 0x3da   :  { %v7909_v10 = vpop.f32.mrf.mxu1  ;;  %8277 = vmatpush2.bf16.msra.mxu0 %v12159_v56  ;;  %v12215_v56 = vld [vmem:[#allocation2 + $0x15b4] ss:$52 sps:$4 sm:$0xff]  }
 0x3db   :  { %v13107_v22 = vadd.f32 %v7950_v49, %v7908_v8  ;;  %v7910_v46 = vadd.f32 %v7909_v10, %v13097_v4  ;;  %8242 = vmatpush2.bf16.msra.mxu1 %v12156_v52  ;;  %8278 = vmatprep.subr.bf16.mxu0 %v12167_v57  ;;  %v12171_v4 = vld [vmem:[#allocation2 + $0xb88] ss:$52 sps:$4 sm:$0xff]   ;;  %v12218_v57 = vld [vmem:[#allocation2 + $0xd2c] ss:$52 sps:$4 sm:$0xff]   ;;  %v12224_v10 = vld [vmem:[#allocation2 + $0x1344] ss:$52 sps:$4 sm:$0xff]  }
 0x3dc   :  { %v7911_v16 = vpop.f32.mrf.mxu1  ;;  %8243 = vmatprep.subr.bf16.mxu1 %v12164_v54  ;;  %v12209_v49 = vld [vmem:[#allocation2 + $0x161c] ss:$52 sps:$4 sm:$0xff]   ;;  %v12212_v52 = vld [vmem:[#allocation2 + $0xd94] ss:$52 sps:$4 sm:$0xff]   ;;  %v12221_v8 = vld [vmem:[#allocation2 + $0x154c] ss:$52 sps:$4 sm:$0xff]  }
 0x3dd   :  { %v13110_v14 = vadd.f32 %v7952_v9, %v7910_v46  ;;  %v7912_v1 = vadd.f32 %v7911_v16, %v13099_v45  ;;  %v12180_v45 = vld [vmem:[#allocation2 + $0xab8] ss:$52 sps:$4 sm:$0xff]   ;;  %v12213_v54 = vld [vmem:[#allocation2 + $0x15b0] ss:$52 sps:$4 sm:$0xff]   ;;  %v12219_v9 = vld [vmem:[#allocation2 + $0x1548] ss:$52 sps:$4 sm:$0xff]  }
 0x3de   :  { %8279 = vmatpush2.bf16.msra.mxu0 %v12165_v12  ;;  %v12227_v46 = vld [vmem:[#allocation2 + $0x14e4] ss:$52 sps:$4 sm:$0xff]   ;;  %v12230_v12 = vld [vmem:[#allocation2 + $0x12dc] ss:$52 sps:$4 sm:$0xff]  }
 0x3df   :  { %v13113_v6 = vadd.f32 %v7954_v36, %v7912_v1  ;;  %8244 = vmatpush2.bf16.msra.mxu1 %v12162_v42  ;;  %8280 = vmatprep.subr.bf16.mxu0 %v12173_v15  ;;  %v12222_v42 = vld [vmem:[#allocation2 + $0x1340] ss:$52 sps:$4 sm:$0xff]   ;;  %v12233_v16 = vld [vmem:[#allocation2 + $0x147c] ss:$52 sps:$4 sm:$0xff]   ;;  %v12231_v15 = vld [vmem:[#allocation2 + $0x1478] ss:$52 sps:$4 sm:$0xff]  }
 0x3e0   :  { %8245 = vmatprep.subr.bf16.mxu1 %v12170_v60  ;;  %v12228_v60 = vld [vmem:[#allocation2 + $0x12d8] ss:$52 sps:$4 sm:$0xff]   ;;  %v12236_v1 = vld [vmem:[#allocation2 + $0x1274] ss:$52 sps:$4 sm:$0xff]  }
 0x3e1   :  { %v12239_v36 = vld [vmem:[#allocation2 + $0x1414] ss:$52 sps:$4 sm:$0xff]  }
 0x3e2   :  { %8281 = vmatpush2.bf16.msra.mxu0 %v12171_v4  ;;  %v12237_v4 = vld [vmem:[#allocation2 + $0x1410] ss:$52 sps:$4 sm:$0xff]  }
 0x3e3   :  { %8246 = vmatpush2.bf16.msra.mxu1 %v12168_v17  ;;  %8282 = vmatprep.subr.bf16.mxu0 %v12176_v18  ;;  %v12234_v17 = vld [vmem:[#allocation2 + $0x1270] ss:$52 sps:$4 sm:$0xff]   ;;  %v12242_v18 = vld [vmem:[#allocation2 + $0x120c] ss:$52 sps:$4 sm:$0xff]  }
 0x3e4   :  { %8301 = vmatprep.subr.bf16.mxu1 %v12179_v33  ;;  %v12245_v33 = vld [vmem:[#allocation2 + $0x13ac] ss:$52 sps:$4 sm:$0xff]  }
 0x3e6   :  { %8248 = vmatmul.mubr.bf16.vlgmr.msra.gmra.mxu1 %v13038_v2  ;;  %8283 = vmatpush2.bf16.msra.mxu0 %v12174_v55  ;;  %v12192_v2 = vld [vmem:[#allocation2 + $0x9e8] ss:$52 sps:$4 sm:$0xff]  }
 0x3e7   :  { %8302 = vmatpush1.bf16.msra.mxu1 %v12177_v21  ;;  %8284 = vmatprep.subr.bf16.mxu0 %v12182_v23  ;;  %v12240_v55 = vld [vmem:[#allocation2 + $0x1208] ss:$52 sps:$4 sm:$0xff]  }
 0x3e8   :  { %8303 = vmatprep.subr.bf16.mxu1 %v12185_v61  ;;  %8333 = vmatprep.mubr.bf16.mxu1 %v13044_v3  ;;  %v12201_v3 = vld [vmem:[#allocation2 + $0x1680] ss:$52 sps:$4 sm:$0xff]   ;;  %v12243_v21 = vld [vmem:[#allocation2 + $0x13a8] ss:$52 sps:$4 sm:$0xff]   ;;  %v12248_v61 = vld [vmem:[#allocation2 + $0x11a4] ss:$52 sps:$4 sm:$0xff]  }
 0x3ea   :  { %8285 = vmatpush2.bf16.msra.mxu0 %v12180_v45  ;;  %v12251_v45 = vld [vmem:[#allocation2 + $0x19c4] ss:$52 sps:$4 sm:$0xff]  }
 0x3eb   :  { %8304 = vmatpush1.bf16.msra.mxu1 %v12183_v25  ;;  %8286 = vmatprep.subr.bf16.mxu0 %v12188_v26  ;;  %v12246_v25 = vld [vmem:[#allocation2 + $0x11a0] ss:$52 sps:$4 sm:$0xff]  }
 0x3ec   :  { %8305 = vmatprep.subr.bf16.mxu1 %v12191_v29  ;;  %v12249_v26 = vld [vmem:[#allocation2 + $0x19c0] ss:$52 sps:$4 sm:$0xff]  }
 0x3ee   :  { %8287 = vmatpush2.bf16.msra.mxu0 %v12186_v30  ;;  %v12254_v30 = vld [vmem:[#allocation2 + $0x113c] ss:$52 sps:$4 sm:$0xff]  }
 0x3ef   :  { %8306 = vmatpush1.bf16.msra.mxu1 %v12189_v32  ;;  %8288 = vmatprep.subr.bf16.mxu0 %v12194_v37  ;;  %v12257_v32 = vld [vmem:[#allocation2 + $0x195c] ss:$52 sps:$4 sm:$0xff]  }
 0x3f0   :  { %8307 = vmatprep.subr.bf16.mxu1 %v12197_v11 }
 0x3f2   :  { %8289 = vmatpush2.bf16.msra.mxu0 %v12192_v2  ;;  %v12252_v2 = vld [vmem:[#allocation2 + $0x1138] ss:$52 sps:$4 sm:$0xff]  }
 0x3f3   :  { %8308 = vmatpush1.bf16.msra.mxu1 %v12195_v38  ;;  %8344 = vmatprep.subr.bf16.mxu0 %v12203_v41  ;;  %v12255_v38 = vld [vmem:[#allocation2 + $0x1958] ss:$52 sps:$4 sm:$0xff]  }
 0x3f4   :  { %8309 = vmatprep.subr.bf16.mxu1 %v12200_v39 }
 0x3f5   :  { %8291 = vmatmul.mubr.bf16.vlgmr.msra.gmra.mxu0 %v13050_v34  ;;  %v12216_v34 = vld [vmem:[#allocation2 + $0xd28] ss:$52 sps:$4 sm:$0xff]   ;;  %v7991_v23 = vpop.f32.mrf.mxu0 }
 0x3f6   :  { %8345 = vmatpush1.bf16.msra.mxu0 %v12201_v3  ;;  %8376 = vmatprep.mubr.bf16.mxu0 %v13056_v35  ;;  %v12225_v35 = vld [vmem:[#allocation2 + $0x14e0] ss:$52 sps:$4 sm:$0xff]  }
 0x3f7   :  { %8310 = vmatpush1.bf16.msra.mxu1 %v12198_v43  ;;  %8346 = vmatprep.subr.bf16.mxu0 %v12209_v49  ;;  %v13119_v29 = vpop.f32.mrf.mxu0  ;;  %v12260_v43 = vld [vmem:[#allocation2 + $0x10d4] ss:$52 sps:$4 sm:$0xff]  }
 0x3f8   :  { %8311 = vmatprep.subr.bf16.mxu1 %v12206_v47  ;;  %v12263_v3 = vld [vmem:[#allocation2 + $0x18f4] ss:$52 sps:$4 sm:$0xff]  }
 0x3f9   :  { %v7995_v39 = vpop.f32.mrf.mxu0 }
 0x3fa   :  { %8347 = vmatpush1.bf16.msra.mxu0 %v12207_v48  ;;  %v12261_v48 = vld [vmem:[#allocation2 + $0x18f0] ss:$52 sps:$4 sm:$0xff]  }
 0x3fb   :  { %8312 = vmatpush1.bf16.msra.mxu1 %v12204_v31  ;;  %8348 = vmatprep.subr.bf16.mxu0 %v12215_v56  ;;  %v12258_v31 = vld [vmem:[#allocation2 + $0x10d0] ss:$52 sps:$4 sm:$0xff]  }
 0x3fc   :  { %8313 = vmatprep.subr.bf16.mxu1 %v12212_v52  ;;  %v7997_v52 = vpop.f32.mrf.mxu0 }
 0x3fe   :  { %8349 = vmatpush1.bf16.msra.mxu0 %v12213_v54  ;;  %v12269_v54 = vld [vmem:[#allocation2 + $0x188c] ss:$52 sps:$4 sm:$0xff]  }
 0x3ff   :  { %8314 = vmatpush1.bf16.msra.mxu1 %v12210_v62  ;;  %8350 = vmatprep.subr.bf16.mxu0 %v12221_v8  ;;  %v12266_v62 = vld [vmem:[#allocation2 + $0x106c] ss:$52 sps:$4 sm:$0xff]   ;;  %v12264_v8 = vld [vmem:[#allocation2 + $0x1068] ss:$52 sps:$4 sm:$0xff]  }
 0x400   :  { %8315 = vmatprep.subr.bf16.mxu1 %v12218_v57 }
 0x402   :  { %8351 = vmatpush1.bf16.msra.mxu0 %v12219_v9  ;;  %v12272_v9 = vld [vmem:[#allocation2 + $0x1824] ss:$52 sps:$4 sm:$0xff]  }
 0x403   :  { %8316 = vmatpush1.bf16.msra.mxu1 %v12216_v34  ;;  %8352 = vmatprep.subr.bf16.mxu0 %v12227_v46  ;;  %v12267_v34 = vld [vmem:[#allocation2 + $0x1888] ss:$52 sps:$4 sm:$0xff]   ;;  %v12270_v46 = vld [vmem:[#allocation2 + $0x1820] ss:$52 sps:$4 sm:$0xff]  }
 0x404   :  { %8317 = vmatprep.subr.bf16.mxu1 %v12224_v10  ;;  %v12275_v10 = vld [vmem:[#allocation2 + $0x1d04] ss:$52 sps:$4 sm:$0xff]  }
 0x406   :  { %8353 = vmatpush1.bf16.msra.mxu0 %v12225_v35  ;;  %v12278_v35 = vld [vmem:[#allocation2 + $0x17bc] ss:$52 sps:$4 sm:$0xff]  }
 0x407   :  { %8318 = vmatpush2.bf16.msra.mxu1 %v12222_v42  ;;  %8354 = vmatprep.subr.bf16.mxu0 %v12233_v16  ;;  %v12273_v42 = vld [vmem:[#allocation2 + $0x1d00] ss:$52 sps:$4 sm:$0xff]   ;;  %v12276_v16 = vld [vmem:[#allocation2 + $0x17b8] ss:$52 sps:$4 sm:$0xff]  }
 0x408   :  { %8319 = vmatprep.subr.bf16.mxu1 %v12230_v12  ;;  %v12281_v12 = vld [vmem:[#allocation2 + $0x1c9c] ss:$52 sps:$4 sm:$0xff]  }
 0x40a   :  { %8355 = vmatpush1.bf16.msra.mxu0 %v12231_v15  ;;  %v12284_v15 = vld [vmem:[#allocation2 + $0x1754] ss:$52 sps:$4 sm:$0xff]  }
 0x40b   :  { %8320 = vmatpush2.bf16.msra.mxu1 %v12228_v60  ;;  %8356 = vmatprep.subr.bf16.mxu0 %v12239_v36  ;;  %v12279_v60 = vld [vmem:[#allocation2 + $0x1c98] ss:$52 sps:$4 sm:$0xff]   ;;  %v12282_v36 = vld [vmem:[#allocation2 + $0x1750] ss:$52 sps:$4 sm:$0xff]  }
 0x40c   :  { %8321 = vmatprep.subr.bf16.mxu1 %v12236_v1  ;;  %v12287_v1 = vld [vmem:[#allocation2 + $0x1c34] ss:$52 sps:$4 sm:$0xff]  }
 0x40e   :  { %8357 = vmatpush1.bf16.msra.mxu0 %v12237_v4  ;;  %v12290_v4 = vld [vmem:[#allocation2 + $0x16ec] ss:$52 sps:$4 sm:$0xff]  }
 0x40f   :  { %8322 = vmatpush2.bf16.msra.mxu1 %v12234_v17  ;;  %8358 = vmatprep.subr.bf16.mxu0 %v12245_v33  ;;  %v12285_v17 = vld [vmem:[#allocation2 + $0x1c30] ss:$52 sps:$4 sm:$0xff]   ;;  %v12291_v33 = vld [vmem:[#allocation2 + $0x1bc8] ss:$52 sps:$4 sm:$0xff]  }
 0x410   :  { %8323 = vmatprep.subr.bf16.mxu1 %v12242_v18  ;;  %v12293_v18 = vld [vmem:[#allocation2 + $0x1bcc] ss:$52 sps:$4 sm:$0xff]  }
 0x412   :  { %8359 = vmatpush1.bf16.msra.mxu0 %v12243_v21  ;;  %v12299_v21 = vld [vmem:[#allocation2 + $0x21e4] ss:$52 sps:$4 sm:$0xff]  }
 0x413   :  { %8324 = vmatpush2.bf16.msra.mxu1 %v12240_v55  ;;  %8360 = vmatprep.subr.bf16.mxu0 %v12251_v45  ;;  %v12296_v55 = vld [vmem:[#allocation2 + $0x1b64] ss:$52 sps:$4 sm:$0xff]   ;;  %v12305_v45 = vld [vmem:[#allocation2 + $0x217c] ss:$52 sps:$4 sm:$0xff]  }
 0x414   :  { %8325 = vmatprep.subr.bf16.mxu1 %v12248_v61  ;;  %v12302_v61 = vld [vmem:[#allocation2 + $0x1afc] ss:$52 sps:$4 sm:$0xff]  }
 0x416   :  { %v8034_v37 = vpop.f32.mrf.mxu1  ;;  %8361 = vmatpush2.bf16.msra.mxu0 %v12249_v26 }
 0x417   :  { %v13121_v11 = vadd.f32 %v8034_v37, %v7991_v23  ;;  %8326 = vmatpush2.bf16.msra.mxu1 %v12246_v25  ;;  %8362 = vmatprep.subr.bf16.mxu0 %v12257_v32  ;;  %v12294_v23 = vld [vmem:[#allocation2 + $0x1b60] ss:$52 sps:$4 sm:$0xff]   ;;  %v12303_v32 = vld [vmem:[#allocation2 + $0x2178] ss:$52 sps:$4 sm:$0xff]  }
 0x418   :  { %v13123_v41 = vpop.f32.mrf.mxu1  ;;  %8327 = vmatprep.subr.bf16.mxu1 %v12254_v30  ;;  %v12300_v30 = vld [vmem:[#allocation2 + $0x1af8] ss:$52 sps:$4 sm:$0xff]  }
 0x41a   :  { %v8038_v47 = vpop.f32.mrf.mxu1  ;;  %8363 = vmatpush2.bf16.msra.mxu0 %v12255_v38  ;;  %v12311_v38 = vld [vmem:[#allocation2 + $0x2114] ss:$52 sps:$4 sm:$0xff]  }
 0x41b   :  { %v13125_v49 = vadd.f32 %v8038_v47, %v7995_v39  ;;  %8328 = vmatpush2.bf16.msra.mxu1 %v12252_v2  ;;  %8364 = vmatprep.subr.bf16.mxu0 %v12263_v3  ;;  %v12308_v2 = vld [vmem:[#allocation2 + $0x1a94] ss:$52 sps:$4 sm:$0xff]   ;;  %v12314_v47 = vld [vmem:[#allocation2 + $0x1a2c] ss:$52 sps:$4 sm:$0xff]  }
 0x41c   :  { %v8040_v56 = vpop.f32.mrf.mxu1  ;;  %8329 = vmatprep.subr.bf16.mxu1 %v12260_v43 }
 0x41d   :  { %v13127_v57 = vadd.f32 %v8040_v56, %v7997_v52  ;;  %v12312_v52 = vld [vmem:[#allocation2 + $0x1a28] ss:$52 sps:$4 sm:$0xff]  }
 0x41e   :  { %8365 = vmatpush2.bf16.msra.mxu0 %v12261_v48  ;;  %v12315_v56 = vld [vmem:[#allocation2 + $0x20a8] ss:$52 sps:$4 sm:$0xff]  }
 0x41f   :  { %8330 = vmatpush2.bf16.msra.mxu1 %v12258_v31  ;;  %8366 = vmatprep.subr.bf16.mxu0 %v12269_v54  ;;  %v12317_v31 = vld [vmem:[#allocation2 + $0x20ac] ss:$52 sps:$4 sm:$0xff]  }
 0x420   :  { %8331 = vmatprep.subr.bf16.mxu1 %v12266_v62  ;;  %v12321_v62 = vld [vmem:[#allocation2 + $0x648] ss:$52 sps:$4 sm:$0xff]   ;;  %v12318_v54 = vld [vmem:[#allocation2 + $0x2040] ss:$52 sps:$4 sm:$0xff]  }
 0x422   :  { %8367 = vmatpush2.bf16.msra.mxu0 %v12267_v34  ;;  %v12325_v34 = vld [vmem:[#allocation2 + $0x1fdc] ss:$52 sps:$4 sm:$0xff]  }
 0x423   :  { %8332 = vmatpush2.bf16.msra.mxu1 %v12264_v8  ;;  %8368 = vmatprep.subr.bf16.mxu0 %v12272_v9  ;;  %v12322_v8 = vld [vmem:[#allocation2 + $0x308] ss:$52 sps:$4 sm:$0xff]   ;;  %v12326_v9 = vld [vmem:[#allocation2 + $0x5e0] ss:$52 sps:$4 sm:$0xff]  }
 0x424   :  { %8387 = vmatprep.subr.bf16.mxu1 %v12275_v10  ;;  %v12323_v10 = vld [vmem:[#allocation2 + $0x1fd8] ss:$52 sps:$4 sm:$0xff]  }
 0x426   :  { %8334 = vmatmul.mubr.bf16.vlgmr.msra.gmra.mxu1 %v13070_v59  ;;  %8369 = vmatpush2.bf16.msra.mxu0 %v12270_v46  ;;  %v12288_v59 = vld [vmem:[#allocation2 + $0x16e8] ss:$52 sps:$4 sm:$0xff]   ;;  %v12327_v46 = vld [vmem:[#allocation2 + $0x2a0] ss:$52 sps:$4 sm:$0xff]  }
 0x427   :  { %8388 = vmatpush1.bf16.msra.mxu1 %v12273_v42  ;;  %8370 = vmatprep.subr.bf16.mxu0 %v12278_v35  ;;  %v12330_v42 = vld [vmem:[#allocation2 + $0x1f74] ss:$52 sps:$4 sm:$0xff]   ;;  %v12331_v35 = vld [vmem:[#allocation2 + $0x578] ss:$52 sps:$4 sm:$0xff]  }
 0x428   :  { %8389 = vmatprep.subr.bf16.mxu1 %v12281_v12  ;;  %8419 = vmatprep.mubr.bf16.mxu1 %v13076_v7  ;;  %v12297_v7 = vld [vmem:[#allocation2 + $0x21e0] ss:$52 sps:$4 sm:$0xff]   ;;  %v12508_v12 = vld [vmem:[%s13336_s0 + $0x4] ss:$44 sps:$4 sm:$0xff]  }
 0x42a   :  { %8371 = vmatpush2.bf16.msra.mxu0 %v12276_v16  ;;  %v12328_v16 = vld [vmem:[#allocation2 + $0x1f70] ss:$52 sps:$4 sm:$0xff]  }
 0x42b   :  { %8390 = vmatpush1.bf16.msra.mxu1 %v12279_v60  ;;  %8372 = vmatprep.subr.bf16.mxu0 %v12284_v15  ;;  %v12332_v60 = vld [vmem:[#allocation2 + $0x238] ss:$52 sps:$4 sm:$0xff]  }
 0x42c   :  { %8391 = vmatprep.subr.bf16.mxu1 %v12287_v1  ;;  %v12335_v15 = vld [vmem:[#allocation2 + $0x1f0c] ss:$52 sps:$4 sm:$0xff]   ;;  %v12336_v1 = vld [vmem:[#allocation2 + $0x510] ss:$52 sps:$4 sm:$0xff]  }
 0x42e   :  { %8373 = vmatpush2.bf16.msra.mxu0 %v12282_v36  ;;  %v12333_v36 = vld [vmem:[#allocation2 + $0x1f08] ss:$52 sps:$4 sm:$0xff]  }
 0x42f   :  { %8392 = vmatpush1.bf16.msra.mxu1 %v12285_v17  ;;  %8374 = vmatprep.subr.bf16.mxu0 %v12290_v4  ;;  %v12337_v17 = vld [vmem:[#allocation2 + $0x1d0] ss:$52 sps:$4 sm:$0xff]  }
 0x430   :  { %8393 = vmatprep.subr.bf16.mxu1 %v12293_v18  ;;  %v12340_v4 = vld [vmem:[#allocation2 + $0x1ea4] ss:$52 sps:$4 sm:$0xff]   ;;  %v12341_v18 = vld [vmem:[#allocation2 + $0x4a8] ss:$52 sps:$4 sm:$0xff]  }
 0x432   :  { %8375 = vmatpush2.bf16.msra.mxu0 %v12288_v59  ;;  %v12338_v59 = vld [vmem:[#allocation2 + $0x1ea0] ss:$52 sps:$4 sm:$0xff]  }
 0x433   :  { %8394 = vmatpush1.bf16.msra.mxu1 %v12291_v33  ;;  %8438 = vmatprep.subr.bf16.mxu0 %v12299_v21  ;;  %v12342_v33 = vld [vmem:[#allocation2 + $0x168] ss:$52 sps:$4 sm:$0xff]   ;;  %v12346_v21 = vld [vmem:[#allocation2 + $0x440] ss:$52 sps:$4 sm:$0xff]  }
 0x434   :  { %8395 = vmatprep.subr.bf16.mxu1 %v12296_v55  ;;  %v12345_v55 = vld [vmem:[#allocation2 + $0x1e3c] ss:$52 sps:$4 sm:$0xff]  }
 0x435   :  { %v8077_v25 = vpop.f32.mrf.mxu0  ;;  %8377 = vmatmul.mubr.bf16.vlgmr.msra.gmra.mxu0 %v13082_v51  ;;  %v12306_v51 = vld [vmem:[#allocation2 + $0x1a90] ss:$52 sps:$4 sm:$0xff]  }
 0x436   :  { %v13133_v26 = vadd.f32 %v8077_v25, %v13121_v11  ;;  %8439 = vmatpush1.bf16.msra.mxu0 %v12297_v7  ;;  %8462 = vmatprep.mubr.bf16.mxu0 %v12700_v19  ;;  %v12309_v11 = vld [vmem:[#allocation2 + $0x2110] ss:$52 sps:$4 sm:$0xff]  }
 0x437   :  { %8396 = vmatpush1.bf16.msra.mxu1 %v12294_v23  ;;  %v13135_v37 = vpop.f32.mrf.mxu0  ;;  %8440 = vmatprep.subr.bf16.mxu0 %v12305_v45  ;;  %v12347_v45 = vld [vmem:[#allocation2 + $0x100] ss:$52 sps:$4 sm:$0xff]  }
 0x438   :  { %8397 = vmatprep.subr.bf16.mxu1 %v12302_v61  ;;  %v12343_v61 = vld [vmem:[#allocation2 + $0x1e38] ss:$52 sps:$4 sm:$0xff]  }
 0x439   :  { %v8081_v39 = vpop.f32.mrf.mxu0 }
 0x43a   :  { %v13139_v43 = vadd.f32 %v8081_v39, %v13125_v49  ;;  %8441 = vmatpush1.bf16.msra.mxu0 %v12303_v32  ;;  %v12320_v49 = vld [vmem:[#allocation2 + $0x2044] ss:$52 sps:$4 sm:$0xff]  }
 0x43b   :  { %8398 = vmatpush1.bf16.msra.mxu1 %v12300_v30  ;;  %v8083_v3 = vpop.f32.mrf.mxu0  ;;  %8442 = vmatprep.subr.bf16.mxu0 %v12311_v38  ;;  %v12350_v30 = vld [vmem:[#allocation2 + $0x1dd4] ss:$52 sps:$4 sm:$0xff]   ;;  %v12351_v32 = vld [vmem:[#allocation2 + $0x3d8] ss:$52 sps:$4 sm:$0xff]   ;;  %v12348_v39 = vld [vmem:[#allocation2 + $0x1dd0] ss:$52 sps:$4 sm:$0xff]  }
 0x43c   :  { %8399 = vmatprep.subr.bf16.mxu1 %v12308_v2  ;;  %v13142_v48 = vadd.f32 %v8083_v3, %v13127_v57  ;;  %v13147_v57 = vld [vmem:[%s13336_s0 + $0x28] ss:$44 sps:$4 sm:$0xff]   ;;  %v12356_v3 = vld [vmem:[#allocation2 + $0x370] ss:$52 sps:$4 sm:$0xff]  }
 0x43e   :  { %8443 = vmatpush1.bf16.msra.mxu0 %v12309_v11  ;;  %v12355_v11 = vld [vmem:[#allocation2 + $0x1d6c] ss:$52 sps:$4 sm:$0xff]  }
 0x43f   :  { %8400 = vmatpush1.bf16.msra.mxu1 %v12306_v51  ;;  %8444 = vmatprep.subr.bf16.mxu0 %v12317_v31  ;;  %v12352_v51 = vld [vmem:[#allocation2 + $0x98] ss:$52 sps:$4 sm:$0xff]   ;;  %v12353_v31 = vld [vmem:[#allocation2 + $0x1d68] ss:$52 sps:$4 sm:$0xff]  }
 0x440   :  { %8401 = vmatprep.subr.bf16.mxu1 %v12314_v47 }
 0x442   :  { %8445 = vmatpush1.bf16.msra.mxu0 %v12315_v56  ;;  %v12360_v56 = vld [vmem:[#allocation2 + $0x1348] ss:$52 sps:$4 sm:$0xff]  }
 0x443   :  { %8402 = vmatpush1.bf16.msra.mxu1 %v12312_v52  ;;  %10590 = vmatprep.subr.bf16.mxu0 %v12321_v62  ;;  %v12357_v52 = vld [vmem:[#allocation2 + $0x30] ss:$52 sps:$4 sm:$0xff]   ;;  %v12361_v62 = vld [vmem:[#allocation2 + $0x1008] ss:$52 sps:$4 sm:$0xff]  }
 0x444   :  { %8403 = vmatprep.subr.bf16.mxu1 %v12320_v49  ;;  %v12359_v49 = vld [vmem:[#allocation2 + $0x988] ss:$52 sps:$4 sm:$0xff]  }
 0x445   :  { %10543 = vmatmul.mubr.msk.bf16.vlgmr.msra.gmra.mxu0 %vm6921_vm0, %v13147_v57 }
 0x446   :  { %10591 = vmatpush3.bf16.msra.mxu0 %v12322_v8  ;;  %8505 = vmatprep.mubr.bf16.mxu0 %v12508_v12  ;;  %v12364_v8 = vld [vmem:[#allocation2 + $0x12e0] ss:$52 sps:$4 sm:$0xff]  }
 0x447   :  { %8404 = vmatpush2.bf16.msra.mxu1 %v12318_v54  ;;  %10592 = vmatprep.subr.bf16.mxu0 %v12326_v9  ;;  %v12362_v54 = vld [vmem:[#allocation2 + $0xc60] ss:$52 sps:$4 sm:$0xff]  }
 0x448   :  { %8405 = vmatprep.subr.bf16.mxu1 %v12325_v34  ;;  %v12510_v34 = vld [vmem:[%s13336_s0] ss:$44 sps:$4 sm:$0xff]  }
 0x449   :  { %v12363_v9 = vld [vmem:[#allocation2 + $0x920] ss:$52 sps:$4 sm:$0xff]  }
 0x44a   :  { %10593 = vmatpush3.bf16.msra.mxu0 %v12327_v46  ;;  %v12366_v46 = vld [vmem:[#allocation2 + $0xbf8] ss:$52 sps:$4 sm:$0xff]   ;;  %v12512_v12 = vld [vmem:[%s13336_s0 + $0x14] ss:$44 sps:$4 sm:$0xff]  }
 0x44b   :  { %8406 = vmatpush2.bf16.msra.mxu1 %v12323_v10  ;;  %10594 = vmatprep.subr.bf16.mxu0 %v12331_v35  ;;  %v12365_v10 = vld [vmem:[#allocation2 + $0xfa0] ss:$52 sps:$4 sm:$0xff]   ;;  %v12511_v35 = vld [vmem:[%s13336_s0 + $0xc] ss:$44 sps:$4 sm:$0xff]  }
 0x44c   :  { %8407 = vmatprep.subr.bf16.mxu1 %v12330_v42  ;;  %v12368_v42 = vld [vmem:[#allocation2 + $0x1278] ss:$52 sps:$4 sm:$0xff]  }
 0x44e   :  { %10595 = vmatpush3.bf16.msra.mxu0 %v12332_v60  ;;  %v12369_v60 = vld [vmem:[#allocation2 + $0xf38] ss:$52 sps:$4 sm:$0xff]  }
 0x44f   :  { %8408 = vmatpush2.bf16.msra.mxu1 %v12328_v16  ;;  %10596 = vmatprep.subr.bf16.mxu0 %v12336_v1  ;;  %v12367_v16 = vld [vmem:[#allocation2 + $0x8b8] ss:$52 sps:$4 sm:$0xff]   ;;  %v12372_v1 = vld [vmem:[#allocation2 + $0x1210] ss:$52 sps:$4 sm:$0xff]  }
 0x450   :  { %8409 = vmatprep.subr.bf16.mxu1 %v12335_v15  ;;  %v12370_v15 = vld [vmem:[#allocation2 + $0xb90] ss:$52 sps:$4 sm:$0xff]  }
 0x452   :  { %10597 = vmatpush3.bf16.msra.mxu0 %v12337_v17  ;;  %v12373_v17 = vld [vmem:[#allocation2 + $0xed0] ss:$52 sps:$4 sm:$0xff]  }
 0x453   :  { %8410 = vmatpush2.bf16.msra.mxu1 %v12333_v36  ;;  %10598 = vmatprep.subr.bf16.mxu0 %v12341_v18  ;;  %v12371_v36 = vld [vmem:[#allocation2 + $0x850] ss:$52 sps:$4 sm:$0xff]   ;;  %v12376_v18 = vld [vmem:[#allocation2 + $0x11a8] ss:$52 sps:$4 sm:$0xff]  }
 0x454   :  { %8411 = vmatprep.subr.bf16.mxu1 %v12340_v4  ;;  %v12374_v4 = vld [vmem:[#allocation2 + $0xb28] ss:$52 sps:$4 sm:$0xff]  }
 0x456   :  { %v8120_v23 = vpop.f32.mrf.mxu1  ;;  %10599 = vmatpush3.bf16.msra.mxu0 %v12342_v33  ;;  %v12375_v33 = vld [vmem:[#allocation2 + $0x7e8] ss:$52 sps:$4 sm:$0xff]  }
 0x457   :  { %v13155_v7 = vadd.f32 %v8120_v23, %v13133_v26  ;;  %8412 = vmatpush2.bf16.msra.mxu1 %v12338_v59  ;;  %10600 = vmatprep.subr.bf16.mxu0 %v12346_v21  ;;  %v12378_v21 = vld [vmem:[#allocation2 + $0xac0] ss:$52 sps:$4 sm:$0xff]  }
 0x458   :  { %v13157_v25 = vpop.f32.mrf.mxu1  ;;  %8413 = vmatprep.subr.bf16.mxu1 %v12345_v55  ;;  %v12377_v55 = vld [vmem:[#allocation2 + $0xe68] ss:$52 sps:$4 sm:$0xff]   ;;  %v12380_v23 = vld [vmem:[#allocation2 + $0x1140] ss:$52 sps:$4 sm:$0xff]  }
 0x45a   :  { %v8124_v2 = vpop.f32.mrf.mxu1  ;;  %10601 = vmatpush3.bf16.msra.mxu0 %v12347_v45 }
 0x45b   :  { %v13160_v38 = vadd.f32 %v8124_v2, %v13139_v43  ;;  %8414 = vmatpush2.bf16.msra.mxu1 %v12343_v61  ;;  %10602 = vmatprep.subr.bf16.mxu0 %v12351_v32  ;;  %v12358_v43 = vld [vmem:[#allocation2 + $0xcc8] ss:$52 sps:$4 sm:$0xff]   ;;  %v12379_v32 = vld [vmem:[#allocation2 + $0x780] ss:$52 sps:$4 sm:$0xff]  }
 0x45c   :  { %v8126_v26 = vpop.f32.mrf.mxu1  ;;  %8415 = vmatprep.subr.bf16.mxu1 %v12350_v30  ;;  %v12381_v2 = vld [vmem:[#allocation2 + $0xe00] ss:$52 sps:$4 sm:$0xff]  }
 0x45d   :  { %v13163_v47 = vadd.f32 %v8126_v26, %v13142_v48  ;;  %v13168_v48 = vld [vmem:[%s13336_s0 + $0x20] ss:$44 sps:$4 sm:$0xff]  }
 0x45e   :  { %10603 = vmatpush3.bf16.msra.mxu0 %v12352_v51  ;;  %v12382_v51 = vld [vmem:[#allocation2 + $0xa58] ss:$52 sps:$4 sm:$0xff]  }
 0x45f   :  { %8416 = vmatpush2.bf16.msra.mxu1 %v12348_v39  ;;  %10604 = vmatprep.subr.bf16.mxu0 %v12356_v3  ;;  %v12384_v26 = vld [vmem:[#allocation2 + $0x10d8] ss:$52 sps:$4 sm:$0xff]  }
 0x460   :  { %8417 = vmatprep.subr.bf16.mxu1 %v12355_v11 }
 0x462   :  { %10605 = vmatpush3.bf16.msra.mxu0 %v12357_v52 }
 0x463   :  { %8418 = vmatpush2.bf16.msra.mxu1 %v12353_v31  ;;  %10634 = vmatprep.subr.bf16.mxu0 %v12360_v56 }
 0x464   :  { %10612 = vmatprep.subr.bf16.mxu1 %v12358_v43  ;;  %v12383_v43 = vld [vmem:[#allocation2 + $0x718] ss:$52 sps:$4 sm:$0xff]  }
 0x465   :  { %8506 = vmatmul.mubr.bf16.vlgmr.msra.gmra.mxu0 %v12510_v34 }
 0x466   :  { %8420 = vmatmul.mubr.bf16.vlgmr.msra.gmra.mxu1 %v13168_v48  ;;  %10635 = vmatpush3.bf16.msra.mxu0 %v12361_v62  ;;  %v8206_v59 = vpop.f32.mrf.mxu1  ;;  %v12388_v62 = vld [vmem:[#allocation2 + $0x1070] ss:$52 sps:$4 sm:$0xff]  }
 0x467   :  { %10613 = vmatpush3.bf16.msra.mxu1 %v12359_v49  ;;  %10636 = vmatprep.subr.bf16.mxu0 %v12364_v8  ;;  %v12386_v49 = vld [vmem:[#allocation2 + $0x9f0] ss:$52 sps:$4 sm:$0xff]  }
 0x468   :  { %10614 = vmatprep.subr.bf16.mxu1 %v12362_v54  ;;  %8546 = vmatprep.mubr.bf16.mxu1 %v12511_v35  ;;  %v13180_v61 = vpop.f32.mrf.mxu1  ;;  %v12391_v35 = vld [vmem:[#allocation2 + $0x1688] ss:$52 sps:$4 sm:$0xff]  }
 0x469   :  { %8587 = vmatprep.mubr.bf16.mxu0 %v12512_v12  ;;  %v12393_v12 = vld [vmem:[#allocation2 + $0x1d08] ss:$52 sps:$4 sm:$0xff]  }
 0x46a   :  { %10637 = vmatpush3.bf16.msra.mxu0 %v12365_v10  ;;  %v8210_v3 = vpop.f32.mrf.mxu1  ;;  %v12387_v10 = vld [vmem:[#allocation2 + $0x6b0] ss:$52 sps:$4 sm:$0xff]  }
 0x46b   :  { %10615 = vmatpush3.bf16.msra.mxu1 %v12363_v9  ;;  %10638 = vmatprep.subr.bf16.mxu0 %v12368_v42  ;;  %v12392_v42 = vld [vmem:[#allocation2 + $0x2048] ss:$52 sps:$4 sm:$0xff]  }
 0x46c   :  { %10616 = vmatprep.subr.bf16.mxu1 %v12366_v46  ;;  %v8212_v34 = vpop.f32.mrf.mxu1  ;;  %v12390_v46 = vld [vmem:[#allocation2 + $0x19c8] ss:$52 sps:$4 sm:$0xff]  }
 0x46e   :  { %10639 = vmatpush3.bf16.msra.mxu0 %v12369_v60  ;;  %v12396_v60 = vld [vmem:[#allocation2 + $0x1fe0] ss:$52 sps:$4 sm:$0xff]  }
 0x46f   :  { %10617 = vmatpush3.bf16.msra.mxu1 %v12367_v16  ;;  %10640 = vmatprep.subr.bf16.mxu0 %v12372_v1  ;;  %v12394_v16 = vld [vmem:[#allocation2 + $0x1960] ss:$52 sps:$4 sm:$0xff]  }
 0x470   :  { %10618 = vmatprep.subr.bf16.mxu1 %v12370_v15  ;;  %v12514_v15 = vld [vmem:[%s13336_s0 + $0x10] ss:$44 sps:$4 sm:$0xff]   ;;  %v12395_v1 = vld [vmem:[#allocation2 + $0x1620] ss:$52 sps:$4 sm:$0xff]  }
 0x472   :  { %10641 = vmatpush3.bf16.msra.mxu0 %v12373_v17  ;;  %v12398_v17 = vld [vmem:[#allocation2 + $0x18f8] ss:$52 sps:$4 sm:$0xff]  }
 0x473   :  { %10619 = vmatpush3.bf16.msra.mxu1 %v12371_v36  ;;  %10642 = vmatprep.subr.bf16.mxu0 %v12376_v18  ;;  %v12397_v36 = vld [vmem:[#allocation2 + $0x1ca0] ss:$52 sps:$4 sm:$0xff]   ;;  %v12515_v18 = vld [vmem:[%s13336_s0 + $0x1c] ss:$44 sps:$4 sm:$0xff]  }
 0x474   :  { %10620 = vmatprep.subr.bf16.mxu1 %v12374_v4  ;;  %v12400_v4 = vld [vmem:[#allocation2 + $0x1f78] ss:$52 sps:$4 sm:$0xff]  }
 0x475   :  { %v8163_v45 = vpop.f32.mrf.mxu0 }
 0x476   :  { %v8164_v30 = vadd.f32 %v8163_v45, %v13155_v7  ;;  %10643 = vmatpush3.bf16.msra.mxu0 %v12377_v55  ;;  %v12385_v7 = vld [vmem:[#allocation2 + $0xd98] ss:$52 sps:$4 sm:$0xff]   ;;  %v12403_v45 = vld [vmem:[#allocation2 + $0x1550] ss:$52 sps:$4 sm:$0xff]  }
 0x477   :  { %10621 = vmatpush3.bf16.msra.mxu1 %v12375_v33  ;;  %v13183_v39 = vpop.f32.mrf.mxu0  ;;  %10644 = vmatprep.subr.bf16.mxu0 %v12380_v23  ;;  %v12399_v33 = vld [vmem:[#allocation2 + $0x15b8] ss:$52 sps:$4 sm:$0xff]   ;;  %v12404_v23 = vld [vmem:[#allocation2 + $0x1f10] ss:$52 sps:$4 sm:$0xff]  }
 0x478   :  { %10622 = vmatprep.subr.bf16.mxu1 %v12378_v21  ;;  %v13185_v11 = vadd.f32 %v8206_v59, %v8164_v30  ;;  %v12516_v59 = vld [vmem:[%s13336_s0 + $0x24] ss:$44 sps:$4 sm:$0xff]   ;;  %v12401_v55 = vld [vmem:[#allocation2 + $0x1c38] ss:$52 sps:$4 sm:$0xff]  }
 0x479   :  { %v8167_v31 = vpop.f32.mrf.mxu0  ;;  %v12402_v21 = vld [vmem:[#allocation2 + $0x1890] ss:$52 sps:$4 sm:$0xff]  }
 0x47a   :  { %v8168_v52 = vadd.f32 %v8167_v31, %v13160_v38  ;;  %10645 = vmatpush3.bf16.msra.mxu0 %v12381_v2  ;;  %v12389_v38 = vld [vmem:[#allocation2 + $0xd30] ss:$52 sps:$4 sm:$0xff]   ;;  %v12408_v2 = vld [vmem:[#allocation2 + $0x1ea8] ss:$52 sps:$4 sm:$0xff]   ;;  %v12412_v31 = vld [vmem:[#allocation2 + $0x1e40] ss:$52 sps:$4 sm:$0xff]  }
 0x47b   :  { %10623 = vmatpush3.bf16.msra.mxu1 %v12379_v32  ;;  %v8169_v56 = vpop.f32.mrf.mxu0  ;;  %10646 = vmatprep.subr.bf16.mxu0 %v12384_v26  ;;  %v12405_v30 = vld [vmem:[#allocation2 + $0x1bd0] ss:$52 sps:$4 sm:$0xff]   ;;  %v12406_v32 = vld [vmem:[#allocation2 + $0x1828] ss:$52 sps:$4 sm:$0xff]  }
 0x47c   :  { %10624 = vmatprep.subr.bf16.mxu1 %v12382_v51  ;;  %v13188_v54 = vadd.f32 %v8210_v3, %v8168_v52  ;;  %v8170_v8 = vadd.f32 %v8169_v56, %v13163_v47  ;;  %v12513_v47 = vld [vmem:[%s13336_s0 + $0x8] ss:$44 sps:$4 sm:$0xff]   ;;  %v12416_v56 = vld [vmem:[#allocation2 + $0x1dd8] ss:$52 sps:$4 sm:$0xff]  }
 0x47d   :  { %v12407_v51 = vld [vmem:[#allocation2 + $0x14e8] ss:$52 sps:$4 sm:$0xff]   ;;  %v12410_v3 = vld [vmem:[#allocation2 + $0x17c0] ss:$52 sps:$4 sm:$0xff]  }
 0x47e   :  { %v13191_v9 = vadd.f32 %v8212_v34, %v8170_v8  ;;  %10647 = vmatpush3.bf16.msra.mxu0 %v12385_v7  ;;  %v12409_v26 = vld [vmem:[#allocation2 + $0x1b68] ss:$52 sps:$4 sm:$0xff]   ;;  %v12411_v52 = vld [vmem:[#allocation2 + $0x1480] ss:$52 sps:$4 sm:$0xff]   ;;  %v12414_v7 = vld [vmem:[#allocation2 + $0x1758] ss:$52 sps:$4 sm:$0xff]  }
 0x47f   :  { %10625 = vmatpush3.bf16.msra.mxu1 %v12383_v43  ;;  %10648 = vmatprep.subr.bf16.mxu0 %v12388_v62  ;;  %v12413_v43 = vld [vmem:[#allocation2 + $0x1b00] ss:$52 sps:$4 sm:$0xff]   ;;  %v12417_v62 = vld [vmem:[#allocation2 + $0x1a98] ss:$52 sps:$4 sm:$0xff]   ;;  %v12418_v8 = vld [vmem:[#allocation2 + $0x16f0] ss:$52 sps:$4 sm:$0xff]  }
 0x480   :  { %10626 = vmatprep.subr.bf16.mxu1 %v12386_v49  ;;  %v12415_v49 = vld [vmem:[#allocation2 + $0x1418] ss:$52 sps:$4 sm:$0xff]   ;;  %v12420_v34 = vld [vmem:[#allocation2 + $0x1d70] ss:$52 sps:$4 sm:$0xff]  }
 0x482   :  { %10649 = vmatpush3.bf16.msra.mxu0 %v12389_v38  ;;  %v12421_v38 = vld [vmem:[#allocation2 + $0x1a30] ss:$52 sps:$4 sm:$0xff]  }
 0x483   :  { %10627 = vmatpush3.bf16.msra.mxu1 %v12387_v10  ;;  %10678 = vmatprep.subr.bf16.mxu0 %v12392_v42  ;;  %v12419_v10 = vld [vmem:[#allocation2 + $0x13b0] ss:$52 sps:$4 sm:$0xff]   ;;  %v12701_v42 = vmov 0.0  }
 0x484   :  { %10656 = vmatprep.subr.bf16.mxu1 %v12390_v46  ;;  %v12422_v46 = vld [vmem:[#allocation2 + $0x21e8] ss:$52 sps:$4 sm:$0xff]  }
 0x485   :  { %8588 = vmatmul.mubr.bf16.vlgmr.msra.gmra.mxu0 %v12514_v15 }
 0x486   :  { %8547 = vmatmul.mubr.bf16.vlgmr.msra.gmra.mxu1 %v12513_v47  ;;  %10679 = vmatpush3.bf16.msra.mxu0 %v12393_v12  ;;  %v12423_v12 = vld [vmem:[#allocation2 + $0x2180] ss:$52 sps:$4 sm:$0xff]  }
 0x487   :  { %10657 = vmatpush3.bf16.msra.mxu1 %v12391_v35  ;;  %10680 = vmatprep.subr.bf16.mxu0 %v12396_v60  ;;  %v12517_v35 = vld [vmem:[%s13336_s0 + $0x18] ss:$44 sps:$4 sm:$0xff]   ;;  %s12703_s0 = smov 112  }
 0x488   :  { %10658 = vmatprep.subr.bf16.mxu1 %v12394_v16  ;;  %8628 = vmatprep.mubr.bf16.mxu1 %v12515_v18  ;;  %v12424_v16 = vld [vmem:[#allocation2 + $0x2118] ss:$52 sps:$4 sm:$0xff]   ;;  %v12425_v60 = vld [vmem:[#allocation2 + $0x20b0] ss:$52 sps:$4 sm:$0xff]  }
 0x489   :  { %8669 = vmatprep.mubr.bf16.mxu0 %v12516_v59 }
 0x48a   :  { %10681 = vmatpush3.bf16.msra.mxu0 %v12397_v36 }
 0x48b   :  { %10659 = vmatpush3.bf16.msra.mxu1 %v12395_v1  ;;  %10682 = vmatprep.subr.bf16.mxu0 %v12400_v4 }
 0x48c   :  { %10660 = vmatprep.subr.bf16.mxu1 %v12398_v17 }
 0x48e   :  { %10683 = vmatpush3.bf16.msra.mxu0 %v12401_v55 }
 0x48f   :  { %10661 = vmatpush3.bf16.msra.mxu1 %v12399_v33  ;;  %10684 = vmatprep.subr.bf16.mxu0 %v12404_v23 }
 0x490   :  { %10662 = vmatprep.subr.bf16.mxu1 %v12402_v21 }
 0x492   :  { %10685 = vmatpush3.bf16.msra.mxu0 %v12405_v30 }
 0x493   :  { %10663 = vmatpush3.bf16.msra.mxu1 %v12403_v45  ;;  %10686 = vmatprep.subr.bf16.mxu0 %v12408_v2 }
 0x494   :  { %10664 = vmatprep.subr.bf16.mxu1 %v12406_v32 }
 0x496   :  { %10687 = vmatpush3.bf16.msra.mxu0 %v12409_v26 }
 0x497   :  { %10665 = vmatpush3.bf16.msra.mxu1 %v12407_v51  ;;  %10688 = vmatprep.subr.bf16.mxu0 %v12412_v31 }
 0x498   :  { %10666 = vmatprep.subr.bf16.mxu1 %v12410_v3 }
 0x49a   :  { %10689 = vmatpush3.bf16.msra.mxu0 %v12413_v43 }
 0x49b   :  { %10667 = vmatpush3.bf16.msra.mxu1 %v12411_v52  ;;  %10690 = vmatprep.subr.bf16.mxu0 %v12416_v56 }
 0x49c   :  { %10668 = vmatprep.subr.bf16.mxu1 %v12414_v7 }
 0x49e   :  { %10691 = vmatpush3.bf16.msra.mxu0 %v12417_v62 }
 0x49f   :  { %10669 = vmatpush3.bf16.msra.mxu1 %v12415_v49  ;;  %10692 = vmatprep.subr.bf16.mxu0 %v12420_v34 }
 0x4a0   :  { %10670 = vmatprep.subr.bf16.mxu1 %v12418_v8 }
 0x4a2   :  { %10693 = vmatpush3.bf16.msra.mxu0 %v12421_v38 }
 0x4a3   :  { %10671 = vmatpush3.bf16.msra.mxu1 %v12419_v10  ;;  %9153 = vmatprep.subr.bf16.mxu0 %v12700_v19 }
 0x4a4   :  { %10745 = vmatprep.subr.bf16.mxu1 %v12701_v42 }
 0x4a5   :  { %8670 = vmatmul.mubr.bf16.vlgmr.msra.gmra.mxu0 %v13168_v48 }
 0x4a6   :  { %8629 = vmatmul.mubr.bf16.vlgmr.msra.gmra.mxu1 %v12517_v35  ;;  %v8249_v47 = vpop.f32.mrf.mxu1 }
 0x4a7   :  { %10746 = vmatpush3.bf16.msra.mxu1 %v12422_v46  ;;  %10753 = vmatprep.mubr.msk.bf16.mxu1 %vm12702_vm1, %v12701_v42 }
 0x4a8   :  { %10747 = vmatprep.subr.bf16.mxu1 %v12701_v42  ;;  %v8251_v1 = vpop.f32.mrf.mxu1 }
 0x4aa   :  { %v8253_v17 = vpop.f32.mrf.mxu1 }
 0x4ab   :  { %10748 = vmatpush3.bf16.msra.mxu1 %v12423_v12 }
 0x4ac   :  { %10749 = vmatprep.subr.bf16.mxu1 %v12701_v42  ;;  %v8255_v18 = vpop.f32.mrf.mxu1 }
 0x4af   :  { %10750 = vmatpush3.bf16.msra.mxu1 %v12424_v16  ;;  %v8037_v16 = vadd.f32 %v13123_v41, %v13119_v29 }
 0x4b0   :  { %10751 = vmatprep.subr.bf16.mxu1 %v12701_v42 }
 0x4b3   :  { %10752 = vmatpush3.bf16.msra.mxu1 %v12425_v60 }
 0x4b5   :  { %v8292_v48 = vpop.f32.mrf.mxu0 }
 0x4b6   :  { %10754 = vmatmul.mubr.msk.bf16.vlgmr.msra.gmra.mxu1 %vm6921_vm0, %v13147_v57  ;;  %v8293_v30 = vadd.f32 %v8292_v48, %v8249_v47 }
 0x4b7   :  { %v8294_v15 = vpop.f32.mrf.mxu0 }
 0x4b8   :  { %v8295_v2 = vadd.f32 %v8294_v15, %v8251_v1  ;;  %v8080_v1 = vadd.f32 %v13135_v37, %v8037_v16 }
 0x4b9   :  { %v8296_v36 = vpop.f32.mrf.mxu0 }
 0x4ba   :  { %v8297_v3 = vadd.f32 %v8296_v36, %v8253_v17 }
 0x4bb   :  { %v8298_v4 = vpop.f32.mrf.mxu0 }
 0x4bc   :  { %v8299_v7 = vadd.f32 %v8298_v4, %v8255_v18  ;;  %v8123_v18 = vadd.f32 %v13157_v25, %v8080_v1 }
 0x4be   :  { %v8166_v29 = vadd.f32 %v13183_v39, %v8123_v18 }
 0x4e6   :  { %v8335_v33 = vpop.f32.mrf.mxu1 }
 0x4e7   :  { %v8336_v51 = vadd.f32 %v8335_v33, %v8293_v30  ;;  %v13228_v33 = vadd.f32 %v13180_v61, %v8166_v29 }
 0x4e8   :  { %v8337_v21 = vpop.f32.mrf.mxu1 }
 0x4e9   :  { %v8338_v31 = vadd.f32 %v8337_v21, %v8295_v2 }
 0x4ea   :  { %v8339_v45 = vpop.f32.mrf.mxu1 }
 0x4eb   :  { %v8340_v56 = vadd.f32 %v8339_v45, %v8297_v3 }
 0x4ec   :  { %v8341_v26 = vpop.f32.mrf.mxu1 }
 0x4ed   :  { %v8342_v10 = vadd.f32 %v8341_v26, %v8299_v7 }
 0x4f5   :  { %v8378_v59 = vpop.f32.mrf.mxu0 }
 0x4f6   :  { %v8379_v52 = vadd.f32 %v8378_v59, %v8336_v51 }
 0x4f7   :  { %v8380_v55 = vpop.f32.mrf.mxu0 }
 0x4f8   :  { %v8381_v49 = vadd.f32 %v8380_v55, %v8338_v31 }
 0x4f9   :  { %v8382_v23 = vpop.f32.mrf.mxu0 }
 0x4fa   :  { %v8383_v38 = vadd.f32 %v8382_v23, %v8340_v56 }
 0x4fb   :  { %v8384_v32 = vpop.f32.mrf.mxu0 }
 0x4fc   :  { %v8385_v60 = vadd.f32 %v8384_v32, %v8342_v10 }
 0x505   :  { %v8464_v57 = vpop.f32.mrf.mxu0 }
 0x507   :  { %v8466_v8 = vpop.f32.mrf.mxu0 }
 0x509   :  { %v8468_v47 = vpop.f32.mrf.mxu0 }
 0x50b   :  { %v8470_v59 = vpop.f32.mrf.mxu0 }
 0x525   :  { %v10606_v37 = vpop.f32.mrf.mxu0 }
 0x526   :  { %v8421_v43 = vpop.f32.mrf.mxu1 }
 0x527   :  { %v8422_v62 = vadd.f32 %v8421_v43, %v8379_v52  ;;  %v10607_v25 = vpop.f32.mrf.mxu0 }
 0x528   :  { %v8423_v34 = vpop.f32.mrf.mxu1 }
 0x529   :  { %v8424_v46 = vadd.f32 %v8423_v34, %v8381_v49  ;;  %v8465_v35 = vadd.f32 %v8464_v57, %v8422_v62  ;;  %v10609_v39 = vpop.f32.mrf.mxu0 }
 0x52a   :  { %v8425_v12 = vpop.f32.mrf.mxu1 }
 0x52b   :  { %v8426_v48 = vadd.f32 %v8425_v12, %v8383_v38  ;;  %8776 = vrot.lane.b32.xlu0 %v8465_v35, %s12703_s0  ;;  %v8467_v36 = vadd.f32 %v8466_v8, %v8424_v46  ;;  %v10610_v55 = vpop.f32.mrf.mxu0 }
 0x52c   :  { %v8427_v15 = vpop.f32.mrf.mxu1  ;;  %v10611_v49 = vadd.f32 %v10610_v55, %v10609_v39 }
 0x52d   :  { %v8428_v17 = vadd.f32 %v8427_v15, %v8385_v60  ;;  %v8469_v4 = vadd.f32 %v8468_v47, %v8426_v48 }
 0x52f   :  { %8784 = vrot.lane.b32.xlu1 %v8469_v4, %s12703_s0  ;;  %8778 = vrot.lane.b32.xlu0 %v8467_v36, %s12703_s0  ;;  %v8471_v41 = vadd.f32 %v8470_v59, %v8428_v17 }
 0x533   :  { %8786 = vrot.lane.b32.xlu0 %v8471_v41, %s12703_s0 }
 0x537   :  { %8774 = vrot.lane.b32.xlu0 %v13228_v33, %s12703_s0 }
 0x53b   :  { %8729 = vrot.lane.b32.xlu0 %v13024_v44, %s12703_s0 }
 0x53f   :  { %8737 = vrot.lane.b32.xlu0 %v13030_v28, %s12703_s0  ;;  %v10608_v28 = vadd.f32 %v10607_v25, %v10606_v37 }
 0x543   :  { %8727 = vrot.lane.b32.xlu0 %v12938_v58, %s12703_s0 }
 0x545   :  { %v10650_v23 = vpop.f32.mrf.mxu0 }
 0x546   :  { %v10628_v21 = vpop.f32.mrf.mxu1 }
 0x547   :  { %v10651_v45 = vpop.f32.mrf.mxu0 }
 0x548   :  { %v10629_v61 = vpop.f32.mrf.mxu1  ;;  %v10652_v7 = vadd.f32 %v10651_v45, %v10650_v23  ;;  %v12428_v45 = vld [vmem:[#allocation6 + $0x70] sm:$0xff]  }
 0x549   :  { %v10653_v32 = vpop.f32.mrf.mxu0  ;;  %v10630_v57 = vadd.f32 %v10629_v61, %v10628_v21  ;;  %v12427_v61 = vld [vmem:[#allocation6 + $0x38] sm:$0xff]  }
 0x54a   :  { %v10631_v30 = vpop.f32.mrf.mxu1 }
 0x54b   :  { %v10654_v51 = vpop.f32.mrf.mxu0  ;;  %v8549_v43 = vadd.f32 %v10630_v57, %v10608_v28  ;;  %v12432_v57 = vld [vmem:[#allocation6 + $0xb0] sm:$0xff]   ;;  %v12434_v28 = vld [vmem:[#allocation6 + $0x60] sm:$0xff]  }
 0x54c   :  { %v10632_v2 = vpop.f32.mrf.mxu1  ;;  %v10655_v46 = vadd.f32 %v10654_v51, %v10653_v32 }
 0x54d   :  { %v10633_v56 = vadd.f32 %v10632_v2, %v10631_v30  ;;  %v8590_v10 = vadd.f32 %v10652_v7, %v8549_v43  ;;  %v12429_v30 = vld [vmem:[#allocation6 + $0xb8] sm:$0xff]  }
 0x54e   :  { %9154 = vmatpush1.bf16.msra.mxu0 %v12429_v30  ;;  %v12439_v7 = vld [vmem:[#allocation6 + $0x18] sm:$0xff]  }
 0x54f   :  { %v8552_v38 = vadd.f32 %v10633_v56, %v10611_v49  ;;  %9155 = vmatprep.subr.bf16.mxu0 %v12700_v19  ;;  %v12440_v49 = vld [vmem:[#allocation6 + $0x50] sm:$0xff]  }
 0x551   :  { %v8593_v48 = vadd.f32 %v10655_v46, %v8552_v38  ;;  %v12444_v38 = vld [vmem:[#allocation6 + $0x90] sm:$0xff]  }
 0x552   :  { %9156 = vmatpush1.bf16.msra.mxu0 %v12432_v57 }
 0x553   :  { %9157 = vmatprep.subr.bf16.mxu0 %v12700_v19 }
 0x565   :  { %v10694_v44 = vpop.f32.mrf.mxu0 }
 0x566   :  { %v10672_v26 = vpop.f32.mrf.mxu1 }
 0x567   :  { %v10695_v52 = vpop.f32.mrf.mxu0 }
 0x568   :  { %v10673_v3 = vpop.f32.mrf.mxu1  ;;  %v10696_v12 = vadd.f32 %v10695_v52, %v10694_v44  ;;  %v12430_v44 = vld [vmem:[#allocation6 + $0x30] sm:$0xff]   ;;  %v12436_v52 = vld [vmem:[#allocation6 + $0x20] sm:$0xff]  }
 0x569   :  { %v10674_v62 = vadd.f32 %v10673_v3, %v10672_v26  ;;  %v10697_v34 = vpop.f32.mrf.mxu0  ;;  %v12433_v3 = vld [vmem:[#allocation6 + $0x28] sm:$0xff]  }
 0x56a   :  { %v10675_v31 = vpop.f32.mrf.mxu1 }
 0x56b   :  { %v8631_v35 = vadd.f32 %v10674_v62, %v8590_v10  ;;  %v10698_v60 = vpop.f32.mrf.mxu0  ;;  %v12441_v62 = vld [vmem:[#allocation6 + $0x98] sm:$0xff]   ;;  %v12443_v10 = vld [vmem:[#allocation6 + $0x48] sm:$0xff]  }
 0x56c   :  { %v10676_v8 = vpop.f32.mrf.mxu1  ;;  %v10699_v15 = vadd.f32 %v10698_v60, %v10697_v34  ;;  %v12442_v34 = vld [vmem:[#allocation6 + $0x10] sm:$0xff]   ;;  %v12446_v60 = vld [vmem:[#allocation6 + $0x40] sm:$0xff]  }
 0x56d   :  { %v10677_v16 = vadd.f32 %v10676_v8, %v10675_v31  ;;  %v8672_v1 = vadd.f32 %v10696_v12, %v8631_v35  ;;  %v12435_v31 = vld [vmem:[#allocation6 + $0xa8] sm:$0xff]  }
 0x56e   :  { %9158 = vmatpush1.bf16.msra.mxu0 %v12435_v31 }
 0x56f   :  { %v8634_v47 = vadd.f32 %v10677_v16, %v8593_v48  ;;  %9159 = vmatprep.subr.bf16.mxu0 %v12700_v19  ;;  %v12447_v48 = vld [vmem:[#allocation6 + $0x88] sm:$0xff]  }
 0x571   :  { %v8675_v18 = vadd.f32 %v10699_v15, %v8634_v47  ;;  %v12448_v47 = vld [vmem:[#allocation6] sm:$0xff]  }
 0x576   :  { %v8712_v36 = vpop.f32.mrf.mxu1 }
 0x577   :  { %v8713_v17 = vadd.f32 %v8712_v36, %v8672_v1  ;;  %v12449_v36 = vld [vmem:[#allocation6 + $0x80] sm:$0xff]  }
 0x578   :  { %v10755_v4 = vpop.f32.mrf.mxu1 }
 0x579   :  { %8780 = vrot.lane.b32.xlu1 %v8713_v17, %s12703_s0  ;;  %v12450_v4 = vld [vmem:[#allocation6 + $0xc0] sm:$0xff]  }
 0x57a   :  { %v8715_v59 = vpop.f32.mrf.mxu1 }
 0x57b   :  { %v8716_v29 = vadd.f32 %v8715_v59, %v8675_v18 }
 0x57c   :  { %v10756_v41 = vpop.f32.mrf.mxu1 }
 0x57d   :  { %8788 = vrot.lane.b32.xlu1 %v8716_v29, %s12703_s0 }
 0x581   :  { %8782 = vrot.lane.b32.xlu1 %v13191_v9, %s12703_s0 }
 0x585   :  { %8731 = vrot.lane.b32.xlu1 %v13027_v50, %s12703_s0 }
 0x589   :  { %8739 = vrot.lane.b32.xlu1 %v13033_v0, %s12703_s0  ;;  %v12426_v0 = vld [vmem:[#allocation6 + $0x78] sm:$0xff]  }
 0x58a   :  { %10705 = vmatprep.subr.bf16.mxu1 %v12426_v0 }
 0x58b   :  { %10706 = vmatpush3.bf16.msra.mxu1 %v12427_v61 }
 0x58c   :  { %10707 = vmatprep.subr.bf16.mxu1 %v12428_v45 }
 0x58d   :  { %8735 = vrot.lane.b32.xlu1 %v12942_v5, %s12703_s0 }
 0x58f   :  { %10708 = vmatpush3.bf16.msra.mxu1 %v12430_v44 }
 0x59d   :  { %v8777_v37 = vpop.permute.xlu0 %8776 }
 0x5a1   :  { %v13248_v25 = vpop.permute.xlu0 %8778  ;;  %v8785_v32 = vpop.permute.xlu1 %8784 }
 0x5a2   :  { %v8791_v50 = vsel %vm8743_vm2, %v8777_v37, %v13248_v25 }
 0x5a3   :  { %v8805_v2 = vmax.f32 %v13107_v22, %v8791_v50  ;;  %v12431_v22 = vld [vmem:[#allocation6 + $0x68] sm:$0xff]   ;;  %v8859_v50 = vld [vmem:[#allocation4] sm:$0xf] }
 0x5a4   :  { %10709 = vmatprep.subr.bf16.mxu1 %v12431_v22 }
 0x5a5   :  { %v13250_v39 = vpop.permute.xlu0 %8786  ;;  %10710 = vmatpush3.bf16.msra.mxu1 %v12433_v3 }
 0x5a6   :  { %v8794_v51 = vsel %vm8743_vm2, %v8785_v32, %v13250_v39  ;;  %10711 = vmatprep.subr.bf16.mxu1 %v12434_v28 }
 0x5a7   :  { %v8809_v26 = vmax.f32 %v13113_v6, %v8794_v51  ;;  %v12437_v6 = vld [vmem:[#allocation6 + $0x58] sm:$0xff]  }
 0x5a9   :  { %v8775_v55 = vpop.permute.xlu0 %8774  ;;  %10712 = vmatpush3.bf16.msra.mxu1 %v12436_v52 }
 0x5aa   :  { %v8790_v21 = vsel %vm8743_vm2, %v8775_v55, %v8777_v37  ;;  %10713 = vmatprep.subr.bf16.mxu1 %v12437_v6  ;;  %v8861_v37 = vlaneseq }
 0x5ab   :  { %v8804_v23 = vmax.f32 %v13104_v40, %v8790_v21 }
 0x5ad   :  { %8820 = vrot.lane.b32.xlu0 %v8804_v23, %s12704_s12  ;;  %10714 = vmatpush3.bf16.msra.mxu1 %v12439_v7  ;;  %v8730_v18 = vpop.permute.xlu0 %8729 }
 0x5ae   :  { %10715 = vmatprep.subr.bf16.mxu1 %v12440_v49 }
 0x5b1   :  { %8822 = vrot.lane.b32.xlu0 %v8805_v2, %s12704_s12  ;;  %10716 = vmatpush3.bf16.msra.mxu1 %v12442_v34  ;;  %v8738_v59 = vpop.permute.xlu0 %8737 }
 0x5b2   :  { %10717 = vmatprep.subr.bf16.mxu1 %v12443_v10 }
 0x5b5   :  { %8830 = vrot.lane.b32.xlu0 %v8809_v26, %s12704_s12  ;;  %v8728_v29 = vpop.permute.xlu0 %8727 }
 0x5b6   :  { %v8744_v55 = vsel %vm8743_vm2, %v8728_v29, %v8730_v18  ;;  %v12451_v29 = vld [vmem:[#allocation9 + $0x38] sm:$0xff]  }
 0x5b9   :  { %8733 = vrot.lane.b32.xlu0 %v13104_v40, %s12703_s0  ;;  %v12438_v40 = vld [vmem:[#allocation6 + $0xa0] sm:$0xff]  }
 0x5ba   :  { %9160 = vmatpush1.bf16.msra.mxu0 %v12438_v40 }
 0x5bb   :  { %9161 = vmatprep.subr.bf16.mxu0 %v12700_v19 }
 0x5be   :  { %9162 = vmatpush1.bf16.msra.mxu0 %v12441_v62 }
 0x5bf   :  { %9163 = vmatprep.subr.bf16.mxu0 %v12700_v19 }
 0x5c2   :  { %9164 = vmatpush1.bf16.msra.mxu0 %v12444_v38 }
 0x5c3   :  { %9165 = vmatprep.subr.bf16.mxu0 %v12700_v19 }
 0x5c6   :  { %9166 = vmatpush1.bf16.msra.mxu0 %v12447_v48 }
 0x5c7   :  { %9167 = vmatprep.subr.bf16.mxu0 %v12700_v19 }
 0x5ca   :  { %9168 = vmatpush1.bf16.msra.mxu0 %v12449_v36 }
 0x5cb   :  { %9183 = vmatprep.subr.bf16.mxu0 %v12700_v19 }
 0x5ce   :  { %9184 = vmatpush2.bf16.msra.mxu0 %v12450_v4 }
 0x5cf   :  { %10777 = vmatprep.subr.bf16.mxu0 %v12701_v42 }
 0x5eb   :  { %v8781_v43 = vpop.permute.xlu1 %8780 }
 0x5ec   :  { %v8807_v56 = vmax.f32 %v13228_v33, %v8781_v43  ;;  %v12445_v33 = vld [vmem:[#allocation6 + $0x8] sm:$0xff]   ;;  %v8792_v16 = vsel %vm8743_vm2, %v13248_v25, %v8781_v43  ;;  %v8862_v25 = vshrl.u32 %v8861_v37, 7 }
 0x5ed   :  { %10718 = vmatpush3.bf16.msra.mxu1 %v12445_v33  ;;  %v8806_v15 = vmax.f32 %v13185_v11, %v8792_v16 }
 0x5ee   :  { %8826 = vrot.lane.b32.xlu0 %v8807_v56, %s12704_s12  ;;  %10719 = vmatprep.subr.bf16.mxu1 %v12446_v60  ;;  %v8863_v23 = vsub.s32 0, %v8862_v25  ;;  %v8867_v57 = vsub.s32 1, %v8862_v25  ;;  %v8875_v34 = vsub.s32 3, %v8862_v25  ;;  %v8871_v38 = vsub.s32 2, %v8862_v25 }
 0x5ef   :  { %v8789_v8 = vpop.permute.xlu1 %8788 }
 0x5f0   :  { %v8795_v1 = vsel %vm8743_vm2, %v13250_v39, %v8789_v8  ;;  %v8811_v11 = vmax.f32 %v13191_v9, %v8789_v8  ;;  %v8758_v9 = vmax.f32 %v12881_v13, %v8744_v55  ;;  %v8864_v61 = vrot.slane %v8859_v50, %v8863_v23  ;;  %v12452_v55 = vld [vmem:[#allocation9 + $0x30] sm:$0xff]  }
 0x5f1   :  { %10720 = vmatpush3.bf16.msra.mxu1 %v12448_v47  ;;  %v8810_v17 = vmax.f32 %v13188_v54, %v8795_v1  ;;  %v8868_v43 = vrot.slane %v8859_v50, %v8867_v57  ;;  %v8872_v1 = vrot.slane %v8859_v50, %v8871_v38  ;;  %v12464_v38 = vld [vmem:[#allocation12 + $0x10] sm:$0xff]  }
 0x5f2   :  { %10757 = vmatprep.subr.bf16.mxu1 %v12701_v42 }
 0x5f3   :  { %v8783_v46 = vpop.permute.xlu1 %8782 }
 0x5f4   :  { %v8793_v35 = vsel %vm8743_vm2, %v8783_v46, %v8785_v32 }
 0x5f5   :  { %v8808_v12 = vmax.f32 %v13110_v14, %v8793_v35 }
 0x5f7   :  { %8828 = vrot.lane.b32.xlu1 %v8808_v12, %s12704_s12  ;;  %v8732_v41 = vpop.permute.xlu1 %8731 }
 0x5f8   :  { %v8745_v51 = vsel %vm8743_vm2, %v8730_v18, %v8732_v41 }
 0x5f9   :  { %v8759_v3 = vmax.f32 %v12887_v20, %v8745_v51  ;;  %v12460_v51 = vld [vmem:[#allocation12 + $0x30] sm:$0xff]  }
 0x5fb   :  { %8824 = vrot.lane.b32.xlu1 %v8806_v15, %s12704_s12  ;;  %v8740_v19 = vpop.permute.xlu1 %8739 }
 0x5fc   :  { %v8748_v13 = vsel %vm8743_vm2, %v8738_v59, %v8740_v19 }
 0x5fd   :  { %v8763_v56 = vmax.f32 %v12893_v27, %v8748_v13  ;;  %v8876_v27 = vrot.slane %v8859_v50, %v8875_v34 }
 0x5ff   :  { %8832 = vrot.lane.b32.xlu1 %v8810_v17, %s12704_s12  ;;  %v8736_v21 = vpop.permute.xlu1 %8735 }
 0x600   :  { %v8747_v0 = vsel %vm8743_vm2, %v8736_v21, %v8738_v59 }
 0x601   :  { %v8762_v30 = vmax.f32 %v12890_v24, %v8747_v0  ;;  %v12454_v0 = vld [vmem:[#allocation9 + $0x20] sm:$0xff]  }
 0x603   :  { %8741 = vrot.lane.b32.xlu1 %v13110_v14, %s12703_s0 }
 0x607   :  { %8834 = vrot.lane.b32.xlu1 %v8811_v11, %s12704_s12 }
 0x61f   :  { %v8821_v54 = vpop.permute.xlu0 %8820 }
 0x623   :  { %v8823_v39 = vpop.permute.xlu0 %8822 }
 0x624   :  { %v8837_v14 = vsel %vm8836_vm3, %v8821_v54, %v8823_v39 }
 0x625   :  { %v8851_v45 = vmax.f32 %v8758_v9, %v8837_v14  ;;  %v12453_v9 = vld [vmem:[#allocation9 + $0x28] sm:$0xff]  }
 0x627   :  { %v8831_v32 = vpop.permute.xlu0 %8830  ;;  %v8881_v44 = vadd.f32 %v8864_v61, %v8851_v45  ;;  %v12456_v45 = vld [vmem:[#allocation9 + $0x10] sm:$0xff]  }
 0x629   :  { %v8889_v6 = vmax.f32 %v8881_v44, 0.0  ;;  %v12462_v44 = vld [vmem:[#allocation12 + $0x20] sm:$0xff]  }
 0x62b   :  { %v8734_v40 = vpop.permute.xlu0 %8733 }
 0x62c   :  { %v8746_v8 = vsel %vm8743_vm2, %v8732_v41, %v8734_v40  ;;  %v8761_v35 = vmax.f32 %v12938_v58, %v8734_v40 }
 0x62d   :  { %v8760_v16 = vmax.f32 %v12936_v53, %v8746_v8 }
 0x660   :  { %v8827_v10 = vpop.permute.xlu0 %8826 }
 0x661   :  { %v8854_v47 = vmax.f32 %v8761_v35, %v8827_v10  ;;  %v10572_v35 = vld [vmem:[#allocation10] ss:$0 sm:$0xff] }
 0x663   :  { %v8884_v41 = vadd.f32 %v8876_v27, %v8854_v47 }
 0x669   :  { %v8829_v2 = vpop.permute.xlu1 %8828 }
 0x66a   :  { %v8840_v26 = vsel %vm8836_vm3, %v8829_v2, %v8831_v32  ;;  %v12459_v2 = vld [vmem:[#allocation12 + $0x38] sm:$0xff]  }
 0x66b   :  { %v8855_v22 = vmax.f32 %v8762_v30, %v8840_v26  ;;  %v12457_v30 = vld [vmem:[#allocation9 + $0x8] sm:$0xff]  }
 0x66c   :  { %v12461_v26 = vld [vmem:[#allocation12 + $0x28] sm:$0xff]  }
 0x66d   :  { %v8885_v28 = vadd.f32 %v8864_v61, %v8855_v22  ;;  %v8825_v31 = vpop.permute.xlu1 %8824  ;;  %v12455_v61 = vld [vmem:[#allocation9 + $0x18] sm:$0xff]  }
 0x66e   :  { %v8838_v52 = vsel %vm8836_vm3, %v8823_v39, %v8825_v31  ;;  %v8839_v12 = vsel %vm8836_vm3, %v8825_v31, %v8827_v10  ;;  %v12463_v22 = vld [vmem:[#allocation12 + $0x18] sm:$0xff]  }
 0x66f   :  { %v8893_v24 = vmax.f32 %v8885_v28, 0.0  ;;  %v8852_v7 = vmax.f32 %v8759_v3, %v8838_v52  ;;  %v8853_v36 = vmax.f32 %v8760_v16, %v8839_v12  ;;  %v10545_v31 = vld [vmem:[#allocation7] ss:$0 sm:$0xff] }
 0x671   :  { %v8897_v49 = vpack.c.bf16 %v8893_v24, %v8889_v6  ;;  %v8833_v62 = vpop.permute.xlu1 %8832  ;;  %v8882_v46 = vadd.f32 %v8868_v43, %v8852_v7  ;;  %v8883_v37 = vadd.f32 %v8872_v1, %v8853_v36 }
 0x672   :  { %v8841_v20 = vsel %vm8836_vm3, %v8831_v32, %v8833_v62  ;;  %v12458_v32 = vld [vmem:[#allocation9] sm:$0xff]  }
 0x673   :  { %v8856_v33 = vmax.f32 %v8763_v56, %v8841_v20  ;;  %v8890_v17 = vmax.f32 %v8882_v46, 0.0  ;;  %v8891_v21 = vmax.f32 %v8883_v37, 0.0  ;;  %v12465_v46 = vld [vmem:[#allocation12 + $0x8] sm:$0xff]  }
 0x675   :  { %v8886_v60 = vadd.f32 %v8868_v43, %v8856_v33  ;;  %v8742_v48 = vpop.permute.xlu1 %8741  ;;  %v12466_v33 = vld [vmem:[#allocation12] sm:$0xff]  }
 0x676   :  { %v8749_v15 = vsel %vm8743_vm2, %v8740_v19, %v8742_v48  ;;  %v8765_v11 = vmax.f32 %v12942_v5, %v8742_v48  ;;  %v8892_v5 = vmax.f32 %v8884_v41, 0.0 }
 0x677   :  { %v8894_v4 = vmax.f32 %v8886_v60, 0.0  ;;  %v8764_v18 = vmax.f32 %v12940_v63, %v8749_v15 }
 0x679   :  { %v8835_v59 = vpop.permute.xlu1 %8834  ;;  %v8898_v58 = vpack.c.bf16 %v8894_v4, %v8890_v17  ;;  %v10581_v17 = vld [vmem:[#allocation13] ss:$0 sm:$0xff] }
 0x67a   :  { %v8842_v53 = vsel %vm8836_vm3, %v8833_v62, %v8835_v59  ;;  %v8858_v54 = vmax.f32 %v8765_v11, %v8835_v59 }
 0x67b   :  { %v8857_v25 = vmax.f32 %v8764_v18, %v8842_v53  ;;  %9144 = vmatprep.mubr.bf16.mxu1 %v8898_v58 }
 0x67c   :  { %v8888_v39 = vadd.f32 %v8876_v27, %v8858_v54  ;;  %9145 = vmatmul.mubr.bf16.vlgmr.msra.gmra.mxu1 %v8897_v49 }
 0x67d   :  { %v8887_v19 = vadd.f32 %v8872_v1, %v8857_v25  ;;  %10758 = vmatpush3.bf16.msra.mxu1 %v12451_v29  ;;  %10773 = vmatprep.mubr.msk.bf16.mxu1 %vm12702_vm1, %v12701_v42 }
 0x67e   :  { %v8896_v63 = vmax.f32 %v8888_v39, 0.0  ;;  %10759 = vmatprep.subr.bf16.mxu1 %v12701_v42 }
 0x67f   :  { %v8895_v23 = vmax.f32 %v8887_v19, 0.0 }
 0x680   :  { %v8900_v50 = vpack.c.bf16 %v8896_v63, %v8892_v5 }
 0x681   :  { %v8899_v14 = vpack.c.bf16 %v8895_v23, %v8891_v21  ;;  %10760 = vmatpush3.bf16.msra.mxu1 %v12452_v55 }
 0x682   :  { %10571 = vmatprep.mubr.msk.bf16.mxu0 %vm9108_vm4, %v8900_v50  ;;  %10761 = vmatprep.subr.bf16.mxu1 %v12701_v42 }
 0x683   :  { %9186 = vmatmul.mubr.bf16.vlgmr.msra.gmra.mxu0 %v8899_v14 }
 0x684   :  { %10793 = vmatprep.mubr.msk.bf16.mxu0 %vm12702_vm1, %v12701_v42  ;;  %10778 = vmatpush3.bf16.msra.mxu0 %v12459_v2 }
 0x685   :  { %10762 = vmatpush3.bf16.msra.mxu1 %v12453_v9  ;;  %10779 = vmatprep.subr.bf16.mxu0 %v12701_v42 }
 0x686   :  { %10763 = vmatprep.subr.bf16.mxu1 %v12701_v42 }
 0x688   :  { %10780 = vmatpush3.bf16.msra.mxu0 %v12460_v51 }
 0x689   :  { %10764 = vmatpush3.bf16.msra.mxu1 %v12454_v0  ;;  %10781 = vmatprep.subr.bf16.mxu0 %v12701_v42 }
 0x68a   :  { %10765 = vmatprep.subr.bf16.mxu1 %v12701_v42 }
 0x68c   :  { %10782 = vmatpush3.bf16.msra.mxu0 %v12461_v26 }
 0x68d   :  { %10766 = vmatpush3.bf16.msra.mxu1 %v12455_v61  ;;  %10783 = vmatprep.subr.bf16.mxu0 %v12701_v42 }
 0x68e   :  { %10767 = vmatprep.subr.bf16.mxu1 %v12701_v42 }
 0x690   :  { %10784 = vmatpush3.bf16.msra.mxu0 %v12462_v44 }
 0x691   :  { %10768 = vmatpush3.bf16.msra.mxu1 %v12456_v45  ;;  %10785 = vmatprep.subr.bf16.mxu0 %v12701_v42 }
 0x692   :  { %10769 = vmatprep.subr.bf16.mxu1 %v12701_v42 }
 0x694   :  { %10786 = vmatpush3.bf16.msra.mxu0 %v12463_v22 }
 0x695   :  { %10770 = vmatpush3.bf16.msra.mxu1 %v12457_v30  ;;  %10787 = vmatprep.subr.bf16.mxu0 %v12701_v42 }
 0x696   :  { %10771 = vmatprep.subr.bf16.mxu1 %v12701_v42 }
 0x698   :  { %10788 = vmatpush3.bf16.msra.mxu0 %v12464_v38 }
 0x699   :  { %10772 = vmatpush3.bf16.msra.mxu1 %v12458_v32  ;;  %10789 = vmatprep.subr.bf16.mxu0 %v12701_v42 }
 0x69c   :  { %10790 = vmatpush3.bf16.msra.mxu0 %v12465_v46 }
 0x69d   :  { %10791 = vmatprep.subr.bf16.mxu0 %v12701_v42 }
 0x6a0   :  { %10792 = vmatpush3.bf16.msra.mxu0 %v12466_v33 }
 0x73c   :  { %v10721_v57 = vpop.f32.mrf.mxu1 }
 0x73e   :  { %v10722_v3 = vpop.f32.mrf.mxu1 }
 0x73f   :  { %v10723_v28 = vadd.f32 %v10722_v3, %v10721_v57 }
 0x740   :  { %v10724_v13 = vpop.f32.mrf.mxu1 }
 0x741   :  { %v9147_v6 = vadd.f32 %v10723_v28, %v10545_v31 }
 0x742   :  { %v10725_v52 = vpop.f32.mrf.mxu1 }
 0x743   :  { %v10726_v40 = vadd.f32 %v10725_v52, %v10724_v13  ;;  %v9187_v24 = vpop.f32.mrf.mxu0 }
 0x744   :  { %v9188_v56 = vadd.f32 %v9187_v24, %v9147_v6 }
 0x745   :  { %v9189_v43 = vpop.f32.mrf.mxu0  ;;  %v9150_v7 = vadd.f32 %v10726_v40, %v10545_v31 }
 0x746   :  { %v9194_v34 = vmax.f32 %v9188_v56, 0.0 }
 0x747   :  { %v9190_v49 = vpop.f32.mrf.mxu0 }
 0x748   :  { %v9191_v62 = vadd.f32 %v9190_v49, %v9150_v7 }
 0x749   :  { %v9192_v8 = vpop.f32.mrf.mxu0 }
 0x74a   :  { %v9195_v20 = vmax.f32 %v9191_v62, 0.0 }
 0x74c   :  { %v9196_v10 = vpack.c.bf16 %v9195_v20, %v9194_v34 }
 0x74e   :  { %10774 = vmatmul.mubr.bf16.vlgmr.msra.gmra.mxu1 %v9196_v10 }
 0x80e   :  { %v9302_v12 = vpop.f32.mrf.mxu1 }
 0x80f   :  { %v9303_v60 = vadd.f32 %v10572_v35, %v9302_v12 }
 0x810   :  { %v10775_v16 = vpop.f32.mrf.mxu1 }
 0x811   :  { %v9309_v15 = vmax.f32 %v9303_v60, 0.0 }
 0x812   :  { %v9305_v48 = vpop.f32.mrf.mxu1 }
 0x813   :  { %v9306_v27 = vadd.f32 %v10572_v35, %v9305_v48 }
 0x814   :  { %v10776_v47 = vpop.f32.mrf.mxu1 }
 0x815   :  { %v9310_v1 = vmax.f32 %v9306_v27, 0.0 }
 0x817   :  { %v9311_v36 = vpack.c.bf16 %v9310_v1, %v9309_v15 }
 0x819   :  { %10794 = vmatmul.mubr.bf16.vlgmr.msra.gmra.mxu0 %v9311_v36 }
 0x8d9   :  { %v9417_v4 = vpop.f32.mrf.mxu0 }
 0x8da   :  { %v9418_v11 = vadd.f32 %v10581_v17, %v9417_v4 }
 0x8db   :  { %v10795_v18 = vpop.f32.mrf.mxu0 }
 0x8dc   :  { %9424 = vst [vmem:[%s13345_s9] sm:$0xff] %v9418_v11 }
 0x8dd   :  { %v9420_v42 = vpop.f32.mrf.mxu0 }
 0x8de   :  { %v9421_v59 = vadd.f32 %v10581_v17, %v9420_v42 }
 0x8df   :  { %v10796_v58 = vpop.f32.mrf.mxu0 }
 0x8e0   :  { %9425 = vst [vmem:[%s13345_s9 + $0x8] sm:$0xff] %v9421_v59 }
 0x8e1   :  { %9430 = vsyncpa [#allocation3], 1 }
 0x8e2   :  { %9431 = vsyncpa [#allocation5], 1 }
 0x8e3   :  { %9432 = vsyncpa [#allocation8], 1 }
 0x8e4   :  { %9433 = vsyncpa [#allocation11], 1 }
 0x8e5   :  { %9434 = vsyncpa [#allocation14], 1 }

</bundles_post_ra>
